<compile_context>
chip_gen: v5e
topology: v5e:2x2
jax: 0.10.0
libtpu: 0.0.40
codegen_flags: <defaults>
</compile_context>

<pallas_src>
import jax
import jax.numpy as jnp
from jax.experimental import pallas as pl
from jax.experimental.pallas import tpu as pltpu

LANE = 128


def _round_up(x, m):
    return ((x + m - 1) // m) * m


def _pad2(a, rows, cols):
    r, c = a.shape
    return jnp.pad(a, ((0, rows - r), (0, cols - c)))


# ----------------------------------------------------------------------------
# One-time parameter preparation (pad / cast / pack) -- NOT in the hot path.
# ----------------------------------------------------------------------------
def prepare_params(params, *, matmul_dtype=jnp.bfloat16):
    """params: flat list [w1,b1,w2,b2,w3,b3,w4,b4,wd4,bd4,wd3,bd3,wd2,bd2,wd1,bd1]
    with weights shaped (in_dim, out_dim) f32 and biases shaped (1, out_dim) f32.
    Returns a dict of packed/padded arrays + metadata consumed by dec_ae_forward."""
    n_input = params[0].shape[0]
    num_features = params[6].shape[1]          # w4 is (64, num_features)
    f_pad = _round_up(num_features, LANE)
    n_pad = _round_up(n_input, LANE)
    s = max(256, f_pad)                        # square size of the mid-layer stack
    b_cols = max(256, f_pad, n_pad)

    # padded (in, out) dims per layer, forward order: fc1..fc4, fc_d4..fc_d1
    dims = ((n_input, 256), (256, 128), (128, 128), (128, f_pad),
            (f_pad, 128), (128, 128), (128, 256), (256, n_pad))

    # all 8 biases -> one (8, b_cols) f32 array (one row per layer)
    b_pack = jnp.stack([_pad2(params[2 * i + 1], 1, b_cols)[0]
                        for i in range(8)]).astype(jnp.float32)

    # fc1 keeps its true in-dim so x needs no feature padding (out-dim 256 is
    # already lane aligned); fc_d1 out-dim padded to n_pad for lane-dense stores.
    w1_p = params[0].astype(matmul_dtype)                        # (n_input, 256)
    wd1_p = _pad2(params[14], 256, n_pad).astype(matmul_dtype)   # (256, n_pad)

    # middle six layers (fc2, fc3, fc4, fc_d4, fc_d3, fc_d2) padded to (s, s)
    # and stacked -> one resident DMA.  (For typical num_features <= 256 the
    # padding waste is < 1 MiB.)
    mid_idx = (1, 2, 3, 4, 5, 6)
    w_mid = jnp.stack([_pad2(params[2 * i], s, s)
                       for i in mid_idx]).astype(matmul_dtype)   # (6, s, s)

    return dict(w1=w1_p, w_mid=w_mid, wd1=wd1_p, biases=b_pack, dims=dims,
                n_input=n_input, num_features=num_features,
                f_pad=f_pad, n_pad=n_pad)


# ----------------------------------------------------------------------------
# Kernel
# ----------------------------------------------------------------------------
def _make_kernel(dims):
    mid_dims = dims[1:7]           # fc2, fc3, fc4, fc_d4, fc_d3, fc_d2

    def kernel(x_ref, w1_ref, wmid_ref, wd1_ref, b_ref, xae_ref, xde_ref):
        biases = b_ref[...]                                  # (8, b_cols) f32

        def dense(h, w, li, dout, act=True):
            # bf16 operands on the MXU, f32 accumulate / bias add / ReLU.
            y = jnp.dot(h.astype(w.dtype), w,
                        preferred_element_type=jnp.float32) + biases[li:li + 1, :dout]
            return jnp.maximum(y, 0.0) if act else y

        def w_mid(j):
            din, dout = mid_dims[j]
            return wmid_ref[j, :din, :dout], dout            # static 128-aligned slice

        h = x_ref[...]                                       # (TM, n_input) f32
        # --- encoder ---
        h = dense(h, w1_ref[...], 0, dims[0][1])             # fc1   (TM, 256)
        w, d = w_mid(0); h = dense(h, w, 1, d)               # fc2   (TM, 128)
        w, d = w_mid(1); h = dense(h, w, 2, d)               # fc3   (TM, 128)
        w, d = w_mid(2); z = dense(h, w, 3, d, act=False)    # fc4   (TM, f_pad) = x_ae
        xae_ref[...] = z.astype(xae_ref.dtype)
        # --- decoder ---
        w, d = w_mid(3); h = dense(z, w, 4, d)               # fc_d4 (TM, 128)
        w, d = w_mid(4); h = dense(h, w, 5, d)               # fc_d3 (TM, 128)
        w, d = w_mid(5); h = dense(h, w, 6, d)               # fc_d2 (TM, 256)
        h = dense(h, wd1_ref[...], 7, dims[7][1])            # fc_d1 (TM, n_pad) = x_de
        xde_ref[...] = h.astype(xde_ref.dtype)

    return kernel


# ----------------------------------------------------------------------------
# Forward wrapper
# ----------------------------------------------------------------------------
def dec_ae_forward(x, prepared, *, tm=512, out_dtype=jnp.float32):
    """x: (B, n_input) f32. Returns (x_ae (B, num_features), x_de (B, n_input))."""
    B, n_input = x.shape
    assert n_input == prepared["n_input"]
    f_pad, n_pad = prepared["f_pad"], prepared["n_pad"]
    dims = prepared["dims"]
    weights = (prepared["w1"], prepared["w_mid"], prepared["wd1"], prepared["biases"])
    out_isz = jnp.dtype(out_dtype).itemsize

    # ---- batch tile: big (amortizes per-step overhead), multiple of 128 ----
    tm_eff = max(LANE, min(_round_up(tm, LANE), _round_up(B, LANE)))
    steps = pl.cdiv(B, tm_eff)
    if steps > 1 and steps % 2 == 1:
        # prefer an even step count so the "parallel" axis splits evenly over
        # v7x's two TensorCores (no-op on v5e/v6e)
        tm_eff = max(LANE, _round_up(pl.cdiv(B, steps + 1), LANE))

    # ---- generation-aware VMEM budget (v5e/v6e: 128 MiB, v7x: 64 MiB) ----
    try:
        phys_vmem = int(pltpu.get_tpu_info().vmem_capacity_bytes)
    except Exception:
        phys_vmem = 64 << 20                       # conservative (v7x per-core)
    vmem_cap = int(phys_vmem * 0.75)               # leave compiler headroom

    def vmem_need(tm_rows, weight_bufs):
        resident = sum(int(w.size) * w.dtype.itemsize for w in weights) * weight_bufs
        stream = 2 * tm_rows * (n_input * x.dtype.itemsize + (f_pad + n_pad) * out_isz)
        acts = 6 * tm_rows * max(256, f_pad, n_pad) * 4
        return resident + stream + acts

    def build_call(single_buffer_weights):
        wb = 1 if single_buffer_weights else 2
        tm_rows = tm_eff
        while vmem_need(tm_rows, wb) > vmem_cap and tm_rows > LANE:
            tm_rows = _round_up(tm_rows // 2, LANE)     # shrink TM instead of spilling
        nsteps = pl.cdiv(B, tm_rows)

        def tile_spec(cols):                 # batch-tiled: x and both outputs
            return pl.BlockSpec((tm_rows, cols), lambda i: (i, 0))

        def resident_spec(shape):            # constant block index -> fetched once
            kw = {}
            if single_buffer_weights:
                kw["pipeline_mode"] = pl.Buffered(1)    # no double buffer needed
            return pl.BlockSpec(shape, lambda i: (0,) * len(shape), **kw)

        in_specs = [tile_spec(n_input)] + [resident_spec(w.shape) for w in weights]
        out_specs = (tile_spec(f_pad), tile_spec(n_pad))
        out_shape = (jax.ShapeDtypeStruct((B, f_pad), out_dtype),
                     jax.ShapeDtypeStruct((B, n_pad), out_dtype))

        flops = 2 * B * sum(di * do for di, do in dims)
        bytes_accessed = (B * n_input * x.dtype.itemsize
                          + sum(int(w.size) * w.dtype.itemsize for w in weights)
                          + B * (f_pad + n_pad) * out_isz)
        cost = pl.CostEstimate(flops=int(flops), transcendentals=0,
                               bytes_accessed=int(bytes_accessed))

        vmem_limit = min(vmem_cap, max(32 << 20, int(1.5 * vmem_need(tm_rows, wb))))

        return pl.pallas_call(
            _make_kernel(dims),
            out_shape=out_shape,
            grid_spec=pl.GridSpec(grid=(nsteps,), in_specs=in_specs,
                                  out_specs=out_specs),
            compiler_params=pltpu.CompilerParams(
                dimension_semantics=("parallel",),
                vmem_limit_bytes=vmem_limit),
            cost_estimate=cost,
        )

    try:
        xae_p, xde_p = build_call(True)(x, *weights)
    except Exception:
        # Fallback if this jax version rejects single-buffered pipeline_mode.
        xae_p, xde_p = build_call(False)(x, *weights)

    # Drop the lane-padding columns (exact zeros by construction).
    return xae_p[:, :prepared["num_features"]], xde_p[:, :n_input]


# ----------------------------------------------------------------------------
# Parameter init (mirrors torch: xavier_uniform_ weights, zero biases)
# ----------------------------------------------------------------------------
def _xavier_uniform(key, in_dim, out_dim, dtype=jnp.float32):
    bound = (6.0 / (in_dim + out_dim)) ** 0.5
    return jax.random.uniform(key, (in_dim, out_dim), dtype,
                              minval=-bound, maxval=bound)


def make_params(key, n_input, num_features):
    dims = [
        (n_input, 256), (256, 128), (128, 64), (64, num_features),   # fc1..fc4
        (num_features, 64), (64, 128), (128, 256), (256, n_input),   # fc_d4..fc_d1
    ]
    keys = jax.random.split(key, len(dims))
    params = []
    for k, (din, dout) in zip(keys, dims):
        params.append(_xavier_uniform(k, din, dout))
        params.append(jnp.zeros((1, dout), jnp.float32))
    return params


def reference_forward(x, params, matmul_dtype=jnp.bfloat16):
    """Pure-JAX reference mirroring the kernel's bf16-operand / f32-accumulate math."""
    def dense(h, w, b, act=True):
        y = jnp.dot(h.astype(matmul_dtype), w.astype(matmul_dtype),
                    preferred_element_type=jnp.float32) + b
        return jnp.maximum(y, 0.0) if act else y

    w1, b1, w2, b2, w3, b3, w4, b4, wd4, bd4, wd3, bd3, wd2, bd2, wd1, bd1 = params
    h = dense(x, w1, b1)
    h = dense(h, w2, b2)
    h = dense(h, w3, b3)
    z = dense(h, w4, b4, act=False)
    d = dense(z, wd4, bd4)
    d = dense(d, wd3, bd3)
    d = dense(d, wd2, bd2)
    d = dense(d, wd1, bd1)
    return z, d


if __name__ == "__main__":
    B = 300           # deliberately not a multiple of 128 (exercises masked last tile)
    n_input = 32
    num_features = 16
    num_classes = 10  # only used by clusterCenter; unused in the pretrain forward

    key = jax.random.PRNGKey(0)
    kx, kp = jax.random.split(key)
    x = jax.random.normal(kx, (B, n_input), jnp.float32)
    params = make_params(kp, n_input, num_features)

    prepared = prepare_params(params)          # pad / cast / pack weights ONCE
    x_ae, x_de = dec_ae_forward(x, prepared)   # default tm=512 -> 1 big batch tile
    jax.block_until_ready((x_ae, x_de))

    ref_ae, ref_de = reference_forward(x, params)
    assert x_ae.shape == (B, num_features) and x_de.shape == (B, n_input)
    assert jnp.allclose(x_ae, ref_ae, atol=2e-3, rtol=2e-3), \
        float(jnp.max(jnp.abs(x_ae - ref_ae)))
    assert jnp.allclose(x_de, ref_de, atol=2e-3, rtol=2e-3), \
        float(jnp.max(jnp.abs(x_de - ref_de)))
    print("KERNEL_OK")
</pallas_src>

<mosaic_0001>
module attributes {stable_mosaic.version = 11 : i64} {
  func.func @kernel(%arg0: i32, %arg1: memref<384x32xf32, #tpu.memory_space<vmem>>, %arg2: memref<32x256xbf16, #tpu.memory_space<vmem>>, %arg3: memref<6x256x256xbf16, #tpu.memory_space<vmem>>, %arg4: memref<256x128xbf16, #tpu.memory_space<vmem>>, %arg5: memref<8x256xf32, #tpu.memory_space<vmem>>, %arg6: memref<384x128xf32, #tpu.memory_space<vmem>>, %arg7: memref<384x128xf32, #tpu.memory_space<vmem>>) attributes {dimension_semantics = [#tpu.dimension_semantics<parallel>], iteration_bounds = array<i64: 1>, scalar_prefetch = 0 : i64, scratch_operands = 0 : i64, tpu.core_type = #tpu.core_type<tc>, window_params = [{transform_indices = @transform_0, window_bounds = array<i64: 384, 32>}, {pipeline_mode = #tpu.pipeline_mode<synchronous>, transform_indices = @transform_1, window_bounds = array<i64: 32, 256>}, {pipeline_mode = #tpu.pipeline_mode<synchronous>, transform_indices = @transform_2, window_bounds = array<i64: 6, 256, 256>}, {pipeline_mode = #tpu.pipeline_mode<synchronous>, transform_indices = @transform_3, window_bounds = array<i64: 256, 128>}, {pipeline_mode = #tpu.pipeline_mode<synchronous>, transform_indices = @transform_4, window_bounds = array<i64: 8, 256>}, {transform_indices = @transform_5, window_bounds = array<i64: 384, 128>}, {transform_indices = @transform_6, window_bounds = array<i64: 384, 128>}]} {
    %c0 = arith.constant 0 : index
    %c0_0 = arith.constant 0 : index
    %0 = vector.load %arg5[%c0, %c0_0] : memref<8x256xf32, #tpu.memory_space<vmem>>, vector<8x256xf32>
    %c0_1 = arith.constant 0 : index
    %c0_2 = arith.constant 0 : index
    %1 = vector.load %arg1[%c0_1, %c0_2] : memref<384x32xf32, #tpu.memory_space<vmem>>, vector<384x32xf32>
    %c0_3 = arith.constant 0 : index
    %c0_4 = arith.constant 0 : index
    %2 = vector.load %arg2[%c0_3, %c0_4] : memref<32x256xbf16, #tpu.memory_space<vmem>>, vector<32x256xbf16>
    %3 = arith.truncf %1 : vector<384x32xf32> to vector<384x32xbf16>
    %cst = arith.constant dense<0.000000e+00> : vector<384x256xf32>
    %4 = tpu.matmul %3, %2, %cst {dimension_numbers = #tpu.dot_dimension_numbers<[1], [0], [0], [1], [0, 0, 1, 1], [], []>} : vector<384x32xbf16>, vector<32x256xbf16>, vector<384x256xf32> -> vector<384x256xf32>
    %5 = vector.extract_strided_slice %0 {offsets = [0, 0], sizes = [1, 256], strides = [1, 1]} : vector<8x256xf32> to vector<1x256xf32>
    %6 = vector.broadcast %5 : vector<1x256xf32> to vector<384x256xf32>
    %7 = arith.addf %4, %6 : vector<384x256xf32>
    %cst_5 = arith.constant 0.000000e+00 : f32
    %8 = vector.broadcast %cst_5 : f32 to vector<384x256xf32>
    %9 = arith.maximumf %7, %8 : vector<384x256xf32>
    %c0_6 = arith.constant 0 : index
    %c0_7 = arith.constant 0 : index
    %c0_8 = arith.constant 0 : index
    %10 = vector.load %arg3[%c0_6, %c0_7, %c0_8] : memref<6x256x256xbf16, #tpu.memory_space<vmem>>, vector<1x256x128xbf16>
    %11 = vector.shape_cast %10 : vector<1x256x128xbf16> to vector<256x128xbf16>
    %12 = arith.truncf %9 : vector<384x256xf32> to vector<384x256xbf16>
    %cst_9 = arith.constant dense<0.000000e+00> : vector<384x128xf32>
    %13 = tpu.matmul %12, %11, %cst_9 {dimension_numbers = #tpu.dot_dimension_numbers<[1], [0], [0], [1], [0, 0, 1, 1], [], []>} : vector<384x256xbf16>, vector<256x128xbf16>, vector<384x128xf32> -> vector<384x128xf32>
    %14 = vector.extract_strided_slice %0 {offsets = [1, 0], sizes = [1, 128], strides = [1, 1]} : vector<8x256xf32> to vector<1x128xf32>
    %15 = vector.broadcast %14 : vector<1x128xf32> to vector<384x128xf32>
    %16 = arith.addf %13, %15 : vector<384x128xf32>
    %cst_10 = arith.constant 0.000000e+00 : f32
    %17 = vector.broadcast %cst_10 : f32 to vector<384x128xf32>
    %18 = arith.maximumf %16, %17 : vector<384x128xf32>
    %c1 = arith.constant 1 : index
    %c0_11 = arith.constant 0 : index
    %c0_12 = arith.constant 0 : index
    %19 = vector.load %arg3[%c1, %c0_11, %c0_12] : memref<6x256x256xbf16, #tpu.memory_space<vmem>>, vector<1x128x128xbf16>
    %20 = vector.shape_cast %19 : vector<1x128x128xbf16> to vector<128x128xbf16>
    %21 = arith.truncf %18 : vector<384x128xf32> to vector<384x128xbf16>
    %cst_13 = arith.constant dense<0.000000e+00> : vector<384x128xf32>
    %22 = tpu.matmul %21, %20, %cst_13 {dimension_numbers = #tpu.dot_dimension_numbers<[1], [0], [0], [1], [0, 0, 1, 1], [], []>} : vector<384x128xbf16>, vector<128x128xbf16>, vector<384x128xf32> -> vector<384x128xf32>
    %23 = vector.extract_strided_slice %0 {offsets = [2, 0], sizes = [1, 128], strides = [1, 1]} : vector<8x256xf32> to vector<1x128xf32>
    %24 = vector.broadcast %23 : vector<1x128xf32> to vector<384x128xf32>
    %25 = arith.addf %22, %24 : vector<384x128xf32>
    %cst_14 = arith.constant 0.000000e+00 : f32
    %26 = vector.broadcast %cst_14 : f32 to vector<384x128xf32>
    %27 = arith.maximumf %25, %26 : vector<384x128xf32>
    %c2 = arith.constant 2 : index
    %c0_15 = arith.constant 0 : index
    %c0_16 = arith.constant 0 : index
    %28 = vector.load %arg3[%c2, %c0_15, %c0_16] : memref<6x256x256xbf16, #tpu.memory_space<vmem>>, vector<1x128x128xbf16>
    %29 = vector.shape_cast %28 : vector<1x128x128xbf16> to vector<128x128xbf16>
    %30 = arith.truncf %27 : vector<384x128xf32> to vector<384x128xbf16>
    %cst_17 = arith.constant dense<0.000000e+00> : vector<384x128xf32>
    %31 = tpu.matmul %30, %29, %cst_17 {dimension_numbers = #tpu.dot_dimension_numbers<[1], [0], [0], [1], [0, 0, 1, 1], [], []>} : vector<384x128xbf16>, vector<128x128xbf16>, vector<384x128xf32> -> vector<384x128xf32>
    %32 = vector.extract_strided_slice %0 {offsets = [3, 0], sizes = [1, 128], strides = [1, 1]} : vector<8x256xf32> to vector<1x128xf32>
    %33 = vector.broadcast %32 : vector<1x128xf32> to vector<384x128xf32>
    %34 = arith.addf %31, %33 : vector<384x128xf32>
    %c0_18 = arith.constant 0 : index
    %c0_19 = arith.constant 0 : index
    %35 = vector.load %arg6[%c0_18, %c0_19] : memref<384x128xf32, #tpu.memory_space<vmem>>, vector<384x128xf32>
    tpu.vector_store %arg6[%c0_18, %c0_19], %34 {strides = array<i32>} : memref<384x128xf32, #tpu.memory_space<vmem>>, vector<384x128xf32>,
    %c3 = arith.constant 3 : index
    %c0_20 = arith.constant 0 : index
    %c0_21 = arith.constant 0 : index
    %36 = vector.load %arg3[%c3, %c0_20, %c0_21] : memref<6x256x256xbf16, #tpu.memory_space<vmem>>, vector<1x128x128xbf16>
    %37 = vector.shape_cast %36 : vector<1x128x128xbf16> to vector<128x128xbf16>
    %38 = arith.truncf %34 : vector<384x128xf32> to vector<384x128xbf16>
    %cst_22 = arith.constant dense<0.000000e+00> : vector<384x128xf32>
    %39 = tpu.matmul %38, %37, %cst_22 {dimension_numbers = #tpu.dot_dimension_numbers<[1], [0], [0], [1], [0, 0, 1, 1], [], []>} : vector<384x128xbf16>, vector<128x128xbf16>, vector<384x128xf32> -> vector<384x128xf32>
    %40 = vector.extract_strided_slice %0 {offsets = [4, 0], sizes = [1, 128], strides = [1, 1]} : vector<8x256xf32> to vector<1x128xf32>
    %41 = vector.broadcast %40 : vector<1x128xf32> to vector<384x128xf32>
    %42 = arith.addf %39, %41 : vector<384x128xf32>
    %cst_23 = arith.constant 0.000000e+00 : f32
    %43 = vector.broadcast %cst_23 : f32 to vector<384x128xf32>
    %44 = arith.maximumf %42, %43 : vector<384x128xf32>
    %c4 = arith.constant 4 : index
    %c0_24 = arith.constant 0 : index
    %c0_25 = arith.constant 0 : index
    %45 = vector.load %arg3[%c4, %c0_24, %c0_25] : memref<6x256x256xbf16, #tpu.memory_space<vmem>>, vector<1x128x128xbf16>
    %46 = vector.shape_cast %45 : vector<1x128x128xbf16> to vector<128x128xbf16>
    %47 = arith.truncf %44 : vector<384x128xf32> to vector<384x128xbf16>
    %cst_26 = arith.constant dense<0.000000e+00> : vector<384x128xf32>
    %48 = tpu.matmul %47, %46, %cst_26 {dimension_numbers = #tpu.dot_dimension_numbers<[1], [0], [0], [1], [0, 0, 1, 1], [], []>} : vector<384x128xbf16>, vector<128x128xbf16>, vector<384x128xf32> -> vector<384x128xf32>
    %49 = vector.extract_strided_slice %0 {offsets = [5, 0], sizes = [1, 128], strides = [1, 1]} : vector<8x256xf32> to vector<1x128xf32>
    %50 = vector.broadcast %49 : vector<1x128xf32> to vector<384x128xf32>
    %51 = arith.addf %48, %50 : vector<384x128xf32>
    %cst_27 = arith.constant 0.000000e+00 : f32
    %52 = vector.broadcast %cst_27 : f32 to vector<384x128xf32>
    %53 = arith.maximumf %51, %52 : vector<384x128xf32>
    %c5 = arith.constant 5 : index
    %c0_28 = arith.constant 0 : index
    %c0_29 = arith.constant 0 : index
    %54 = vector.load %arg3[%c5, %c0_28, %c0_29] : memref<6x256x256xbf16, #tpu.memory_space<vmem>>, vector<1x128x256xbf16>
    %55 = vector.shape_cast %54 : vector<1x128x256xbf16> to vector<128x256xbf16>
    %56 = arith.truncf %53 : vector<384x128xf32> to vector<384x128xbf16>
    %cst_30 = arith.constant dense<0.000000e+00> : vector<384x256xf32>
    %57 = tpu.matmul %56, %55, %cst_30 {dimension_numbers = #tpu.dot_dimension_numbers<[1], [0], [0], [1], [0, 0, 1, 1], [], []>} : vector<384x128xbf16>, vector<128x256xbf16>, vector<384x256xf32> -> vector<384x256xf32>
    %58 = vector.extract_strided_slice %0 {offsets = [6, 0], sizes = [1, 256], strides = [1, 1]} : vector<8x256xf32> to vector<1x256xf32>
    %59 = vector.broadcast %58 : vector<1x256xf32> to vector<384x256xf32>
    %60 = arith.addf %57, %59 : vector<384x256xf32>
    %cst_31 = arith.constant 0.000000e+00 : f32
    %61 = vector.broadcast %cst_31 : f32 to vector<384x256xf32>
    %62 = arith.maximumf %60, %61 : vector<384x256xf32>
    %c0_32 = arith.constant 0 : index
    %c0_33 = arith.constant 0 : index
    %63 = vector.load %arg4[%c0_32, %c0_33] : memref<256x128xbf16, #tpu.memory_space<vmem>>, vector<256x128xbf16>
    %64 = arith.truncf %62 : vector<384x256xf32> to vector<384x256xbf16>
    %cst_34 = arith.constant dense<0.000000e+00> : vector<384x128xf32>
    %65 = tpu.matmul %64, %63, %cst_34 {dimension_numbers = #tpu.dot_dimension_numbers<[1], [0], [0], [1], [0, 0, 1, 1], [], []>} : vector<384x256xbf16>, vector<256x128xbf16>, vector<384x128xf32> -> vector<384x128xf32>
    %66 = vector.extract_strided_slice %0 {offsets = [7, 0], sizes = [1, 128], strides = [1, 1]} : vector<8x256xf32> to vector<1x128xf32>
    %67 = vector.broadcast %66 : vector<1x128xf32> to vector<384x128xf32>
    %68 = arith.addf %65, %67 : vector<384x128xf32>
    %cst_35 = arith.constant 0.000000e+00 : f32
    %69 = vector.broadcast %cst_35 : f32 to vector<384x128xf32>
    %70 = arith.maximumf %68, %69 : vector<384x128xf32>
    %c0_36 = arith.constant 0 : index
    %c0_37 = arith.constant 0 : index
    %71 = vector.load %arg7[%c0_36, %c0_37] : memref<384x128xf32, #tpu.memory_space<vmem>>, vector<384x128xf32>
    tpu.vector_store %arg7[%c0_36, %c0_37], %70 {strides = array<i32>} : memref<384x128xf32, #tpu.memory_space<vmem>>, vector<384x128xf32>,
    return
  }
  func.func @transform_0(%arg0: i32) -> (i32, i32) {
    %c0_i32 = arith.constant 0 : i32
    %c0_i32_0 = arith.constant 0 : i32
    return %arg0, %c0_i32 : i32, i32
  }
  func.func @transform_1(%arg0: i32) -> (i32, i32) {
    %c0_i32 = arith.constant 0 : i32
    %c0_i32_0 = arith.constant 0 : i32
    %c0_i32_1 = arith.constant 0 : i32
    return %c0_i32, %c0_i32_0 : i32, i32
  }
  func.func @transform_2(%arg0: i32) -> (i32, i32, i32) {
    %c0_i32 = arith.constant 0 : i32
    %c0_i32_0 = arith.constant 0 : i32
    %c0_i32_1 = arith.constant 0 : i32
    %c0_i32_2 = arith.constant 0 : i32
    return %c0_i32, %c0_i32_0, %c0_i32_1 : i32, i32, i32
  }
  func.func @transform_3(%arg0: i32) -> (i32, i32) {
    %c0_i32 = arith.constant 0 : i32
    %c0_i32_0 = arith.constant 0 : i32
    %c0_i32_1 = arith.constant 0 : i32
    return %c0_i32, %c0_i32_0 : i32, i32
  }
  func.func @transform_4(%arg0: i32) -> (i32, i32) {
    %c0_i32 = arith.constant 0 : i32
    %c0_i32_0 = arith.constant 0 : i32
    %c0_i32_1 = arith.constant 0 : i32
    return %c0_i32, %c0_i32_0 : i32, i32
  }
  func.func @transform_5(%arg0: i32) -> (i32, i32) {
    %c0_i32 = arith.constant 0 : i32
    %c0_i32_0 = arith.constant 0 : i32
    return %arg0, %c0_i32 : i32, i32
  }
  func.func @transform_6(%arg0: i32) -> (i32, i32) {
    %c0_i32 = arith.constant 0 : i32
    %c0_i32_0 = arith.constant 0 : i32
    return %arg0, %c0_i32 : i32, i32
  }
}

module attributes {stable_mosaic.version = 11 : i64} {
  func.func @kernel(%arg0: i32, %arg1: memref<384x32xf32, #tpu.memory_space<vmem>>, %arg2: memref<32x256xbf16, #tpu.memory_space<vmem>>, %arg3: memref<6x256x256xbf16, #tpu.memory_space<vmem>>, %arg4: memref<256x128xbf16, #tpu.memory_space<vmem>>, %arg5: memref<8x256xf32, #tpu.memory_space<vmem>>, %arg6: memref<384x128xf32, #tpu.memory_space<vmem>>, %arg7: memref<384x128xf32, #tpu.memory_space<vmem>>) attributes {dimension_semantics = [#tpu.dimension_semantics<parallel>], iteration_bounds = array<i64: 1>, scalar_prefetch = 0 : i64, scratch_operands = 0 : i64, tpu.core_type = #tpu.core_type<tc>, window_params = [{transform_indices = @transform_0, window_bounds = array<i64: 384, 32>}, {pipeline_mode = #tpu.pipeline_mode<synchronous>, transform_indices = @transform_1, window_bounds = array<i64: 32, 256>}, {pipeline_mode = #tpu.pipeline_mode<synchronous>, transform_indices = @transform_2, window_bounds = array<i64: 6, 256, 256>}, {pipeline_mode = #tpu.pipeline_mode<synchronous>, transform_indices = @transform_3, window_bounds = array<i64: 256, 128>}, {pipeline_mode = #tpu.pipeline_mode<synchronous>, transform_indices = @transform_4, window_bounds = array<i64: 8, 256>}, {transform_indices = @transform_5, window_bounds = array<i64: 384, 128>}, {transform_indices = @transform_6, window_bounds = array<i64: 384, 128>}]} {
    %c0 = arith.constant 0 : index
    %c0_0 = arith.constant 0 : index
    %0 = vector.load %arg5[%c0, %c0_0] : memref<8x256xf32, #tpu.memory_space<vmem>>, vector<8x256xf32>
    %c0_1 = arith.constant 0 : index
    %c0_2 = arith.constant 0 : index
    %1 = vector.load %arg1[%c0_1, %c0_2] : memref<384x32xf32, #tpu.memory_space<vmem>>, vector<384x32xf32>
    %c0_3 = arith.constant 0 : index
    %c0_4 = arith.constant 0 : index
    %2 = vector.load %arg2[%c0_3, %c0_4] : memref<32x256xbf16, #tpu.memory_space<vmem>>, vector<32x256xbf16>
    %3 = arith.truncf %1 : vector<384x32xf32> to vector<384x32xbf16>
    %cst = arith.constant dense<0.000000e+00> : vector<384x256xf32>
    %4 = tpu.matmul %3, %2, %cst {dimension_numbers = #tpu.dot_dimension_numbers<[1], [0], [0], [1], [0, 0, 1, 1], [], []>} : vector<384x32xbf16>, vector<32x256xbf16>, vector<384x256xf32> -> vector<384x256xf32>
    %5 = vector.extract_strided_slice %0 {offsets = [0, 0], sizes = [1, 256], strides = [1, 1]} : vector<8x256xf32> to vector<1x256xf32>
    %6 = vector.broadcast %5 : vector<1x256xf32> to vector<384x256xf32>
    %7 = arith.addf %4, %6 : vector<384x256xf32>
    %cst_5 = arith.constant 0.000000e+00 : f32
    %8 = vector.broadcast %cst_5 : f32 to vector<384x256xf32>
    %9 = arith.maximumf %7, %8 : vector<384x256xf32>
    %c0_6 = arith.constant 0 : index
    %c0_7 = arith.constant 0 : index
    %c0_8 = arith.constant 0 : index
    %10 = vector.load %arg3[%c0_6, %c0_7, %c0_8] : memref<6x256x256xbf16, #tpu.memory_space<vmem>>, vector<1x256x128xbf16>
    %11 = vector.shape_cast %10 : vector<1x256x128xbf16> to vector<256x128xbf16>
    %12 = arith.truncf %9 : vector<384x256xf32> to vector<384x256xbf16>
    %cst_9 = arith.constant dense<0.000000e+00> : vector<384x128xf32>
    %13 = tpu.matmul %12, %11, %cst_9 {dimension_numbers = #tpu.dot_dimension_numbers<[1], [0], [0], [1], [0, 0, 1, 1], [], []>} : vector<384x256xbf16>, vector<256x128xbf16>, vector<384x128xf32> -> vector<384x128xf32>
    %14 = vector.extract_strided_slice %0 {offsets = [1, 0], sizes = [1, 128], strides = [1, 1]} : vector<8x256xf32> to vector<1x128xf32>
    %15 = vector.broadcast %14 : vector<1x128xf32> to vector<384x128xf32>
    %16 = arith.addf %13, %15 : vector<384x128xf32>
    %cst_10 = arith.constant 0.000000e+00 : f32
    %17 = vector.broadcast %cst_10 : f32 to vector<384x128xf32>
    %18 = arith.maximumf %16, %17 : vector<384x128xf32>
    %c1 = arith.constant 1 : index
    %c0_11 = arith.constant 0 : index
    %c0_12 = arith.constant 0 : index
    %19 = vector.load %arg3[%c1, %c0_11, %c0_12] : memref<6x256x256xbf16, #tpu.memory_space<vmem>>, vector<1x128x128xbf16>
    %20 = vector.shape_cast %19 : vector<1x128x128xbf16> to vector<128x128xbf16>
    %21 = arith.truncf %18 : vector<384x128xf32> to vector<384x128xbf16>
    %cst_13 = arith.constant dense<0.000000e+00> : vector<384x128xf32>
    %22 = tpu.matmul %21, %20, %cst_13 {dimension_numbers = #tpu.dot_dimension_numbers<[1], [0], [0], [1], [0, 0, 1, 1], [], []>} : vector<384x128xbf16>, vector<128x128xbf16>, vector<384x128xf32> -> vector<384x128xf32>
    %23 = vector.extract_strided_slice %0 {offsets = [2, 0], sizes = [1, 128], strides = [1, 1]} : vector<8x256xf32> to vector<1x128xf32>
    %24 = vector.broadcast %23 : vector<1x128xf32> to vector<384x128xf32>
    %25 = arith.addf %22, %24 : vector<384x128xf32>
    %cst_14 = arith.constant 0.000000e+00 : f32
    %26 = vector.broadcast %cst_14 : f32 to vector<384x128xf32>
    %27 = arith.maximumf %25, %26 : vector<384x128xf32>
    %c2 = arith.constant 2 : index
    %c0_15 = arith.constant 0 : index
    %c0_16 = arith.constant 0 : index
    %28 = vector.load %arg3[%c2, %c0_15, %c0_16] : memref<6x256x256xbf16, #tpu.memory_space<vmem>>, vector<1x128x128xbf16>
    %29 = vector.shape_cast %28 : vector<1x128x128xbf16> to vector<128x128xbf16>
    %30 = arith.truncf %27 : vector<384x128xf32> to vector<384x128xbf16>
    %cst_17 = arith.constant dense<0.000000e+00> : vector<384x128xf32>
    %31 = tpu.matmul %30, %29, %cst_17 {dimension_numbers = #tpu.dot_dimension_numbers<[1], [0], [0], [1], [0, 0, 1, 1], [], []>} : vector<384x128xbf16>, vector<128x128xbf16>, vector<384x128xf32> -> vector<384x128xf32>
    %32 = vector.extract_strided_slice %0 {offsets = [3, 0], sizes = [1, 128], strides = [1, 1]} : vector<8x256xf32> to vector<1x128xf32>
    %33 = vector.broadcast %32 : vector<1x128xf32> to vector<384x128xf32>
    %34 = arith.addf %31, %33 : vector<384x128xf32>
    %c0_18 = arith.constant 0 : index
    %c0_19 = arith.constant 0 : index
    %35 = vector.load %arg6[%c0_18, %c0_19] : memref<384x128xf32, #tpu.memory_space<vmem>>, vector<384x128xf32>
    tpu.vector_store %arg6[%c0_18, %c0_19], %34 {strides = array<i32>} : memref<384x128xf32, #tpu.memory_space<vmem>>, vector<384x128xf32>,
    %c3 = arith.constant 3 : index
    %c0_20 = arith.constant 0 : index
    %c0_21 = arith.constant 0 : index
    %36 = vector.load %arg3[%c3, %c0_20, %c0_21] : memref<6x256x256xbf16, #tpu.memory_space<vmem>>, vector<1x128x128xbf16>
    %37 = vector.shape_cast %36 : vector<1x128x128xbf16> to vector<128x128xbf16>
    %38 = arith.truncf %34 : vector<384x128xf32> to vector<384x128xbf16>
    %cst_22 = arith.constant dense<0.000000e+00> : vector<384x128xf32>
    %39 = tpu.matmul %38, %37, %cst_22 {dimension_numbers = #tpu.dot_dimension_numbers<[1], [0], [0], [1], [0, 0, 1, 1], [], []>} : vector<384x128xbf16>, vector<128x128xbf16>, vector<384x128xf32> -> vector<384x128xf32>
    %40 = vector.extract_strided_slice %0 {offsets = [4, 0], sizes = [1, 128], strides = [1, 1]} : vector<8x256xf32> to vector<1x128xf32>
    %41 = vector.broadcast %40 : vector<1x128xf32> to vector<384x128xf32>
    %42 = arith.addf %39, %41 : vector<384x128xf32>
    %cst_23 = arith.constant 0.000000e+00 : f32
    %43 = vector.broadcast %cst_23 : f32 to vector<384x128xf32>
    %44 = arith.maximumf %42, %43 : vector<384x128xf32>
    %c4 = arith.constant 4 : index
    %c0_24 = arith.constant 0 : index
    %c0_25 = arith.constant 0 : index
    %45 = vector.load %arg3[%c4, %c0_24, %c0_25] : memref<6x256x256xbf16, #tpu.memory_space<vmem>>, vector<1x128x128xbf16>
    %46 = vector.shape_cast %45 : vector<1x128x128xbf16> to vector<128x128xbf16>
    %47 = arith.truncf %44 : vector<384x128xf32> to vector<384x128xbf16>
    %cst_26 = arith.constant dense<0.000000e+00> : vector<384x128xf32>
    %48 = tpu.matmul %47, %46, %cst_26 {dimension_numbers = #tpu.dot_dimension_numbers<[1], [0], [0], [1], [0, 0, 1, 1], [], []>} : vector<384x128xbf16>, vector<128x128xbf16>, vector<384x128xf32> -> vector<384x128xf32>
    %49 = vector.extract_strided_slice %0 {offsets = [5, 0], sizes = [1, 128], strides = [1, 1]} : vector<8x256xf32> to vector<1x128xf32>
    %50 = vector.broadcast %49 : vector<1x128xf32> to vector<384x128xf32>
    %51 = arith.addf %48, %50 : vector<384x128xf32>
    %cst_27 = arith.constant 0.000000e+00 : f32
    %52 = vector.broadcast %cst_27 : f32 to vector<384x128xf32>
    %53 = arith.maximumf %51, %52 : vector<384x128xf32>
    %c5 = arith.constant 5 : index
    %c0_28 = arith.constant 0 : index
    %c0_29 = arith.constant 0 : index
    %54 = vector.load %arg3[%c5, %c0_28, %c0_29] : memref<6x256x256xbf16, #tpu.memory_space<vmem>>, vector<1x128x256xbf16>
    %55 = vector.shape_cast %54 : vector<1x128x256xbf16> to vector<128x256xbf16>
    %56 = arith.truncf %53 : vector<384x128xf32> to vector<384x128xbf16>
    %cst_30 = arith.constant dense<0.000000e+00> : vector<384x256xf32>
    %57 = tpu.matmul %56, %55, %cst_30 {dimension_numbers = #tpu.dot_dimension_numbers<[1], [0], [0], [1], [0, 0, 1, 1], [], []>} : vector<384x128xbf16>, vector<128x256xbf16>, vector<384x256xf32> -> vector<384x256xf32>
    %58 = vector.extract_strided_slice %0 {offsets = [6, 0], sizes = [1, 256], strides = [1, 1]} : vector<8x256xf32> to vector<1x256xf32>
    %59 = vector.broadcast %58 : vector<1x256xf32> to vector<384x256xf32>
    %60 = arith.addf %57, %59 : vector<384x256xf32>
    %cst_31 = arith.constant 0.000000e+00 : f32
    %61 = vector.broadcast %cst_31 : f32 to vector<384x256xf32>
    %62 = arith.maximumf %60, %61 : vector<384x256xf32>
    %c0_32 = arith.constant 0 : index
    %c0_33 = arith.constant 0 : index
    %63 = vector.load %arg4[%c0_32, %c0_33] : memref<256x128xbf16, #tpu.memory_space<vmem>>, vector<256x128xbf16>
    %64 = arith.truncf %62 : vector<384x256xf32> to vector<384x256xbf16>
    %cst_34 = arith.constant dense<0.000000e+00> : vector<384x128xf32>
    %65 = tpu.matmul %64, %63, %cst_34 {dimension_numbers = #tpu.dot_dimension_numbers<[1], [0], [0], [1], [0, 0, 1, 1], [], []>} : vector<384x256xbf16>, vector<256x128xbf16>, vector<384x128xf32> -> vector<384x128xf32>
    %66 = vector.extract_strided_slice %0 {offsets = [7, 0], sizes = [1, 128], strides = [1, 1]} : vector<8x256xf32> to vector<1x128xf32>
    %67 = vector.broadcast %66 : vector<1x128xf32> to vector<384x128xf32>
    %68 = arith.addf %65, %67 : vector<384x128xf32>
    %cst_35 = arith.constant 0.000000e+00 : f32
    %69 = vector.broadcast %cst_35 : f32 to vector<384x128xf32>
    %70 = arith.maximumf %68, %69 : vector<384x128xf32>
    %c0_36 = arith.constant 0 : index
    %c0_37 = arith.constant 0 : index
    %71 = vector.load %arg7[%c0_36, %c0_37] : memref<384x128xf32, #tpu.memory_space<vmem>>, vector<384x128xf32>
    tpu.vector_store %arg7[%c0_36, %c0_37], %70 {strides = array<i32>} : memref<384x128xf32, #tpu.memory_space<vmem>>, vector<384x128xf32>,
    return
  }
  func.func @transform_0(%arg0: i32) -> (i32, i32) {
    %c0_i32 = arith.constant 0 : i32
    %c0_i32_0 = arith.constant 0 : i32
    return %arg0, %c0_i32 : i32, i32
  }
  func.func @transform_1(%arg0: i32) -> (i32, i32) {
    %c0_i32 = arith.constant 0 : i32
    %c0_i32_0 = arith.constant 0 : i32
    %c0_i32_1 = arith.constant 0 : i32
    return %c0_i32, %c0_i32_0 : i32, i32
  }
  func.func @transform_2(%arg0: i32) -> (i32, i32, i32) {
    %c0_i32 = arith.constant 0 : i32
    %c0_i32_0 = arith.constant 0 : i32
    %c0_i32_1 = arith.constant 0 : i32
    %c0_i32_2 = arith.constant 0 : i32
    return %c0_i32, %c0_i32_0, %c0_i32_1 : i32, i32, i32
  }
  func.func @transform_3(%arg0: i32) -> (i32, i32) {
    %c0_i32 = arith.constant 0 : i32
    %c0_i32_0 = arith.constant 0 : i32
    %c0_i32_1 = arith.constant 0 : i32
    return %c0_i32, %c0_i32_0 : i32, i32
  }
  func.func @transform_4(%arg0: i32) -> (i32, i32) {
    %c0_i32 = arith.constant 0 : i32
    %c0_i32_0 = arith.constant 0 : i32
    %c0_i32_1 = arith.constant 0 : i32
    return %c0_i32, %c0_i32_0 : i32, i32
  }
  func.func @transform_5(%arg0: i32) -> (i32, i32) {
    %c0_i32 = arith.constant 0 : i32
    %c0_i32_0 = arith.constant 0 : i32
    return %arg0, %c0_i32 : i32, i32
  }
  func.func @transform_6(%arg0: i32) -> (i32, i32) {
    %c0_i32 = arith.constant 0 : i32
    %c0_i32_0 = arith.constant 0 : i32
    return %arg0, %c0_i32 : i32, i32
  }
}

</mosaic_0001>

<bundles_post_ra>
// kernel: tpu_custom_call.1
= control target key start
LH: loop header
LB: loop body
LE: loop exit
PB: predicated region body
PF: predicated region fallthrough
CT: control target
= control target key end

     0   :  { %12 = vsyncpa [#allocation3], 0  ;;  %s4917_s0 = inlined_call_operand.vmem [shape: f32[300,32], index: 0, kind: input, shape index: {}]   ;;  %s4918_s1 = inlined_call_operand.vmem [shape: bf16[32,256], index: 1, kind: input, shape index: {}]   ;;  %s4919_s2 = inlined_call_operand.hbm [shape: bf16[6,256,256], index: 2, kind: input, shape index: {}]   ;;  %s4920_s3 = inlined_call_operand.vmem [shape: bf16[256,128], index: 3, kind: input, shape index: {}]   ;;  %s4921_s4 = inlined_call_operand.vmem [shape: f32[8,256], index: 4, kind: input, shape index: {}]   ;;  %s4922_s5 = inlined_call_operand.hbm [shape: f32[300,128], index: 5, kind: output, shape index: {0}]   ;;  %s4923_s6 = inlined_call_operand.hbm [shape: f32[300,128], index: 6, kind: output, shape index: {1}]  }
   0x1   :  { %13 = vsyncpa [#allocation4], 0 }
   0x2   :  { %14 = vsyncpa [#allocation7], 0  ;;  %s23_s23 = sshll.u32 %s4919_s2, 4  ;;  %s3719_s24 = smov [#allocation2]   ;;  %s24_s23 = int_to_ptr.hbm [resolvable:$true] %s23_s23 }
   0x3   :  { %s25_s25 = sshll.u32 %s3719_s24, 4  ;;  %s3720_s26 = smov 128   ;;  %s26_s25 = int_to_ptr.vmem [resolvable:$true] %s25_s25 }
   0x4   :  { %s3721_s27 = smov 8  }
   0x5   :  { %31 = dma.hbm_to_vmem [thread:$0]  %s24_s23, 24576, %s26_s25, [#allocation3], %s3720_s26, %s3720_s26, %s3721_s27  }
   0x6   :  { %3713 = dma.done.wait [#allocation3], 24576  }
   0x7   :  { %3714 = vsyncadd [#allocation3], 4294942720  ;;  %v3174_v0 = vld [vmem:[%s4918_s1 + $0x10] sm:$0xf]  ;;  %v3551_v1 = vld [vmem:[%s4918_s1 + $0x14] sm:$0xf0] }
   0x8   :  { %v3550_v2 = vld [vmem:[%s4918_s1 + $0x14] sm:$0xf]  ;;  %v3175_v3 = vor.u32 %v3551_v1, %v3174_v0  ;;  %v3176_v4 = vld [vmem:[%s4918_s1 + $0x18] sm:$0xf0]  ;;  %v3166_v5 = vld [vmem:[%s4918_s1] sm:$0xf] }
   0x9   :  { %v3549_v6 = vld [vmem:[%s4918_s1 + $0x4] sm:$0xf0]  ;;  %v3179_v7 = vor.u32 %v3550_v2, %v3176_v4  ;;  %v3548_v8 = vld [vmem:[%s4918_s1 + $0x4] sm:$0xf]  ;;  %v3168_v9 = vld [vmem:[%s4918_s1 + $0x8] sm:$0xf0] }
   0xa   :  { %v43_v10 = vld [vmem:[%s4917_s0] sm:$0xff]  ;;  %220 = vmatpush.bf16.msra.mxu0 %v3175_v3  ;;  %v3167_v11 = vor.u32 %v3549_v6, %v3166_v5  ;;  %v44_v12 = vld [vmem:[%s4917_s0 + $0x8] sm:$0xff]  ;;  %v3322_v13 = vld [vmem:[#allocation2 + $0x170] sm:$0xf]  ;;  %v3171_v15 = vor.u32 %v3548_v8, %v3168_v9  ;;  %vm141_vm0 = vcmask 261120  }
   0xb   :  { %v3575_v14 = vld [vmem:[#allocation2 + $0x174] sm:$0xf0]  ;;  %349 = vmatpush.bf16.msra.mxu1 %v3179_v7  ;;  %v95_v17 = vpack.c.bf16 %v44_v12, %v43_v10  ;;  %v45_v18 = vld [vmem:[%s4917_s0 + $0x10] sm:$0xff]  ;;  %v3318_v21 = vld [vmem:[#allocation2 + $0x160] sm:$0xf] }
   0xc   :  { %v3323_v16 = vor.u32 %v3575_v14, %v3322_v13  ;;  %v46_v19 = vld [vmem:[%s4917_s0 + $0x18] sm:$0xff]  ;;  %v3574_v22 = vld [vmem:[#allocation2 + $0x164] sm:$0xf0]  ;;  %v47_v24 = vld [vmem:[%s4917_s0 + $0x20] sm:$0xff] }
   0xd   :  { %v96_v20 = vpack.c.bf16 %v46_v19, %v45_v18  ;;  %v3319_v23 = vor.u32 %v3574_v22, %v3318_v21  ;;  %v48_v25 = vld [vmem:[%s4917_s0 + $0x28] sm:$0xff]  ;;  %v49_v27 = vld [vmem:[%s4917_s0 + $0x30] sm:$0xff]  ;;  %v50_v28 = vld [vmem:[%s4917_s0 + $0x38] sm:$0xff] }
   0xe   :  { %221 = vmatpush.bf16.msra.mxu0 %v3167_v11  ;;  %v97_v26 = vpack.c.bf16 %v48_v25, %v47_v24  ;;  %v98_v29 = vpack.c.bf16 %v50_v28, %v49_v27  ;;  %v51_v30 = vld [vmem:[%s4917_s0 + $0x40] sm:$0xff]  ;;  %v52_v31 = vld [vmem:[%s4917_s0 + $0x48] sm:$0xff]  ;;  %v3314_v33 = vld [vmem:[#allocation2 + $0x150] sm:$0xf] }
   0xf   :  { %350 = vmatpush.bf16.msra.mxu1 %v3171_v15  ;;  %v99_v32 = vpack.c.bf16 %v52_v31, %v51_v30  ;;  %v3573_v34 = vld [vmem:[#allocation2 + $0x154] sm:$0xf0]  ;;  %v3258_v36 = vld [vmem:[#allocation2 + $0x70] sm:$0xf]  ;;  %v3254_v45 = vld [vmem:[#allocation2 + $0x60] sm:$0xf] }
  0x10   :  { %v3315_v35 = vor.u32 %v3573_v34, %v3314_v33  ;;  %v3559_v37 = vld [vmem:[#allocation2 + $0x74] sm:$0xf0]  ;;  %v3290_v38 = vld [vmem:[#allocation2 + $0xf0] sm:$0xf]  ;;  %v3558_v46 = vld [vmem:[#allocation2 + $0x64] sm:$0xf0] }
  0x11   :  { %3180 = vmatmul.msk.bf16.vlgmr.msra.gmra.mxu0 %vm141_vm0, %v95_v17  ;;  %v3259_v39 = vor.u32 %v3559_v37, %v3258_v36  ;;  %v3567_v40 = vld [vmem:[#allocation2 + $0xf4] sm:$0xf0]  ;;  %v53_v42 = vld [vmem:[%s4917_s0 + $0x50] sm:$0xff]  ;;  %v3255_v47 = vor.u32 %v3558_v46, %v3254_v45  ;;  %v3286_v48 = vld [vmem:[#allocation2 + $0xe0] sm:$0xf] }
  0x12   :  { %1141 = vmatpush.bf16.msrb.mxu0 %v3323_v16  ;;  %3204 = vmatmul.msk.bf16.vlgmr.msra.gmra.mxu1 %vm141_vm0, %v95_v17  ;;  %v3291_v41 = vor.u32 %v3567_v40, %v3290_v38  ;;  %v54_v43 = vld [vmem:[%s4917_s0 + $0x58] sm:$0xff]  ;;  %v3566_v49 = vld [vmem:[#allocation2 + $0xe4] sm:$0xf0]  ;;  %v3250_v51 = vld [vmem:[#allocation2 + $0x50] sm:$0xf] }
  0x13   :  { %745 = vmatpush.bf16.msra.mxu2 %v3259_v39  ;;  %v100_v44 = vpack.c.bf16 %v54_v43, %v53_v42  ;;  %v3287_v50 = vor.u32 %v3566_v49, %v3286_v48  ;;  %v3557_v52 = vld [vmem:[#allocation2 + $0x54] sm:$0xf0]  ;;  %v3282_v53 = vld [vmem:[#allocation2 + $0xd0] sm:$0xf]  ;;  %v3246_v56 = vld [vmem:[#allocation2 + $0x40] sm:$0xf] }
  0x14   :  { %874 = vmatpush.bf16.msra.mxu3 %v3291_v41  ;;  %v3251_v54 = vor.u32 %v3557_v52, %v3250_v51  ;;  %v3565_v55 = vld [vmem:[#allocation2 + $0xd4] sm:$0xf0]  ;;  %v3556_v57 = vld [vmem:[#allocation2 + $0x44] sm:$0xf0]  ;;  %v3278_v59 = vld [vmem:[#allocation2 + $0xc0] sm:$0xf] }
  0x15   :  { %v3283_v58 = vor.u32 %v3565_v55, %v3282_v53  ;;  %v3564_v60 = vld [vmem:[#allocation2 + $0xc4] sm:$0xf0]  ;;  %v3247_v61 = vor.u32 %v3556_v57, %v3246_v56  ;;  %v55_v63 = vld [vmem:[%s4917_s0 + $0x60] sm:$0xff]  ;;  %v3242_v1 = vld [vmem:[#allocation2 + $0x30] sm:$0xf] }
  0x16   :  { %1142 = vmatpush.bf16.msrb.mxu0 %v3319_v23  ;;  %v3279_v62 = vor.u32 %v3564_v60, %v3278_v59  ;;  %v56_v0 = vld [vmem:[%s4917_s0 + $0x68] sm:$0xff]  ;;  %v3555_v2 = vld [vmem:[#allocation2 + $0x34] sm:$0xf0]  ;;  %v3274_v5 = vld [vmem:[#allocation2 + $0xb0] sm:$0xf] }
  0x17   :  { %746 = vmatpush.bf16.msra.mxu2 %v3255_v47  ;;  %v3243_v3 = vor.u32 %v3555_v2, %v3242_v1  ;;  %v101_v4 = vpack.c.bf16 %v56_v0, %v55_v63  ;;  %v3563_v6 = vld [vmem:[#allocation2 + $0xb4] sm:$0xf0]  ;;  %v3238_v8 = vld [vmem:[#allocation2 + $0x20] sm:$0xf]  ;;  %v3554_v9 = vld [vmem:[#allocation2 + $0x24] sm:$0xf0] }
  0x18   :  { %875 = vmatpush.bf16.msra.mxu3 %v3287_v50  ;;  %v3275_v7 = vor.u32 %v3563_v6, %v3274_v5  ;;  %v3239_v10 = vor.u32 %v3554_v9, %v3238_v8  ;;  %v3270_v11 = vld [vmem:[#allocation2 + $0xa0] sm:$0xf]  ;;  %v3562_v12 = vld [vmem:[#allocation2 + $0xa4] sm:$0xf0]  ;;  %v3234_v14 = vld [vmem:[#allocation2 + $0x10] sm:$0xf] }
  0x19   :  { %v3271_v13 = vor.u32 %v3562_v12, %v3270_v11  ;;  %v3553_v15 = vld [vmem:[#allocation2 + $0x14] sm:$0xf0]  ;;  %v3266_v17 = vld [vmem:[#allocation2 + $0x90] sm:$0xf]  ;;  %v3552_v21 = vld [vmem:[#allocation2 + $0x4] sm:$0xf0] }
  0x1a   :  { %1143 = vmatpush.bf16.msrb.mxu0 %v3315_v35  ;;  %v3235_v16 = vor.u32 %v3553_v15, %v3234_v14  ;;  %v3561_v18 = vld [vmem:[#allocation2 + $0x94] sm:$0xf0]  ;;  %v3262_v23 = vld [vmem:[#allocation2 + $0x80] sm:$0xf]  ;;  %v3560_v24 = vld [vmem:[#allocation2 + $0x84] sm:$0xf0] }
  0x1b   :  { %747 = vmatpush.bf16.msra.mxu2 %v3251_v54  ;;  %v3267_v19 = vor.u32 %v3561_v18, %v3266_v17  ;;  %v57_v25 = vld [vmem:[%s4917_s0 + $0x70] sm:$0xff]  ;;  %v3263_v27 = vor.u32 %v3560_v24, %v3262_v23  ;;  %v3583_v30 = vld [vmem:[#allocation2 + $0x274] sm:$0xf0]  ;;  %v3572_v33 = vld [vmem:[#allocation2 + $0x144] sm:$0xf0] }
  0x1c   :  { %876 = vmatpush.bf16.msra.mxu3 %v3283_v58  ;;  %v59_v35 = vld [vmem:[%s4917_s0 + $0x80] sm:$0xff]  ;;  %v60_v36 = vld [vmem:[%s4917_s0 + $0x88] sm:$0xff]  ;;  %v61_v54 = vld [vmem:[%s4917_s0 + $0x90] sm:$0xff] }
  0x1d   :  { %v42_v37 = vld [vmem:[%s4921_s4 + $0x8] sm:$0xff]  ;;  %v103_v38 = vpack.c.bf16 %v60_v36, %v59_v35  ;;  %v3865_v39 = vld [vmem:[%s4921_s4] sm:$0xff]  ;;  %v62_v55 = vld [vmem:[%s4917_s0 + $0x98] sm:$0xff] }
  0x1e   :  { %v3867_v42 = vperm.slane %v42_v37, 0  ;;  %v3870_v43 = vperm.slane %v3865_v39, 0  ;;  %v104_v58 = vpack.c.bf16 %v62_v55, %v61_v54  ;;  %v64_v8 = vld [vmem:[%s4917_s0 + $0xa8] sm:$0xff]  ;;  %v3350_v12 = vld [vmem:[#allocation2 + $0x260] sm:$0xf] }
  0x1f   :  { %748 = vmatpush.bf16.msra.mxu2 %v3247_v61  ;;  %v3306_v17 = vld [vmem:[#allocation2 + $0x130] sm:$0xf]  ;;  %v3571_v18 = vld [vmem:[#allocation2 + $0x134] sm:$0xf0] }
  0x20   :  { %877 = vmatpush.bf16.msra.mxu3 %v3279_v62 }
  0x21   :  { %3181 = vmatmul.msk.bf16.gmra.mxu0 %vm141_vm0, %v96_v20 }
  0x22   :  { %3205 = vmatmul.msk.bf16.gmra.mxu1 %vm141_vm0, %v96_v20  ;;  %v3230_v20 = vld [vmem:[#allocation2] sm:$0xf] }
  0x23   :  { %749 = vmatpush.bf16.msra.mxu2 %v3243_v3  ;;  %v3231_v22 = vor.u32 %v3552_v21, %v3230_v20 }
  0x24   :  { %878 = vmatpush.bf16.msra.mxu3 %v3275_v7  ;;  %v63_v7 = vld [vmem:[%s4917_s0 + $0xa0] sm:$0xff] }
  0x25   :  { %v105_v11 = vpack.c.bf16 %v64_v8, %v63_v7  ;;  %v3346_v8 = vld [vmem:[#allocation2 + $0x250] sm:$0xf] }
  0x27   :  { %750 = vmatpush.bf16.msra.mxu2 %v3239_v10 }
  0x28   :  { %879 = vmatpush.bf16.msra.mxu3 %v3271_v13  ;;  %v3582_v13 = vld [vmem:[#allocation2 + $0x264] sm:$0xf0] }
  0x29   :  { %v3351_v15 = vor.u32 %v3582_v13, %v3350_v12  ;;  %v3302_v13 = vld [vmem:[#allocation2 + $0x120] sm:$0xf] }
  0x2b   :  { %751 = vmatpush.bf16.msra.mxu2 %v3235_v16 }
  0x2c   :  { %880 = vmatpush.bf16.msra.mxu3 %v3267_v19  ;;  %v3307_v19 = vor.u32 %v3571_v18, %v3306_v17 }
  0x2f   :  { %752 = vmatpush.bf16.msra.mxu2 %v3231_v22 }
  0x30   :  { %881 = vmatpush.bf16.msra.mxu3 %v3263_v27 }
  0x31   :  { %3182 = vmatmul.msk.bf16.gmra.mxu0 %vm141_vm0, %v97_v26 }
  0x32   :  { %3206 = vmatmul.msk.bf16.gmra.mxu1 %vm141_vm0, %v97_v26  ;;  %v58_v26 = vld [vmem:[%s4917_s0 + $0x78] sm:$0xff] }
  0x33   :  { %v102_v28 = vpack.c.bf16 %v58_v26, %v57_v25 }
  0x41   :  { %3183 = vmatmul.msk.bf16.gmra.mxu0 %vm141_vm0, %v98_v29 }
  0x42   :  { %3207 = vmatmul.msk.bf16.gmra.mxu1 %vm141_vm0, %v98_v29  ;;  %v3354_v29 = vld [vmem:[#allocation2 + $0x270] sm:$0xf] }
  0x43   :  { %v3355_v31 = vor.u32 %v3583_v30, %v3354_v29  ;;  %v65_v30 = vld [vmem:[%s4917_s0 + $0xb0] sm:$0xff] }
  0x45   :  { %1408 = vmatpush.bf16.msrb.mxu1 %v3355_v31  ;;  %v66_v31 = vld [vmem:[%s4917_s0 + $0xb8] sm:$0xff] }
  0x49   :  { %1409 = vmatpush.bf16.msrb.mxu1 %v3351_v15 }
  0x51   :  { %3184 = vmatmul.msk.bf16.gmra.mxu0 %vm141_vm0, %v99_v32 }
  0x52   :  { %3208 = vmatmul.msk.bf16.gmra.mxu1 %vm141_vm0, %v99_v32  ;;  %v3310_v32 = vld [vmem:[#allocation2 + $0x140] sm:$0xf] }
  0x53   :  { %v3311_v34 = vor.u32 %v3572_v33, %v3310_v32 }
  0x55   :  { %1144 = vmatpush.bf16.msrb.mxu0 %v3311_v34  ;;  %v106_v34 = vpack.c.bf16 %v66_v31, %v65_v30 }
  0x59   :  { %1145 = vmatpush.bf16.msrb.mxu0 %v3307_v19 }
  0x61   :  { %3185 = vmatmul.msk.bf16.gmra.mxu0 %vm141_vm0, %v100_v44 }
  0x62   :  { %3209 = vmatmul.msk.bf16.gmra.mxu1 %vm141_vm0, %v100_v44 }
  0x71   :  { %3186 = vmatmul.msk.bf16.gmra.mxu0 %vm141_vm0, %v101_v4 }
  0x72   :  { %3210 = vmatmul.msk.bf16.gmra.mxu1 %vm141_vm0, %v101_v4 }
  0x81   :  { %3187 = vmatmul.msk.bf16.gmra.mxu0 %vm141_vm0, %v102_v28 }
  0x82   :  { %3211 = vmatmul.msk.bf16.gmra.mxu1 %vm141_vm0, %v102_v28 }
  0x8e   :  { %v223_v40 = vpop.f32.mrf.mxu0 }
  0x8f   :  { %v352_v41 = vpop.f32.mrf.mxu1  ;;  %v224_v45 = vadd.f32 %v223_v40, %v3870_v43 }
  0x90   :  { %v353_v44 = vadd.f32 %v352_v41, %v3867_v42 }
  0x91   :  { %3188 = vmatmul.msk.bf16.gmra.mxu0 %vm141_vm0, %v103_v38  ;;  %v472_v51 = vmax.f32 %v224_v45, 0.0 }
  0x92   :  { %3212 = vmatmul.msk.bf16.gmra.mxu1 %vm141_vm0, %v103_v38  ;;  %v473_v49 = vmax.f32 %v353_v44, 0.0 }
  0x96   :  { %v225_v46 = vpop.f32.mrf.mxu0 }
  0x97   :  { %v226_v47 = vadd.f32 %v225_v46, %v3870_v43  ;;  %v354_v48 = vpop.f32.mrf.mxu1 }
  0x98   :  { %v355_v50 = vadd.f32 %v354_v48, %v3867_v42 }
  0x99   :  { %v474_v52 = vmax.f32 %v226_v47, 0.0 }
  0x9a   :  { %v475_v53 = vmax.f32 %v355_v50, 0.0  ;;  %v67_v50 = vld [vmem:[%s4917_s0 + $0xc0] sm:$0xff] }
  0x9b   :  { %v600_v56 = vpack.c.bf16 %v474_v52, %v472_v51  ;;  %v68_v51 = vld [vmem:[%s4917_s0 + $0xc8] sm:$0xff] }
  0x9c   :  { %v601_v57 = vpack.c.bf16 %v475_v53, %v473_v49  ;;  %v107_v54 = vpack.c.bf16 %v68_v51, %v67_v50 }
  0x9d   :  { %753 = vmatmul.bf16.vlgmr.msra.gmra.mxu2 %v600_v56 }
  0x9e   :  { %v228_v59 = vpop.f32.mrf.mxu0  ;;  %882 = vmatmul.bf16.vlgmr.msra.gmra.mxu3 %v601_v57 }
  0x9f   :  { %v357_v60 = vpop.f32.mrf.mxu1  ;;  %v229_v62 = vadd.f32 %v228_v59, %v3870_v43 }
  0xa0   :  { %v358_v61 = vadd.f32 %v357_v60, %v3867_v42 }
  0xa1   :  { %3189 = vmatmul.msk.bf16.gmra.mxu0 %vm141_vm0, %v104_v58  ;;  %v476_v4 = vmax.f32 %v229_v62, 0.0 }
  0xa2   :  { %3213 = vmatmul.msk.bf16.gmra.mxu1 %vm141_vm0, %v104_v58  ;;  %v477_v2 = vmax.f32 %v358_v61, 0.0 }
  0xa6   :  { %v230_v63 = vpop.f32.mrf.mxu0 }
  0xa7   :  { %v231_v0 = vadd.f32 %v230_v63, %v3870_v43  ;;  %v359_v1 = vpop.f32.mrf.mxu1 }
  0xa8   :  { %v360_v3 = vadd.f32 %v359_v1, %v3867_v42 }
  0xa9   :  { %v478_v5 = vmax.f32 %v231_v0, 0.0 }
  0xaa   :  { %v479_v6 = vmax.f32 %v360_v3, 0.0  ;;  %v69_v3 = vld [vmem:[%s4917_s0 + $0xd0] sm:$0xff] }
  0xab   :  { %v602_v9 = vpack.c.bf16 %v478_v5, %v476_v4  ;;  %v70_v4 = vld [vmem:[%s4917_s0 + $0xd8] sm:$0xff] }
  0xac   :  { %v603_v10 = vpack.c.bf16 %v479_v6, %v477_v2  ;;  %v108_v7 = vpack.c.bf16 %v70_v4, %v69_v3 }
  0xad   :  { %758 = vmatmul.bf16.gmra.mxu2 %v602_v9  ;;  %v3581_v9 = vld [vmem:[#allocation2 + $0x254] sm:$0xf0] }
  0xae   :  { %v233_v14 = vpop.f32.mrf.mxu0  ;;  %887 = vmatmul.bf16.gmra.mxu3 %v603_v10 }
  0xaf   :  { %v362_v16 = vpop.f32.mrf.mxu1  ;;  %v234_v21 = vadd.f32 %v233_v14, %v3870_v43  ;;  %v3570_v14 = vld [vmem:[#allocation2 + $0x124] sm:$0xf0] }
  0xb0   :  { %v363_v20 = vadd.f32 %v362_v16, %v3867_v42  ;;  %v3303_v15 = vor.u32 %v3570_v14, %v3302_v13  ;;  %v3569_v13 = vld [vmem:[#allocation2 + $0x114] sm:$0xf0] }
  0xb1   :  { %3190 = vmatmul.msk.bf16.gmra.mxu0 %vm141_vm0, %v105_v11  ;;  %v480_v27 = vmax.f32 %v234_v21, 0.0 }
  0xb2   :  { %3214 = vmatmul.msk.bf16.gmra.mxu1 %vm141_vm0, %v105_v11  ;;  %v481_v25 = vmax.f32 %v363_v20, 0.0  ;;  %v3347_v11 = vor.u32 %v3581_v9, %v3346_v8  ;;  %1146 = vmatpush.bf16.msrb.mxu0 %v3303_v15  ;;  %v3342_v9 = vld [vmem:[#allocation2 + $0x240] sm:$0xf] }
  0xb4   :  { %1410 = vmatpush.bf16.msrb.mxu1 %v3347_v11 }
  0xb6   :  { %v235_v22 = vpop.f32.mrf.mxu0 }
  0xb7   :  { %v236_v23 = vadd.f32 %v235_v22, %v3870_v43  ;;  %v364_v24 = vpop.f32.mrf.mxu1 }
  0xb8   :  { %v365_v26 = vadd.f32 %v364_v24, %v3867_v42 }
  0xb9   :  { %v482_v28 = vmax.f32 %v236_v23, 0.0 }
  0xba   :  { %v483_v29 = vmax.f32 %v365_v26, 0.0  ;;  %v71_v26 = vld [vmem:[%s4917_s0 + $0xe0] sm:$0xff] }
  0xbb   :  { %v604_v32 = vpack.c.bf16 %v482_v28, %v480_v27  ;;  %v72_v27 = vld [vmem:[%s4917_s0 + $0xe8] sm:$0xff] }
  0xbc   :  { %v605_v33 = vpack.c.bf16 %v483_v29, %v481_v25  ;;  %v109_v30 = vpack.c.bf16 %v72_v27, %v71_v26  ;;  %v78_v26 = vld [vmem:[%s4917_s0 + $0x118] sm:$0xff] }
  0xbd   :  { %763 = vmatmul.bf16.gmra.mxu2 %v604_v32 }
  0xbe   :  { %v238_v35 = vpop.f32.mrf.mxu0  ;;  %892 = vmatmul.bf16.gmra.mxu3 %v605_v33 }
  0xbf   :  { %v367_v36 = vpop.f32.mrf.mxu1  ;;  %v239_v38 = vadd.f32 %v238_v35, %v3870_v43 }
  0xc0   :  { %v368_v37 = vadd.f32 %v367_v36, %v3867_v42 }
  0xc1   :  { %3191 = vmatmul.msk.bf16.gmra.mxu0 %vm141_vm0, %v106_v34  ;;  %v484_v47 = vmax.f32 %v239_v38, 0.0 }
  0xc2   :  { %3215 = vmatmul.msk.bf16.gmra.mxu1 %vm141_vm0, %v106_v34  ;;  %v485_v45 = vmax.f32 %v368_v37, 0.0 }
  0xc6   :  { %v240_v40 = vpop.f32.mrf.mxu0 }
  0xc7   :  { %v241_v41 = vadd.f32 %v240_v40, %v3870_v43  ;;  %v369_v44 = vpop.f32.mrf.mxu1 }
  0xc8   :  { %v370_v46 = vadd.f32 %v369_v44, %v3867_v42 }
  0xc9   :  { %v486_v48 = vmax.f32 %v241_v41, 0.0 }
  0xca   :  { %v487_v49 = vmax.f32 %v370_v46, 0.0  ;;  %v73_v46 = vld [vmem:[%s4917_s0 + $0xf0] sm:$0xff] }
  0xcb   :  { %v606_v52 = vpack.c.bf16 %v486_v48, %v484_v47  ;;  %v74_v47 = vld [vmem:[%s4917_s0 + $0xf8] sm:$0xff] }
  0xcc   :  { %v607_v53 = vpack.c.bf16 %v487_v49, %v485_v45  ;;  %v110_v50 = vpack.c.bf16 %v74_v47, %v73_v46 }
  0xcd   :  { %768 = vmatmul.bf16.gmra.mxu2 %v606_v52 }
  0xce   :  { %v243_v55 = vpop.f32.mrf.mxu0  ;;  %897 = vmatmul.bf16.gmra.mxu3 %v607_v53 }
  0xcf   :  { %v372_v56 = vpop.f32.mrf.mxu1  ;;  %v244_v58 = vadd.f32 %v243_v55, %v3870_v43 }
  0xd0   :  { %v373_v57 = vadd.f32 %v372_v56, %v3867_v42 }
  0xd1   :  { %3192 = vmatmul.msk.bf16.gmra.mxu0 %vm141_vm0, %v107_v54  ;;  %v488_v0 = vmax.f32 %v244_v58, 0.0 }
  0xd2   :  { %3216 = vmatmul.msk.bf16.gmra.mxu1 %vm141_vm0, %v107_v54  ;;  %v489_v62 = vmax.f32 %v373_v57, 0.0 }
  0xd6   :  { %v245_v59 = vpop.f32.mrf.mxu0 }
  0xd7   :  { %v246_v60 = vadd.f32 %v245_v59, %v3870_v43  ;;  %v374_v61 = vpop.f32.mrf.mxu1 }
  0xd8   :  { %v375_v63 = vadd.f32 %v374_v61, %v3867_v42 }
  0xd9   :  { %v490_v1 = vmax.f32 %v246_v60, 0.0 }
  0xda   :  { %v491_v2 = vmax.f32 %v375_v63, 0.0  ;;  %v3591_v63 = vld [vmem:[#allocation2 + $0x374] sm:$0xf0] }
  0xdb   :  { %v608_v5 = vpack.c.bf16 %v490_v1, %v488_v0  ;;  %v75_v1 = vld [vmem:[%s4917_s0 + $0x100] sm:$0xff] }
  0xdc   :  { %v609_v6 = vpack.c.bf16 %v491_v2, %v489_v62  ;;  %v3386_v62 = vld [vmem:[#allocation2 + $0x370] sm:$0xf]  ;;  %v76_v2 = vld [vmem:[%s4917_s0 + $0x108] sm:$0xff] }
  0xdd   :  { %773 = vmatmul.bf16.gmra.mxu2 %v608_v5  ;;  %v3387_v3 = vor.u32 %v3591_v63, %v3386_v62 }
  0xde   :  { %v248_v10 = vpop.f32.mrf.mxu0  ;;  %902 = vmatmul.bf16.gmra.mxu3 %v609_v6  ;;  %v111_v6 = vpack.c.bf16 %v76_v2, %v75_v1 }
  0xdf   :  { %v377_v12 = vpop.f32.mrf.mxu1  ;;  %v249_v17 = vadd.f32 %v248_v10, %v3870_v43  ;;  %1675 = vmatpush.bf16.msrb.mxu2 %v3387_v3  ;;  %v3580_v10 = vld [vmem:[#allocation2 + $0x244] sm:$0xf0] }
  0xe0   :  { %v378_v16 = vadd.f32 %v377_v12, %v3867_v42  ;;  %v3343_v11 = vor.u32 %v3580_v10, %v3342_v9  ;;  %v3298_v12 = vld [vmem:[#allocation2 + $0x110] sm:$0xf] }
  0xe1   :  { %3193 = vmatmul.msk.bf16.gmra.mxu0 %vm141_vm0, %v108_v7  ;;  %v492_v23 = vmax.f32 %v249_v17, 0.0  ;;  %v3299_v14 = vor.u32 %v3569_v13, %v3298_v12 }
  0xe2   :  { %3217 = vmatmul.msk.bf16.gmra.mxu1 %vm141_vm0, %v108_v7  ;;  %v493_v21 = vmax.f32 %v378_v16, 0.0 }
  0xe3   :  { %1411 = vmatpush.bf16.msrb.mxu1 %v3343_v11  ;;  %1147 = vmatpush.bf16.msrb.mxu0 %v3299_v14  ;;  %v3338_v14 = vld [vmem:[#allocation2 + $0x230] sm:$0xf] }
  0xe6   :  { %v250_v18 = vpop.f32.mrf.mxu0 }
  0xe7   :  { %v251_v19 = vadd.f32 %v250_v18, %v3870_v43  ;;  %v379_v20 = vpop.f32.mrf.mxu1 }
  0xe8   :  { %v380_v22 = vadd.f32 %v379_v20, %v3867_v42 }
  0xe9   :  { %v494_v24 = vmax.f32 %v251_v19, 0.0 }
  0xea   :  { %v495_v25 = vmax.f32 %v380_v22, 0.0 }
  0xeb   :  { %v610_v28 = vpack.c.bf16 %v494_v24, %v492_v23 }
  0xec   :  { %v611_v29 = vpack.c.bf16 %v495_v25, %v493_v21  ;;  %v77_v25 = vld [vmem:[%s4917_s0 + $0x110] sm:$0xff] }
  0xed   :  { %778 = vmatmul.bf16.gmra.mxu2 %v610_v28 }
  0xee   :  { %v253_v31 = vpop.f32.mrf.mxu0  ;;  %907 = vmatmul.bf16.gmra.mxu3 %v611_v29  ;;  %v112_v29 = vpack.c.bf16 %v78_v26, %v77_v25 }
  0xef   :  { %v382_v32 = vpop.f32.mrf.mxu1  ;;  %v254_v34 = vadd.f32 %v253_v31, %v3870_v43 }
  0xf0   :  { %v383_v33 = vadd.f32 %v382_v32, %v3867_v42 }
  0xf1   :  { %3194 = vmatmul.msk.bf16.gmra.mxu0 %vm141_vm0, %v109_v30  ;;  %v496_v41 = vmax.f32 %v254_v34, 0.0 }
  0xf2   :  { %3218 = vmatmul.msk.bf16.gmra.mxu1 %vm141_vm0, %v109_v30  ;;  %v497_v38 = vmax.f32 %v383_v33, 0.0 }
  0xf6   :  { %v255_v35 = vpop.f32.mrf.mxu0 }
  0xf7   :  { %v256_v36 = vadd.f32 %v255_v35, %v3870_v43  ;;  %v384_v37 = vpop.f32.mrf.mxu1 }
  0xf8   :  { %v385_v40 = vadd.f32 %v384_v37, %v3867_v42 }
  0xf9   :  { %v498_v44 = vmax.f32 %v256_v36, 0.0 }
  0xfa   :  { %v499_v45 = vmax.f32 %v385_v40, 0.0 }
  0xfb   :  { %v612_v48 = vpack.c.bf16 %v498_v44, %v496_v41 }
  0xfc   :  { %v613_v49 = vpack.c.bf16 %v499_v45, %v497_v38 }
  0xfd   :  { %783 = vmatmul.bf16.gmra.mxu2 %v612_v48 }
  0xfe   :  { %v258_v51 = vpop.f32.mrf.mxu0  ;;  %912 = vmatmul.bf16.gmra.mxu3 %v613_v49  ;;  %v79_v49 = vld [vmem:[%s4917_s0 + $0x120] sm:$0xff] }
  0xff   :  { %v387_v52 = vpop.f32.mrf.mxu1  ;;  %v259_v54 = vadd.f32 %v258_v51, %v3870_v43 }
 0x100   :  { %v388_v53 = vadd.f32 %v387_v52, %v3867_v42 }
 0x101   :  { %3195 = vmatmul.msk.bf16.gmra.mxu0 %vm141_vm0, %v110_v50  ;;  %v500_v60 = vmax.f32 %v259_v54, 0.0 }
 0x102   :  { %3219 = vmatmul.msk.bf16.gmra.mxu1 %vm141_vm0, %v110_v50  ;;  %v501_v58 = vmax.f32 %v388_v53, 0.0  ;;  %v80_v50 = vld [vmem:[%s4917_s0 + $0x128] sm:$0xff] }
 0x103   :  { %v113_v53 = vpack.c.bf16 %v80_v50, %v79_v49 }
 0x106   :  { %v260_v55 = vpop.f32.mrf.mxu0 }
 0x107   :  { %v261_v56 = vadd.f32 %v260_v55, %v3870_v43  ;;  %v389_v57 = vpop.f32.mrf.mxu1 }
 0x108   :  { %v390_v59 = vadd.f32 %v389_v57, %v3867_v42 }
 0x109   :  { %v502_v61 = vmax.f32 %v261_v56, 0.0 }
 0x10a   :  { %v503_v0 = vmax.f32 %v390_v59, 0.0 }
 0x10b   :  { %v614_v4 = vpack.c.bf16 %v502_v61, %v500_v60 }
 0x10c   :  { %v615_v5 = vpack.c.bf16 %v503_v0, %v501_v58 }
 0x10d   :  { %788 = vmatmul.bf16.gmra.mxu2 %v614_v4  ;;  %v3382_v4 = vld [vmem:[#allocation2 + $0x360] sm:$0xf] }
 0x10e   :  { %v263_v7 = vpop.f32.mrf.mxu0  ;;  %917 = vmatmul.bf16.gmra.mxu3 %v615_v5  ;;  %v3590_v5 = vld [vmem:[#allocation2 + $0x364] sm:$0xf0] }
 0x10f   :  { %v392_v8 = vpop.f32.mrf.mxu1  ;;  %v264_v16 = vadd.f32 %v263_v7, %v3870_v43  ;;  %v81_v7 = vld [vmem:[%s4917_s0 + $0x130] sm:$0xff]  ;;  %v3383_v9 = vor.u32 %v3590_v5, %v3382_v4 }
 0x110   :  { %v393_v15 = vadd.f32 %v392_v8, %v3867_v42  ;;  %v82_v8 = vld [vmem:[%s4917_s0 + $0x138] sm:$0xff] }
 0x111   :  { %3196 = vmatmul.msk.bf16.gmra.mxu0 %vm141_vm0, %v111_v6  ;;  %v504_v22 = vmax.f32 %v264_v16, 0.0  ;;  %1676 = vmatpush.bf16.msrb.mxu2 %v3383_v9  ;;  %v114_v13 = vpack.c.bf16 %v82_v8, %v81_v7 }
 0x112   :  { %3220 = vmatmul.msk.bf16.gmra.mxu1 %vm141_vm0, %v111_v6  ;;  %v505_v20 = vmax.f32 %v393_v15, 0.0  ;;  %v3579_v15 = vld [vmem:[#allocation2 + $0x234] sm:$0xf0] }
 0x116   :  { %v265_v17 = vpop.f32.mrf.mxu0 }
 0x117   :  { %v266_v18 = vadd.f32 %v265_v17, %v3870_v43  ;;  %v394_v19 = vpop.f32.mrf.mxu1  ;;  %v3339_v17 = vor.u32 %v3579_v15, %v3338_v14 }
 0x118   :  { %v395_v21 = vadd.f32 %v394_v19, %v3867_v42 }
 0x119   :  { %v506_v23 = vmax.f32 %v266_v18, 0.0  ;;  %1412 = vmatpush.bf16.msrb.mxu1 %v3339_v17 }
 0x11a   :  { %v507_v24 = vmax.f32 %v395_v21, 0.0  ;;  %v3568_v21 = vld [vmem:[#allocation2 + $0x104] sm:$0xf0] }
 0x11b   :  { %v616_v27 = vpack.c.bf16 %v506_v23, %v504_v22 }
 0x11c   :  { %v617_v28 = vpack.c.bf16 %v507_v24, %v505_v20  ;;  %v3294_v20 = vld [vmem:[#allocation2 + $0x100] sm:$0xf] }
 0x11d   :  { %793 = vmatmul.bf16.gmra.mxu2 %v616_v27  ;;  %v3295_v22 = vor.u32 %v3568_v21, %v3294_v20  ;;  %v3378_v21 = vld [vmem:[#allocation2 + $0x350] sm:$0xf] }
 0x11e   :  { %v268_v30 = vpop.f32.mrf.mxu0  ;;  %922 = vmatmul.bf16.gmra.mxu3 %v617_v28 }
 0x11f   :  { %v397_v31 = vpop.f32.mrf.mxu1  ;;  %v269_v35 = vadd.f32 %v268_v30, %v3870_v43  ;;  %1148 = vmatpush.bf16.msrb.mxu0 %v3295_v22  ;;  %v3589_v22 = vld [vmem:[#allocation2 + $0x354] sm:$0xf0] }
 0x120   :  { %v3980_v32 = vpop.f32.mrf.mxu2  ;;  %v398_v34 = vadd.f32 %v397_v31, %v3867_v42 }
 0x121   :  { %3197 = vmatmul.msk.bf16.gmra.mxu0 %vm141_vm0, %v112_v29  ;;  %v3983_v33 = vpop.f32.mrf.mxu3  ;;  %v508_v45 = vmax.f32 %v269_v35, 0.0 }
 0x122   :  { %3221 = vmatmul.msk.bf16.gmra.mxu1 %vm141_vm0, %v112_v29  ;;  %v509_v40 = vmax.f32 %v398_v34, 0.0 }
 0x126   :  { %v270_v36 = vpop.f32.mrf.mxu0 }
 0x127   :  { %v271_v37 = vadd.f32 %v270_v36, %v3870_v43  ;;  %v399_v38 = vpop.f32.mrf.mxu1  ;;  %v83_v36 = vld [vmem:[%s4917_s0 + $0x140] sm:$0xff] }
 0x128   :  { %v400_v41 = vadd.f32 %v399_v38, %v3867_v42  ;;  %v3990_v44 = vpop.f32.mrf.mxu2 }
 0x129   :  { %v510_v46 = vmax.f32 %v271_v37, 0.0  ;;  %v3992_v47 = vpop.f32.mrf.mxu3  ;;  %v84_v37 = vld [vmem:[%s4917_s0 + $0x148] sm:$0xff] }
 0x12a   :  { %v511_v48 = vmax.f32 %v400_v41, 0.0 }
 0x12b   :  { %v618_v51 = vpack.c.bf16 %v510_v46, %v508_v45  ;;  %v115_v45 = vpack.c.bf16 %v84_v37, %v83_v36 }
 0x12c   :  { %v619_v52 = vpack.c.bf16 %v511_v48, %v509_v40 }
 0x12d   :  { %798 = vmatmul.bf16.gmra.mxu2 %v618_v51 }
 0x12e   :  { %v273_v54 = vpop.f32.mrf.mxu0  ;;  %927 = vmatmul.bf16.gmra.mxu3 %v619_v52 }
 0x12f   :  { %v402_v55 = vpop.f32.mrf.mxu1  ;;  %v274_v59 = vadd.f32 %v273_v54, %v3870_v43 }
 0x130   :  { %v4000_v56 = vpop.f32.mrf.mxu2  ;;  %v403_v58 = vadd.f32 %v402_v55, %v3867_v42 }
 0x131   :  { %3198 = vmatmul.msk.bf16.gmra.mxu0 %vm141_vm0, %v113_v53  ;;  %v4003_v57 = vpop.f32.mrf.mxu3  ;;  %v512_v2 = vmax.f32 %v274_v59, 0.0 }
 0x132   :  { %3222 = vmatmul.msk.bf16.gmra.mxu1 %vm141_vm0, %v113_v53  ;;  %v513_v63 = vmax.f32 %v403_v58, 0.0 }
 0x136   :  { %v275_v60 = vpop.f32.mrf.mxu0 }
 0x137   :  { %v276_v61 = vadd.f32 %v275_v60, %v3870_v43  ;;  %v404_v62 = vpop.f32.mrf.mxu1 }
 0x138   :  { %v405_v0 = vadd.f32 %v404_v62, %v3867_v42  ;;  %v4010_v1 = vpop.f32.mrf.mxu2 }
 0x139   :  { %v514_v3 = vmax.f32 %v276_v61, 0.0  ;;  %v4018_v11 = vpop.f32.mrf.mxu3 }
 0x13a   :  { %v515_v6 = vmax.f32 %v405_v0, 0.0  ;;  %v85_v0 = vld [vmem:[%s4917_s0 + $0x150] sm:$0xff] }
 0x13b   :  { %v620_v10 = vpack.c.bf16 %v514_v3, %v512_v2  ;;  %v86_v2 = vld [vmem:[%s4917_s0 + $0x158] sm:$0xff] }
 0x13c   :  { %v621_v12 = vpack.c.bf16 %v515_v6, %v513_v63  ;;  %v116_v5 = vpack.c.bf16 %v86_v2, %v85_v0  ;;  %v90_v0 = vld [vmem:[%s4917_s0 + $0x178] sm:$0xff] }
 0x13d   :  { %803 = vmatmul.bf16.gmra.mxu2 %v620_v10 }
 0x13e   :  { %v278_v16 = vpop.f32.mrf.mxu0  ;;  %932 = vmatmul.bf16.gmra.mxu3 %v621_v12 }
 0x13f   :  { %v407_v18 = vpop.f32.mrf.mxu1  ;;  %v279_v24 = vadd.f32 %v278_v16, %v3870_v43 }
 0x140   :  { %v4021_v19 = vpop.f32.mrf.mxu2  ;;  %v408_v23 = vadd.f32 %v407_v18, %v3867_v42 }
 0x141   :  { %3199 = vmatmul.msk.bf16.gmra.mxu0 %vm141_vm0, %v114_v13  ;;  %v4026_v25 = vpop.f32.mrf.mxu3  ;;  %v516_v31 = vmax.f32 %v279_v24, 0.0 }
 0x142   :  { %3223 = vmatmul.msk.bf16.gmra.mxu1 %vm141_vm0, %v114_v13  ;;  %v517_v29 = vmax.f32 %v408_v23, 0.0 }
 0x146   :  { %v280_v26 = vpop.f32.mrf.mxu0 }
 0x147   :  { %v281_v27 = vadd.f32 %v280_v26, %v3870_v43  ;;  %v409_v28 = vpop.f32.mrf.mxu1  ;;  %v87_v26 = vld [vmem:[%s4917_s0 + $0x160] sm:$0xff] }
 0x148   :  { %v410_v30 = vadd.f32 %v409_v28, %v3867_v42  ;;  %v4036_v40 = vpop.f32.mrf.mxu2  ;;  %v3379_v28 = vor.u32 %v3589_v22, %v3378_v21 }
 0x149   :  { %v518_v34 = vmax.f32 %v281_v27, 0.0  ;;  %v4038_v49 = vpop.f32.mrf.mxu3  ;;  %v88_v27 = vld [vmem:[%s4917_s0 + $0x168] sm:$0xff] }
 0x14a   :  { %v519_v35 = vmax.f32 %v410_v30, 0.0  ;;  %1677 = vmatpush.bf16.msrb.mxu2 %v3379_v28 }
 0x14b   :  { %v622_v38 = vpack.c.bf16 %v518_v34, %v516_v31  ;;  %v117_v31 = vpack.c.bf16 %v88_v27, %v87_v26  ;;  %v3334_v34 = vld [vmem:[#allocation2 + $0x220] sm:$0xf] }
 0x14c   :  { %v623_v41 = vpack.c.bf16 %v519_v35, %v517_v29  ;;  %v3578_v35 = vld [vmem:[#allocation2 + $0x224] sm:$0xf0] }
 0x14d   :  { %808 = vmatmul.bf16.gmra.mxu2 %v622_v38  ;;  %v3335_v38 = vor.u32 %v3578_v35, %v3334_v34 }
 0x14e   :  { %v283_v46 = vpop.f32.mrf.mxu0  ;;  %937 = vmatmul.bf16.gmra.mxu3 %v623_v41 }
 0x14f   :  { %v412_v48 = vpop.f32.mrf.mxu1  ;;  %v284_v51 = vadd.f32 %v283_v46, %v3870_v43  ;;  %1413 = vmatpush.bf16.msrb.mxu1 %v3335_v38 }
 0x150   :  { %v413_v50 = vadd.f32 %v412_v48, %v3867_v42  ;;  %v4044_v52 = vpop.f32.mrf.mxu2 }
 0x151   :  { %3200 = vmatmul.msk.bf16.gmra.mxu0 %vm141_vm0, %v115_v45  ;;  %v520_v60 = vmax.f32 %v284_v51, 0.0  ;;  %v4048_v62 = vpop.f32.mrf.mxu3 }
 0x152   :  { %3224 = vmatmul.msk.bf16.gmra.mxu1 %vm141_vm0, %v115_v45  ;;  %v521_v58 = vmax.f32 %v413_v50, 0.0 }
 0x156   :  { %v285_v53 = vpop.f32.mrf.mxu0 }
 0x157   :  { %v286_v54 = vadd.f32 %v285_v53, %v3870_v43  ;;  %v414_v55 = vpop.f32.mrf.mxu1 }
 0x158   :  { %v415_v59 = vadd.f32 %v414_v55, %v3867_v42  ;;  %v4056_v8 = vpop.f32.mrf.mxu2 }
 0x159   :  { %v522_v61 = vmax.f32 %v286_v54, 0.0  ;;  %v4060_v9 = vpop.f32.mrf.mxu3 }
 0x15a   :  { %v523_v63 = vmax.f32 %v415_v59, 0.0 }
 0x15b   :  { %v624_v3 = vpack.c.bf16 %v522_v61, %v520_v60 }
 0x15c   :  { %v625_v4 = vpack.c.bf16 %v523_v63, %v521_v58  ;;  %v89_v63 = vld [vmem:[%s4917_s0 + $0x170] sm:$0xff] }
 0x15d   :  { %813 = vmatmul.bf16.gmra.mxu2 %v624_v3 }
 0x15e   :  { %v288_v6 = vpop.f32.mrf.mxu0  ;;  %942 = vmatmul.bf16.gmra.mxu3 %v625_v4  ;;  %v118_v4 = vpack.c.bf16 %v90_v0, %v89_v63  ;;  %v3374_v0 = vld [vmem:[#allocation2 + $0x340] sm:$0xf] }
 0x15f   :  { %v417_v7 = vpop.f32.mrf.mxu1  ;;  %v289_v12 = vadd.f32 %v288_v6, %v3870_v43 }
 0x160   :  { %v418_v10 = vadd.f32 %v417_v7, %v3867_v42  ;;  %v4066_v23 = vpop.f32.mrf.mxu2 }
 0x161   :  { %3201 = vmatmul.msk.bf16.gmra.mxu0 %vm141_vm0, %v116_v5  ;;  %v524_v18 = vmax.f32 %v289_v12, 0.0  ;;  %v4074_v36 = vpop.f32.mrf.mxu3 }
 0x162   :  { %3225 = vmatmul.msk.bf16.gmra.mxu1 %vm141_vm0, %v116_v5  ;;  %v525_v16 = vmax.f32 %v418_v10, 0.0  ;;  %v4095_v10 = vperm.slane %v3865_v39, 1 }
 0x166   :  { %v290_v13 = vpop.f32.mrf.mxu0 }
 0x167   :  { %v291_v14 = vadd.f32 %v290_v13, %v3870_v43  ;;  %v419_v15 = vpop.f32.mrf.mxu1  ;;  %v757_v13 = vadd.f32 %v3990_v44, %v4095_v10 }
 0x168   :  { %v420_v17 = vadd.f32 %v419_v15, %v3867_v42  ;;  %v4078_v45 = vpop.f32.mrf.mxu2  ;;  %v755_v15 = vadd.f32 %v3980_v32, %v4095_v10 }
 0x169   :  { %v526_v20 = vmax.f32 %v291_v14, 0.0  ;;  %v4083_v54 = vpop.f32.mrf.mxu3  ;;  %v886_v39 = vadd.f32 %v3992_v47, %v757_v13 }
 0x16a   :  { %v527_v24 = vmax.f32 %v420_v17, 0.0  ;;  %v884_v44 = vadd.f32 %v3983_v33, %v755_v15  ;;  %v762_v33 = vadd.f32 %v4010_v1, %v4095_v10 }
 0x16b   :  { %v626_v29 = vpack.c.bf16 %v526_v20, %v524_v18 }
 0x16c   :  { %v627_v30 = vpack.c.bf16 %v527_v24, %v525_v16  ;;  %v1003_v34 = vmax.f32 %v884_v44, 0.0  ;;  %v767_v44 = vadd.f32 %v4036_v40, %v4095_v10 }
 0x16d   :  { %818 = vmatmul.bf16.gmra.mxu2 %v626_v29  ;;  %v1004_v29 = vmax.f32 %v886_v39, 0.0 }
 0x16e   :  { %v293_v37 = vpop.f32.mrf.mxu0  ;;  %947 = vmatmul.bf16.gmra.mxu3 %v627_v30 }
 0x16f   :  { %v422_v41 = vpop.f32.mrf.mxu1  ;;  %v294_v48 = vadd.f32 %v293_v37, %v3870_v43  ;;  %v1068_v35 = vpack.c.bf16 %v1004_v29, %v1003_v34 }
 0x170   :  { %v423_v46 = vadd.f32 %v422_v41, %v3867_v42  ;;  %v4092_v5 = vpop.f32.mrf.mxu2 }
 0x171   :  { %3202 = vmatmul.msk.bf16.gmra.mxu0 %vm141_vm0, %v117_v31  ;;  %v528_v59 = vmax.f32 %v294_v48, 0.0  ;;  %v4098_v12 = vpop.f32.mrf.mxu3 }
 0x172   :  { %3226 = vmatmul.msk.bf16.gmra.mxu1 %vm141_vm0, %v117_v31  ;;  %v529_v55 = vmax.f32 %v423_v46, 0.0  ;;  %v760_v46 = vadd.f32 %v4000_v56, %v4095_v10 }
 0x174   :  { %v889_v1 = vadd.f32 %v4003_v57, %v760_v46  ;;  %v3577_v57 = vld [vmem:[#allocation2 + $0x214] sm:$0xf0] }
 0x176   :  { %v295_v50 = vpop.f32.mrf.mxu0 }
 0x177   :  { %v296_v51 = vadd.f32 %v295_v50, %v3870_v43  ;;  %v424_v53 = vpop.f32.mrf.mxu1 }
 0x178   :  { %v425_v58 = vadd.f32 %v424_v53, %v3867_v42  ;;  %v4109_v21 = vpop.f32.mrf.mxu2  ;;  %v891_v53 = vadd.f32 %v4018_v11, %v762_v33 }
 0x179   :  { %v530_v60 = vmax.f32 %v296_v51, 0.0  ;;  %v4113_v30 = vpop.f32.mrf.mxu3 }
 0x17a   :  { %v531_v61 = vmax.f32 %v425_v58, 0.0 }
 0x17b   :  { %v628_v2 = vpack.c.bf16 %v530_v60, %v528_v59 }
 0x17c   :  { %v629_v3 = vpack.c.bf16 %v531_v61, %v529_v55 }
 0x17d   :  { %823 = vmatmul.bf16.gmra.mxu2 %v628_v2  ;;  %v3588_v2 = vld [vmem:[#allocation2 + $0x344] sm:$0xf0] }
 0x17e   :  { %v298_v6 = vpop.f32.mrf.mxu0  ;;  %952 = vmatmul.bf16.gmra.mxu3 %v629_v3  ;;  %v3375_v3 = vor.u32 %v3588_v2, %v3374_v0 }
 0x17f   :  { %v427_v7 = vpop.f32.mrf.mxu1  ;;  %v299_v16 = vadd.f32 %v298_v6, %v3870_v43  ;;  %v3599_v6 = vld [vmem:[#allocation2 + $0x474] sm:$0xf0] }
 0x180   :  { %v428_v14 = vadd.f32 %v427_v7, %v3867_v42  ;;  %v4115_v38 = vpop.f32.mrf.mxu2  ;;  %v1006_v7 = vmax.f32 %v891_v53, 0.0  ;;  %1678 = vmatpush.bf16.msrb.mxu2 %v3375_v3 }
 0x181   :  { %3203 = vmatmul.msk.bf16.gmra.mxu0 %vm141_vm0, %v118_v4  ;;  %v532_v26 = vmax.f32 %v299_v16, 0.0  ;;  %v4123_v50 = vpop.f32.mrf.mxu3  ;;  %v1005_v16 = vmax.f32 %v889_v1, 0.0 }
 0x182   :  { %3227 = vmatmul.msk.bf16.gmra.mxu1 %vm141_vm0, %v118_v4  ;;  %v533_v22 = vmax.f32 %v428_v14, 0.0  ;;  %v3418_v4 = vld [vmem:[#allocation2 + $0x470] sm:$0xf] }
 0x183   :  { %v3419_v14 = vor.u32 %v3599_v6, %v3418_v4 }
 0x185   :  { %1942 = vmatpush.bf16.msrb.mxu3 %v3419_v14 }
 0x186   :  { %v300_v17 = vpop.f32.mrf.mxu0 }
 0x187   :  { %v301_v18 = vadd.f32 %v300_v17, %v3870_v43  ;;  %v429_v20 = vpop.f32.mrf.mxu1  ;;  %v3330_v17 = vld [vmem:[#allocation2 + $0x210] sm:$0xf] }
 0x188   :  { %v430_v24 = vadd.f32 %v429_v20, %v3867_v42  ;;  %v4129_v11 = vpop.f32.mrf.mxu2 }
 0x189   :  { %v534_v27 = vmax.f32 %v301_v18, 0.0  ;;  %v3331_v18 = vor.u32 %v3577_v57, %v3330_v17 }
 0x18a   :  { %v535_v28 = vmax.f32 %v430_v24, 0.0  ;;  %v4131_v24 = vpop.f32.mrf.mxu3 }
 0x18b   :  { %v630_v32 = vpack.c.bf16 %v534_v27, %v532_v26  ;;  %1414 = vmatpush.bf16.msrb.mxu1 %v3331_v18  ;;  %v765_v27 = vadd.f32 %v4021_v19, %v4095_v10 }
 0x18c   :  { %v631_v31 = vpack.c.bf16 %v535_v28, %v533_v22  ;;  %v1069_v22 = vpack.c.bf16 %v1006_v7, %v1005_v16 }
 0x18d   :  { %828 = vmatmul.bf16.gmra.mxu2 %v630_v32  ;;  %v894_v40 = vadd.f32 %v4026_v25, %v765_v27  ;;  %v772_v25 = vadd.f32 %v4056_v8, %v4095_v10  ;;  %v775_v27 = vadd.f32 %v4066_v23, %v4095_v10 }
 0x18e   :  { %v303_v47 = vpop.f32.mrf.mxu0  ;;  %957 = vmatmul.bf16.gmra.mxu3 %v631_v31  ;;  %v896_v31 = vadd.f32 %v4038_v49, %v767_v44 }
 0x18f   :  { %v432_v37 = vpop.f32.mrf.mxu1  ;;  %v304_v48 = vadd.f32 %v303_v47, %v3870_v43 }
 0x190   :  { %v433_v41 = vadd.f32 %v432_v37, %v3867_v42  ;;  %v4139_v29 = vpop.f32.mrf.mxu2 }
 0x191   :  { %1149 = vmatmul.bf16.vlgmr.msrb.gmra.mxu0 %v1068_v35  ;;  %v536_v61 = vmax.f32 %v304_v48, 0.0  ;;  %v1008_v48 = vmax.f32 %v896_v31, 0.0 }
 0x192   :  { %v537_v59 = vmax.f32 %v433_v41, 0.0  ;;  %v4145_v46 = vpop.f32.mrf.mxu3 }
 0x196   :  { %v305_v51 = vpop.f32.mrf.mxu0 }
 0x197   :  { %v306_v55 = vadd.f32 %v305_v51, %v3870_v43  ;;  %v434_v58 = vpop.f32.mrf.mxu1 }
 0x198   :  { %v435_v60 = vadd.f32 %v434_v58, %v3867_v42 }
 0x199   :  { %v538_v63 = vmax.f32 %v306_v55, 0.0  ;;  %v1007_v55 = vmax.f32 %v894_v40, 0.0  ;;  %v904_v40 = vadd.f32 %v4074_v36, %v775_v27 }
 0x19a   :  { %v539_v56 = vmax.f32 %v435_v60, 0.0  ;;  %v4147_v60 = vpop.f32.mrf.mxu2  ;;  %v4151_v1 = vpop.f32.mrf.mxu3 }
 0x19b   :  { %v632_v13 = vpack.c.bf16 %v538_v63, %v536_v61  ;;  %v770_v63 = vadd.f32 %v4044_v52, %v4095_v10 }
 0x19c   :  { %v633_v15 = vpack.c.bf16 %v539_v56, %v537_v59  ;;  %v1070_v59 = vpack.c.bf16 %v1008_v48, %v1007_v55  ;;  %v901_v56 = vadd.f32 %v4060_v9, %v772_v25  ;;  %v3587_v48 = vld [vmem:[#allocation2 + $0x334] sm:$0xf0]  ;;  %v3598_v55 = vld [vmem:[#allocation2 + $0x464] sm:$0xf0]  ;;  %v1011_v25 = vmax.f32 %v904_v40, 0.0 }
 0x19d   :  { %833 = vmatmul.bf16.gmra.mxu2 %v632_v13  ;;  %v899_v8 = vadd.f32 %v4048_v62, %v770_v63  ;;  %v777_v62 = vadd.f32 %v4078_v45, %v4095_v10  ;;  %v3576_v63 = vld [vmem:[#allocation2 + $0x204] sm:$0xf0] }
 0x19e   :  { %v308_v39 = vpop.f32.mrf.mxu0  ;;  %962 = vmatmul.bf16.gmra.mxu3 %v633_v15  ;;  %v1010_v17 = vmax.f32 %v901_v56, 0.0 }
 0x19f   :  { %v437_v20 = vpop.f32.mrf.mxu1  ;;  %v309_v28 = vadd.f32 %v308_v39, %v3870_v43  ;;  %v1009_v39 = vmax.f32 %v899_v8, 0.0  ;;  %v906_v31 = vadd.f32 %v4083_v54, %v777_v62  ;;  %v780_v8 = vadd.f32 %v4092_v5, %v4095_v10 }
 0x1a0   :  { %v438_v26 = vadd.f32 %v437_v20, %v3867_v42 }
 0x1a1   :  { %1154 = vmatmul.bf16.gmra.mxu0 %v1069_v22  ;;  %v540_v33 = vmax.f32 %v309_v28, 0.0  ;;  %v1071_v22 = vpack.c.bf16 %v1010_v17, %v1009_v39 }
 0x1a2   :  { %v541_v35 = vmax.f32 %v438_v26, 0.0  ;;  %v4161_v15 = vpop.f32.mrf.mxu2  ;;  %v4163_v18 = vpop.f32.mrf.mxu3 }
 0x1a6   :  { %v310_v32 = vpop.f32.mrf.mxu0 }
 0x1a7   :  { %v311_v34 = vadd.f32 %v310_v32, %v3870_v43  ;;  %v439_v47 = vpop.f32.mrf.mxu1 }
 0x1a8   :  { %v440_v37 = vadd.f32 %v439_v47, %v3867_v42 }
 0x1a9   :  { %v542_v41 = vmax.f32 %v311_v34, 0.0 }
 0x1aa   :  { %v543_v19 = vmax.f32 %v440_v37, 0.0  ;;  %v4167_v44 = vpop.f32.mrf.mxu2 }
 0x1ab   :  { %v634_v51 = vpack.c.bf16 %v542_v41, %v540_v33 }
 0x1ac   :  { %v635_v53 = vpack.c.bf16 %v543_v19, %v541_v35  ;;  %v4175_v35 = vpop.f32.mrf.mxu3  ;;  %v3370_v19 = vld [vmem:[#allocation2 + $0x330] sm:$0xf] }
 0x1ad   :  { %838 = vmatmul.bf16.gmra.mxu2 %v634_v51  ;;  %v3371_v51 = vor.u32 %v3587_v48, %v3370_v19 }
 0x1ae   :  { %v313_v58 = vpop.f32.mrf.mxu0  ;;  %967 = vmatmul.bf16.gmra.mxu3 %v635_v53  ;;  %v3414_v53 = vld [vmem:[#allocation2 + $0x460] sm:$0xf] }
 0x1af   :  { %v442_v49 = vpop.f32.mrf.mxu1  ;;  %v314_v0 = vadd.f32 %v313_v58, %v3870_v43  ;;  %v1012_v58 = vmax.f32 %v906_v31, 0.0  ;;  %1679 = vmatpush.bf16.msrb.mxu2 %v3371_v51 }
 0x1b0   :  { %v443_v61 = vadd.f32 %v442_v49, %v3867_v42  ;;  %v3415_v49 = vor.u32 %v3598_v55, %v3414_v53 }
 0x1b1   :  { %1159 = vmatmul.bf16.gmra.mxu0 %v1070_v59  ;;  %v544_v13 = vmax.f32 %v314_v0, 0.0 }
 0x1b2   :  { %v545_v6 = vmax.f32 %v443_v61, 0.0  ;;  %1943 = vmatpush.bf16.msrb.mxu3 %v3415_v49  ;;  %v3326_v61 = vld [vmem:[#allocation2 + $0x200] sm:$0xf]  ;;  %v4179_v0 = vpop.f32.mrf.mxu2 }
 0x1b6   :  { %v315_v2 = vpop.f32.mrf.mxu0 }
 0x1b7   :  { %v316_v3 = vadd.f32 %v315_v2, %v3870_v43  ;;  %v444_v4 = vpop.f32.mrf.mxu1  ;;  %v3327_v2 = vor.u32 %v3576_v63, %v3326_v61 }
 0x1b8   :  { %v445_v7 = vadd.f32 %v444_v4, %v3867_v42  ;;  %v4181_v4 = vpop.f32.mrf.mxu3 }
 0x1b9   :  { %v546_v14 = vmax.f32 %v316_v3, 0.0  ;;  %v1072_v3 = vpack.c.bf16 %v1012_v58, %v1011_v25  ;;  %1415 = vmatpush.bf16.msrb.mxu1 %v3327_v2 }
 0x1ba   :  { %v547_v16 = vmax.f32 %v445_v7, 0.0 }
 0x1bb   :  { %v636_v52 = vpack.c.bf16 %v546_v14, %v544_v13 }
 0x1bc   :  { %v637_v57 = vpack.c.bf16 %v547_v16, %v545_v6  ;;  %v782_v6 = vadd.f32 %v4109_v21, %v4095_v10  ;;  %v909_v21 = vadd.f32 %v4098_v12, %v780_v8  ;;  %v787_v12 = vadd.f32 %v4129_v11, %v4095_v10 }
 0x1bd   :  { %843 = vmatmul.bf16.gmra.mxu2 %v636_v52 }
 0x1be   :  { %v318_v9 = vpop.f32.mrf.mxu0  ;;  %972 = vmatmul.bf16.gmra.mxu3 %v637_v57  ;;  %v911_v16 = vadd.f32 %v4113_v30, %v782_v6  ;;  %v4191_v57 = vpop.f32.mrf.mxu2  ;;  %v916_v19 = vadd.f32 %v4131_v24, %v787_v12 }
 0x1bf   :  { %v447_v20 = vpop.f32.mrf.mxu1  ;;  %v319_v28 = vadd.f32 %v318_v9, %v3870_v43 }
 0x1c0   :  { %v448_v26 = vadd.f32 %v447_v20, %v3867_v42  ;;  %v4195_v27 = vpop.f32.mrf.mxu3  ;;  %v1016_v49 = vmax.f32 %v916_v19, 0.0  ;;  %v795_v19 = vadd.f32 %v4161_v15, %v4095_v10 }
 0x1c1   :  { %1164 = vmatmul.bf16.gmra.mxu0 %v1071_v22  ;;  %v548_v33 = vmax.f32 %v319_v28, 0.0 }
 0x1c2   :  { %v549_v37 = vmax.f32 %v448_v26, 0.0  ;;  %v1014_v26 = vmax.f32 %v911_v16, 0.0 }
 0x1c6   :  { %v320_v32 = vpop.f32.mrf.mxu0 }
 0x1c7   :  { %v321_v34 = vadd.f32 %v320_v32, %v3870_v43  ;;  %v449_v47 = vpop.f32.mrf.mxu1  ;;  %v1013_v32 = vmax.f32 %v909_v21, 0.0 }
 0x1c8   :  { %v450_v45 = vadd.f32 %v449_v47, %v3867_v42  ;;  %v4197_v47 = vpop.f32.mrf.mxu2 }
 0x1c9   :  { %v550_v41 = vmax.f32 %v321_v34, 0.0  ;;  %v1073_v34 = vpack.c.bf16 %v1014_v26, %v1013_v32  ;;  %v3410_v26 = vld [vmem:[#allocation2 + $0x450] sm:$0xf]  ;;  %v3597_v32 = vld [vmem:[#allocation2 + $0x454] sm:$0xf0] }
 0x1ca   :  { %v551_v23 = vmax.f32 %v450_v45, 0.0  ;;  %v785_v45 = vadd.f32 %v4115_v38, %v4095_v10 }
 0x1cb   :  { %v638_v54 = vpack.c.bf16 %v550_v41, %v548_v33  ;;  %v4205_v33 = vpop.f32.mrf.mxu3 }
 0x1cc   :  { %v639_v59 = vpack.c.bf16 %v551_v23, %v549_v37  ;;  %v914_v11 = vadd.f32 %v4123_v50, %v785_v45  ;;  %v792_v50 = vadd.f32 %v4147_v60, %v4095_v10  ;;  %v797_v45 = vadd.f32 %v4167_v44, %v4095_v10 }
 0x1cd   :  { %848 = vmatmul.bf16.gmra.mxu2 %v638_v54  ;;  %v924_v44 = vadd.f32 %v4163_v18, %v795_v19 }
 0x1ce   :  { %v323_v36 = vpop.f32.mrf.mxu0  ;;  %977 = vmatmul.bf16.gmra.mxu3 %v639_v59  ;;  %v1015_v61 = vmax.f32 %v914_v11, 0.0 }
 0x1cf   :  { %v452_v56 = vpop.f32.mrf.mxu1  ;;  %v324_v13 = vadd.f32 %v323_v36, %v3870_v43 }
 0x1d0   :  { %v453_v7 = vadd.f32 %v452_v56, %v3867_v42  ;;  %v4211_v59 = vpop.f32.mrf.mxu2  ;;  %v1074_v36 = vpack.c.bf16 %v1016_v49, %v1015_v61 }
 0x1d1   :  { %1169 = vmatmul.bf16.gmra.mxu0 %v1072_v3  ;;  %v552_v20 = vmax.f32 %v324_v13, 0.0  ;;  %v790_v3 = vadd.f32 %v4139_v29, %v4095_v10 }
 0x1d2   :  { %v553_v39 = vmax.f32 %v453_v7, 0.0  ;;  %v921_v7 = vadd.f32 %v4151_v1, %v792_v50  ;;  %v3586_v1 = vld [vmem:[#allocation2 + $0x324] sm:$0xf0]  ;;  %v802_v50 = vadd.f32 %v4191_v57, %v4095_v10 }
 0x1d3   :  { %v4213_v2 = vpop.f32.mrf.mxu3  ;;  %v919_v60 = vadd.f32 %v4145_v46, %v790_v3  ;;  %v800_v3 = vadd.f32 %v4179_v0, %v4095_v10 }
 0x1d4   :  { %v1018_v21 = vmax.f32 %v921_v7, 0.0 }
 0x1d6   :  { %v325_v14 = vpop.f32.mrf.mxu0 }
 0x1d7   :  { %v326_v17 = vadd.f32 %v325_v14, %v3870_v43  ;;  %v454_v52 = vpop.f32.mrf.mxu1 }
 0x1d8   :  { %v455_v9 = vadd.f32 %v454_v52, %v3867_v42  ;;  %v4222_v8 = vpop.f32.mrf.mxu2 }
 0x1d9   :  { %v554_v22 = vmax.f32 %v326_v17, 0.0 }
 0x1da   :  { %v555_v62 = vmax.f32 %v455_v9, 0.0 }
 0x1db   :  { %v640_v5 = vpack.c.bf16 %v554_v22, %v552_v20  ;;  %v4227_v20 = vpop.f32.mrf.mxu3 }
 0x1dc   :  { %v641_v28 = vpack.c.bf16 %v555_v62, %v553_v39  ;;  %v3366_v62 = vld [vmem:[#allocation2 + $0x320] sm:$0xf] }
 0x1dd   :  { %853 = vmatmul.bf16.gmra.mxu2 %v640_v5 }
 0x1de   :  { %v328_v30 = vpop.f32.mrf.mxu0  ;;  %982 = vmatmul.bf16.gmra.mxu3 %v641_v28  ;;  %v3367_v28 = vor.u32 %v3586_v1, %v3366_v62  ;;  %v805_v62 = vadd.f32 %v4197_v47, %v4095_v10 }
 0x1df   :  { %v457_v31 = vpop.f32.mrf.mxu1  ;;  %v329_v40 = vadd.f32 %v328_v30, %v3870_v43  ;;  %v1017_v30 = vmax.f32 %v919_v60, 0.0 }
 0x1e0   :  { %v458_v37 = vadd.f32 %v457_v31, %v3867_v42  ;;  %v3411_v31 = vor.u32 %v3597_v32, %v3410_v26  ;;  %1680 = vmatpush.bf16.msrb.mxu2 %v3367_v28  ;;  %v934_v32 = vadd.f32 %v4205_v33, %v805_v62 }
 0x1e1   :  { %1174 = vmatmul.bf16.gmra.mxu0 %v1073_v34  ;;  %v556_v55 = vmax.f32 %v329_v40, 0.0  ;;  %v1075_v12 = vpack.c.bf16 %v1018_v21, %v1017_v30 }
 0x1e2   :  { %v557_v51 = vmax.f32 %v458_v37, 0.0  ;;  %1944 = vmatpush.bf16.msrb.mxu3 %v3411_v31  ;;  %v4229_v37 = vpop.f32.mrf.mxu2 }
 0x1e3   :  { %v4233_v40 = vpop.f32.mrf.mxu3  ;;  %v812_v33 = vadd.f32 %v4229_v37, %v4095_v10 }
 0x1e6   :  { %v330_v41 = vpop.f32.mrf.mxu0 }
 0x1e7   :  { %v331_v48 = vadd.f32 %v330_v41, %v3870_v43  ;;  %v459_v23 = vpop.f32.mrf.mxu1 }
 0x1e8   :  { %v460_v53 = vadd.f32 %v459_v23, %v3867_v42 }
 0x1e9   :  { %v558_v58 = vmax.f32 %v331_v48, 0.0 }
 0x1ea   :  { %v559_v54 = vmax.f32 %v460_v53, 0.0 }
 0x1eb   :  { %v642_v38 = vpack.c.bf16 %v558_v58, %v556_v55 }
 0x1ec   :  { %v643_v25 = vpack.c.bf16 %v559_v54, %v557_v51  ;;  %v926_v51 = vadd.f32 %v4175_v35, %v797_v45  ;;  %v3406_v45 = vld [vmem:[#allocation2 + $0x440] sm:$0xf] }
 0x1ed   :  { %858 = vmatmul.bf16.gmra.mxu2 %v642_v38  ;;  %v4243_v38 = vpop.f32.mrf.mxu2 }
 0x1ee   :  { %v333_v63 = vpop.f32.mrf.mxu0  ;;  %987 = vmatmul.bf16.gmra.mxu3 %v643_v25  ;;  %v1020_v61 = vmax.f32 %v926_v51, 0.0 }
 0x1ef   :  { %v462_v24 = vpop.f32.mrf.mxu1  ;;  %v334_v6 = vadd.f32 %v333_v63, %v3870_v43 }
 0x1f0   :  { %v463_v56 = vadd.f32 %v462_v24, %v3867_v42  ;;  %v1019_v24 = vmax.f32 %v924_v44, 0.0 }
 0x1f1   :  { %1179 = vmatmul.bf16.gmra.mxu0 %v1074_v36  ;;  %v560_v39 = vmax.f32 %v334_v6, 0.0  ;;  %v4245_v36 = vpop.f32.mrf.mxu3 }
 0x1f2   :  { %v561_v17 = vmax.f32 %v463_v56, 0.0 }
 0x1f5   :  { %v4257_v56 = vpop.f32.mrf.mxu2 }
 0x1f6   :  { %v335_v13 = vpop.f32.mrf.mxu0 }
 0x1f7   :  { %v336_v14 = vadd.f32 %v335_v13, %v3870_v43  ;;  %v464_v16 = vpop.f32.mrf.mxu1  ;;  %v931_v13 = vadd.f32 %v4195_v27, %v802_v50  ;;  %v807_v27 = vadd.f32 %v4211_v59, %v4095_v10  ;;  %v3596_v59 = vld [vmem:[#allocation2 + $0x444] sm:$0xf0] }
 0x1f8   :  { %v465_v52 = vadd.f32 %v464_v16, %v3867_v42  ;;  %v3407_v47 = vor.u32 %v3596_v59, %v3406_v45  ;;  %v3402_v45 = vld [vmem:[#allocation2 + $0x430] sm:$0xf] }
 0x1f9   :  { %v562_v9 = vmax.f32 %v336_v14, 0.0  ;;  %v4264_v16 = vpop.f32.mrf.mxu3  ;;  %v936_v26 = vadd.f32 %v4213_v2, %v807_v27 }
 0x1fa   :  { %v563_v29 = vmax.f32 %v465_v52, 0.0  ;;  %1945 = vmatpush.bf16.msrb.mxu3 %v3407_v47 }
 0x1fb   :  { %v644_v22 = vpack.c.bf16 %v562_v9, %v560_v39  ;;  %v1022_v39 = vmax.f32 %v931_v13, 0.0 }
 0x1fc   :  { %v645_v5 = vpack.c.bf16 %v563_v29, %v561_v17  ;;  %v929_v17 = vadd.f32 %v4181_v4, %v800_v3  ;;  %v817_v3 = vadd.f32 %v4257_v56, %v4095_v10 }
 0x1fd   :  { %863 = vmatmul.bf16.gmra.mxu2 %v644_v22  ;;  %v4267_v21 = vpop.f32.mrf.mxu2 }
 0x1fe   :  { %v338_v34 = vpop.f32.mrf.mxu0  ;;  %992 = vmatmul.bf16.gmra.mxu3 %v645_v5  ;;  %v1021_v9 = vmax.f32 %v929_v17, 0.0  ;;  %v946_v13 = vadd.f32 %v4264_v16, %v817_v3  ;;  %v820_v16 = vadd.f32 %v4267_v21, %v4095_v10 }
 0x1ff   :  { %v467_v46 = vpop.f32.mrf.mxu1  ;;  %v339_v48 = vadd.f32 %v338_v34, %v3870_v43  ;;  %v3362_v34 = vld [vmem:[#allocation2 + $0x310] sm:$0xf] }
 0x200   :  { %v468_v41 = vadd.f32 %v467_v46, %v3867_v42  ;;  %v1077_v29 = vpack.c.bf16 %v1022_v39, %v1021_v9  ;;  %v3585_v46 = vld [vmem:[#allocation2 + $0x314] sm:$0xf0] }
 0x201   :  { %1184 = vmatmul.bf16.gmra.mxu0 %v1075_v12  ;;  %v564_v54 = vmax.f32 %v339_v48, 0.0  ;;  %v4269_v22 = vpop.f32.mrf.mxu3  ;;  %v3363_v12 = vor.u32 %v3585_v46, %v3362_v34  ;;  %v3584_v34 = vld [vmem:[#allocation2 + $0x304] sm:$0xf0] }
 0x202   :  { %v565_v55 = vmax.f32 %v468_v41, 0.0  ;;  %v1024_v41 = vmax.f32 %v936_v26, 0.0 }
 0x203   :  { %1681 = vmatpush.bf16.msrb.mxu2 %v3363_v12 }
 0x205   :  { %v821_v28 = vpop.f32.mrf.mxu2 }
 0x206   :  { %v340_v23 = vpop.f32.mrf.mxu0  ;;  %v822_v27 = vadd.f32 %v821_v28, %v4095_v10  ;;  %v3595_v28 = vld [vmem:[#allocation2 + $0x434] sm:$0xf0] }
 0x207   :  { %v341_v53 = vadd.f32 %v340_v23, %v3870_v43  ;;  %v469_v11 = vpop.f32.mrf.mxu1  ;;  %v1076_v43 = vpack.c.bf16 %v1020_v61, %v1019_v24  ;;  %v1023_v23 = vmax.f32 %v934_v32, 0.0 }
 0x208   :  { %v470_v58 = vadd.f32 %v469_v11, %v3867_v42  ;;  %v4250_v42 = vld [vmem:[%s4921_s4] sm:$0xff]  ;;  %v810_v11 = vadd.f32 %v4222_v8, %v4095_v10 }
 0x209   :  { %v566_v49 = vmax.f32 %v341_v53, 0.0  ;;  %v4253_v18 = vperm.slane %v4250_v42, 2  ;;  %v950_v48 = vpop.f32.mrf.mxu3  ;;  %v1078_v51 = vpack.c.bf16 %v1024_v41, %v1023_v23 }
 0x20a   :  { %v567_v25 = vmax.f32 %v470_v58, 0.0 }
 0x20b   :  { %v646_v15 = vpack.c.bf16 %v566_v49, %v564_v54  ;;  %v941_v54 = vadd.f32 %v4233_v40, %v812_v33  ;;  %v815_v40 = vadd.f32 %v4243_v38, %v4095_v10 }
 0x20c   :  { %v647_v63 = vpack.c.bf16 %v567_v25, %v565_v55  ;;  %v939_v25 = vadd.f32 %v4227_v20, %v810_v11 }
 0x20d   :  { %868 = vmatmul.bf16.gmra.mxu2 %v646_v15  ;;  %v4279_v53 = vpop.f32.mrf.mxu2  ;;  %v944_v17 = vadd.f32 %v4245_v36, %v815_v40 }
 0x20e   :  { %v1150_v35 = vpop.f32.mrf.mxu0  ;;  %997 = vmatmul.bf16.gmra.mxu3 %v647_v63  ;;  %v1026_v63 = vmax.f32 %v941_v54, 0.0  ;;  %v1025_v37 = vmax.f32 %v939_v25, 0.0 }
 0x20f   :  { %v1151_v6 = vadd.f32 %v1150_v35, %v4253_v18  ;;  %v1027_v9 = vmax.f32 %v944_v17, 0.0 }
 0x210   :  { %v1079_v8 = vpack.c.bf16 %v1026_v63, %v1025_v37 }
 0x211   :  { %1189 = vmatmul.bf16.gmra.mxu0 %v1076_v43  ;;  %v1270_v52 = vmax.f32 %v1151_v6, 0.0  ;;  %v4286_v58 = vpop.f32.mrf.mxu3 }
 0x215   :  { %v826_v35 = vpop.f32.mrf.mxu2 }
 0x216   :  { %v1152_v7 = vpop.f32.mrf.mxu0 }
 0x217   :  { %v1153_v14 = vadd.f32 %v1152_v7, %v4253_v18 }
 0x219   :  { %v1271_v60 = vmax.f32 %v1153_v14, 0.0  ;;  %v955_v50 = vpop.f32.mrf.mxu3 }
 0x21b   :  { %v1335_v57 = vpack.c.bf16 %v1271_v60, %v1270_v52 }
 0x21d   :  { %1416 = vmatmul.bf16.vlgmr.msrb.gmra.mxu1 %v1335_v57  ;;  %v4296_v20 = vpop.f32.mrf.mxu2  ;;  %v1028_v57 = vmax.f32 %v946_v13, 0.0 }
 0x21e   :  { %v1155_v0 = vpop.f32.mrf.mxu0 }
 0x21f   :  { %v1156_v4 = vadd.f32 %v1155_v0, %v4253_v18  ;;  %v1080_v0 = vpack.c.bf16 %v1028_v57, %v1027_v9 }
 0x221   :  { %1194 = vmatmul.bf16.gmra.mxu0 %v1077_v29  ;;  %v1272_v30 = vmax.f32 %v1156_v4, 0.0  ;;  %v4301_v39 = vpop.f32.mrf.mxu3 }
 0x225   :  { %v831_v29 = vpop.f32.mrf.mxu2 }
 0x226   :  { %v1157_v1 = vpop.f32.mrf.mxu0 }
 0x227   :  { %v1158_v5 = vadd.f32 %v1157_v1, %v4253_v18  ;;  %v951_v1 = vadd.f32 %v950_v48, %v822_v27 }
 0x229   :  { %v1273_v31 = vmax.f32 %v1158_v5, 0.0  ;;  %v960_v62 = vpop.f32.mrf.mxu3  ;;  %v949_v5 = vadd.f32 %v4269_v22, %v820_v16  ;;  %v1030_v59 = vmax.f32 %v951_v1, 0.0  ;;  %v827_v22 = vadd.f32 %v826_v35, %v4095_v10 }
 0x22b   :  { %v1336_v19 = vpack.c.bf16 %v1273_v31, %v1272_v30  ;;  %v3358_v31 = vld [vmem:[#allocation2 + $0x300] sm:$0xf]  ;;  %v1029_v21 = vmax.f32 %v949_v5, 0.0 }
 0x22c   :  { %v3359_v12 = vor.u32 %v3584_v34, %v3358_v31  ;;  %v3398_v5 = vld [vmem:[#allocation2 + $0x420] sm:$0xf] }
 0x22d   :  { %1421 = vmatmul.bf16.gmra.mxu1 %v1336_v19  ;;  %v834_v46 = vpop.f32.mrf.mxu2  ;;  %v3403_v19 = vor.u32 %v3595_v28, %v3402_v45  ;;  %v1081_v23 = vpack.c.bf16 %v1030_v59, %v1029_v21  ;;  %v3615_v28 = vld [vmem:[#allocation2 + $0x574] sm:$0xf0]  ;;  %v3480_v21 = vld [vmem:[#allocation2 + $0x578] sm:$0xf0] }
 0x22e   :  { %v1160_v2 = vpop.f32.mrf.mxu0  ;;  %1682 = vmatpush.bf16.msrb.mxu2 %v3359_v12 }
 0x22f   :  { %v1161_v55 = vadd.f32 %v1160_v2, %v4253_v18  ;;  %1946 = vmatpush.bf16.msrb.mxu3 %v3403_v19  ;;  %v3614_v19 = vld [vmem:[#allocation2 + $0x574] sm:$0xf] }
 0x231   :  { %1199 = vmatmul.bf16.gmra.mxu0 %v1078_v51  ;;  %v1274_v61 = vmax.f32 %v1161_v55, 0.0  ;;  %v963_v47 = vpop.f32.mrf.mxu3  ;;  %v825_v51 = vadd.f32 %v4279_v53, %v4095_v10  ;;  %v956_v55 = vadd.f32 %v955_v50, %v827_v22  ;;  %v830_v50 = vadd.f32 %v4296_v20, %v4095_v10 }
 0x233   :  { %v959_v13 = vadd.f32 %v4301_v39, %v830_v50 }
 0x235   :  { %v836_v2 = vpop.f32.mrf.mxu2 }
 0x236   :  { %v1162_v44 = vpop.f32.mrf.mxu0 }
 0x237   :  { %v1163_v49 = vadd.f32 %v1162_v44, %v4253_v18 }
 0x239   :  { %v1275_v15 = vmax.f32 %v1163_v49, 0.0  ;;  %v965_v54 = vpop.f32.mrf.mxu3  ;;  %v954_v49 = vadd.f32 %v4286_v58, %v825_v51 }
 0x23b   :  { %v1337_v24 = vpack.c.bf16 %v1275_v15, %v1274_v61  ;;  %v1032_v15 = vmax.f32 %v956_v55, 0.0 }
 0x23d   :  { %1426 = vmatmul.bf16.gmra.mxu1 %v1337_v24  ;;  %v1031_v24 = vmax.f32 %v954_v49, 0.0  ;;  %v839_v35 = vpop.f32.mrf.mxu2 }
 0x23e   :  { %v1165_v43 = vpop.f32.mrf.mxu0 }
 0x23f   :  { %v1166_v6 = vadd.f32 %v1165_v43, %v4253_v18  ;;  %v1082_v43 = vpack.c.bf16 %v1032_v15, %v1031_v24 }
 0x241   :  { %1204 = vmatmul.bf16.gmra.mxu0 %v1079_v8  ;;  %v1276_v52 = vmax.f32 %v1166_v6, 0.0  ;;  %v968_v53 = vpop.f32.mrf.mxu3  ;;  %v832_v8 = vadd.f32 %v831_v29, %v4095_v10  ;;  %v835_v29 = vadd.f32 %v834_v46, %v4095_v10  ;;  %v3478_v46 = vld [vmem:[#allocation2 + $0x570] sm:$0xf] }
 0x243   :  { %v961_v58 = vadd.f32 %v960_v62, %v832_v8 }
 0x246   :  { %v1167_v7 = vpop.f32.mrf.mxu0 }
 0x247   :  { %v1168_v14 = vadd.f32 %v1167_v7, %v4253_v18  ;;  %v841_v7 = vpop.f32.mrf.mxu2 }
 0x248   :  { %v842_v22 = vadd.f32 %v841_v7, %v4095_v10 }
 0x249   :  { %v1277_v60 = vmax.f32 %v1168_v14, 0.0  ;;  %v970_v57 = vpop.f32.mrf.mxu3 }
 0x24a   :  { %v971_v55 = vadd.f32 %v970_v57, %v842_v22 }
 0x24b   :  { %v1338_v56 = vpack.c.bf16 %v1277_v60, %v1276_v52  ;;  %v1034_v52 = vmax.f32 %v961_v58, 0.0 }
 0x24c   :  { %v1038_v24 = vmax.f32 %v971_v55, 0.0 }
 0x24d   :  { %1431 = vmatmul.bf16.gmra.mxu1 %v1338_v56  ;;  %v1033_v56 = vmax.f32 %v959_v13, 0.0 }
 0x24e   :  { %v1170_v38 = vpop.f32.mrf.mxu0 }
 0x24f   :  { %v1171_v36 = vadd.f32 %v1170_v38, %v4253_v18  ;;  %v1083_v38 = vpack.c.bf16 %v1034_v52, %v1033_v56  ;;  %v844_v20 = vpop.f32.mrf.mxu2 }
 0x250   :  { %v845_v7 = vadd.f32 %v844_v20, %v4095_v10 }
 0x251   :  { %1209 = vmatmul.bf16.gmra.mxu0 %v1080_v0  ;;  %v1278_v32 = vmax.f32 %v1171_v36, 0.0  ;;  %v837_v0 = vadd.f32 %v836_v2, %v4095_v10  ;;  %v4324_v62 = vpop.f32.mrf.mxu3  ;;  %v840_v2 = vadd.f32 %v839_v35, %v4095_v10 }
 0x252   :  { %v974_v57 = vadd.f32 %v4324_v62, %v845_v7 }
 0x253   :  { %v966_v16 = vadd.f32 %v965_v54, %v837_v0  ;;  %v4332_v54 = vperm.slane %v4250_v42, 3  ;;  %v969_v49 = vadd.f32 %v968_v53, %v840_v2 }
 0x254   :  { %v1039_v20 = vmax.f32 %v974_v57, 0.0 }
 0x255   :  { %v1036_v31 = vmax.f32 %v966_v16, 0.0  ;;  %v1037_v35 = vmax.f32 %v969_v49, 0.0 }
 0x256   :  { %v1172_v4 = vpop.f32.mrf.mxu0 }
 0x257   :  { %v1173_v26 = vadd.f32 %v1172_v4, %v4253_v18  ;;  %v964_v4 = vadd.f32 %v963_v47, %v835_v29  ;;  %v846_v12 = vpop.f32.mrf.mxu2  ;;  %v1085_v50 = vpack.c.bf16 %v1038_v24, %v1037_v35 }
 0x258   :  { %v847_v58 = vadd.f32 %v846_v12, %v4095_v10 }
 0x259   :  { %v1279_v30 = vmax.f32 %v1173_v26, 0.0  ;;  %v1035_v45 = vmax.f32 %v964_v4, 0.0  ;;  %v975_v47 = vpop.f32.mrf.mxu3 }
 0x25a   :  { %v976_v52 = vadd.f32 %v975_v47, %v847_v58 }
 0x25b   :  { %v1339_v41 = vpack.c.bf16 %v1279_v30, %v1278_v32  ;;  %v3594_v32 = vld [vmem:[#allocation2 + $0x424] sm:$0xf0] }
 0x25c   :  { %v3399_v30 = vor.u32 %v3594_v32, %v3398_v5  ;;  %v1040_v29 = vmax.f32 %v976_v52, 0.0 }
 0x25d   :  { %1436 = vmatmul.bf16.gmra.mxu1 %v1339_v41  ;;  %v3479_v41 = vor.u32 %v3615_v28, %v3478_v46 }
 0x25e   :  { %v1175_v48 = vpop.f32.mrf.mxu0  ;;  %1947 = vmatpush.bf16.msrb.mxu3 %v3399_v30  ;;  %v1086_v4 = vpack.c.bf16 %v1040_v29, %v1039_v20 }
 0x25f   :  { %v1176_v33 = vadd.f32 %v1175_v48, %v4253_v18  ;;  %v1084_v48 = vpack.c.bf16 %v1036_v31, %v1035_v45  ;;  %2242 = vmatpush.bf16.msra.mxu0 %v3479_v41 }
 0x261   :  { %1214 = vmatmul.bf16.gmra.mxu0 %v1081_v23  ;;  %v1280_v25 = vmax.f32 %v1176_v33, 0.0  ;;  %v3483_v23 = vor.u32 %v3614_v19, %v3480_v21  ;;  %v849_v33 = vpop.f32.mrf.mxu2  ;;  %v978_v15 = vpop.f32.mrf.mxu3  ;;  %v3394_v19 = vld [vmem:[#allocation2 + $0x410] sm:$0xf]  ;;  %v3593_v21 = vld [vmem:[#allocation2 + $0x414] sm:$0xf0] }
 0x262   :  { %v850_v32 = vadd.f32 %v849_v33, %v4095_v10  ;;  %v3470_v33 = vld [vmem:[#allocation2 + $0x560] sm:$0xf] }
 0x263   :  { %2371 = vmatpush.bf16.msra.mxu1 %v3483_v23  ;;  %v3395_v23 = vor.u32 %v3593_v21, %v3394_v19 }
 0x264   :  { %v979_v28 = vadd.f32 %v978_v15, %v850_v32 }
 0x265   :  { %1948 = vmatpush.bf16.msrb.mxu3 %v3395_v23 }
 0x266   :  { %v1177_v11 = vpop.f32.mrf.mxu0 }
 0x267   :  { %v1178_v44 = vadd.f32 %v1177_v11, %v4253_v18 }
 0x269   :  { %v1281_v61 = vmax.f32 %v1178_v44, 0.0 }
 0x26b   :  { %v1340_v63 = vpack.c.bf16 %v1281_v61, %v1280_v25 }
 0x26d   :  { %1441 = vmatmul.bf16.gmra.mxu1 %v1340_v63 }
 0x26e   :  { %v1180_v37 = vpop.f32.mrf.mxu0 }
 0x26f   :  { %v1181_v3 = vadd.f32 %v1180_v37, %v4253_v18 }
 0x271   :  { %1219 = vmatmul.bf16.gmra.mxu0 %v1082_v43  ;;  %v1282_v14 = vmax.f32 %v1181_v3, 0.0  ;;  %v851_v3 = vpop.f32.mrf.mxu2 }
 0x276   :  { %v1182_v40 = vpop.f32.mrf.mxu0 }
 0x277   :  { %v1183_v6 = vadd.f32 %v1182_v40, %v4253_v18 }
 0x279   :  { %v1283_v17 = vmax.f32 %v1183_v6, 0.0  ;;  %v980_v6 = vpop.f32.mrf.mxu3 }
 0x27b   :  { %v1341_v60 = vpack.c.bf16 %v1283_v17, %v1282_v14 }
 0x27d   :  { %1446 = vmatmul.bf16.gmra.mxu1 %v1341_v60 }
 0x27e   :  { %v1185_v9 = vpop.f32.mrf.mxu0 }
 0x27f   :  { %v1186_v27 = vadd.f32 %v1185_v9, %v4253_v18 }
 0x281   :  { %1224 = vmatmul.bf16.gmra.mxu0 %v1083_v38  ;;  %v1284_v1 = vmax.f32 %v1186_v27, 0.0  ;;  %v854_v38 = vpop.f32.mrf.mxu2  ;;  %v983_v16 = vpop.f32.mrf.mxu3 }
 0x286   :  { %v1187_v39 = vpop.f32.mrf.mxu0 }
 0x287   :  { %v1188_v36 = vadd.f32 %v1187_v39, %v4253_v18 }
 0x289   :  { %v1285_v26 = vmax.f32 %v1188_v36, 0.0  ;;  %v856_v5 = vpop.f32.mrf.mxu2  ;;  %v985_v46 = vpop.f32.mrf.mxu3 }
 0x28b   :  { %v1342_v34 = vpack.c.bf16 %v1285_v26, %v1284_v1  ;;  %v852_v26 = vadd.f32 %v851_v3, %v4095_v10 }
 0x28d   :  { %1451 = vmatmul.bf16.gmra.mxu1 %v1342_v34  ;;  %v981_v12 = vadd.f32 %v980_v6, %v852_v26 }
 0x28e   :  { %v1190_v59 = vpop.f32.mrf.mxu0 }
 0x28f   :  { %v1191_v51 = vadd.f32 %v1190_v59, %v4253_v18  ;;  %v1042_v47 = vmax.f32 %v981_v12, 0.0 }
 0x291   :  { %1229 = vmatmul.bf16.gmra.mxu0 %v1084_v48  ;;  %v1286_v25 = vmax.f32 %v1191_v51, 0.0  ;;  %v1041_v51 = vmax.f32 %v979_v28, 0.0  ;;  %v859_v55 = vpop.f32.mrf.mxu2  ;;  %v988_v24 = vpop.f32.mrf.mxu3 }
 0x293   :  { %v1087_v15 = vpack.c.bf16 %v1042_v47, %v1041_v51 }
 0x296   :  { %v1192_v11 = vpop.f32.mrf.mxu0 }
 0x297   :  { %v1193_v44 = vadd.f32 %v1192_v11, %v4253_v18  ;;  %v3613_v11 = vld [vmem:[#allocation2 + $0x564] sm:$0xf0] }
 0x298   :  { %v3471_v49 = vor.u32 %v3613_v11, %v3470_v33 }
 0x299   :  { %v1287_v61 = vmax.f32 %v1193_v44, 0.0  ;;  %v861_v6 = vpop.f32.mrf.mxu2 }
 0x29a   :  { %v1417_v63 = vpop.f32.mrf.mxu1  ;;  %2243 = vmatpush.bf16.msra.mxu0 %v3471_v49 }
 0x29b   :  { %v1418_v37 = vadd.f32 %v1417_v63, %v4332_v54  ;;  %v1343_v43 = vpack.c.bf16 %v1287_v61, %v1286_v25  ;;  %v3612_v25 = vld [vmem:[#allocation2 + $0x564] sm:$0xf]  ;;  %v3472_v61 = vld [vmem:[#allocation2 + $0x568] sm:$0xf0] }
 0x29c   :  { %v3475_v63 = vor.u32 %v3612_v25, %v3472_v61 }
 0x29d   :  { %1537 = vst [vmem:[#allocation5] sm:$0xff] %v1418_v37  ;;  %1456 = vmatmul.bf16.gmra.mxu1 %v1343_v43  ;;  %v857_v43 = vadd.f32 %v856_v5, %v4095_v10 }
 0x29e   :  { %v1195_v8 = vpop.f32.mrf.mxu0  ;;  %2372 = vmatpush.bf16.msra.mxu1 %v3475_v63  ;;  %v3592_v63 = vld [vmem:[#allocation2 + $0x404] sm:$0xf0] }
 0x29f   :  { %v1196_v13 = vadd.f32 %v1195_v8, %v4253_v18  ;;  %v855_v8 = vadd.f32 %v854_v38, %v4095_v10  ;;  %v986_v58 = vadd.f32 %v985_v46, %v857_v43 }
 0x2a1   :  { %1234 = vmatmul.bf16.gmra.mxu0 %v1085_v50  ;;  %v1288_v56 = vmax.f32 %v1196_v13, 0.0  ;;  %v984_v7 = vadd.f32 %v983_v16, %v855_v8  ;;  %v1044_v52 = vmax.f32 %v986_v58, 0.0  ;;  %v864_v29 = vpop.f32.mrf.mxu2  ;;  %v860_v16 = vadd.f32 %v859_v55, %v4095_v10  ;;  %v3611_v58 = vld [vmem:[#allocation2 + $0x554] sm:$0xf0] }
 0x2a2   :  { %v1419_v40 = vpop.f32.mrf.mxu1 }
 0x2a3   :  { %v1420_v53 = vadd.f32 %v1419_v40, %v4332_v54  ;;  %v989_v32 = vadd.f32 %v988_v24, %v860_v16 }
 0x2a5   :  { %1538 = vst [vmem:[#allocation5 + $0x8] sm:$0xff] %v1420_v53  ;;  %v1602_v14 = vpack.c.bf16 %v1420_v53, %v1418_v37 }
 0x2a6   :  { %v1197_v17 = vpop.f32.mrf.mxu0 }
 0x2a7   :  { %v1198_v60 = vadd.f32 %v1197_v17, %v4253_v18  ;;  %1683 = vmatmul.bf16.vlgmr.msrb.gmra.mxu2 %v1602_v14 }
 0x2a9   :  { %v1289_v9 = vmax.f32 %v1198_v60, 0.0  ;;  %v866_v28 = vpop.f32.mrf.mxu2 }
 0x2aa   :  { %v1422_v0 = vpop.f32.mrf.mxu1  ;;  %v867_v23 = vadd.f32 %v866_v28, %v4095_v10 }
 0x2ab   :  { %v1423_v27 = vadd.f32 %v1422_v0, %v4332_v54  ;;  %v1344_v39 = vpack.c.bf16 %v1289_v9, %v1288_v56  ;;  %v990_v56 = vpop.f32.mrf.mxu3  ;;  %v1043_v9 = vmax.f32 %v984_v7, 0.0  ;;  %v3610_v7 = vld [vmem:[#allocation2 + $0x554] sm:$0xf] }
 0x2ad   :  { %1539 = vst [vmem:[#allocation5 + $0x10] sm:$0xff] %v1423_v27  ;;  %1461 = vmatmul.bf16.gmra.mxu1 %v1344_v39  ;;  %v1088_v0 = vpack.c.bf16 %v1044_v52, %v1043_v9  ;;  %v862_v39 = vadd.f32 %v861_v6, %v4095_v10 }
 0x2ae   :  { %v1200_v36 = vpop.f32.mrf.mxu0 }
 0x2af   :  { %v1201_v30 = vadd.f32 %v1200_v36, %v4253_v18 }
 0x2b1   :  { %1239 = vmatmul.bf16.gmra.mxu0 %v1086_v4  ;;  %v1290_v59 = vmax.f32 %v1201_v30, 0.0  ;;  %v869_v33 = vpop.f32.mrf.mxu2 }
 0x2b2   :  { %v1424_v1 = vpop.f32.mrf.mxu1 }
 0x2b3   :  { %v1425_v62 = vadd.f32 %v1424_v1, %v4332_v54  ;;  %v993_v1 = vpop.f32.mrf.mxu3 }
 0x2b5   :  { %1540 = vst [vmem:[#allocation5 + $0x18] sm:$0xff] %v1425_v62  ;;  %v1603_v31 = vpack.c.bf16 %v1425_v62, %v1423_v27  ;;  %v991_v62 = vadd.f32 %v990_v56, %v862_v39 }
 0x2b6   :  { %v1202_v34 = vpop.f32.mrf.mxu0 }
 0x2b7   :  { %v1203_v45 = vadd.f32 %v1202_v34, %v4253_v18  ;;  %1688 = vmatmul.bf16.gmra.mxu2 %v1603_v31  ;;  %v1046_v12 = vmax.f32 %v991_v62, 0.0 }
 0x2b9   :  { %v1291_v41 = vmax.f32 %v1203_v45, 0.0  ;;  %v871_v52 = vpop.f32.mrf.mxu2 }
 0x2ba   :  { %v1427_v48 = vpop.f32.mrf.mxu1 }
 0x2bb   :  { %v1428_v22 = vadd.f32 %v1427_v48, %v4332_v54  ;;  %v1345_v2 = vpack.c.bf16 %v1291_v41, %v1290_v59  ;;  %v1045_v59 = vmax.f32 %v989_v32, 0.0  ;;  %v995_v21 = vpop.f32.mrf.mxu3 }
 0x2bc   :  { %v996_v55 = vadd.f32 %v995_v21, %v867_v23 }
 0x2bd   :  { %1541 = vst [vmem:[#allocation5 + $0x20] sm:$0xff] %v1428_v22  ;;  %1466 = vmatmul.bf16.gmra.mxu1 %v1345_v2  ;;  %v1089_v19 = vpack.c.bf16 %v1046_v12, %v1045_v59 }
 0x2be   :  { %v1205_v44 = vpop.f32.mrf.mxu0 }
 0x2bf   :  { %v1206_v50 = vadd.f32 %v1205_v44, %v4253_v18 }
 0x2c1   :  { %1244 = vmatmul.bf16.gmra.mxu0 %v1087_v15  ;;  %v1292_v13 = vmax.f32 %v1206_v50, 0.0  ;;  %v3390_v15 = vld [vmem:[#allocation2 + $0x400] sm:$0xf] }
 0x2c2   :  { %v1429_v37 = vpop.f32.mrf.mxu1  ;;  %v3391_v43 = vor.u32 %v3592_v63, %v3390_v15 }
 0x2c3   :  { %v1430_v35 = vadd.f32 %v1429_v37, %v4332_v54  ;;  %v998_v24 = vpop.f32.mrf.mxu3 }
 0x2c4   :  { %1949 = vmatpush.bf16.msrb.mxu3 %v3391_v43 }
 0x2c5   :  { %1542 = vst [vmem:[#allocation5 + $0x28] sm:$0xff] %v1430_v35  ;;  %v1604_v3 = vpack.c.bf16 %v1430_v35, %v1428_v22  ;;  %v865_v22 = vadd.f32 %v864_v29, %v4095_v10  ;;  %v1048_v35 = vmax.f32 %v996_v55, 0.0 }
 0x2c6   :  { %v1207_v40 = vpop.f32.mrf.mxu0 }
 0x2c7   :  { %v1208_v53 = vadd.f32 %v1207_v40, %v4253_v18  ;;  %1693 = vmatmul.bf16.gmra.mxu2 %v1604_v3  ;;  %v994_v49 = vadd.f32 %v993_v1, %v865_v22  ;;  %v3462_v40 = vld [vmem:[#allocation2 + $0x550] sm:$0xf] }
 0x2c8   :  { %v3463_v6 = vor.u32 %v3611_v58, %v3462_v40 }
 0x2c9   :  { %v1293_v14 = vmax.f32 %v1208_v53, 0.0  ;;  %v1047_v3 = vmax.f32 %v994_v49, 0.0  ;;  %v3623_v49 = vld [vmem:[%s4920_s3 + $0x38] sm:$0xff] }
 0x2ca   :  { %v1432_v17 = vpop.f32.mrf.mxu1  ;;  %2244 = vmatpush.bf16.msra.mxu0 %v3463_v6  ;;  %2773 = vmatpush.bf16.msra.mxu2 %v3623_v49 }
 0x2cb   :  { %v1433_v60 = vadd.f32 %v1432_v17, %v4332_v54  ;;  %v1346_v57 = vpack.c.bf16 %v1293_v14, %v1292_v13  ;;  %v3464_v13 = vld [vmem:[#allocation2 + $0x558] sm:$0xf0]  ;;  %v1090_v14 = vpack.c.bf16 %v1048_v35, %v1047_v3  ;;  %v1000_v9 = vpop.f32.mrf.mxu3 }
 0x2cc   :  { %v3467_v17 = vor.u32 %v3610_v7, %v3464_v13 }
 0x2cd   :  { %1543 = vst [vmem:[#allocation5 + $0x30] sm:$0xff] %v1433_v60  ;;  %1471 = vmatmul.bf16.gmra.mxu1 %v1346_v57  ;;  %v872_v57 = vadd.f32 %v871_v52, %v4095_v10 }
 0x2ce   :  { %v1210_v38 = vpop.f32.mrf.mxu0  ;;  %2373 = vmatpush.bf16.msra.mxu1 %v3467_v17 }
 0x2cf   :  { %v1211_v36 = vadd.f32 %v1210_v38, %v4253_v18  ;;  %v870_v38 = vadd.f32 %v869_v33, %v4095_v10  ;;  %v1001_v39 = vadd.f32 %v1000_v9, %v872_v57  ;;  %v4391_v9 = vperm.slane %v4250_v42, 4 }
 0x2d1   :  { %1249 = vmatmul.bf16.gmra.mxu0 %v1088_v0  ;;  %v1294_v30 = vmax.f32 %v1211_v36, 0.0  ;;  %v999_v16 = vadd.f32 %v998_v24, %v870_v38  ;;  %v3454_v24 = vld [vmem:[#allocation2 + $0x540] sm:$0xf] }
 0x2d2   :  { %v1434_v27 = vpop.f32.mrf.mxu1 }
 0x2d3   :  { %v1435_v20 = vadd.f32 %v1434_v27, %v4332_v54  ;;  %v1049_v32 = vmax.f32 %v999_v16, 0.0 }
 0x2d5   :  { %1544 = vst [vmem:[#allocation5 + $0x38] sm:$0xff] %v1435_v20  ;;  %v1605_v4 = vpack.c.bf16 %v1435_v20, %v1433_v60 }
 0x2d6   :  { %v1212_v26 = vpop.f32.mrf.mxu0 }
 0x2d7   :  { %v1213_v5 = vadd.f32 %v1212_v26, %v4253_v18  ;;  %1698 = vmatmul.bf16.gmra.mxu2 %v1605_v4  ;;  %v1050_v26 = vmax.f32 %v1001_v39, 0.0 }
 0x2d9   :  { %v1295_v31 = vmax.f32 %v1213_v5, 0.0 }
 0x2da   :  { %v1437_v34 = vpop.f32.mrf.mxu1 }
 0x2db   :  { %v1438_v45 = vadd.f32 %v1437_v34, %v4332_v54  ;;  %v1347_v46 = vpack.c.bf16 %v1295_v31, %v1294_v30  ;;  %v1091_v30 = vpack.c.bf16 %v1050_v26, %v1049_v32 }
 0x2dd   :  { %1545 = vst [vmem:[#allocation5 + $0x40] sm:$0xff] %v1438_v45  ;;  %1476 = vmatmul.bf16.gmra.mxu1 %v1347_v46 }
 0x2de   :  { %v1215_v41 = vpop.f32.mrf.mxu0 }
 0x2df   :  { %v1216_v2 = vadd.f32 %v1215_v41, %v4253_v18 }
 0x2e1   :  { %1254 = vmatmul.bf16.gmra.mxu0 %v1089_v19  ;;  %v1296_v25 = vmax.f32 %v1216_v2, 0.0 }
 0x2e2   :  { %v1439_v48 = vpop.f32.mrf.mxu1 }
 0x2e3   :  { %v1440_v47 = vadd.f32 %v1439_v48, %v4332_v54 }
 0x2e5   :  { %1546 = vst [vmem:[#allocation5 + $0x48] sm:$0xff] %v1440_v47  ;;  %v1606_v51 = vpack.c.bf16 %v1440_v47, %v1438_v45 }
 0x2e6   :  { %v1217_v11 = vpop.f32.mrf.mxu0 }
 0x2e7   :  { %v1218_v44 = vadd.f32 %v1217_v11, %v4253_v18  ;;  %1703 = vmatmul.bf16.gmra.mxu2 %v1606_v51 }
 0x2e9   :  { %v1297_v61 = vmax.f32 %v1218_v44, 0.0 }
 0x2ea   :  { %v1442_v37 = vpop.f32.mrf.mxu1 }
 0x2eb   :  { %v1443_v8 = vadd.f32 %v1442_v37, %v4332_v54  ;;  %v1348_v50 = vpack.c.bf16 %v1297_v61, %v1296_v25  ;;  %v3631_v25 = vld [vmem:[%s4920_s3 + $0x78] sm:$0xff]  ;;  %v3609_v37 = vld [vmem:[#allocation2 + $0x544] sm:$0xf0] }
 0x2ec   :  { %2902 = vmatpush.bf16.msra.mxu3 %v3631_v25  ;;  %v3455_v35 = vor.u32 %v3609_v37, %v3454_v24 }
 0x2ed   :  { %1547 = vst [vmem:[#allocation5 + $0x50] sm:$0xff] %v1443_v8  ;;  %1481 = vmatmul.bf16.gmra.mxu1 %v1348_v50  ;;  %v3456_v50 = vld [vmem:[#allocation2 + $0x548] sm:$0xf0] }
 0x2ee   :  { %v1220_v53 = vpop.f32.mrf.mxu0  ;;  %2245 = vmatpush.bf16.msra.mxu0 %v3455_v35  ;;  %v3448_v35 = vld [vmem:[#allocation2 + $0x538] sm:$0xf0] }
 0x2ef   :  { %v1221_v0 = vadd.f32 %v1220_v53, %v4253_v18 }
 0x2f1   :  { %1259 = vmatmul.bf16.gmra.mxu0 %v1090_v14  ;;  %v1298_v36 = vmax.f32 %v1221_v0, 0.0 }
 0x2f2   :  { %v1444_v60 = vpop.f32.mrf.mxu1 }
 0x2f3   :  { %v1445_v56 = vadd.f32 %v1444_v60, %v4332_v54 }
 0x2f5   :  { %1548 = vst [vmem:[#allocation5 + $0x58] sm:$0xff] %v1445_v56  ;;  %v1607_v29 = vpack.c.bf16 %v1445_v56, %v1443_v8  ;;  %v3608_v8 = vld [vmem:[#allocation2 + $0x544] sm:$0xf] }
 0x2f6   :  { %v1222_v27 = vpop.f32.mrf.mxu0  ;;  %v3459_v3 = vor.u32 %v3608_v8, %v3456_v50 }
 0x2f7   :  { %v1223_v20 = vadd.f32 %v1222_v27, %v4253_v18  ;;  %1708 = vmatmul.bf16.gmra.mxu2 %v1607_v29 }
 0x2f8   :  { %2374 = vmatpush.bf16.msra.mxu1 %v3459_v3 }
 0x2f9   :  { %v1299_v4 = vmax.f32 %v1223_v20, 0.0 }
 0x2fa   :  { %v1447_v1 = vpop.f32.mrf.mxu1 }
 0x2fb   :  { %v1448_v62 = vadd.f32 %v1447_v1, %v4332_v54  ;;  %v1349_v5 = vpack.c.bf16 %v1299_v4, %v1298_v36 }
 0x2fd   :  { %1549 = vst [vmem:[#allocation5 + $0x60] sm:$0xff] %v1448_v62  ;;  %1486 = vmatmul.bf16.gmra.mxu1 %v1349_v5 }
 0x2fe   :  { %v1225_v10 = vpop.f32.mrf.mxu0 }
 0x2ff   :  { %v1226_v12 = vadd.f32 %v1225_v10, %v4253_v18 }
 0x301   :  { %1264 = vmatmul.bf16.gmra.mxu0 %v1091_v30  ;;  %v1300_v59 = vmax.f32 %v1226_v12, 0.0 }
 0x302   :  { %v1449_v31 = vpop.f32.mrf.mxu1 }
 0x303   :  { %v1450_v34 = vadd.f32 %v1449_v31, %v4332_v54 }
 0x305   :  { %1550 = vst [vmem:[#allocation5 + $0x68] sm:$0xff] %v1450_v34  ;;  %v1608_v45 = vpack.c.bf16 %v1450_v34, %v1448_v62 }
 0x306   :  { %v1227_v46 = vpop.f32.mrf.mxu0 }
 0x307   :  { %v1228_v28 = vadd.f32 %v1227_v46, %v4253_v18  ;;  %1713 = vmatmul.bf16.gmra.mxu2 %v1608_v45 }
 0x309   :  { %v1301_v41 = vmax.f32 %v1228_v28, 0.0 }
 0x30a   :  { %v1452_v19 = vpop.f32.mrf.mxu1 }
 0x30b   :  { %v1453_v21 = vadd.f32 %v1452_v19, %v4332_v54  ;;  %v1350_v48 = vpack.c.bf16 %v1301_v41, %v1300_v59 }
 0x30d   :  { %1551 = vst [vmem:[#allocation5 + $0x70] sm:$0xff] %v1453_v21  ;;  %1491 = vmatmul.bf16.gmra.mxu1 %v1350_v48 }
 0x30e   :  { %v1230_v23 = vpop.f32.mrf.mxu0 }
 0x30f   :  { %v1231_v2 = vadd.f32 %v1230_v23, %v4253_v18 }
 0x311   :  { %v1302_v55 = vmax.f32 %v1231_v2, 0.0 }
 0x312   :  { %v1454_v47 = vpop.f32.mrf.mxu1 }
 0x313   :  { %v1455_v22 = vadd.f32 %v1454_v47, %v4332_v54 }
 0x315   :  { %1552 = vst [vmem:[#allocation5 + $0x78] sm:$0xff] %v1455_v22  ;;  %v1609_v51 = vpack.c.bf16 %v1455_v22, %v1453_v21 }
 0x316   :  { %v1232_v33 = vpop.f32.mrf.mxu0 }
 0x317   :  { %v1233_v11 = vadd.f32 %v1232_v33, %v4253_v18  ;;  %1718 = vmatmul.bf16.gmra.mxu2 %v1609_v51 }
 0x319   :  { %v1303_v44 = vmax.f32 %v1233_v11, 0.0  ;;  %v3622_v11 = vld [vmem:[%s4920_s3 + $0x30] sm:$0xff] }
 0x31a   :  { %v1457_v61 = vpop.f32.mrf.mxu1  ;;  %2774 = vmatpush.bf16.msra.mxu2 %v3622_v11 }
 0x31b   :  { %v1458_v15 = vadd.f32 %v1457_v61, %v4332_v54  ;;  %v1351_v63 = vpack.c.bf16 %v1303_v44, %v1302_v55  ;;  %v3630_v55 = vld [vmem:[%s4920_s3 + $0x70] sm:$0xff] }
 0x31c   :  { %2903 = vmatpush.bf16.msra.mxu3 %v3630_v55 }
 0x31d   :  { %1553 = vst [vmem:[#allocation5 + $0x80] sm:$0xff] %v1458_v15  ;;  %1496 = vmatmul.bf16.gmra.mxu1 %v1351_v63  ;;  %v3607_v63 = vld [vmem:[#allocation2 + $0x534] sm:$0xf0] }
 0x31e   :  { %v1235_v43 = vpop.f32.mrf.mxu0 }
 0x31f   :  { %v1236_v53 = vadd.f32 %v1235_v43, %v4253_v18  ;;  %v3606_v43 = vld [vmem:[#allocation2 + $0x534] sm:$0xf] }
 0x320   :  { %v3451_v8 = vor.u32 %v3606_v43, %v3448_v35  ;;  %v3438_v43 = vld [vmem:[#allocation2 + $0x520] sm:$0xf]  ;;  %v3605_v35 = vld [vmem:[#allocation2 + $0x524] sm:$0xf0] }
 0x321   :  { %v1304_v14 = vmax.f32 %v1236_v53, 0.0 }
 0x322   :  { %v1459_v40 = vpop.f32.mrf.mxu1  ;;  %2375 = vmatpush.bf16.msra.mxu1 %v3451_v8 }
 0x323   :  { %v1460_v58 = vadd.f32 %v1459_v40, %v4332_v54 }
 0x325   :  { %1554 = vst [vmem:[#allocation5 + $0x88] sm:$0xff] %v1460_v58  ;;  %v1610_v6 = vpack.c.bf16 %v1460_v58, %v1458_v15  ;;  %v3446_v15 = vld [vmem:[#allocation2 + $0x530] sm:$0xf] }
 0x326   :  { %v1237_v7 = vpop.f32.mrf.mxu0  ;;  %v3447_v37 = vor.u32 %v3607_v63, %v3446_v15 }
 0x327   :  { %v1238_v13 = vadd.f32 %v1237_v7, %v4253_v18  ;;  %1723 = vmatmul.bf16.gmra.mxu2 %v1610_v6 }
 0x328   :  { %2246 = vmatpush.bf16.msra.mxu0 %v3447_v37 }
 0x329   :  { %v1305_v17 = vmax.f32 %v1238_v13, 0.0 }
 0x32a   :  { %v1462_v52 = vpop.f32.mrf.mxu1  ;;  %v1684_v60 = vpop.f32.mrf.mxu2 }
 0x32b   :  { %v1463_v57 = vadd.f32 %v1462_v52, %v4332_v54  ;;  %v1352_v56 = vpack.c.bf16 %v1305_v17, %v1304_v14  ;;  %v1685_v0 = vadd.f32 %v1684_v60, %v4391_v9 }
 0x32d   :  { %1555 = vst [vmem:[#allocation5 + $0x90] sm:$0xff] %v1463_v57  ;;  %1501 = vmatmul.bf16.gmra.mxu1 %v1352_v56  ;;  %v1804_v16 = vmax.f32 %v1685_v0, 0.0 }
 0x32e   :  { %v1240_v38 = vpop.f32.mrf.mxu0 }
 0x32f   :  { %v1241_v36 = vadd.f32 %v1240_v38, %v4253_v18 }
 0x331   :  { %v1306_v5 = vmax.f32 %v1241_v36, 0.0 }
 0x332   :  { %v1464_v29 = vpop.f32.mrf.mxu1  ;;  %v1686_v27 = vpop.f32.mrf.mxu2 }
 0x333   :  { %v1465_v39 = vadd.f32 %v1464_v29, %v4332_v54  ;;  %v1687_v20 = vadd.f32 %v1686_v27, %v4391_v9 }
 0x335   :  { %1556 = vst [vmem:[#allocation5 + $0x98] sm:$0xff] %v1465_v39  ;;  %v1611_v4 = vpack.c.bf16 %v1465_v39, %v1463_v57  ;;  %v1805_v1 = vmax.f32 %v1687_v20, 0.0 }
 0x336   :  { %v1242_v26 = vpop.f32.mrf.mxu0 }
 0x337   :  { %v1869_v62 = vpack.c.bf16 %v1805_v1, %v1804_v16  ;;  %v1243_v42 = vadd.f32 %v1242_v26, %v4253_v18  ;;  %1728 = vmatmul.bf16.gmra.mxu2 %v1611_v4 }
 0x339   :  { %v1307_v32 = vmax.f32 %v1243_v42, 0.0  ;;  %1950 = vmatmul.bf16.vlgmr.msrb.gmra.mxu3 %v1869_v62 }
 0x33a   :  { %v1467_v10 = vpop.f32.mrf.mxu1  ;;  %v1689_v30 = vpop.f32.mrf.mxu2 }
 0x33b   :  { %v1468_v31 = vadd.f32 %v1467_v10, %v4332_v54  ;;  %v1353_v34 = vpack.c.bf16 %v1307_v32, %v1306_v5  ;;  %v1690_v45 = vadd.f32 %v1689_v30, %v4391_v9 }
 0x33d   :  { %1557 = vst [vmem:[#allocation5 + $0xa0] sm:$0xff] %v1468_v31  ;;  %1506 = vmatmul.bf16.gmra.mxu1 %v1353_v34  ;;  %v1806_v19 = vmax.f32 %v1690_v45, 0.0 }
 0x33e   :  { %v1245_v12 = vpop.f32.mrf.mxu0 }
 0x33f   :  { %v1246_v21 = vadd.f32 %v1245_v12, %v4253_v18 }
 0x341   :  { %v1308_v51 = vmax.f32 %v1246_v21, 0.0 }
 0x342   :  { %v1469_v46 = vpop.f32.mrf.mxu1  ;;  %v1691_v28 = vpop.f32.mrf.mxu2 }
 0x343   :  { %v1470_v59 = vadd.f32 %v1469_v46, %v4332_v54  ;;  %v1692_v41 = vadd.f32 %v1691_v28, %v4391_v9 }
 0x345   :  { %1558 = vst [vmem:[#allocation5 + $0xa8] sm:$0xff] %v1470_v59  ;;  %v1612_v48 = vpack.c.bf16 %v1470_v59, %v1468_v31  ;;  %v1807_v23 = vmax.f32 %v1692_v41, 0.0 }
 0x346   :  { %v1247_v47 = vpop.f32.mrf.mxu0 }
 0x347   :  { %v1248_v22 = vadd.f32 %v1247_v47, %v4253_v18  ;;  %1733 = vmatmul.bf16.gmra.mxu2 %v1612_v48  ;;  %v1870_v2 = vpack.c.bf16 %v1807_v23, %v1806_v19 }
 0x349   :  { %v1309_v33 = vmax.f32 %v1248_v22, 0.0  ;;  %1955 = vmatmul.bf16.gmra.mxu3 %v1870_v2 }
 0x34a   :  { %v1472_v44 = vpop.f32.mrf.mxu1  ;;  %v1694_v49 = vpop.f32.mrf.mxu2 }
 0x34b   :  { %v1473_v25 = vadd.f32 %v1472_v44, %v4332_v54  ;;  %v1354_v61 = vpack.c.bf16 %v1309_v33, %v1308_v51  ;;  %v1695_v50 = vadd.f32 %v1694_v49, %v4391_v9  ;;  %v3621_v44 = vld [vmem:[%s4920_s3 + $0x28] sm:$0xff] }
 0x34c   :  { %2775 = vmatpush.bf16.msra.mxu2 %v3621_v44  ;;  %v3600_v44 = vld [vmem:[#allocation2 + $0x504] sm:$0xf] }
 0x34d   :  { %1559 = vst [vmem:[#allocation5 + $0xb0] sm:$0xff] %v1473_v25  ;;  %1511 = vmatmul.bf16.gmra.mxu1 %v1354_v61  ;;  %v1808_v6 = vmax.f32 %v1695_v50, 0.0  ;;  %v3629_v61 = vld [vmem:[%s4920_s3 + $0x68] sm:$0xff]  ;;  %v3439_v50 = vor.u32 %v3605_v35, %v3438_v43 }
 0x34e   :  { %v1250_v24 = vpop.f32.mrf.mxu0  ;;  %2904 = vmatpush.bf16.msra.mxu3 %v3629_v61 }
 0x34f   :  { %v1251_v7 = vadd.f32 %v1250_v24, %v4253_v18  ;;  %2247 = vmatpush.bf16.msra.mxu0 %v3439_v50 }
 0x351   :  { %v1310_v57 = vmax.f32 %v1251_v7, 0.0 }
 0x352   :  { %v1474_v3 = vpop.f32.mrf.mxu1  ;;  %v1696_v40 = vpop.f32.mrf.mxu2 }
 0x353   :  { %v1475_v58 = vadd.f32 %v1474_v3, %v4332_v54  ;;  %v1697_v53 = vadd.f32 %v1696_v40, %v4391_v9  ;;  %v3604_v3 = vld [vmem:[#allocation2 + $0x524] sm:$0xf]  ;;  %v3440_v40 = vld [vmem:[#allocation2 + $0x528] sm:$0xf0] }
 0x355   :  { %1560 = vst [vmem:[#allocation5 + $0xb8] sm:$0xff] %v1475_v58  ;;  %v1613_v13 = vpack.c.bf16 %v1475_v58, %v1473_v25  ;;  %v1809_v14 = vmax.f32 %v1697_v53, 0.0  ;;  %v3443_v58 = vor.u32 %v3604_v3, %v3440_v40 }
 0x356   :  { %v1252_v17 = vpop.f32.mrf.mxu0 }
 0x357   :  { %v1253_v52 = vadd.f32 %v1252_v17, %v4253_v18  ;;  %1738 = vmatmul.bf16.gmra.mxu2 %v1613_v13  ;;  %v1871_v60 = vpack.c.bf16 %v1809_v14, %v1808_v6  ;;  %2376 = vmatpush.bf16.msra.mxu1 %v3443_v58 }
 0x359   :  { %v1311_v56 = vmax.f32 %v1253_v52, 0.0  ;;  %1960 = vmatmul.bf16.gmra.mxu3 %v1871_v60 }
 0x35a   :  { %v1477_v38 = vpop.f32.mrf.mxu1  ;;  %v1699_v0 = vpop.f32.mrf.mxu2 }
 0x35b   :  { %v1478_v29 = vadd.f32 %v1477_v38, %v4332_v54  ;;  %v1355_v27 = vpack.c.bf16 %v1311_v56, %v1310_v57  ;;  %v1700_v20 = vadd.f32 %v1699_v0, %v4391_v9 }
 0x35d   :  { %1561 = vst [vmem:[#allocation5 + $0xc0] sm:$0xff] %v1478_v29  ;;  %1516 = vmatmul.bf16.gmra.mxu1 %v1355_v27  ;;  %v1810_v26 = vmax.f32 %v1700_v20, 0.0 }
 0x35e   :  { %v1255_v39 = vpop.f32.mrf.mxu0 }
 0x35f   :  { %v1256_v62 = vadd.f32 %v1255_v39, %v4253_v18 }
 0x361   :  { %v1312_v31 = vmax.f32 %v1256_v62, 0.0 }
 0x362   :  { %v1479_v16 = vpop.f32.mrf.mxu1  ;;  %v1701_v36 = vpop.f32.mrf.mxu2 }
 0x363   :  { %v1480_v4 = vadd.f32 %v1479_v16, %v4332_v54  ;;  %v1702_v1 = vadd.f32 %v1701_v36, %v4391_v9 }
 0x365   :  { %1562 = vst [vmem:[#allocation5 + $0xc8] sm:$0xff] %v1480_v4  ;;  %v1614_v42 = vpack.c.bf16 %v1480_v4, %v1478_v29  ;;  %v1811_v5 = vmax.f32 %v1702_v1, 0.0 }
 0x366   :  { %v1257_v32 = vpop.f32.mrf.mxu0 }
 0x367   :  { %v1258_v10 = vadd.f32 %v1257_v32, %v4253_v18  ;;  %1743 = vmatmul.bf16.gmra.mxu2 %v1614_v42  ;;  %v1872_v30 = vpack.c.bf16 %v1811_v5, %v1810_v26 }
 0x369   :  { %v1313_v34 = vmax.f32 %v1258_v10, 0.0  ;;  %1965 = vmatmul.bf16.gmra.mxu3 %v1872_v30 }
 0x36a   :  { %v1482_v12 = vpop.f32.mrf.mxu1  ;;  %v1704_v45 = vpop.f32.mrf.mxu2 }
 0x36b   :  { %v1483_v46 = vadd.f32 %v1482_v12, %v4332_v54  ;;  %v1356_v28 = vpack.c.bf16 %v1313_v34, %v1312_v31  ;;  %v1705_v41 = vadd.f32 %v1704_v45, %v4391_v9  ;;  %v3430_v45 = vld [vmem:[#allocation2 + $0x510] sm:$0xf] }
 0x36d   :  { %1563 = vst [vmem:[#allocation5 + $0xd0] sm:$0xff] %v1483_v46  ;;  %1521 = vmatmul.bf16.gmra.mxu1 %v1356_v28  ;;  %v1812_v47 = vmax.f32 %v1705_v41, 0.0  ;;  %v3602_v28 = vld [vmem:[#allocation2 + $0x514] sm:$0xf] }
 0x36e   :  { %v1260_v59 = vpop.f32.mrf.mxu0 }
 0x36f   :  { %v1261_v22 = vadd.f32 %v1260_v59, %v4253_v18 }
 0x371   :  { %v1314_v49 = vmax.f32 %v1261_v22, 0.0 }
 0x372   :  { %v1484_v19 = vpop.f32.mrf.mxu1  ;;  %v1706_v21 = vpop.f32.mrf.mxu2 }
 0x373   :  { %v1485_v48 = vadd.f32 %v1484_v19, %v4332_v54  ;;  %v1707_v23 = vadd.f32 %v1706_v21, %v4391_v9  ;;  %v3432_v21 = vld [vmem:[#allocation2 + $0x518] sm:$0xf0] }
 0x375   :  { %1564 = vst [vmem:[#allocation5 + $0xd8] sm:$0xff] %v1485_v48  ;;  %v1615_v2 = vpack.c.bf16 %v1485_v48, %v1483_v46  ;;  %v1813_v51 = vmax.f32 %v1707_v23, 0.0  ;;  %v3603_v46 = vld [vmem:[#allocation2 + $0x514] sm:$0xf0] }
 0x376   :  { %v1262_v33 = vpop.f32.mrf.mxu0  ;;  %v3431_v19 = vor.u32 %v3603_v46, %v3430_v45 }
 0x377   :  { %v1263_v11 = vadd.f32 %v1262_v33, %v4253_v18  ;;  %1748 = vmatmul.bf16.gmra.mxu2 %v1615_v2  ;;  %v1873_v55 = vpack.c.bf16 %v1813_v51, %v1812_v47  ;;  %v3435_v47 = vor.u32 %v3602_v28, %v3432_v21  ;;  %v3422_v33 = vld [vmem:[#allocation2 + $0x500] sm:$0xf] }
 0x378   :  { %2248 = vmatpush.bf16.msra.mxu0 %v3431_v19 }
 0x379   :  { %v1315_v25 = vmax.f32 %v1263_v11, 0.0  ;;  %1970 = vmatmul.bf16.gmra.mxu3 %v1873_v55  ;;  %2377 = vmatpush.bf16.msra.mxu1 %v3435_v47  ;;  %v3601_v11 = vld [vmem:[#allocation2 + $0x504] sm:$0xf0] }
 0x37a   :  { %v1487_v15 = vpop.f32.mrf.mxu1  ;;  %v1709_v63 = vpop.f32.mrf.mxu2  ;;  %v3423_v55 = vor.u32 %v3601_v11, %v3422_v33  ;;  %v3627_v33 = vld [vmem:[%s4920_s3 + $0x58] sm:$0xff] }
 0x37b   :  { %v1488_v24 = vadd.f32 %v1487_v15, %v4332_v54  ;;  %v1357_v37 = vpack.c.bf16 %v1315_v25, %v1314_v49  ;;  %v1710_v53 = vadd.f32 %v1709_v63, %v4391_v9  ;;  %v3424_v49 = vld [vmem:[#allocation2 + $0x508] sm:$0xf0]  ;;  %v3620_v15 = vld [vmem:[%s4920_s3 + $0x20] sm:$0xff] }
 0x37c   :  { %v3427_v61 = vor.u32 %v3600_v44, %v3424_v49  ;;  %2249 = vmatpush.bf16.msra.mxu0 %v3423_v55  ;;  %v3628_v63 = vld [vmem:[%s4920_s3 + $0x60] sm:$0xff]  ;;  %2776 = vmatpush.bf16.msra.mxu2 %v3620_v15 }
 0x37d   :  { %1565 = vst [vmem:[#allocation5 + $0xe0] sm:$0xff] %v1488_v24  ;;  %1526 = vmatmul.bf16.gmra.mxu1 %v1357_v37  ;;  %v1814_v17 = vmax.f32 %v1710_v53, 0.0  ;;  %2905 = vmatpush.bf16.msra.mxu3 %v3628_v63 }
 0x37e   :  { %v1265_v8 = vpop.f32.mrf.mxu0  ;;  %2378 = vmatpush.bf16.msra.mxu1 %v3427_v61 }
 0x37f   :  { %v1266_v52 = vadd.f32 %v1265_v8, %v4253_v18 }
 0x381   :  { %v1316_v29 = vmax.f32 %v1266_v52, 0.0  ;;  %2906 = vmatpush.bf16.msra.mxu3 %v3627_v33 }
 0x382   :  { %v1489_v6 = vpop.f32.mrf.mxu1  ;;  %v1711_v7 = vpop.f32.mrf.mxu2 }
 0x383   :  { %v1490_v13 = vadd.f32 %v1489_v6, %v4332_v54  ;;  %v1712_v14 = vadd.f32 %v1711_v7, %v4391_v9 }
 0x385   :  { %1566 = vst [vmem:[#allocation5 + $0xe8] sm:$0xff] %v1490_v13  ;;  %v1616_v60 = vpack.c.bf16 %v1490_v13, %v1488_v24  ;;  %v1815_v57 = vmax.f32 %v1712_v14, 0.0 }
 0x386   :  { %v1267_v56 = vpop.f32.mrf.mxu0 }
 0x387   :  { %v1268_v38 = vadd.f32 %v1267_v56, %v4253_v18  ;;  %1753 = vmatmul.bf16.gmra.mxu2 %v1616_v60  ;;  %v1874_v0 = vpack.c.bf16 %v1815_v57, %v1814_v17  ;;  %v4462_v60 = vld [vmem:[%s4921_s4] sm:$0xff] }
 0x388   :  { %v4465_v57 = vperm.slane %v4462_v60, 5 }
 0x389   :  { %v1317_v27 = vmax.f32 %v1268_v38, 0.0  ;;  %1975 = vmatmul.bf16.gmra.mxu3 %v1874_v0 }
 0x38a   :  { %v1492_v39 = vpop.f32.mrf.mxu1  ;;  %v1714_v20 = vpop.f32.mrf.mxu2 }
 0x38b   :  { %v1493_v16 = vadd.f32 %v1492_v39, %v4332_v54  ;;  %v1358_v36 = vpack.c.bf16 %v1317_v27, %v1316_v29  ;;  %v1715_v4 = vadd.f32 %v1714_v20, %v4391_v9 }
 0x38d   :  { %1567 = vst [vmem:[#allocation5 + $0xf0] sm:$0xff] %v1493_v16  ;;  %1531 = vmatmul.bf16.gmra.mxu1 %v1358_v36  ;;  %v1816_v42 = vmax.f32 %v1715_v4, 0.0 }
 0x392   :  { %v1494_v1 = vpop.f32.mrf.mxu1  ;;  %v1716_v26 = vpop.f32.mrf.mxu2 }
 0x393   :  { %v1495_v62 = vadd.f32 %v1494_v1, %v4332_v54  ;;  %v1717_v18 = vadd.f32 %v1716_v26, %v4391_v9 }
 0x395   :  { %1568 = vst [vmem:[#allocation5 + $0xf8] sm:$0xff] %v1495_v62  ;;  %v1617_v5 = vpack.c.bf16 %v1495_v62, %v1493_v16  ;;  %v1817_v32 = vmax.f32 %v1717_v18, 0.0 }
 0x397   :  { %1758 = vmatmul.bf16.gmra.mxu2 %v1617_v5  ;;  %v1875_v10 = vpack.c.bf16 %v1817_v32, %v1816_v42 }
 0x399   :  { %1980 = vmatmul.bf16.gmra.mxu3 %v1875_v10 }
 0x39a   :  { %v1497_v30 = vpop.f32.mrf.mxu1  ;;  %v1719_v31 = vpop.f32.mrf.mxu2 }
 0x39b   :  { %v1498_v34 = vadd.f32 %v1497_v30, %v4332_v54  ;;  %v1720_v12 = vadd.f32 %v1719_v31, %v4391_v9 }
 0x39d   :  { %1569 = vst [vmem:[#allocation5 + $0x100] sm:$0xff] %v1498_v34  ;;  %v1818_v22 = vmax.f32 %v1720_v12, 0.0 }
 0x3a2   :  { %v1499_v59 = vpop.f32.mrf.mxu1  ;;  %v1721_v41 = vpop.f32.mrf.mxu2 }
 0x3a3   :  { %v1500_v48 = vadd.f32 %v1499_v59, %v4332_v54  ;;  %v1722_v23 = vadd.f32 %v1721_v41, %v4391_v9 }
 0x3a5   :  { %1570 = vst [vmem:[#allocation5 + $0x108] sm:$0xff] %v1500_v48  ;;  %v1618_v2 = vpack.c.bf16 %v1500_v48, %v1498_v34  ;;  %v1819_v51 = vmax.f32 %v1722_v23, 0.0 }
 0x3a7   :  { %1763 = vmatmul.bf16.gmra.mxu2 %v1618_v2  ;;  %v1876_v25 = vpack.c.bf16 %v1819_v51, %v1818_v22  ;;  %v3619_v2 = vld [vmem:[%s4920_s3 + $0x18] sm:$0xff] }
 0x3a8   :  { %2777 = vmatpush.bf16.msra.mxu2 %v3619_v2 }
 0x3a9   :  { %1985 = vmatmul.bf16.gmra.mxu3 %v1876_v25 }
 0x3aa   :  { %v1502_v24 = vpop.f32.mrf.mxu1  ;;  %v1724_v37 = vpop.f32.mrf.mxu2 }
 0x3ab   :  { %v1503_v43 = vadd.f32 %v1502_v24, %v4332_v54  ;;  %v1725_v35 = vadd.f32 %v1724_v37, %v4391_v9 }
 0x3ad   :  { %1571 = vst [vmem:[#allocation5 + $0x110] sm:$0xff] %v1503_v43  ;;  %v1820_v58 = vmax.f32 %v1725_v35, 0.0 }
 0x3b2   :  { %v1504_v8 = vpop.f32.mrf.mxu1  ;;  %v1726_v50 = vpop.f32.mrf.mxu2 }
 0x3b3   :  { %v1505_v3 = vadd.f32 %v1504_v8, %v4332_v54  ;;  %v1727_v40 = vadd.f32 %v1726_v50, %v4391_v9 }
 0x3b5   :  { %1572 = vst [vmem:[#allocation5 + $0x118] sm:$0xff] %v1505_v3  ;;  %v1619_v53 = vpack.c.bf16 %v1505_v3, %v1503_v43  ;;  %v1821_v6 = vmax.f32 %v1727_v40, 0.0 }
 0x3b7   :  { %1768 = vmatmul.bf16.gmra.mxu2 %v1619_v53  ;;  %v1877_v7 = vpack.c.bf16 %v1821_v6, %v1820_v58 }
 0x3b9   :  { %1990 = vmatmul.bf16.gmra.mxu3 %v1877_v7 }
 0x3ba   :  { %v1507_v13 = vpop.f32.mrf.mxu1  ;;  %v1729_v14 = vpop.f32.mrf.mxu2 }
 0x3bb   :  { %v1508_v17 = vadd.f32 %v1507_v13, %v4332_v54  ;;  %v1730_v56 = vadd.f32 %v1729_v14, %v4391_v9 }
 0x3bc   :  { %v1951_v52 = vpop.f32.mrf.mxu3 }
 0x3bd   :  { %1573 = vst [vmem:[#allocation5 + $0x120] sm:$0xff] %v1508_v17  ;;  %v1952_v29 = vadd.f32 %v1951_v52, %v4465_v57  ;;  %v1822_v16 = vmax.f32 %v1730_v56, 0.0 }
 0x3bf   :  { %v2071_v26 = vmax.f32 %v1952_v29, 0.0 }
 0x3c2   :  { %v1509_v38 = vpop.f32.mrf.mxu1  ;;  %v1731_v0 = vpop.f32.mrf.mxu2 }
 0x3c3   :  { %v1510_v27 = vadd.f32 %v1509_v38, %v4332_v54  ;;  %v1732_v39 = vadd.f32 %v1731_v0, %v4391_v9 }
 0x3c4   :  { %v1953_v20 = vpop.f32.mrf.mxu3 }
 0x3c5   :  { %1574 = vst [vmem:[#allocation5 + $0x128] sm:$0xff] %v1510_v27  ;;  %v1620_v36 = vpack.c.bf16 %v1510_v27, %v1508_v17  ;;  %v1823_v4 = vmax.f32 %v1732_v39, 0.0  ;;  %v1954_v1 = vadd.f32 %v1953_v20, %v4465_v57 }
 0x3c7   :  { %v2072_v62 = vmax.f32 %v1954_v1, 0.0  ;;  %1773 = vmatmul.bf16.gmra.mxu2 %v1620_v36  ;;  %v1878_v18 = vpack.c.bf16 %v1823_v4, %v1822_v16 }
 0x3c9   :  { %v2136_v42 = vpack.c.bf16 %v2072_v62, %v2071_v26  ;;  %1995 = vmatmul.bf16.gmra.mxu3 %v1878_v18 }
 0x3ca   :  { %v1512_v5 = vpop.f32.mrf.mxu1  ;;  %v1734_v32 = vpop.f32.mrf.mxu2 }
 0x3cb   :  { %v1513_v10 = vadd.f32 %v1512_v5, %v4332_v54  ;;  %2250 = vmatmul.bf16.vlgmr.msra.gmra.mxu0 %v2136_v42  ;;  %2379 = vmatmul.bf16.vlgmr.msra.gmra.mxu1 %v2136_v42  ;;  %v1735_v31 = vadd.f32 %v1734_v32, %v4391_v9 }
 0x3cc   :  { %v1956_v30 = vpop.f32.mrf.mxu3 }
 0x3cd   :  { %1575 = vst [vmem:[#allocation5 + $0x130] sm:$0xff] %v1513_v10  ;;  %v1957_v45 = vadd.f32 %v1956_v30, %v4465_v57  ;;  %v1824_v41 = vmax.f32 %v1735_v31, 0.0 }
 0x3cf   :  { %v2073_v23 = vmax.f32 %v1957_v45, 0.0 }
 0x3d2   :  { %v1514_v34 = vpop.f32.mrf.mxu1  ;;  %v1736_v12 = vpop.f32.mrf.mxu2 }
 0x3d3   :  { %v1515_v46 = vadd.f32 %v1514_v34, %v4332_v54  ;;  %v1737_v28 = vadd.f32 %v1736_v12, %v4391_v9 }
 0x3d4   :  { %v1958_v59 = vpop.f32.mrf.mxu3 }
 0x3d5   :  { %1576 = vst [vmem:[#allocation5 + $0x138] sm:$0xff] %v1515_v46  ;;  %v1621_v19 = vpack.c.bf16 %v1515_v46, %v1513_v10  ;;  %v1825_v21 = vmax.f32 %v1737_v28, 0.0  ;;  %v1959_v48 = vadd.f32 %v1958_v59, %v4465_v57 }
 0x3d7   :  { %v2074_v47 = vmax.f32 %v1959_v48, 0.0  ;;  %1778 = vmatmul.bf16.gmra.mxu2 %v1621_v19  ;;  %v1879_v22 = vpack.c.bf16 %v1825_v21, %v1824_v41 }
 0x3d9   :  { %2000 = vmatmul.bf16.gmra.mxu3 %v1879_v22  ;;  %v2137_v51 = vpack.c.bf16 %v2074_v47, %v2073_v23  ;;  %v3618_v22 = vld [vmem:[%s4920_s3 + $0x10] sm:$0xff] }
 0x3da   :  { %v1517_v11 = vpop.f32.mrf.mxu1  ;;  %v1739_v55 = vpop.f32.mrf.mxu2  ;;  %2778 = vmatpush.bf16.msra.mxu2 %v3618_v22 }
 0x3db   :  { %v1518_v44 = vadd.f32 %v1517_v11, %v4332_v54  ;;  %2255 = vmatmul.bf16.gmra.mxu0 %v2137_v51  ;;  %2384 = vmatmul.bf16.gmra.mxu1 %v2137_v51  ;;  %v1740_v25 = vadd.f32 %v1739_v55, %v4391_v9  ;;  %v3626_v51 = vld [vmem:[%s4920_s3 + $0x50] sm:$0xff] }
 0x3dc   :  { %v1961_v49 = vpop.f32.mrf.mxu3  ;;  %2907 = vmatpush.bf16.msra.mxu3 %v3626_v51 }
 0x3dd   :  { %1577 = vst [vmem:[#allocation5 + $0x140] sm:$0xff] %v1518_v44  ;;  %v1962_v63 = vadd.f32 %v1961_v49, %v4465_v57  ;;  %v1826_v35 = vmax.f32 %v1740_v25, 0.0 }
 0x3df   :  { %v2075_v40 = vmax.f32 %v1962_v63, 0.0 }
 0x3e2   :  { %v1519_v61 = vpop.f32.mrf.mxu1  ;;  %v1741_v15 = vpop.f32.mrf.mxu2 }
 0x3e3   :  { %v1520_v24 = vadd.f32 %v1519_v61, %v4332_v54  ;;  %v1742_v37 = vadd.f32 %v1741_v15, %v4391_v9 }
 0x3e4   :  { %v1963_v43 = vpop.f32.mrf.mxu3 }
 0x3e5   :  { %1578 = vst [vmem:[#allocation5 + $0x148] sm:$0xff] %v1520_v24  ;;  %v1622_v8 = vpack.c.bf16 %v1520_v24, %v1518_v44  ;;  %v1827_v50 = vmax.f32 %v1742_v37, 0.0  ;;  %v1964_v3 = vadd.f32 %v1963_v43, %v4465_v57 }
 0x3e7   :  { %v2076_v58 = vmax.f32 %v1964_v3, 0.0  ;;  %1783 = vmatmul.bf16.gmra.mxu2 %v1622_v8  ;;  %v1880_v53 = vpack.c.bf16 %v1827_v50, %v1826_v35 }
 0x3e9   :  { %2005 = vmatmul.bf16.gmra.mxu3 %v1880_v53  ;;  %v2138_v6 = vpack.c.bf16 %v2076_v58, %v2075_v40 }
 0x3ea   :  { %v1522_v7 = vpop.f32.mrf.mxu1  ;;  %v1744_v13 = vpop.f32.mrf.mxu2 }
 0x3eb   :  { %v1523_v14 = vadd.f32 %v1522_v7, %v4332_v54  ;;  %2260 = vmatmul.bf16.gmra.mxu0 %v2138_v6  ;;  %2389 = vmatmul.bf16.gmra.mxu1 %v2138_v6  ;;  %v1745_v52 = vadd.f32 %v1744_v13, %v4391_v9 }
 0x3ec   :  { %v1966_v17 = vpop.f32.mrf.mxu3 }
 0x3ed   :  { %1579 = vst [vmem:[#allocation5 + $0x150] sm:$0xff] %v1523_v14  ;;  %v1967_v0 = vadd.f32 %v1966_v17, %v4465_v57  ;;  %v1828_v20 = vmax.f32 %v1745_v52, 0.0 }
 0x3ef   :  { %v2077_v1 = vmax.f32 %v1967_v0, 0.0 }
 0x3f2   :  { %v1524_v56 = vpop.f32.mrf.mxu1  ;;  %v1746_v38 = vpop.f32.mrf.mxu2 }
 0x3f3   :  { %v1525_v29 = vadd.f32 %v1524_v56, %v4332_v54  ;;  %v1747_v27 = vadd.f32 %v1746_v38, %v4391_v9 }
 0x3f4   :  { %v1968_v39 = vpop.f32.mrf.mxu3 }
 0x3f5   :  { %1580 = vst [vmem:[#allocation5 + $0x158] sm:$0xff] %v1525_v29  ;;  %v1623_v16 = vpack.c.bf16 %v1525_v29, %v1523_v14  ;;  %v1829_v36 = vmax.f32 %v1747_v27, 0.0  ;;  %v1969_v4 = vadd.f32 %v1968_v39, %v4465_v57 }
 0x3f7   :  { %v2078_v26 = vmax.f32 %v1969_v4, 0.0  ;;  %1788 = vmatmul.bf16.gmra.mxu2 %v1623_v16  ;;  %v1881_v62 = vpack.c.bf16 %v1829_v36, %v1828_v20  ;;  %v3617_v4 = vld [vmem:[%s4920_s3 + $0x8] sm:$0xff] }
 0x3f8   :  { %2779 = vmatpush.bf16.msra.mxu2 %v3617_v4 }
 0x3f9   :  { %2010 = vmatmul.bf16.gmra.mxu3 %v1881_v62  ;;  %v2139_v18 = vpack.c.bf16 %v2078_v26, %v2077_v1  ;;  %v3616_v62 = vld [vmem:[%s4920_s3] sm:$0xff] }
 0x3fa   :  { %v1527_v42 = vpop.f32.mrf.mxu1  ;;  %v1749_v5 = vpop.f32.mrf.mxu2 }
 0x3fb   :  { %v1528_v32 = vadd.f32 %v1527_v42, %v4332_v54  ;;  %2265 = vmatmul.bf16.gmra.mxu0 %v2139_v18  ;;  %2394 = vmatmul.bf16.gmra.mxu1 %v2139_v18  ;;  %v1750_v30 = vadd.f32 %v1749_v5, %v4391_v9 }
 0x3fc   :  { %v1971_v10 = vpop.f32.mrf.mxu3  ;;  %2780 = vmatpush.bf16.msra.mxu2 %v3616_v62 }
 0x3fd   :  { %1581 = vst [vmem:[#allocation5 + $0x160] sm:$0xff] %v1528_v32  ;;  %v1972_v12 = vadd.f32 %v1971_v10, %v4465_v57  ;;  %v1830_v59 = vmax.f32 %v1750_v30, 0.0 }
 0x3ff   :  { %v2079_v48 = vmax.f32 %v1972_v12, 0.0 }
 0x402   :  { %v1529_v31 = vpop.f32.mrf.mxu1  ;;  %v1751_v34 = vpop.f32.mrf.mxu2 }
 0x403   :  { %v1530_v45 = vadd.f32 %v1529_v31, %v4332_v54  ;;  %v1752_v46 = vadd.f32 %v1751_v34, %v4391_v9 }
 0x404   :  { %v1973_v28 = vpop.f32.mrf.mxu3 }
 0x405   :  { %1582 = vst [vmem:[#allocation5 + $0x168] sm:$0xff] %v1530_v45  ;;  %v1624_v41 = vpack.c.bf16 %v1530_v45, %v1528_v32  ;;  %v1831_v19 = vmax.f32 %v1752_v46, 0.0  ;;  %v1974_v21 = vadd.f32 %v1973_v28, %v4465_v57  ;;  %v3625_v28 = vld [vmem:[%s4920_s3 + $0x48] sm:$0xff] }
 0x406   :  { %2908 = vmatpush.bf16.msra.mxu3 %v3625_v28 }
 0x407   :  { %v2080_v23 = vmax.f32 %v1974_v21, 0.0  ;;  %1793 = vmatmul.bf16.gmra.mxu2 %v1624_v41  ;;  %v1882_v47 = vpack.c.bf16 %v1831_v19, %v1830_v59 }
 0x409   :  { %2015 = vmatmul.bf16.gmra.mxu3 %v1882_v47  ;;  %v2140_v2 = vpack.c.bf16 %v2080_v23, %v2079_v48 }
 0x40a   :  { %v1532_v33 = vpop.f32.mrf.mxu1  ;;  %v1754_v11 = vpop.f32.mrf.mxu2 }
 0x40b   :  { %v1533_v55 = vadd.f32 %v1532_v33, %v4332_v54  ;;  %2270 = vmatmul.bf16.gmra.mxu0 %v2140_v2  ;;  %2399 = vmatmul.bf16.gmra.mxu1 %v2140_v2  ;;  %v1755_v49 = vadd.f32 %v1754_v11, %v4391_v9 }
 0x40c   :  { %v1976_v44 = vpop.f32.mrf.mxu3 }
 0x40d   :  { %1583 = vst [vmem:[#allocation5 + $0x170] sm:$0xff] %v1533_v55  ;;  %v1977_v15 = vadd.f32 %v1976_v44, %v4465_v57  ;;  %v1832_v43 = vmax.f32 %v1755_v49, 0.0 }
 0x40f   :  { %v2081_v3 = vmax.f32 %v1977_v15, 0.0 }
 0x412   :  { %v1534_v25 = vpop.f32.mrf.mxu1  ;;  %v1756_v61 = vpop.f32.mrf.mxu2 }
 0x413   :  { %v1535_v63 = vadd.f32 %v1534_v25, %v4332_v54  ;;  %v1757_v24 = vadd.f32 %v1756_v61, %v4391_v9  ;;  %v4538_v61 = vperm.slane %v4462_v60, 6 }
 0x414   :  { %v1978_v37 = vpop.f32.mrf.mxu3 }
 0x415   :  { %1584 = vst [vmem:[#allocation5 + $0x178] sm:$0xff] %v1535_v63  ;;  %v1625_v35 = vpack.c.bf16 %v1535_v63, %v1533_v55  ;;  %v1833_v8 = vmax.f32 %v1757_v24, 0.0  ;;  %v1979_v50 = vadd.f32 %v1978_v37, %v4465_v57 }
 0x417   :  { %v2082_v40 = vmax.f32 %v1979_v50, 0.0  ;;  %1798 = vmatmul.bf16.gmra.mxu2 %v1625_v35  ;;  %v1883_v58 = vpack.c.bf16 %v1833_v8, %v1832_v43 }
 0x419   :  { %2020 = vmatmul.bf16.gmra.mxu3 %v1883_v58  ;;  %v2141_v53 = vpack.c.bf16 %v2082_v40, %v2081_v3 }
 0x41a   :  { %v1759_v6 = vpop.f32.mrf.mxu2 }
 0x41b   :  { %2275 = vmatmul.bf16.gmra.mxu0 %v2141_v53  ;;  %2404 = vmatmul.bf16.gmra.mxu1 %v2141_v53  ;;  %v1760_v54 = vadd.f32 %v1759_v6, %v4391_v9 }
 0x41c   :  { %v1981_v7 = vpop.f32.mrf.mxu3 }
 0x41d   :  { %v1982_v14 = vadd.f32 %v1981_v7, %v4465_v57  ;;  %v1834_v56 = vmax.f32 %v1760_v54, 0.0 }
 0x41f   :  { %v2083_v29 = vmax.f32 %v1982_v14, 0.0 }
 0x422   :  { %v1761_v13 = vpop.f32.mrf.mxu2 }
 0x423   :  { %v1762_v17 = vadd.f32 %v1761_v13, %v4391_v9 }
 0x424   :  { %v1983_v52 = vpop.f32.mrf.mxu3 }
 0x425   :  { %v1835_v38 = vmax.f32 %v1762_v17, 0.0  ;;  %v1984_v0 = vadd.f32 %v1983_v52, %v4465_v57 }
 0x427   :  { %v2084_v27 = vmax.f32 %v1984_v0, 0.0  ;;  %v1884_v39 = vpack.c.bf16 %v1835_v38, %v1834_v56 }
 0x429   :  { %2025 = vmatmul.bf16.gmra.mxu3 %v1884_v39  ;;  %v2142_v20 = vpack.c.bf16 %v2084_v27, %v2083_v29 }
 0x42a   :  { %v1764_v16 = vpop.f32.mrf.mxu2 }
 0x42b   :  { %2280 = vmatmul.bf16.gmra.mxu0 %v2142_v20  ;;  %2409 = vmatmul.bf16.gmra.mxu1 %v2142_v20  ;;  %v1765_v1 = vadd.f32 %v1764_v16, %v4391_v9 }
 0x42c   :  { %v1986_v36 = vpop.f32.mrf.mxu3 }
 0x42d   :  { %v1987_v18 = vadd.f32 %v1986_v36, %v4465_v57  ;;  %v1836_v32 = vmax.f32 %v1765_v1, 0.0 }
 0x42f   :  { %v2085_v31 = vmax.f32 %v1987_v18, 0.0 }
 0x432   :  { %v1766_v26 = vpop.f32.mrf.mxu2 }
 0x433   :  { %v1767_v42 = vadd.f32 %v1766_v26, %v4391_v9 }
 0x434   :  { %v1988_v5 = vpop.f32.mrf.mxu3 }
 0x435   :  { %v1837_v10 = vmax.f32 %v1767_v42, 0.0  ;;  %v1989_v30 = vadd.f32 %v1988_v5, %v4465_v57 }
 0x437   :  { %v2086_v34 = vmax.f32 %v1989_v30, 0.0  ;;  %v1885_v12 = vpack.c.bf16 %v1837_v10, %v1836_v32 }
 0x439   :  { %2030 = vmatmul.bf16.gmra.mxu3 %v1885_v12  ;;  %v2143_v45 = vpack.c.bf16 %v2086_v34, %v2085_v31 }
 0x43a   :  { %v1769_v46 = vpop.f32.mrf.mxu2 }
 0x43b   :  { %2285 = vmatmul.bf16.gmra.mxu0 %v2143_v45  ;;  %2414 = vmatmul.bf16.gmra.mxu1 %v2143_v45  ;;  %v1770_v41 = vadd.f32 %v1769_v46, %v4391_v9 }
 0x43c   :  { %v1991_v59 = vpop.f32.mrf.mxu3 }
 0x43d   :  { %v1992_v21 = vadd.f32 %v1991_v59, %v4465_v57  ;;  %v1838_v47 = vmax.f32 %v1770_v41, 0.0  ;;  %v3624_v59 = vld [vmem:[%s4920_s3 + $0x40] sm:$0xff] }
 0x43e   :  { %2909 = vmatpush.bf16.msra.mxu3 %v3624_v59 }
 0x43f   :  { %v2087_v51 = vmax.f32 %v1992_v21, 0.0 }
 0x442   :  { %v1771_v19 = vpop.f32.mrf.mxu2 }
 0x443   :  { %v1772_v48 = vadd.f32 %v1771_v19, %v4391_v9 }
 0x444   :  { %v1993_v23 = vpop.f32.mrf.mxu3 }
 0x445   :  { %v1839_v22 = vmax.f32 %v1772_v48, 0.0  ;;  %v1994_v2 = vadd.f32 %v1993_v23, %v4465_v57 }
 0x447   :  { %v2088_v33 = vmax.f32 %v1994_v2, 0.0  ;;  %v1886_v11 = vpack.c.bf16 %v1839_v22, %v1838_v47 }
 0x448   :  { %v2251_v55 = vpop.f32.mrf.mxu0  ;;  %v4535_v44 = vpop.f32.mrf.mxu1 }
 0x449   :  { %2035 = vmatmul.bf16.gmra.mxu3 %v1886_v11  ;;  %v2144_v49 = vpack.c.bf16 %v2088_v33, %v2087_v51  ;;  %v2252_v63 = vadd.f32 %v2251_v55, %v4538_v61 }
 0x44a   :  { %v1774_v25 = vpop.f32.mrf.mxu2 }
 0x44b   :  { %2290 = vmatmul.bf16.gmra.mxu0 %v2144_v49  ;;  %2419 = vmatmul.bf16.gmra.mxu1 %v2144_v49  ;;  %v1775_v43 = vadd.f32 %v1774_v25, %v4391_v9  ;;  %v2500_v50 = vmax.f32 %v2252_v63, 0.0 }
 0x44c   :  { %v1996_v15 = vpop.f32.mrf.mxu3 }
 0x44d   :  { %v1997_v3 = vadd.f32 %v1996_v15, %v4465_v57  ;;  %v1840_v53 = vmax.f32 %v1775_v43, 0.0 }
 0x44f   :  { %v2089_v13 = vmax.f32 %v1997_v3, 0.0 }
 0x450   :  { %v2253_v24 = vpop.f32.mrf.mxu0  ;;  %v4541_v37 = vpop.f32.mrf.mxu1 }
 0x451   :  { %v2254_v35 = vadd.f32 %v2253_v24, %v4538_v61 }
 0x452   :  { %v1776_v8 = vpop.f32.mrf.mxu2 }
 0x453   :  { %v2502_v40 = vmax.f32 %v2254_v35, 0.0  ;;  %v1777_v60 = vadd.f32 %v1776_v8, %v4391_v9 }
 0x454   :  { %v1998_v58 = vpop.f32.mrf.mxu3 }
 0x455   :  { %v2628_v6 = vpack.c.bf16 %v2502_v40, %v2500_v50  ;;  %v1841_v7 = vmax.f32 %v1777_v60, 0.0  ;;  %v1999_v54 = vadd.f32 %v1998_v58, %v4465_v57 }
 0x457   :  { %v2090_v14 = vmax.f32 %v1999_v54, 0.0  ;;  %2781 = vmatmul.bf16.vlgmr.msra.gmra.mxu2 %v2628_v6  ;;  %v1887_v17 = vpack.c.bf16 %v1841_v7, %v1840_v53 }
 0x458   :  { %v2256_v52 = vpop.f32.mrf.mxu0  ;;  %v4548_v38 = vpop.f32.mrf.mxu1 }
 0x459   :  { %2040 = vmatmul.bf16.gmra.mxu3 %v1887_v17  ;;  %v2145_v56 = vpack.c.bf16 %v2090_v14, %v2089_v13  ;;  %v2257_v27 = vadd.f32 %v2256_v52, %v4538_v61 }
 0x45a   :  { %v1779_v0 = vpop.f32.mrf.mxu2 }
 0x45b   :  { %2295 = vmatmul.bf16.gmra.mxu0 %v2145_v56  ;;  %2424 = vmatmul.bf16.gmra.mxu1 %v2145_v56  ;;  %v1780_v20 = vadd.f32 %v1779_v0, %v4391_v9  ;;  %v2504_v4 = vmax.f32 %v2257_v27, 0.0 }
 0x45c   :  { %v2001_v29 = vpop.f32.mrf.mxu3 }
 0x45d   :  { %v2002_v1 = vadd.f32 %v2001_v29, %v4465_v57  ;;  %v1842_v5 = vmax.f32 %v1780_v20, 0.0 }
 0x45f   :  { %v2091_v31 = vmax.f32 %v2002_v1, 0.0 }
 0x460   :  { %v2258_v39 = vpop.f32.mrf.mxu0  ;;  %v4555_v18 = vpop.f32.mrf.mxu1 }
 0x461   :  { %v2259_v16 = vadd.f32 %v2258_v39, %v4538_v61 }
 0x462   :  { %v1781_v36 = vpop.f32.mrf.mxu2 }
 0x463   :  { %v2506_v26 = vmax.f32 %v2259_v16, 0.0  ;;  %v1782_v62 = vadd.f32 %v1781_v36, %v4391_v9 }
 0x464   :  { %v2003_v42 = vpop.f32.mrf.mxu3 }
 0x465   :  { %v1843_v32 = vmax.f32 %v1782_v62, 0.0  ;;  %v2004_v10 = vadd.f32 %v2003_v42, %v4465_v57  ;;  %v2630_v30 = vpack.c.bf16 %v2506_v26, %v2504_v4 }
 0x467   :  { %v2092_v34 = vmax.f32 %v2004_v10, 0.0  ;;  %2786 = vmatmul.bf16.gmra.mxu2 %v2630_v30  ;;  %v1888_v12 = vpack.c.bf16 %v1843_v32, %v1842_v5 }
 0x468   :  { %v2261_v45 = vpop.f32.mrf.mxu0  ;;  %v4561_v19 = vpop.f32.mrf.mxu1 }
 0x469   :  { %2045 = vmatmul.bf16.gmra.mxu3 %v1888_v12  ;;  %v2146_v46 = vpack.c.bf16 %v2092_v34, %v2091_v31  ;;  %v2262_v21 = vadd.f32 %v2261_v45, %v4538_v61 }
 0x46a   :  { %v1784_v28 = vpop.f32.mrf.mxu2 }
 0x46b   :  { %2300 = vmatmul.bf16.gmra.mxu0 %v2146_v46  ;;  %2429 = vmatmul.bf16.gmra.mxu1 %v2146_v46  ;;  %v1785_v23 = vadd.f32 %v1784_v28, %v4391_v9  ;;  %v2508_v2 = vmax.f32 %v2262_v21, 0.0 }
 0x46c   :  { %v2006_v41 = vpop.f32.mrf.mxu3 }
 0x46d   :  { %v2007_v51 = vadd.f32 %v2006_v41, %v4465_v57  ;;  %v1844_v49 = vmax.f32 %v1785_v23, 0.0 }
 0x46f   :  { %v2093_v24 = vmax.f32 %v2007_v51, 0.0 }
 0x470   :  { %v2263_v48 = vpop.f32.mrf.mxu0  ;;  %v4569_v8 = vpop.f32.mrf.mxu1 }
 0x471   :  { %v2264_v47 = vadd.f32 %v2263_v48, %v4538_v61 }
 0x472   :  { %v1786_v22 = vpop.f32.mrf.mxu2 }
 0x473   :  { %v2510_v33 = vmax.f32 %v2264_v47, 0.0  ;;  %v1787_v11 = vadd.f32 %v1786_v22, %v4391_v9 }
 0x474   :  { %v2008_v55 = vpop.f32.mrf.mxu3 }
 0x475   :  { %v1845_v25 = vmax.f32 %v1787_v11, 0.0  ;;  %v2009_v15 = vadd.f32 %v2008_v55, %v4465_v57  ;;  %v2632_v63 = vpack.c.bf16 %v2510_v33, %v2508_v2 }
 0x477   :  { %v2094_v43 = vmax.f32 %v2009_v15, 0.0  ;;  %2791 = vmatmul.bf16.gmra.mxu2 %v2632_v63  ;;  %v1889_v35 = vpack.c.bf16 %v1845_v25, %v1844_v49 }
 0x478   :  { %v2266_v50 = vpop.f32.mrf.mxu0  ;;  %v4574_v54 = vpop.f32.mrf.mxu1 }
 0x479   :  { %2050 = vmatmul.bf16.gmra.mxu3 %v1889_v35  ;;  %v2147_v3 = vpack.c.bf16 %v2094_v43, %v2093_v24  ;;  %v2267_v58 = vadd.f32 %v2266_v50, %v4538_v61 }
 0x47a   :  { %v1789_v40 = vpop.f32.mrf.mxu2 }
 0x47b   :  { %2305 = vmatmul.bf16.gmra.mxu0 %v2147_v3  ;;  %2434 = vmatmul.bf16.gmra.mxu1 %v2147_v3  ;;  %v1790_v6 = vadd.f32 %v1789_v40, %v4391_v9  ;;  %v2512_v14 = vmax.f32 %v2267_v58, 0.0 }
 0x47c   :  { %v2011_v60 = vpop.f32.mrf.mxu3 }
 0x47d   :  { %v2012_v17 = vadd.f32 %v2011_v60, %v4465_v57  ;;  %v1846_v29 = vmax.f32 %v1790_v6, 0.0 }
 0x47f   :  { %v2095_v16 = vmax.f32 %v2012_v17, 0.0 }
 0x480   :  { %v2268_v53 = vpop.f32.mrf.mxu0  ;;  %v4579_v42 = vpop.f32.mrf.mxu1 }
 0x481   :  { %v2269_v7 = vadd.f32 %v2268_v53, %v4538_v61 }
 0x482   :  { %v1791_v13 = vpop.f32.mrf.mxu2 }
 0x483   :  { %v2514_v52 = vmax.f32 %v2269_v7, 0.0  ;;  %v1792_v56 = vadd.f32 %v1791_v13, %v4391_v9 }
 0x484   :  { %v2013_v0 = vpop.f32.mrf.mxu3 }
 0x485   :  { %v1847_v27 = vmax.f32 %v1792_v56, 0.0  ;;  %v2014_v39 = vadd.f32 %v2013_v0, %v4465_v57  ;;  %v2634_v20 = vpack.c.bf16 %v2514_v52, %v2512_v14 }
 0x487   :  { %v2096_v36 = vmax.f32 %v2014_v39, 0.0  ;;  %2796 = vmatmul.bf16.gmra.mxu2 %v2634_v20  ;;  %v1890_v4 = vpack.c.bf16 %v1847_v27, %v1846_v29 }
 0x488   :  { %v2271_v1 = vpop.f32.mrf.mxu0  ;;  %v4587_v47 = vpop.f32.mrf.mxu1 }
 0x489   :  { %2055 = vmatmul.bf16.gmra.mxu3 %v1890_v4  ;;  %v2148_v26 = vpack.c.bf16 %v2096_v36, %v2095_v16  ;;  %v2272_v32 = vadd.f32 %v2271_v1, %v4538_v61 }
 0x48a   :  { %v1794_v62 = vpop.f32.mrf.mxu2 }
 0x48b   :  { %2310 = vmatmul.bf16.gmra.mxu0 %v2148_v26  ;;  %2439 = vmatmul.bf16.gmra.mxu1 %v2148_v26  ;;  %v1795_v30 = vadd.f32 %v1794_v62, %v4391_v9  ;;  %v2516_v12 = vmax.f32 %v2272_v32, 0.0 }
 0x48c   :  { %v2016_v5 = vpop.f32.mrf.mxu3 }
 0x48d   :  { %v2017_v45 = vadd.f32 %v2016_v5, %v4465_v57  ;;  %v1848_v41 = vmax.f32 %v1795_v30, 0.0 }
 0x48f   :  { %v2097_v22 = vmax.f32 %v2017_v45, 0.0 }
 0x490   :  { %v2273_v10 = vpop.f32.mrf.mxu0  ;;  %v4590_v15 = vpop.f32.mrf.mxu1 }
 0x491   :  { %v2274_v31 = vadd.f32 %v2273_v10, %v4538_v61 }
 0x492   :  { %v1796_v34 = vpop.f32.mrf.mxu2 }
 0x493   :  { %v2518_v46 = vmax.f32 %v2274_v31, 0.0  ;;  %v1797_v28 = vadd.f32 %v1796_v34, %v4391_v9 }
 0x494   :  { %v2018_v59 = vpop.f32.mrf.mxu3 }
 0x495   :  { %v1849_v21 = vmax.f32 %v1797_v28, 0.0  ;;  %v2019_v48 = vadd.f32 %v2018_v59, %v4465_v57  ;;  %v2636_v23 = vpack.c.bf16 %v2518_v46, %v2516_v12 }
 0x497   :  { %v2098_v2 = vmax.f32 %v2019_v48, 0.0  ;;  %2801 = vmatmul.bf16.gmra.mxu2 %v2636_v23  ;;  %v1891_v51 = vpack.c.bf16 %v1849_v21, %v1848_v41 }
 0x498   :  { %v2276_v33 = vpop.f32.mrf.mxu0  ;;  %v4597_v29 = vpop.f32.mrf.mxu1 }
 0x499   :  { %2060 = vmatmul.bf16.gmra.mxu3 %v1891_v51  ;;  %v2149_v11 = vpack.c.bf16 %v2098_v2, %v2097_v22  ;;  %v2277_v25 = vadd.f32 %v2276_v33, %v4538_v61 }
 0x49a   :  { %v1799_v55 = vpop.f32.mrf.mxu2 }
 0x49b   :  { %2315 = vmatmul.bf16.gmra.mxu0 %v2149_v11  ;;  %2444 = vmatmul.bf16.gmra.mxu1 %v2149_v11  ;;  %v1800_v24 = vadd.f32 %v1799_v55, %v4391_v9  ;;  %v2520_v50 = vmax.f32 %v2277_v25, 0.0 }
 0x49c   :  { %v2021_v49 = vpop.f32.mrf.mxu3 }
 0x49d   :  { %v2022_v3 = vadd.f32 %v2021_v49, %v4465_v57  ;;  %v1850_v53 = vmax.f32 %v1800_v24, 0.0 }
 0x49f   :  { %v2099_v14 = vmax.f32 %v2022_v3, 0.0 }
 0x4a0   :  { %v2278_v63 = vpop.f32.mrf.mxu0  ;;  %v4611_v10 = vpop.f32.mrf.mxu1 }
 0x4a1   :  { %v2279_v43 = vadd.f32 %v2278_v63, %v4538_v61 }
 0x4a2   :  { %v1801_v35 = vpop.f32.mrf.mxu2 }
 0x4a3   :  { %v2522_v40 = vmax.f32 %v2279_v43, 0.0  ;;  %v1802_v60 = vadd.f32 %v1801_v35, %v4391_v9  ;;  %v3639_v9 = vld [vmem:[%s4921_s4 + $0x8] sm:$0xff] }
 0x4a4   :  { %v2023_v58 = vpop.f32.mrf.mxu3  ;;  %v4602_v39 = vperm.slane %v3639_v9, 6 }
 0x4a5   :  { %v1851_v6 = vmax.f32 %v1802_v60, 0.0  ;;  %v2024_v7 = vadd.f32 %v2023_v58, %v4465_v57  ;;  %v2638_v13 = vpack.c.bf16 %v2522_v40, %v2520_v50 }
 0x4a6   :  { %v2383_v20 = vadd.f32 %v4541_v37, %v4602_v39  ;;  %v2381_v4 = vadd.f32 %v4535_v44, %v4602_v39  ;;  %v2388_v21 = vadd.f32 %v4555_v18, %v4602_v39  ;;  %v2386_v22 = vadd.f32 %v4548_v38, %v4602_v39 }
 0x4a7   :  { %v2100_v17 = vmax.f32 %v2024_v7, 0.0  ;;  %2806 = vmatmul.bf16.gmra.mxu2 %v2638_v13  ;;  %v1892_v52 = vpack.c.bf16 %v1851_v6, %v1850_v53  ;;  %v2393_v60 = vadd.f32 %v4569_v8, %v4602_v39  ;;  %v2391_v6 = vadd.f32 %v4561_v19, %v4602_v39 }
 0x4a8   :  { %v2281_v56 = vpop.f32.mrf.mxu0  ;;  %v2503_v26 = vmax.f32 %v2383_v20, 0.0  ;;  %v2501_v31 = vmax.f32 %v2381_v4, 0.0  ;;  %v4614_v41 = vpop.f32.mrf.mxu1  ;;  %v2507_v51 = vmax.f32 %v2388_v21, 0.0  ;;  %v2505_v25 = vmax.f32 %v2386_v22, 0.0 }
 0x4a9   :  { %2065 = vmatmul.bf16.gmra.mxu3 %v1892_v52  ;;  %v2150_v0 = vpack.c.bf16 %v2100_v17, %v2099_v14  ;;  %v2282_v16 = vadd.f32 %v2281_v56, %v4538_v61  ;;  %v2511_v14 = vmax.f32 %v2393_v60, 0.0 }
 0x4aa   :  { %v2629_v12 = vpack.c.bf16 %v2503_v26, %v2501_v31  ;;  %v2631_v35 = vpack.c.bf16 %v2507_v51, %v2505_v25  ;;  %v2396_v31 = vadd.f32 %v4574_v54, %v4602_v39 }
 0x4ab   :  { %2320 = vmatmul.bf16.gmra.mxu0 %v2150_v0  ;;  %2449 = vmatmul.bf16.gmra.mxu1 %v2150_v0  ;;  %v2524_v62 = vmax.f32 %v2282_v16, 0.0 }
 0x4ac   :  { %v2026_v27 = vpop.f32.mrf.mxu3 }
 0x4ad   :  { %v2027_v5 = vadd.f32 %v2026_v27, %v4465_v57  ;;  %v2509_v27 = vmax.f32 %v2391_v6, 0.0 }
 0x4af   :  { %v2101_v45 = vmax.f32 %v2027_v5, 0.0  ;;  %v2398_v5 = vadd.f32 %v4579_v42, %v4602_v39 }
 0x4b0   :  { %v2283_v36 = vpop.f32.mrf.mxu0  ;;  %v4624_v50 = vpop.f32.mrf.mxu1 }
 0x4b1   :  { %v2284_v1 = vadd.f32 %v2283_v36, %v4538_v61  ;;  %v2633_v36 = vpack.c.bf16 %v2511_v14, %v2509_v27 }
 0x4b3   :  { %v2526_v32 = vmax.f32 %v2284_v1, 0.0 }
 0x4b4   :  { %v2028_v30 = vpop.f32.mrf.mxu3 }
 0x4b5   :  { %v2029_v34 = vadd.f32 %v2028_v30, %v4465_v57  ;;  %v2640_v37 = vpack.c.bf16 %v2526_v32, %v2524_v62 }
 0x4b7   :  { %v2102_v46 = vmax.f32 %v2029_v34, 0.0  ;;  %2811 = vmatmul.bf16.gmra.mxu2 %v2640_v37  ;;  %v2515_v37 = vmax.f32 %v2398_v5, 0.0 }
 0x4b8   :  { %v2286_v28 = vpop.f32.mrf.mxu0  ;;  %v4632_v13 = vpop.f32.mrf.mxu1 }
 0x4b9   :  { %2910 = vmatmul.bf16.vlgmr.msra.gmra.mxu3 %v2629_v12  ;;  %v2151_v44 = vpack.c.bf16 %v2102_v46, %v2101_v45  ;;  %v2287_v48 = vadd.f32 %v2286_v28, %v4538_v61 }
 0x4bb   :  { %2325 = vmatmul.bf16.gmra.mxu0 %v2151_v44  ;;  %2454 = vmatmul.bf16.gmra.mxu1 %v2151_v44  ;;  %v2528_v33 = vmax.f32 %v2287_v48, 0.0 }
 0x4bc   :  { %v2031_v59 = vpop.f32.mrf.mxu3 }
 0x4bd   :  { %v2032_v11 = vadd.f32 %v2031_v59, %v4465_v57  ;;  %v2513_v59 = vmax.f32 %v2396_v31, 0.0 }
 0x4bf   :  { %v2103_v43 = vmax.f32 %v2032_v11, 0.0  ;;  %v2635_v54 = vpack.c.bf16 %v2515_v37, %v2513_v59 }
 0x4c0   :  { %v2288_v23 = vpop.f32.mrf.mxu0  ;;  %v4638_v26 = vpop.f32.mrf.mxu1 }
 0x4c1   :  { %v2289_v2 = vadd.f32 %v2288_v23, %v4538_v61 }
 0x4c3   :  { %v2530_v55 = vmax.f32 %v2289_v2, 0.0 }
 0x4c4   :  { %v2033_v49 = vpop.f32.mrf.mxu3 }
 0x4c5   :  { %v2034_v63 = vadd.f32 %v2033_v49, %v4465_v57  ;;  %v2642_v24 = vpack.c.bf16 %v2530_v55, %v2528_v33  ;;  %v2403_v55 = vadd.f32 %v4590_v15, %v4602_v39 }
 0x4c7   :  { %v2104_v18 = vmax.f32 %v2034_v63, 0.0  ;;  %2816 = vmatmul.bf16.gmra.mxu2 %v2642_v24  ;;  %v2401_v24 = vadd.f32 %v4587_v47, %v4602_v39 }
 0x4c8   :  { %v2291_v3 = vpop.f32.mrf.mxu0  ;;  %v4650_v48 = vpop.f32.mrf.mxu1 }
 0x4c9   :  { %2915 = vmatmul.bf16.gmra.mxu3 %v2631_v35  ;;  %v2152_v38 = vpack.c.bf16 %v2104_v18, %v2103_v43  ;;  %v2292_v58 = vadd.f32 %v2291_v3, %v4538_v61  ;;  %v2519_v18 = vmax.f32 %v2403_v55, 0.0  ;;  %v2517_v60 = vmax.f32 %v2401_v24, 0.0 }
 0x4cb   :  { %2330 = vmatmul.bf16.gmra.mxu0 %v2152_v38  ;;  %2459 = vmatmul.bf16.gmra.mxu1 %v2152_v38  ;;  %v2532_v17 = vmax.f32 %v2292_v58, 0.0 }
 0x4cc   :  { %v2036_v40 = vpop.f32.mrf.mxu3 }
 0x4cd   :  { %v2037_v52 = vadd.f32 %v2036_v40, %v4465_v57 }
 0x4cf   :  { %v2105_v20 = vmax.f32 %v2037_v52, 0.0 }
 0x4d0   :  { %v2293_v53 = vpop.f32.mrf.mxu0  ;;  %v4657_v25 = vpop.f32.mrf.mxu1 }
 0x4d1   :  { %v2294_v7 = vadd.f32 %v2293_v53, %v4538_v61 }
 0x4d3   :  { %v2534_v56 = vmax.f32 %v2294_v7, 0.0  ;;  %v2637_v7 = vpack.c.bf16 %v2519_v18, %v2517_v60 }
 0x4d4   :  { %v2038_v0 = vpop.f32.mrf.mxu3 }
 0x4d5   :  { %v2039_v9 = vadd.f32 %v2038_v0, %v4465_v57  ;;  %v2644_v8 = vpack.c.bf16 %v2534_v56, %v2532_v17  ;;  %v2408_v0 = vadd.f32 %v4611_v10, %v4602_v39 }
 0x4d7   :  { %v2106_v16 = vmax.f32 %v2039_v9, 0.0  ;;  %2821 = vmatmul.bf16.gmra.mxu2 %v2644_v8  ;;  %v2406_v8 = vadd.f32 %v4597_v29, %v4602_v39 }
 0x4d8   :  { %v2296_v4 = vpop.f32.mrf.mxu0  ;;  %v4666_v52 = vpop.f32.mrf.mxu1 }
 0x4d9   :  { %2920 = vmatmul.bf16.gmra.mxu3 %v2633_v36  ;;  %v2153_v19 = vpack.c.bf16 %v2106_v16, %v2105_v20  ;;  %v2297_v32 = vadd.f32 %v2296_v4, %v4538_v61  ;;  %v2523_v36 = vmax.f32 %v2408_v0, 0.0 }
 0x4da   :  { %v4636_v1 = vpop.f32.mrf.mxu2 }
 0x4db   :  { %2335 = vmatmul.bf16.gmra.mxu0 %v2153_v19  ;;  %2464 = vmatmul.bf16.gmra.mxu1 %v2153_v19  ;;  %v2536_v12 = vmax.f32 %v2297_v32, 0.0 }
 0x4dc   :  { %v2041_v62 = vpop.f32.mrf.mxu3 }
 0x4dd   :  { %v2042_v45 = vadd.f32 %v2041_v62, %v4465_v57 }
 0x4df   :  { %v2107_v23 = vmax.f32 %v2042_v45, 0.0 }
 0x4e0   :  { %v2298_v30 = vpop.f32.mrf.mxu0  ;;  %v4677_v5 = vpop.f32.mrf.mxu1 }
 0x4e1   :  { %v2299_v34 = vadd.f32 %v2298_v30, %v4538_v61  ;;  %v2521_v30 = vmax.f32 %v2406_v8, 0.0 }
 0x4e2   :  { %v4647_v28 = vpop.f32.mrf.mxu2 }
 0x4e3   :  { %v2538_v46 = vmax.f32 %v2299_v34, 0.0  ;;  %v2639_v29 = vpack.c.bf16 %v2523_v36, %v2521_v30 }
 0x4e4   :  { %v2043_v44 = vpop.f32.mrf.mxu3 }
 0x4e5   :  { %v2044_v21 = vadd.f32 %v2043_v44, %v4465_v57  ;;  %v2646_v42 = vpack.c.bf16 %v2538_v46, %v2536_v12 }
 0x4e7   :  { %v2108_v22 = vmax.f32 %v2044_v21, 0.0  ;;  %2826 = vmatmul.bf16.gmra.mxu2 %v2646_v42  ;;  %v2413_v21 = vadd.f32 %v4624_v50, %v4602_v39 }
 0x4e8   :  { %v2301_v2 = vpop.f32.mrf.mxu0  ;;  %v4682_v59 = vpop.f32.mrf.mxu1 }
 0x4e9   :  { %2925 = vmatmul.bf16.gmra.mxu3 %v2635_v54  ;;  %v2154_v51 = vpack.c.bf16 %v2108_v22, %v2107_v23  ;;  %v2302_v49 = vadd.f32 %v2301_v2, %v4538_v61  ;;  %v2411_v22 = vadd.f32 %v4614_v41, %v4602_v39  ;;  %v2527_v2 = vmax.f32 %v2413_v21, 0.0 }
 0x4ea   :  { %v4652_v11 = vpop.f32.mrf.mxu2 }
 0x4eb   :  { %2340 = vmatmul.bf16.gmra.mxu0 %v2154_v51  ;;  %2469 = vmatmul.bf16.gmra.mxu1 %v2154_v51  ;;  %v2540_v35 = vmax.f32 %v2302_v49, 0.0 }
 0x4ec   :  { %v2046_v33 = vpop.f32.mrf.mxu3 }
 0x4ed   :  { %v2047_v3 = vadd.f32 %v2046_v33, %v4465_v57 }
 0x4ef   :  { %v2109_v53 = vmax.f32 %v2047_v3, 0.0 }
 0x4f0   :  { %v2303_v63 = vpop.f32.mrf.mxu0 }
 0x4f1   :  { %v2304_v43 = vadd.f32 %v2303_v63, %v4538_v61  ;;  %v2525_v63 = vmax.f32 %v2411_v22, 0.0 }
 0x4f2   :  { %v4664_v14 = vpop.f32.mrf.mxu2 }
 0x4f3   :  { %v2542_v38 = vmax.f32 %v2304_v43, 0.0  ;;  %v2641_v3 = vpack.c.bf16 %v2527_v2, %v2525_v63 }
 0x4f4   :  { %v2048_v40 = vpop.f32.mrf.mxu3 }
 0x4f5   :  { %v2049_v58 = vadd.f32 %v2048_v40, %v4465_v57  ;;  %v2648_v15 = vpack.c.bf16 %v2542_v38, %v2540_v35  ;;  %v4694_v38 = vpop.f32.mrf.mxu1 }
 0x4f7   :  { %v2110_v6 = vmax.f32 %v2049_v58, 0.0  ;;  %2831 = vmatmul.bf16.gmra.mxu2 %v2648_v15  ;;  %v2418_v58 = vadd.f32 %v4638_v26, %v4602_v39 }
 0x4f8   :  { %v2306_v17 = vpop.f32.mrf.mxu0 }
 0x4f9   :  { %2930 = vmatmul.bf16.gmra.mxu3 %v2637_v7  ;;  %v2155_v47 = vpack.c.bf16 %v2110_v6, %v2109_v53  ;;  %v2307_v27 = vadd.f32 %v2306_v17, %v4538_v61  ;;  %v2416_v7 = vadd.f32 %v4632_v13, %v4602_v39 }
 0x4fa   :  { %v4674_v16 = vpop.f32.mrf.mxu2 }
 0x4fb   :  { %2345 = vmatmul.bf16.gmra.mxu0 %v2155_v47  ;;  %2474 = vmatmul.bf16.gmra.mxu1 %v2155_v47  ;;  %v2544_v4 = vmax.f32 %v2307_v27, 0.0 }
 0x4fc   :  { %v2051_v56 = vpop.f32.mrf.mxu3 }
 0x4fd   :  { %v2052_v19 = vadd.f32 %v2051_v56, %v4465_v57  ;;  %v4704_v47 = vpop.f32.mrf.mxu1  ;;  %v2531_v56 = vmax.f32 %v2418_v58, 0.0 }
 0x4ff   :  { %v2111_v34 = vmax.f32 %v2052_v19, 0.0 }
 0x500   :  { %v2308_v9 = vpop.f32.mrf.mxu0 }
 0x501   :  { %v2309_v20 = vadd.f32 %v2308_v9, %v4538_v61 }
 0x502   :  { %v4680_v46 = vpop.f32.mrf.mxu2 }
 0x503   :  { %v2546_v62 = vmax.f32 %v2309_v20, 0.0  ;;  %v2529_v20 = vmax.f32 %v2416_v7, 0.0  ;;  %v2426_v7 = vadd.f32 %v4666_v52, %v4602_v39 }
 0x504   :  { %v2053_v32 = vpop.f32.mrf.mxu3 }
 0x505   :  { %v2054_v10 = vadd.f32 %v2053_v32, %v4465_v57  ;;  %v2650_v31 = vpack.c.bf16 %v2546_v62, %v2544_v4  ;;  %v2643_v62 = vpack.c.bf16 %v2531_v56, %v2529_v20 }
 0x507   :  { %v2112_v37 = vmax.f32 %v2054_v10, 0.0  ;;  %2836 = vmatmul.bf16.gmra.mxu2 %v2650_v31  ;;  %v4710_v10 = vpop.f32.mrf.mxu1 }
 0x508   :  { %v2311_v12 = vpop.f32.mrf.mxu0 }
 0x509   :  { %2935 = vmatmul.bf16.gmra.mxu3 %v2639_v29  ;;  %v2156_v45 = vpack.c.bf16 %v2112_v37, %v2111_v34  ;;  %v2312_v42 = vadd.f32 %v2311_v12, %v4538_v61  ;;  %v2423_v34 = vadd.f32 %v4657_v25, %v4602_v39  ;;  %v2421_v12 = vadd.f32 %v4650_v48, %v4602_v39  ;;  %v3640_v48 = vld [vmem:[%s4921_s4] sm:$0xff] }
 0x50a   :  { %v4692_v18 = vpop.f32.mrf.mxu2 }
 0x50b   :  { %2350 = vmatmul.bf16.gmra.mxu0 %v2156_v45  ;;  %2479 = vmatmul.bf16.gmra.mxu1 %v2156_v45  ;;  %v2548_v51 = vmax.f32 %v2312_v42, 0.0  ;;  %v2533_v2 = vmax.f32 %v2421_v12, 0.0 }
 0x50c   :  { %v2056_v44 = vpop.f32.mrf.mxu3 }
 0x50d   :  { %v2057_v33 = vadd.f32 %v2056_v44, %v4465_v57  ;;  %v2535_v44 = vmax.f32 %v2423_v34, 0.0 }
 0x50f   :  { %v2113_v50 = vmax.f32 %v2057_v33, 0.0  ;;  %v4722_v33 = vpop.f32.mrf.mxu1 }
 0x510   :  { %v2313_v23 = vpop.f32.mrf.mxu0 }
 0x511   :  { %v2314_v54 = vadd.f32 %v2313_v23, %v4538_v61 }
 0x512   :  { %v4699_v53 = vpop.f32.mrf.mxu2 }
 0x513   :  { %v2550_v55 = vmax.f32 %v2314_v54, 0.0 }
 0x514   :  { %v2058_v49 = vpop.f32.mrf.mxu3 }
 0x515   :  { %v2652_v24 = vpack.c.bf16 %v2550_v55, %v2548_v51  ;;  %v2059_v43 = vadd.f32 %v2058_v49, %v4465_v57  ;;  %v4727_v55 = vperm.slane %v3640_v48, 7 }
 0x517   :  { %v2114_v35 = vmax.f32 %v2059_v43, 0.0  ;;  %2841 = vmatmul.bf16.gmra.mxu2 %v2652_v24  ;;  %v2645_v24 = vpack.c.bf16 %v2535_v44, %v2533_v2  ;;  %v2785_v56 = vadd.f32 %v4647_v28, %v4727_v55 }
 0x518   :  { %v2316_v41 = vpop.f32.mrf.mxu0 }
 0x519   :  { %2940 = vmatmul.bf16.gmra.mxu3 %v2641_v3  ;;  %v2157_v40 = vpack.c.bf16 %v2114_v35, %v2113_v50  ;;  %v2317_v15 = vadd.f32 %v2316_v41, %v4538_v61  ;;  %v2783_v35 = vadd.f32 %v4636_v1, %v4727_v55 }
 0x51a   :  { %v4708_v30 = vpop.f32.mrf.mxu2 }
 0x51b   :  { %2355 = vmatmul.bf16.gmra.mxu0 %v2157_v40  ;;  %2484 = vmatmul.bf16.gmra.mxu1 %v2157_v40  ;;  %v2552_v0 = vmax.f32 %v2317_v15, 0.0  ;;  %v2428_v40 = vadd.f32 %v4677_v5, %v4602_v39  ;;  %v4736_v15 = vpop.f32.mrf.mxu1  ;;  %v2537_v5 = vmax.f32 %v2426_v7, 0.0 }
 0x51c   :  { %v2061_v60 = vpop.f32.mrf.mxu3 }
 0x51d   :  { %v2062_v27 = vadd.f32 %v2061_v60, %v4465_v57 }
 0x51f   :  { %v2115_v4 = vmax.f32 %v2062_v27, 0.0 }
 0x520   :  { %v2318_v6 = vpop.f32.mrf.mxu0 }
 0x521   :  { %v2319_v17 = vadd.f32 %v2318_v6, %v4538_v61 }
 0x522   :  { %v4719_v22 = vpop.f32.mrf.mxu2 }
 0x523   :  { %v2554_v9 = vmax.f32 %v2319_v17, 0.0  ;;  %v2539_v17 = vmax.f32 %v2428_v40, 0.0  ;;  %v4745_v52 = vpop.f32.mrf.mxu1  ;;  %v2436_v40 = vadd.f32 %v4704_v47, %v4602_v39 }
 0x524   :  { %v2063_v8 = vpop.f32.mrf.mxu3 }
 0x525   :  { %v2654_v26 = vpack.c.bf16 %v2554_v9, %v2552_v0  ;;  %v2064_v36 = vadd.f32 %v2063_v8, %v4465_v57 }
 0x527   :  { %v2116_v19 = vmax.f32 %v2064_v36, 0.0  ;;  %2846 = vmatmul.bf16.gmra.mxu2 %v2654_v26  ;;  %v2647_v36 = vpack.c.bf16 %v2539_v17, %v2537_v5  ;;  %v2545_v17 = vmax.f32 %v2436_v40, 0.0 }
 0x528   :  { %v2321_v32 = vpop.f32.mrf.mxu0 }
 0x529   :  { %2945 = vmatmul.bf16.gmra.mxu3 %v2643_v62  ;;  %v2158_v13 = vpack.c.bf16 %v2116_v19, %v2115_v4  ;;  %v2322_v37 = vadd.f32 %v2321_v32, %v4538_v61  ;;  %v2788_v62 = vadd.f32 %v4652_v11, %v4727_v55  ;;  %v2790_v11 = vadd.f32 %v4664_v14, %v4727_v55 }
 0x52a   :  { %v4731_v41 = vpop.f32.mrf.mxu2 }
 0x52b   :  { %2360 = vmatmul.bf16.gmra.mxu0 %v2158_v13  ;;  %2489 = vmatmul.bf16.gmra.mxu1 %v2158_v13  ;;  %v2556_v21 = vmax.f32 %v2322_v37, 0.0  ;;  %v2433_v13 = vadd.f32 %v4694_v38, %v4602_v39 }
 0x52c   :  { %v2066_v31 = vpop.f32.mrf.mxu3 }
 0x52d   :  { %v2067_v42 = vadd.f32 %v2066_v31, %v4465_v57  ;;  %v2543_v44 = vmax.f32 %v2433_v13, 0.0 }
 0x52f   :  { %v2117_v49 = vmax.f32 %v2067_v42, 0.0 }
 0x530   :  { %v2323_v29 = vpop.f32.mrf.mxu0 }
 0x531   :  { %v2324_v45 = vadd.f32 %v2323_v29, %v4538_v61  ;;  %v2431_v29 = vadd.f32 %v4682_v59, %v4602_v39 }
 0x532   :  { %v4743_v4 = vpop.f32.mrf.mxu2 }
 0x533   :  { %v2558_v23 = vmax.f32 %v2324_v45, 0.0 }
 0x534   :  { %v2068_v54 = vpop.f32.mrf.mxu3 }
 0x535   :  { %v2656_v51 = vpack.c.bf16 %v2558_v23, %v2556_v21  ;;  %v2069_v25 = vadd.f32 %v2068_v54, %v4465_v57  ;;  %v4759_v23 = vpop.f32.mrf.mxu1  ;;  %v2541_v54 = vmax.f32 %v2431_v29, 0.0 }
 0x537   :  { %v2118_v63 = vmax.f32 %v2069_v25, 0.0  ;;  %2851 = vmatmul.bf16.gmra.mxu2 %v2656_v51  ;;  %v2649_v59 = vpack.c.bf16 %v2543_v44, %v2541_v54  ;;  %v2803_v54 = vadd.f32 %v4708_v30, %v4727_v55  ;;  %v2805_v30 = vadd.f32 %v4719_v22, %v4727_v55 }
 0x538   :  { %v2326_v43 = vpop.f32.mrf.mxu0 }
 0x539   :  { %2950 = vmatmul.bf16.gmra.mxu3 %v2645_v24  ;;  %v2159_v50 = vpack.c.bf16 %v2118_v63, %v2117_v49  ;;  %v2327_v60 = vadd.f32 %v2326_v43, %v4538_v61  ;;  %v2793_v49 = vadd.f32 %v4674_v16, %v4727_v55 }
 0x53a   :  { %v4755_v45 = vpop.f32.mrf.mxu2 }
 0x53b   :  { %2365 = vmatmul.bf16.gmra.mxu0 %v2159_v50  ;;  %2494 = vmatmul.bf16.gmra.mxu1 %v2159_v50  ;;  %v2560_v0 = vmax.f32 %v2327_v60, 0.0  ;;  %v2438_v50 = vadd.f32 %v4710_v10, %v4602_v39 }
 0x53c   :  { %v2911_v57 = vpop.f32.mrf.mxu3 }
 0x53d   :  { %v2912_v3 = vadd.f32 %v2911_v57, %v2783_v35  ;;  %v4765_v43 = vpop.f32.mrf.mxu1  ;;  %v2547_v16 = vmax.f32 %v2438_v50, 0.0 }
 0x53f   :  { %v3031_v58 = vmax.f32 %v2912_v3, 0.0 }
 0x540   :  { %v2328_v6 = vpop.f32.mrf.mxu0 }
 0x541   :  { %3079 = vst [vmem:[#allocation6] sm:$0xff] %v3031_v58  ;;  %v2329_v1 = vadd.f32 %v2328_v6, %v4538_v61  ;;  %v2795_v58 = vadd.f32 %v4680_v46, %v4727_v55 }
 0x542   :  { %v4763_v63 = vpop.f32.mrf.mxu2 }
 0x543   :  { %v2562_v27 = vmax.f32 %v2329_v1, 0.0 }
 0x544   :  { %v2913_v9 = vpop.f32.mrf.mxu3 }
 0x545   :  { %v2658_v8 = vpack.c.bf16 %v2562_v27, %v2560_v0  ;;  %v2914_v20 = vadd.f32 %v2913_v9, %v2785_v56  ;;  %v2651_v9 = vpack.c.bf16 %v2547_v16, %v2545_v17  ;;  %v2452_v5 = vpop.f32.mrf.mxu1 }
 0x547   :  { %v3032_v26 = vmax.f32 %v2914_v20, 0.0  ;;  %2856 = vmatmul.bf16.gmra.mxu2 %v2658_v8  ;;  %v2798_v8 = vadd.f32 %v4692_v18, %v4727_v55 }
 0x548   :  { %v2331_v19 = vpop.f32.mrf.mxu0 }
 0x549   :  { %3080 = vst [vmem:[#allocation6 + $0x8] sm:$0xff] %v3032_v26  ;;  %2955 = vmatmul.bf16.gmra.mxu3 %v2647_v36  ;;  %v2332_v31 = vadd.f32 %v2331_v19, %v4538_v61  ;;  %v2443_v26 = vadd.f32 %v4736_v15, %v4602_v39 }
 0x54a   :  { %v4775_v0 = vpop.f32.mrf.mxu2 }
 0x54b   :  { %v2564_v21 = vmax.f32 %v2332_v31, 0.0  ;;  %v2551_v18 = vmax.f32 %v2443_v26, 0.0 }
 0x54c   :  { %v2916_v28 = vpop.f32.mrf.mxu3 }
 0x54d   :  { %v2917_v32 = vadd.f32 %v2916_v28, %v2788_v62  ;;  %v4787_v31 = vpop.f32.mrf.mxu1 }
 0x54f   :  { %v3033_v34 = vmax.f32 %v2917_v32, 0.0  ;;  %v2441_v32 = vadd.f32 %v4722_v33, %v4602_v39 }
 0x550   :  { %v2333_v37 = vpop.f32.mrf.mxu0 }
 0x551   :  { %3081 = vst [vmem:[#allocation6 + $0x10] sm:$0xff] %v3033_v34  ;;  %v2334_v12 = vadd.f32 %v2333_v37, %v4538_v61  ;;  %v2800_v34 = vadd.f32 %v4699_v53, %v4727_v55 }
 0x552   :  { %v4782_v62 = vpop.f32.mrf.mxu2 }
 0x553   :  { %v2566_v42 = vmax.f32 %v2334_v12, 0.0  ;;  %v2549_v12 = vmax.f32 %v2441_v32, 0.0 }
 0x554   :  { %v2918_v38 = vpop.f32.mrf.mxu3 }
 0x555   :  { %v2660_v2 = vpack.c.bf16 %v2566_v42, %v2564_v21  ;;  %v2919_v51 = vadd.f32 %v2918_v38, %v2790_v11  ;;  %v2653_v21 = vpack.c.bf16 %v2551_v18, %v2549_v12 }
 0x557   :  { %v3034_v25 = vmax.f32 %v2919_v51, 0.0  ;;  %2861 = vmatmul.bf16.gmra.mxu2 %v2660_v2  ;;  %v2457_v2 = vpop.f32.mrf.mxu1 }
 0x558   :  { %v2336_v48 = vpop.f32.mrf.mxu0 }
 0x559   :  { %3082 = vst [vmem:[#allocation6 + $0x18] sm:$0xff] %v3034_v25  ;;  %2960 = vmatmul.bf16.gmra.mxu3 %v2649_v59  ;;  %v2337_v35 = vadd.f32 %v2336_v48, %v4538_v61  ;;  %v2448_v25 = vadd.f32 %v4759_v23, %v4602_v39 }
 0x55a   :  { %v4791_v33 = vpop.f32.mrf.mxu2 }
 0x55b   :  { %v2568_v6 = vmax.f32 %v2337_v35, 0.0  ;;  %v2555_v50 = vmax.f32 %v2448_v25, 0.0 }
 0x55c   :  { %v2921_v14 = vpop.f32.mrf.mxu3 }
 0x55d   :  { %v2922_v24 = vadd.f32 %v2921_v14, %v2793_v49  ;;  %v2446_v14 = vadd.f32 %v4745_v52, %v4602_v39 }
 0x55f   :  { %v3035_v57 = vmax.f32 %v2922_v24, 0.0  ;;  %v2553_v23 = vmax.f32 %v2446_v14, 0.0 }
 0x560   :  { %v2338_v3 = vpop.f32.mrf.mxu0 }
 0x561   :  { %3083 = vst [vmem:[#allocation6 + $0x20] sm:$0xff] %v3035_v57  ;;  %v2339_v60 = vadd.f32 %v2338_v3, %v4538_v61 }
 0x562   :  { %v4803_v3 = vpop.f32.mrf.mxu2 }
 0x563   :  { %v2570_v7 = vmax.f32 %v2339_v60, 0.0 }
 0x564   :  { %v2923_v1 = vpop.f32.mrf.mxu3 }
 0x565   :  { %v2662_v56 = vpack.c.bf16 %v2570_v7, %v2568_v6  ;;  %v2924_v10 = vadd.f32 %v2923_v1, %v2795_v58  ;;  %v4805_v58 = vpop.f32.mrf.mxu1  ;;  %v2655_v6 = vpack.c.bf16 %v2555_v50, %v2553_v23  ;;  %v2808_v1 = vadd.f32 %v4731_v41, %v4727_v55 }
 0x566   :  { %v2810_v41 = vadd.f32 %v4743_v4, %v4727_v55 }
 0x567   :  { %v3036_v27 = vmax.f32 %v2924_v10, 0.0  ;;  %2866 = vmatmul.bf16.gmra.mxu2 %v2662_v56  ;;  %v2453_v10 = vadd.f32 %v2452_v5, %v4602_v39 }
 0x568   :  { %v2341_v47 = vpop.f32.mrf.mxu0 }
 0x569   :  { %3084 = vst [vmem:[#allocation6 + $0x28] sm:$0xff] %v3036_v27  ;;  %2965 = vmatmul.bf16.gmra.mxu3 %v2651_v9  ;;  %v2342_v36 = vadd.f32 %v2341_v47, %v4538_v61  ;;  %v2559_v26 = vmax.f32 %v2453_v10, 0.0 }
 0x56a   :  { %v4809_v56 = vpop.f32.mrf.mxu2 }
 0x56b   :  { %v2572_v37 = vmax.f32 %v2342_v36, 0.0 }
 0x56c   :  { %v2926_v20 = vpop.f32.mrf.mxu3 }
 0x56d   :  { %v2927_v46 = vadd.f32 %v2926_v20, %v2798_v8  ;;  %v2462_v47 = vpop.f32.mrf.mxu1  ;;  %v2451_v20 = vadd.f32 %v4765_v43, %v4602_v39 }
 0x56f   :  { %v3037_v19 = vmax.f32 %v2927_v46, 0.0  ;;  %v2557_v32 = vmax.f32 %v2451_v20, 0.0 }
 0x570   :  { %v2343_v28 = vpop.f32.mrf.mxu0 }
 0x571   :  { %3085 = vst [vmem:[#allocation6 + $0x30] sm:$0xff] %v3037_v19  ;;  %v2344_v13 = vadd.f32 %v2343_v28, %v4538_v61  ;;  %v2657_v18 = vpack.c.bf16 %v2559_v26, %v2557_v32 }
 0x573   :  { %v2574_v15 = vmax.f32 %v2344_v13, 0.0 }
 0x574   :  { %v2928_v29 = vpop.f32.mrf.mxu3 }
 0x575   :  { %v2664_v44 = vpack.c.bf16 %v2574_v15, %v2572_v37  ;;  %v2929_v11 = vadd.f32 %v2928_v29, %v2800_v34  ;;  %v4818_v37 = vpop.f32.mrf.mxu2  ;;  %v4820_v43 = vpop.f32.mrf.mxu1  ;;  %v2813_v29 = vadd.f32 %v4755_v45, %v4727_v55  ;;  %v2815_v45 = vadd.f32 %v4763_v63, %v4727_v55 }
 0x577   :  { %v3038_v42 = vmax.f32 %v2929_v11, 0.0  ;;  %2871 = vmatmul.bf16.gmra.mxu2 %v2664_v44  ;;  %v2458_v44 = vadd.f32 %v2457_v2, %v4602_v39 }
 0x578   :  { %v2346_v38 = vpop.f32.mrf.mxu0 }
 0x579   :  { %3086 = vst [vmem:[#allocation6 + $0x38] sm:$0xff] %v3038_v42  ;;  %2970 = vmatmul.bf16.gmra.mxu3 %v2653_v21  ;;  %v2347_v59 = vadd.f32 %v2346_v38, %v4538_v61  ;;  %v2456_v38 = vadd.f32 %v4787_v31, %v4602_v39 }
 0x57b   :  { %v2576_v35 = vmax.f32 %v2347_v59, 0.0 }
 0x57c   :  { %v2931_v51 = vpop.f32.mrf.mxu3 }
 0x57d   :  { %v2932_v53 = vadd.f32 %v2931_v51, %v2803_v54  ;;  %v4829_v51 = vpop.f32.mrf.mxu2 }
 0x57f   :  { %v3039_v48 = vmax.f32 %v2932_v53, 0.0  ;;  %v2563_v53 = vmax.f32 %v2458_v44, 0.0 }
 0x580   :  { %v2348_v49 = vpop.f32.mrf.mxu0 }
 0x581   :  { %3087 = vst [vmem:[#allocation6 + $0x40] sm:$0xff] %v3039_v48  ;;  %v2349_v24 = vadd.f32 %v2348_v49, %v4538_v61  ;;  %v2467_v48 = vpop.f32.mrf.mxu1  ;;  %v2561_v49 = vmax.f32 %v2456_v38, 0.0 }
 0x583   :  { %v2578_v57 = vmax.f32 %v2349_v24, 0.0  ;;  %v2659_v50 = vpack.c.bf16 %v2563_v53, %v2561_v49 }
 0x584   :  { %v2933_v40 = vpop.f32.mrf.mxu3 }
 0x585   :  { %v2666_v60 = vpack.c.bf16 %v2578_v57, %v2576_v35  ;;  %v2934_v16 = vadd.f32 %v2933_v40, %v2805_v30  ;;  %v2818_v35 = vadd.f32 %v4775_v0, %v4727_v55  ;;  %v4835_v57 = vpop.f32.mrf.mxu2  ;;  %v2820_v0 = vadd.f32 %v4782_v62, %v4727_v55 }
 0x587   :  { %v3040_v7 = vmax.f32 %v2934_v16, 0.0  ;;  %2876 = vmatmul.bf16.gmra.mxu2 %v2666_v60  ;;  %v2463_v60 = vadd.f32 %v2462_v47, %v4602_v39 }
 0x588   :  { %v2351_v52 = vpop.f32.mrf.mxu0 }
 0x589   :  { %3088 = vst [vmem:[#allocation6 + $0x48] sm:$0xff] %v3040_v7  ;;  %2975 = vmatmul.bf16.gmra.mxu3 %v2655_v6  ;;  %v2352_v27 = vadd.f32 %v2351_v52, %v4538_v61  ;;  %v2470_v23 = vpop.f32.mrf.mxu1  ;;  %v2461_v52 = vadd.f32 %v4805_v58, %v4602_v39 }
 0x58b   :  { %v2580_v36 = vmax.f32 %v2352_v27, 0.0 }
 0x58c   :  { %v2936_v22 = vpop.f32.mrf.mxu3 }
 0x58d   :  { %v2937_v17 = vadd.f32 %v2936_v22, %v2808_v1  ;;  %v2567_v22 = vmax.f32 %v2463_v60, 0.0  ;;  %v4844_v20 = vpop.f32.mrf.mxu2 }
 0x58f   :  { %v3041_v9 = vmax.f32 %v2937_v17, 0.0 }
 0x590   :  { %v2353_v8 = vpop.f32.mrf.mxu0 }
 0x591   :  { %3089 = vst [vmem:[#allocation6 + $0x50] sm:$0xff] %v3041_v9  ;;  %v2354_v46 = vadd.f32 %v2353_v8, %v4538_v61  ;;  %v2565_v9 = vmax.f32 %v2461_v52, 0.0 }
 0x593   :  { %v2582_v19 = vmax.f32 %v2354_v46, 0.0  ;;  %v2661_v46 = vpack.c.bf16 %v2567_v22, %v2565_v9  ;;  %v2835_v22 = vadd.f32 %v4835_v57, %v4727_v55 }
 0x594   :  { %v2938_v28 = vpop.f32.mrf.mxu3 }
 0x595   :  { %v2668_v5 = vpack.c.bf16 %v2582_v19, %v2580_v36  ;;  %v2939_v13 = vadd.f32 %v2938_v28, %v2810_v41  ;;  %v2472_v41 = vpop.f32.mrf.mxu1  ;;  %v2823_v36 = vadd.f32 %v4791_v33, %v4727_v55  ;;  %v2468_v28 = vadd.f32 %v2467_v48, %v4602_v39 }
 0x596   :  { %v2825_v33 = vadd.f32 %v4803_v3, %v4727_v55  ;;  %v2473_v3 = vadd.f32 %v2472_v41, %v4602_v39 }
 0x597   :  { %v3042_v34 = vmax.f32 %v2939_v13, 0.0  ;;  %2881 = vmatmul.bf16.gmra.mxu2 %v2668_v5  ;;  %v4850_v13 = vpop.f32.mrf.mxu2 }
 0x598   :  { %v2356_v15 = vpop.f32.mrf.mxu0  ;;  %v2575_v49 = vmax.f32 %v2473_v3, 0.0 }
 0x599   :  { %3090 = vst [vmem:[#allocation6 + $0x58] sm:$0xff] %v3042_v34  ;;  %2980 = vmatmul.bf16.gmra.mxu3 %v2657_v18  ;;  %v2357_v11 = vadd.f32 %v2356_v15, %v4538_v61  ;;  %v2466_v34 = vadd.f32 %v4820_v43, %v4602_v39 }
 0x59b   :  { %v2584_v25 = vmax.f32 %v2357_v11, 0.0 }
 0x59c   :  { %v2941_v4 = vpop.f32.mrf.mxu3 }
 0x59d   :  { %v2942_v12 = vadd.f32 %v2941_v4, %v2813_v29  ;;  %v2475_v29 = vpop.f32.mrf.mxu1  ;;  %v2571_v4 = vmax.f32 %v2468_v28, 0.0 }
 0x59f   :  { %v3043_v21 = vmax.f32 %v2942_v12, 0.0  ;;  %v2842_v43 = vpop.f32.mrf.mxu2 }
 0x5a0   :  { %v2358_v42 = vpop.f32.mrf.mxu0 }
 0x5a1   :  { %3091 = vst [vmem:[#allocation6 + $0x60] sm:$0xff] %v3043_v21  ;;  %v2359_v54 = vadd.f32 %v2358_v42, %v4538_v61  ;;  %v2569_v21 = vmax.f32 %v2466_v34, 0.0 }
 0x5a3   :  { %v2586_v59 = vmax.f32 %v2359_v54, 0.0  ;;  %v2663_v54 = vpack.c.bf16 %v2571_v4, %v2569_v21 }
 0x5a4   :  { %v2943_v2 = vpop.f32.mrf.mxu3 }
 0x5a5   :  { %v2670_v14 = vpack.c.bf16 %v2586_v59, %v2584_v25  ;;  %v2944_v24 = vadd.f32 %v2943_v2, %v2815_v45  ;;  %v2477_v45 = vpop.f32.mrf.mxu1  ;;  %v2471_v2 = vadd.f32 %v2470_v23, %v4602_v39 }
 0x5a7   :  { %v3044_v30 = vmax.f32 %v2944_v24, 0.0  ;;  %2886 = vmatmul.bf16.gmra.mxu2 %v2670_v14  ;;  %v2830_v14 = vadd.f32 %v4818_v37, %v4727_v55  ;;  %v2844_v24 = vpop.f32.mrf.mxu2  ;;  %v2476_v37 = vadd.f32 %v2475_v29, %v4602_v39 }
 0x5a8   :  { %v2361_v31 = vpop.f32.mrf.mxu0 }
 0x5a9   :  { %3092 = vst [vmem:[#allocation6 + $0x68] sm:$0xff] %v3044_v30  ;;  %2985 = vmatmul.bf16.gmra.mxu3 %v2659_v50  ;;  %v2362_v16 = vadd.f32 %v2361_v31, %v4538_v61  ;;  %v2573_v30 = vmax.f32 %v2471_v2, 0.0 }
 0x5ab   :  { %v2588_v17 = vmax.f32 %v2362_v16, 0.0 }
 0x5ac   :  { %v2946_v40 = vpop.f32.mrf.mxu3 }
 0x5ad   :  { %v2947_v63 = vadd.f32 %v2946_v40, %v2818_v35  ;;  %v2480_v35 = vpop.f32.mrf.mxu1  ;;  %v2665_v40 = vpack.c.bf16 %v2575_v49, %v2573_v30 }
 0x5af   :  { %v3045_v6 = vmax.f32 %v2947_v63, 0.0  ;;  %v2833_v63 = vadd.f32 %v4829_v51, %v4727_v55  ;;  %v2847_v23 = vpop.f32.mrf.mxu2 }
 0x5b0   :  { %v2363_v7 = vpop.f32.mrf.mxu0 }
 0x5b1   :  { %3093 = vst [vmem:[#allocation6 + $0x70] sm:$0xff] %v3045_v6  ;;  %v2364_v1 = vadd.f32 %v2363_v7, %v4538_v61  ;;  %v2478_v6 = vadd.f32 %v2477_v45, %v4602_v39 }
 0x5b3   :  { %v2590_v10 = vmax.f32 %v2364_v1, 0.0  ;;  %v2579_v1 = vmax.f32 %v2478_v6, 0.0 }
 0x5b4   :  { %v2948_v27 = vpop.f32.mrf.mxu3 }
 0x5b5   :  { %v2672_v8 = vpack.c.bf16 %v2590_v10, %v2588_v17  ;;  %v2949_v47 = vadd.f32 %v2948_v27, %v2820_v0  ;;  %v2482_v52 = vpop.f32.mrf.mxu1  ;;  %v2577_v17 = vmax.f32 %v2476_v37, 0.0 }
 0x5b6   :  { %v2483_v41 = vadd.f32 %v2482_v52, %v4602_v39 }
 0x5b7   :  { %v3046_v26 = vmax.f32 %v2949_v47, 0.0  ;;  %2891 = vmatmul.bf16.gmra.mxu2 %v2672_v8  ;;  %v2667_v27 = vpack.c.bf16 %v2579_v1, %v2577_v17  ;;  %v2849_v51 = vpop.f32.mrf.mxu2  ;;  %v2838_v47 = vadd.f32 %v4844_v20, %v4727_v55  ;;  %v2843_v20 = vadd.f32 %v2842_v43, %v4727_v55 }
 0x5b8   :  { %v2366_v58 = vpop.f32.mrf.mxu0 }
 0x5b9   :  { %3094 = vst [vmem:[#allocation6 + $0x78] sm:$0xff] %v3046_v26  ;;  %2990 = vmatmul.bf16.gmra.mxu3 %v2661_v46  ;;  %v2367_v32 = vadd.f32 %v2366_v58, %v4538_v61 }
 0x5bb   :  { %v2592_v12 = vmax.f32 %v2367_v32, 0.0 }
 0x5bc   :  { %v2951_v19 = vpop.f32.mrf.mxu3 }
 0x5bd   :  { %v2952_v62 = vadd.f32 %v2951_v19, %v2823_v36  ;;  %v2485_v8 = vpop.f32.mrf.mxu1  ;;  %v2481_v36 = vadd.f32 %v2480_v35, %v4602_v39  ;;  %v2583_v19 = vmax.f32 %v2483_v41, 0.0 }
 0x5be   :  { %v2486_v21 = vadd.f32 %v2485_v8, %v4602_v39 }
 0x5bf   :  { %v3047_v5 = vmax.f32 %v2952_v62, 0.0  ;;  %v2852_v57 = vpop.f32.mrf.mxu2  ;;  %v2840_v62 = vadd.f32 %v4850_v13, %v4727_v55 }
 0x5c0   :  { %v2368_v18 = vpop.f32.mrf.mxu0 }
 0x5c1   :  { %3095 = vst [vmem:[#allocation6 + $0x80] sm:$0xff] %v3047_v5  ;;  %v2369_v15 = vadd.f32 %v2368_v18, %v4538_v61  ;;  %v2828_v61 = vadd.f32 %v4809_v56, %v4727_v55  ;;  %v2581_v5 = vmax.f32 %v2481_v36, 0.0 }
 0x5c3   :  { %v2594_v44 = vmax.f32 %v2369_v15, 0.0  ;;  %v2669_v34 = vpack.c.bf16 %v2583_v19, %v2581_v5 }
 0x5c4   :  { %v2953_v11 = vpop.f32.mrf.mxu3 }
 0x5c5   :  { %v2674_v42 = vpack.c.bf16 %v2594_v44, %v2592_v12  ;;  %v2954_v38 = vadd.f32 %v2953_v11, %v2825_v33  ;;  %v2487_v28 = vpop.f32.mrf.mxu1 }
 0x5c6   :  { %v2488_v44 = vadd.f32 %v2487_v28, %v4602_v39 }
 0x5c7   :  { %v3048_v53 = vmax.f32 %v2954_v38, 0.0  ;;  %2896 = vmatmul.bf16.gmra.mxu2 %v2674_v42  ;;  %v2854_v29 = vpop.f32.mrf.mxu2  ;;  %v2845_v42 = vadd.f32 %v2844_v24, %v4727_v55 }
 0x5c8   :  { %v2587_v13 = vmax.f32 %v2488_v44, 0.0  ;;  %v2855_v17 = vadd.f32 %v2854_v29, %v4727_v55 }
 0x5c9   :  { %3096 = vst [vmem:[#allocation6 + $0x88] sm:$0xff] %v3048_v53  ;;  %2995 = vmatmul.bf16.gmra.mxu3 %v2663_v54  ;;  %v2585_v54 = vmax.f32 %v2486_v21, 0.0 }
 0x5cb   :  { %v2671_v45 = vpack.c.bf16 %v2587_v13, %v2585_v54 }
 0x5cc   :  { %v2956_v25 = vpop.f32.mrf.mxu3 }
 0x5cd   :  { %v2957_v59 = vadd.f32 %v2956_v25, %v2828_v61  ;;  %v2490_v12 = vpop.f32.mrf.mxu1 }
 0x5cf   :  { %v3049_v48 = vmax.f32 %v2957_v59, 0.0  ;;  %v2857_v61 = vpop.f32.mrf.mxu2  ;;  %v2848_v59 = vadd.f32 %v2847_v23, %v4727_v55  ;;  %v2853_v23 = vadd.f32 %v2852_v57, %v4727_v55 }
 0x5d1   :  { %3097 = vst [vmem:[#allocation6 + $0x90] sm:$0xff] %v3049_v48 }
 0x5d4   :  { %v2958_v50 = vpop.f32.mrf.mxu3 }
 0x5d5   :  { %v2959_v31 = vadd.f32 %v2958_v50, %v2830_v14  ;;  %v2492_v43 = vpop.f32.mrf.mxu1  ;;  %v2491_v50 = vadd.f32 %v2490_v12, %v4602_v39 }
 0x5d6   :  { %v2493_v2 = vadd.f32 %v2492_v43, %v4602_v39 }
 0x5d7   :  { %v3050_v56 = vmax.f32 %v2959_v31, 0.0  ;;  %v2859_v14 = vpop.f32.mrf.mxu2  ;;  %v2850_v31 = vadd.f32 %v2849_v51, %v4727_v55 }
 0x5d8   :  { %v2591_v30 = vmax.f32 %v2493_v2, 0.0 }
 0x5d9   :  { %3098 = vst [vmem:[#allocation6 + $0x98] sm:$0xff] %v3050_v56  ;;  %3000 = vmatmul.bf16.gmra.mxu3 %v2665_v40  ;;  %v2589_v40 = vmax.f32 %v2491_v50, 0.0 }
 0x5dc   :  { %v2961_v60 = vpop.f32.mrf.mxu3 }
 0x5dd   :  { %v2962_v16 = vadd.f32 %v2961_v60, %v2833_v63  ;;  %v2495_v24 = vpop.f32.mrf.mxu1  ;;  %v2673_v63 = vpack.c.bf16 %v2591_v30, %v2589_v40 }
 0x5df   :  { %v3051_v7 = vmax.f32 %v2962_v16, 0.0  ;;  %v2862_v16 = vpop.f32.mrf.mxu2 }
 0x5e1   :  { %3099 = vst [vmem:[#allocation6 + $0xa0] sm:$0xff] %v3051_v7 }
 0x5e4   :  { %v2963_v0 = vpop.f32.mrf.mxu3 }
 0x5e5   :  { %v2964_v10 = vadd.f32 %v2963_v0, %v2835_v22  ;;  %v2497_v6 = vpop.f32.mrf.mxu1  ;;  %v2496_v22 = vadd.f32 %v2495_v24, %v4602_v39 }
 0x5e6   :  { %v2498_v37 = vadd.f32 %v2497_v6, %v4602_v39  ;;  %v2860_v39 = vadd.f32 %v2859_v14, %v4727_v55 }
 0x5e7   :  { %v3052_v9 = vmax.f32 %v2964_v10, 0.0  ;;  %v2864_v10 = vpop.f32.mrf.mxu2 }
 0x5e8   :  { %v2595_v0 = vmax.f32 %v2498_v37, 0.0 }
 0x5e9   :  { %3100 = vst [vmem:[#allocation6 + $0xa8] sm:$0xff] %v3052_v9  ;;  %3005 = vmatmul.bf16.gmra.mxu3 %v2667_v27  ;;  %v2593_v9 = vmax.f32 %v2496_v22, 0.0 }
 0x5eb   :  { %v2675_v8 = vpack.c.bf16 %v2595_v0, %v2593_v9 }
 0x5ec   :  { %v2966_v46 = vpop.f32.mrf.mxu3 }
 0x5ed   :  { %v2967_v26 = vadd.f32 %v2966_v46, %v2838_v47  ;;  %v2858_v46 = vadd.f32 %v2857_v61, %v4727_v55 }
 0x5ef   :  { %v3053_v58 = vmax.f32 %v2967_v26, 0.0 }
 0x5f1   :  { %3101 = vst [vmem:[#allocation6 + $0xb0] sm:$0xff] %v3053_v58  ;;  %v2867_v58 = vpop.f32.mrf.mxu2 }
 0x5f2   :  { %v2868_v12 = vadd.f32 %v2867_v58, %v4727_v55 }
 0x5f4   :  { %v2968_v32 = vpop.f32.mrf.mxu3 }
 0x5f5   :  { %v2969_v18 = vadd.f32 %v2968_v32, %v2840_v62  ;;  %v2863_v32 = vadd.f32 %v2862_v16, %v4727_v55 }
 0x5f7   :  { %v3054_v15 = vmax.f32 %v2969_v18, 0.0 }
 0x5f9   :  { %3102 = vst [vmem:[#allocation6 + $0xb8] sm:$0xff] %v3054_v15  ;;  %3010 = vmatmul.bf16.gmra.mxu3 %v2669_v34  ;;  %v2869_v28 = vpop.f32.mrf.mxu2 }
 0x5fc   :  { %v2971_v4 = vpop.f32.mrf.mxu3 }
 0x5fd   :  { %v2972_v33 = vadd.f32 %v2971_v4, %v2843_v20  ;;  %v2865_v20 = vadd.f32 %v2864_v10, %v4727_v55 }
 0x5ff   :  { %v3055_v11 = vmax.f32 %v2972_v33, 0.0 }
 0x601   :  { %3103 = vst [vmem:[#allocation6 + $0xc0] sm:$0xff] %v3055_v11  ;;  %v2872_v15 = vpop.f32.mrf.mxu2 }
 0x604   :  { %v2973_v38 = vpop.f32.mrf.mxu3 }
 0x605   :  { %v2974_v53 = vadd.f32 %v2973_v38, %v2845_v42  ;;  %v2870_v42 = vadd.f32 %v2869_v28, %v4727_v55 }
 0x607   :  { %v3056_v25 = vmax.f32 %v2974_v53, 0.0 }
 0x609   :  { %3104 = vst [vmem:[#allocation6 + $0xc8] sm:$0xff] %v3056_v25  ;;  %3015 = vmatmul.bf16.gmra.mxu3 %v2671_v45  ;;  %v2874_v44 = vpop.f32.mrf.mxu2  ;;  %v2873_v45 = vadd.f32 %v2872_v15, %v4727_v55 }
 0x60c   :  { %v2976_v3 = vpop.f32.mrf.mxu3 }
 0x60d   :  { %v2977_v48 = vadd.f32 %v2976_v3, %v2848_v59 }
 0x60f   :  { %v3057_v49 = vmax.f32 %v2977_v48, 0.0  ;;  %v2875_v48 = vadd.f32 %v2874_v44, %v4727_v55 }
 0x611   :  { %3105 = vst [vmem:[#allocation6 + $0xd0] sm:$0xff] %v3057_v49  ;;  %v2877_v53 = vpop.f32.mrf.mxu2 }
 0x612   :  { %v2878_v24 = vadd.f32 %v2877_v53, %v4727_v55 }
 0x614   :  { %v2978_v35 = vpop.f32.mrf.mxu3 }
 0x615   :  { %v2979_v56 = vadd.f32 %v2978_v35, %v2850_v31 }
 0x617   :  { %v3058_v60 = vmax.f32 %v2979_v56, 0.0 }
 0x619   :  { %3106 = vst [vmem:[#allocation6 + $0xd8] sm:$0xff] %v3058_v60  ;;  %3020 = vmatmul.bf16.gmra.mxu3 %v2673_v63  ;;  %v2879_v3 = vpop.f32.mrf.mxu2 }
 0x61a   :  { %v2880_v40 = vadd.f32 %v2879_v3, %v4727_v55 }
 0x61c   :  { %v2981_v7 = vpop.f32.mrf.mxu3 }
 0x61d   :  { %v2982_v52 = vadd.f32 %v2981_v7, %v2853_v23 }
 0x61f   :  { %v3059_v1 = vmax.f32 %v2982_v52, 0.0 }
 0x621   :  { %3107 = vst [vmem:[#allocation6 + $0xe0] sm:$0xff] %v3059_v1  ;;  %v2882_v50 = vpop.f32.mrf.mxu2 }
 0x622   :  { %v2883_v23 = vadd.f32 %v2882_v50, %v4727_v55 }
 0x624   :  { %v2983_v27 = vpop.f32.mrf.mxu3 }
 0x625   :  { %v2984_v51 = vadd.f32 %v2983_v27, %v2855_v17 }
 0x627   :  { %v3060_v47 = vmax.f32 %v2984_v51, 0.0 }
 0x629   :  { %3108 = vst [vmem:[#allocation6 + $0xe8] sm:$0xff] %v3060_v47  ;;  %3025 = vmatmul.bf16.gmra.mxu3 %v2675_v8  ;;  %v2884_v56 = vpop.f32.mrf.mxu2 }
 0x62a   :  { %v2885_v1 = vadd.f32 %v2884_v56, %v4727_v55 }
 0x62c   :  { %v2986_v26 = vpop.f32.mrf.mxu3 }
 0x62d   :  { %v2987_v41 = vadd.f32 %v2986_v26, %v2858_v46 }
 0x62f   :  { %v3061_v36 = vmax.f32 %v2987_v41, 0.0 }
 0x631   :  { %3109 = vst [vmem:[#allocation6 + $0xf0] sm:$0xff] %v3061_v36  ;;  %v2887_v52 = vpop.f32.mrf.mxu2 }
 0x632   :  { %v2888_v27 = vadd.f32 %v2887_v52, %v4727_v55 }
 0x634   :  { %v2988_v57 = vpop.f32.mrf.mxu3 }
 0x635   :  { %v2989_v19 = vadd.f32 %v2988_v57, %v2860_v39 }
 0x637   :  { %v3062_v62 = vmax.f32 %v2989_v19, 0.0 }
 0x639   :  { %3110 = vst [vmem:[#allocation6 + $0xf8] sm:$0xff] %v3062_v62  ;;  %v2889_v10 = vpop.f32.mrf.mxu2 }
 0x63a   :  { %v2890_v46 = vadd.f32 %v2889_v10, %v4727_v55 }
 0x63c   :  { %v2991_v5 = vpop.f32.mrf.mxu3 }
 0x63d   :  { %v2992_v18 = vadd.f32 %v2991_v5, %v2863_v32 }
 0x63f   :  { %v3063_v34 = vmax.f32 %v2992_v18, 0.0 }
 0x641   :  { %3111 = vst [vmem:[#allocation6 + $0x100] sm:$0xff] %v3063_v34  ;;  %v2892_v47 = vpop.f32.mrf.mxu2 }
 0x642   :  { %v2893_v36 = vadd.f32 %v2892_v47, %v4727_v55 }
 0x644   :  { %v2993_v29 = vpop.f32.mrf.mxu3 }
 0x645   :  { %v2994_v4 = vadd.f32 %v2993_v29, %v2865_v20 }
 0x647   :  { %v3064_v33 = vmax.f32 %v2994_v4, 0.0 }
 0x649   :  { %3112 = vst [vmem:[#allocation6 + $0x108] sm:$0xff] %v3064_v33  ;;  %v2894_v39 = vpop.f32.mrf.mxu2 }
 0x64a   :  { %v2895_v28 = vadd.f32 %v2894_v39, %v4727_v55 }
 0x64c   :  { %v2996_v11 = vpop.f32.mrf.mxu3 }
 0x64d   :  { %v2997_v21 = vadd.f32 %v2996_v11, %v2868_v12 }
 0x64f   :  { %v3065_v13 = vmax.f32 %v2997_v21, 0.0 }
 0x651   :  { %3113 = vst [vmem:[#allocation6 + $0x110] sm:$0xff] %v3065_v13  ;;  %v2897_v18 = vpop.f32.mrf.mxu2 }
 0x652   :  { %v2898_v15 = vadd.f32 %v2897_v18, %v4727_v55 }
 0x654   :  { %v2998_v38 = vpop.f32.mrf.mxu3 }
 0x655   :  { %v2999_v54 = vadd.f32 %v2998_v38, %v2870_v42 }
 0x657   :  { %v3066_v61 = vmax.f32 %v2999_v54, 0.0 }
 0x659   :  { %3114 = vst [vmem:[#allocation6 + $0x118] sm:$0xff] %v3066_v61  ;;  %v2899_v33 = vpop.f32.mrf.mxu2 }
 0x65a   :  { %v2900_v12 = vadd.f32 %v2899_v33, %v4727_v55 }
 0x65c   :  { %v3001_v25 = vpop.f32.mrf.mxu3 }
 0x65d   :  { %v3002_v43 = vadd.f32 %v3001_v25, %v2873_v45 }
 0x65f   :  { %v3067_v59 = vmax.f32 %v3002_v43, 0.0 }
 0x661   :  { %3115 = vst [vmem:[#allocation6 + $0x120] sm:$0xff] %v3067_v59 }
 0x664   :  { %v3003_v2 = vpop.f32.mrf.mxu3 }
 0x665   :  { %v3004_v49 = vadd.f32 %v3003_v2, %v2875_v48 }
 0x667   :  { %v3068_v14 = vmax.f32 %v3004_v49, 0.0 }
 0x669   :  { %3116 = vst [vmem:[#allocation6 + $0x128] sm:$0xff] %v3068_v14 }
 0x66c   :  { %v3006_v30 = vpop.f32.mrf.mxu3 }
 0x66d   :  { %v3007_v31 = vadd.f32 %v3006_v30, %v2878_v24 }
 0x66f   :  { %v3069_v35 = vmax.f32 %v3007_v31, 0.0 }
 0x671   :  { %3117 = vst [vmem:[#allocation6 + $0x130] sm:$0xff] %v3069_v35 }
 0x674   :  { %v3008_v63 = vpop.f32.mrf.mxu3 }
 0x675   :  { %v3009_v60 = vadd.f32 %v3008_v63, %v2880_v40 }
 0x677   :  { %v3070_v16 = vmax.f32 %v3009_v60, 0.0 }
 0x679   :  { %3118 = vst [vmem:[#allocation6 + $0x138] sm:$0xff] %v3070_v16 }
 0x67c   :  { %v3011_v6 = vpop.f32.mrf.mxu3 }
 0x67d   :  { %v3012_v7 = vadd.f32 %v3011_v6, %v2883_v23 }
 0x67f   :  { %v3071_v37 = vmax.f32 %v3012_v7, 0.0 }
 0x681   :  { %3119 = vst [vmem:[#allocation6 + $0x140] sm:$0xff] %v3071_v37 }
 0x684   :  { %v3013_v22 = vpop.f32.mrf.mxu3 }
 0x685   :  { %v3014_v0 = vadd.f32 %v3013_v22, %v2885_v1 }
 0x687   :  { %v3072_v17 = vmax.f32 %v3014_v0, 0.0 }
 0x689   :  { %3120 = vst [vmem:[#allocation6 + $0x148] sm:$0xff] %v3072_v17 }
 0x68c   :  { %v3016_v9 = vpop.f32.mrf.mxu3 }
 0x68d   :  { %v3017_v51 = vadd.f32 %v3016_v9, %v2888_v27 }
 0x68f   :  { %v3073_v8 = vmax.f32 %v3017_v51, 0.0 }
 0x691   :  { %3121 = vst [vmem:[#allocation6 + $0x150] sm:$0xff] %v3073_v8 }
 0x694   :  { %v3018_v26 = vpop.f32.mrf.mxu3 }
 0x695   :  { %v3019_v41 = vadd.f32 %v3018_v26, %v2890_v46 }
 0x697   :  { %v3074_v58 = vmax.f32 %v3019_v41, 0.0 }
 0x699   :  { %3122 = vst [vmem:[#allocation6 + $0x158] sm:$0xff] %v3074_v58 }
 0x69c   :  { %v3021_v57 = vpop.f32.mrf.mxu3 }
 0x69d   :  { %v3022_v19 = vadd.f32 %v3021_v57, %v2893_v36 }
 0x69f   :  { %v3075_v62 = vmax.f32 %v3022_v19, 0.0 }
 0x6a1   :  { %3123 = vst [vmem:[#allocation6 + $0x160] sm:$0xff] %v3075_v62 }
 0x6a4   :  { %v3023_v32 = vpop.f32.mrf.mxu3 }
 0x6a5   :  { %v3024_v5 = vadd.f32 %v3023_v32, %v2895_v28 }
 0x6a7   :  { %v3076_v34 = vmax.f32 %v3024_v5, 0.0 }
 0x6a9   :  { %3124 = vst [vmem:[#allocation6 + $0x168] sm:$0xff] %v3076_v34 }
 0x6ac   :  { %v3026_v20 = vpop.f32.mrf.mxu3 }
 0x6ad   :  { %v3027_v29 = vadd.f32 %v3026_v20, %v2898_v15 }
 0x6af   :  { %v3077_v4 = vmax.f32 %v3027_v29, 0.0 }
 0x6b1   :  { %3125 = vst [vmem:[#allocation6 + $0x170] sm:$0xff] %v3077_v4 }
 0x6b4   :  { %v3028_v44 = vpop.f32.mrf.mxu3 }
 0x6b5   :  { %v3029_v11 = vadd.f32 %v3028_v44, %v2900_v12 }
 0x6b7   :  { %v3078_v21 = vmax.f32 %v3029_v11, 0.0 }
 0x6b9   :  { %3126 = vst [vmem:[#allocation6 + $0x178] sm:$0xff] %v3078_v21 }
 0x6ba   :  { %3130 = vsyncadd [#allocation4], 1280  ;;  %s3133_s13 = sshll.u32 %s4922_s5, 4  ;;  %s3722_s14 = smov [#allocation5]   ;;  %s3134_s13 = int_to_ptr.hbm [resolvable:$true] %s3133_s13 }
 0x6bb   :  { %s3131_s15 = sshll.u32 %s3722_s14, 4  ;;  %s3132_s15 = int_to_ptr.vmem [resolvable:$true] %s3131_s15 }
 0x6bc   :  { %3139 = dma.vmem_to_hbm [thread:$0]  %s3132_s15, 4864, %s3134_s13, [#allocation4], %s3720_s26, %s3720_s26, %s3721_s27  }
 0x6bd   :  { %3143 = vsyncadd [#allocation7], 1280  ;;  %s3146_s18 = sshll.u32 %s4923_s6, 4  ;;  %s3723_s19 = smov [#allocation6]   ;;  %s3147_s18 = int_to_ptr.hbm [resolvable:$true] %s3146_s18 }
 0x6be   :  { %s3144_s20 = sshll.u32 %s3723_s19, 4  ;;  %s3145_s20 = int_to_ptr.vmem [resolvable:$true] %s3144_s20 }
 0x6bf   :  { %3152 = dma.vmem_to_hbm [thread:$0]  %s3145_s20, 4864, %s3147_s18, [#allocation7], %s3720_s26, %s3720_s26, %s3721_s27  }
 0x6c0   :  { %3715 = dma.done.wait [#allocation4], 6144  }
 0x6c1   :  { %3716 = vsyncadd [#allocation4], 4294961152 }
 0x6c2   :  { %3717 = dma.done.wait [#allocation7], 6144  }
 0x6c3   :  { %3718 = vsyncadd [#allocation7], 4294961152 }
 0x6c4   :  { %3161 = vsyncpa [#allocation3], 1 }
 0x6c5   :  { %3162 = vsyncpa [#allocation4], 1 }
 0x6c6   :  { %3163 = vsyncpa [#allocation7], 1 }

// kernel: tpu_custom_call.1
= control target key start
LH: loop header
LB: loop body
LE: loop exit
PB: predicated region body
PF: predicated region fallthrough
CT: control target
= control target key end

     0   :  { %12 = vsyncpa [#allocation3], 0  ;;  %s4917_s0 = inlined_call_operand.vmem [shape: f32[300,32], index: 0, kind: input, shape index: {}]   ;;  %s4918_s1 = inlined_call_operand.vmem [shape: bf16[32,256], index: 1, kind: input, shape index: {}]   ;;  %s4919_s2 = inlined_call_operand.hbm [shape: bf16[6,256,256], index: 2, kind: input, shape index: {}]   ;;  %s4920_s3 = inlined_call_operand.vmem [shape: bf16[256,128], index: 3, kind: input, shape index: {}]   ;;  %s4921_s4 = inlined_call_operand.vmem [shape: f32[8,256], index: 4, kind: input, shape index: {}]   ;;  %s4922_s5 = inlined_call_operand.hbm [shape: f32[300,128], index: 5, kind: output, shape index: {0}]   ;;  %s4923_s6 = inlined_call_operand.hbm [shape: f32[300,128], index: 6, kind: output, shape index: {1}]  }
   0x1   :  { %13 = vsyncpa [#allocation4], 0 }
   0x2   :  { %14 = vsyncpa [#allocation7], 0  ;;  %s23_s23 = sshll.u32 %s4919_s2, 4  ;;  %s3719_s24 = smov [#allocation2]   ;;  %s24_s23 = int_to_ptr.hbm [resolvable:$true] %s23_s23 }
   0x3   :  { %s25_s25 = sshll.u32 %s3719_s24, 4  ;;  %s3720_s26 = smov 128   ;;  %s26_s25 = int_to_ptr.vmem [resolvable:$true] %s25_s25 }
   0x4   :  { %s3721_s27 = smov 8  }
   0x5   :  { %31 = dma.hbm_to_vmem [thread:$0]  %s24_s23, 24576, %s26_s25, [#allocation3], %s3720_s26, %s3720_s26, %s3721_s27  }
   0x6   :  { %3713 = dma.done.wait [#allocation3], 24576  }
   0x7   :  { %3714 = vsyncadd [#allocation3], 4294942720  ;;  %v3174_v0 = vld [vmem:[%s4918_s1 + $0x10] sm:$0xf]  ;;  %v3551_v1 = vld [vmem:[%s4918_s1 + $0x14] sm:$0xf0] }
   0x8   :  { %v3550_v2 = vld [vmem:[%s4918_s1 + $0x14] sm:$0xf]  ;;  %v3175_v3 = vor.u32 %v3551_v1, %v3174_v0  ;;  %v3176_v4 = vld [vmem:[%s4918_s1 + $0x18] sm:$0xf0]  ;;  %v3166_v5 = vld [vmem:[%s4918_s1] sm:$0xf] }
   0x9   :  { %v3549_v6 = vld [vmem:[%s4918_s1 + $0x4] sm:$0xf0]  ;;  %v3179_v7 = vor.u32 %v3550_v2, %v3176_v4  ;;  %v3548_v8 = vld [vmem:[%s4918_s1 + $0x4] sm:$0xf]  ;;  %v3168_v9 = vld [vmem:[%s4918_s1 + $0x8] sm:$0xf0] }
   0xa   :  { %v43_v10 = vld [vmem:[%s4917_s0] sm:$0xff]  ;;  %220 = vmatpush.bf16.msra.mxu0 %v3175_v3  ;;  %v3167_v11 = vor.u32 %v3549_v6, %v3166_v5  ;;  %v44_v12 = vld [vmem:[%s4917_s0 + $0x8] sm:$0xff]  ;;  %v3322_v13 = vld [vmem:[#allocation2 + $0x170] sm:$0xf]  ;;  %v3171_v15 = vor.u32 %v3548_v8, %v3168_v9  ;;  %vm141_vm0 = vcmask 261120  }
   0xb   :  { %v3575_v14 = vld [vmem:[#allocation2 + $0x174] sm:$0xf0]  ;;  %349 = vmatpush.bf16.msra.mxu1 %v3179_v7  ;;  %v95_v17 = vpack.c.bf16 %v44_v12, %v43_v10  ;;  %v45_v18 = vld [vmem:[%s4917_s0 + $0x10] sm:$0xff]  ;;  %v3318_v21 = vld [vmem:[#allocation2 + $0x160] sm:$0xf] }
   0xc   :  { %v3323_v16 = vor.u32 %v3575_v14, %v3322_v13  ;;  %v46_v19 = vld [vmem:[%s4917_s0 + $0x18] sm:$0xff]  ;;  %v3574_v22 = vld [vmem:[#allocation2 + $0x164] sm:$0xf0]  ;;  %v47_v24 = vld [vmem:[%s4917_s0 + $0x20] sm:$0xff] }
   0xd   :  { %v96_v20 = vpack.c.bf16 %v46_v19, %v45_v18  ;;  %v3319_v23 = vor.u32 %v3574_v22, %v3318_v21  ;;  %v48_v25 = vld [vmem:[%s4917_s0 + $0x28] sm:$0xff]  ;;  %v49_v27 = vld [vmem:[%s4917_s0 + $0x30] sm:$0xff]  ;;  %v50_v28 = vld [vmem:[%s4917_s0 + $0x38] sm:$0xff] }
   0xe   :  { %221 = vmatpush.bf16.msra.mxu0 %v3167_v11  ;;  %v97_v26 = vpack.c.bf16 %v48_v25, %v47_v24  ;;  %v98_v29 = vpack.c.bf16 %v50_v28, %v49_v27  ;;  %v51_v30 = vld [vmem:[%s4917_s0 + $0x40] sm:$0xff]  ;;  %v52_v31 = vld [vmem:[%s4917_s0 + $0x48] sm:$0xff]  ;;  %v3314_v33 = vld [vmem:[#allocation2 + $0x150] sm:$0xf] }
   0xf   :  { %350 = vmatpush.bf16.msra.mxu1 %v3171_v15  ;;  %v99_v32 = vpack.c.bf16 %v52_v31, %v51_v30  ;;  %v3573_v34 = vld [vmem:[#allocation2 + $0x154] sm:$0xf0]  ;;  %v3258_v36 = vld [vmem:[#allocation2 + $0x70] sm:$0xf]  ;;  %v3254_v45 = vld [vmem:[#allocation2 + $0x60] sm:$0xf] }
  0x10   :  { %v3315_v35 = vor.u32 %v3573_v34, %v3314_v33  ;;  %v3559_v37 = vld [vmem:[#allocation2 + $0x74] sm:$0xf0]  ;;  %v3290_v38 = vld [vmem:[#allocation2 + $0xf0] sm:$0xf]  ;;  %v3558_v46 = vld [vmem:[#allocation2 + $0x64] sm:$0xf0] }
  0x11   :  { %3180 = vmatmul.msk.bf16.vlgmr.msra.gmra.mxu0 %vm141_vm0, %v95_v17  ;;  %v3259_v39 = vor.u32 %v3559_v37, %v3258_v36  ;;  %v3567_v40 = vld [vmem:[#allocation2 + $0xf4] sm:$0xf0]  ;;  %v53_v42 = vld [vmem:[%s4917_s0 + $0x50] sm:$0xff]  ;;  %v3255_v47 = vor.u32 %v3558_v46, %v3254_v45  ;;  %v3286_v48 = vld [vmem:[#allocation2 + $0xe0] sm:$0xf] }
  0x12   :  { %1141 = vmatpush.bf16.msrb.mxu0 %v3323_v16  ;;  %3204 = vmatmul.msk.bf16.vlgmr.msra.gmra.mxu1 %vm141_vm0, %v95_v17  ;;  %v3291_v41 = vor.u32 %v3567_v40, %v3290_v38  ;;  %v54_v43 = vld [vmem:[%s4917_s0 + $0x58] sm:$0xff]  ;;  %v3566_v49 = vld [vmem:[#allocation2 + $0xe4] sm:$0xf0]  ;;  %v3250_v51 = vld [vmem:[#allocation2 + $0x50] sm:$0xf] }
  0x13   :  { %745 = vmatpush.bf16.msra.mxu2 %v3259_v39  ;;  %v100_v44 = vpack.c.bf16 %v54_v43, %v53_v42  ;;  %v3287_v50 = vor.u32 %v3566_v49, %v3286_v48  ;;  %v3557_v52 = vld [vmem:[#allocation2 + $0x54] sm:$0xf0]  ;;  %v3282_v53 = vld [vmem:[#allocation2 + $0xd0] sm:$0xf]  ;;  %v3246_v56 = vld [vmem:[#allocation2 + $0x40] sm:$0xf] }
  0x14   :  { %874 = vmatpush.bf16.msra.mxu3 %v3291_v41  ;;  %v3251_v54 = vor.u32 %v3557_v52, %v3250_v51  ;;  %v3565_v55 = vld [vmem:[#allocation2 + $0xd4] sm:$0xf0]  ;;  %v3556_v57 = vld [vmem:[#allocation2 + $0x44] sm:$0xf0]  ;;  %v3278_v59 = vld [vmem:[#allocation2 + $0xc0] sm:$0xf] }
  0x15   :  { %v3283_v58 = vor.u32 %v3565_v55, %v3282_v53  ;;  %v3564_v60 = vld [vmem:[#allocation2 + $0xc4] sm:$0xf0]  ;;  %v3247_v61 = vor.u32 %v3556_v57, %v3246_v56  ;;  %v55_v63 = vld [vmem:[%s4917_s0 + $0x60] sm:$0xff]  ;;  %v3242_v1 = vld [vmem:[#allocation2 + $0x30] sm:$0xf] }
  0x16   :  { %1142 = vmatpush.bf16.msrb.mxu0 %v3319_v23  ;;  %v3279_v62 = vor.u32 %v3564_v60, %v3278_v59  ;;  %v56_v0 = vld [vmem:[%s4917_s0 + $0x68] sm:$0xff]  ;;  %v3555_v2 = vld [vmem:[#allocation2 + $0x34] sm:$0xf0]  ;;  %v3274_v5 = vld [vmem:[#allocation2 + $0xb0] sm:$0xf] }
  0x17   :  { %746 = vmatpush.bf16.msra.mxu2 %v3255_v47  ;;  %v3243_v3 = vor.u32 %v3555_v2, %v3242_v1  ;;  %v101_v4 = vpack.c.bf16 %v56_v0, %v55_v63  ;;  %v3563_v6 = vld [vmem:[#allocation2 + $0xb4] sm:$0xf0]  ;;  %v3238_v8 = vld [vmem:[#allocation2 + $0x20] sm:$0xf]  ;;  %v3554_v9 = vld [vmem:[#allocation2 + $0x24] sm:$0xf0] }
  0x18   :  { %875 = vmatpush.bf16.msra.mxu3 %v3287_v50  ;;  %v3275_v7 = vor.u32 %v3563_v6, %v3274_v5  ;;  %v3239_v10 = vor.u32 %v3554_v9, %v3238_v8  ;;  %v3270_v11 = vld [vmem:[#allocation2 + $0xa0] sm:$0xf]  ;;  %v3562_v12 = vld [vmem:[#allocation2 + $0xa4] sm:$0xf0]  ;;  %v3234_v14 = vld [vmem:[#allocation2 + $0x10] sm:$0xf] }
  0x19   :  { %v3271_v13 = vor.u32 %v3562_v12, %v3270_v11  ;;  %v3553_v15 = vld [vmem:[#allocation2 + $0x14] sm:$0xf0]  ;;  %v3266_v17 = vld [vmem:[#allocation2 + $0x90] sm:$0xf]  ;;  %v3552_v21 = vld [vmem:[#allocation2 + $0x4] sm:$0xf0] }
  0x1a   :  { %1143 = vmatpush.bf16.msrb.mxu0 %v3315_v35  ;;  %v3235_v16 = vor.u32 %v3553_v15, %v3234_v14  ;;  %v3561_v18 = vld [vmem:[#allocation2 + $0x94] sm:$0xf0]  ;;  %v3262_v23 = vld [vmem:[#allocation2 + $0x80] sm:$0xf]  ;;  %v3560_v24 = vld [vmem:[#allocation2 + $0x84] sm:$0xf0] }
  0x1b   :  { %747 = vmatpush.bf16.msra.mxu2 %v3251_v54  ;;  %v3267_v19 = vor.u32 %v3561_v18, %v3266_v17  ;;  %v57_v25 = vld [vmem:[%s4917_s0 + $0x70] sm:$0xff]  ;;  %v3263_v27 = vor.u32 %v3560_v24, %v3262_v23  ;;  %v3583_v30 = vld [vmem:[#allocation2 + $0x274] sm:$0xf0]  ;;  %v3572_v33 = vld [vmem:[#allocation2 + $0x144] sm:$0xf0] }
  0x1c   :  { %876 = vmatpush.bf16.msra.mxu3 %v3283_v58  ;;  %v59_v35 = vld [vmem:[%s4917_s0 + $0x80] sm:$0xff]  ;;  %v60_v36 = vld [vmem:[%s4917_s0 + $0x88] sm:$0xff]  ;;  %v61_v54 = vld [vmem:[%s4917_s0 + $0x90] sm:$0xff] }
  0x1d   :  { %v42_v37 = vld [vmem:[%s4921_s4 + $0x8] sm:$0xff]  ;;  %v103_v38 = vpack.c.bf16 %v60_v36, %v59_v35  ;;  %v3865_v39 = vld [vmem:[%s4921_s4] sm:$0xff]  ;;  %v62_v55 = vld [vmem:[%s4917_s0 + $0x98] sm:$0xff] }
  0x1e   :  { %v3867_v42 = vperm.slane %v42_v37, 0  ;;  %v3870_v43 = vperm.slane %v3865_v39, 0  ;;  %v104_v58 = vpack.c.bf16 %v62_v55, %v61_v54  ;;  %v64_v8 = vld [vmem:[%s4917_s0 + $0xa8] sm:$0xff]  ;;  %v3350_v12 = vld [vmem:[#allocation2 + $0x260] sm:$0xf] }
  0x1f   :  { %748 = vmatpush.bf16.msra.mxu2 %v3247_v61  ;;  %v3306_v17 = vld [vmem:[#allocation2 + $0x130] sm:$0xf]  ;;  %v3571_v18 = vld [vmem:[#allocation2 + $0x134] sm:$0xf0] }
  0x20   :  { %877 = vmatpush.bf16.msra.mxu3 %v3279_v62 }
  0x21   :  { %3181 = vmatmul.msk.bf16.gmra.mxu0 %vm141_vm0, %v96_v20 }
  0x22   :  { %3205 = vmatmul.msk.bf16.gmra.mxu1 %vm141_vm0, %v96_v20  ;;  %v3230_v20 = vld [vmem:[#allocation2] sm:$0xf] }
  0x23   :  { %749 = vmatpush.bf16.msra.mxu2 %v3243_v3  ;;  %v3231_v22 = vor.u32 %v3552_v21, %v3230_v20 }
  0x24   :  { %878 = vmatpush.bf16.msra.mxu3 %v3275_v7  ;;  %v63_v7 = vld [vmem:[%s4917_s0 + $0xa0] sm:$0xff] }
  0x25   :  { %v105_v11 = vpack.c.bf16 %v64_v8, %v63_v7  ;;  %v3346_v8 = vld [vmem:[#allocation2 + $0x250] sm:$0xf] }
  0x27   :  { %750 = vmatpush.bf16.msra.mxu2 %v3239_v10 }
  0x28   :  { %879 = vmatpush.bf16.msra.mxu3 %v3271_v13  ;;  %v3582_v13 = vld [vmem:[#allocation2 + $0x264] sm:$0xf0] }
  0x29   :  { %v3351_v15 = vor.u32 %v3582_v13, %v3350_v12  ;;  %v3302_v13 = vld [vmem:[#allocation2 + $0x120] sm:$0xf] }
  0x2b   :  { %751 = vmatpush.bf16.msra.mxu2 %v3235_v16 }
  0x2c   :  { %880 = vmatpush.bf16.msra.mxu3 %v3267_v19  ;;  %v3307_v19 = vor.u32 %v3571_v18, %v3306_v17 }
  0x2f   :  { %752 = vmatpush.bf16.msra.mxu2 %v3231_v22 }
  0x30   :  { %881 = vmatpush.bf16.msra.mxu3 %v3263_v27 }
  0x31   :  { %3182 = vmatmul.msk.bf16.gmra.mxu0 %vm141_vm0, %v97_v26 }
  0x32   :  { %3206 = vmatmul.msk.bf16.gmra.mxu1 %vm141_vm0, %v97_v26  ;;  %v58_v26 = vld [vmem:[%s4917_s0 + $0x78] sm:$0xff] }
  0x33   :  { %v102_v28 = vpack.c.bf16 %v58_v26, %v57_v25 }
  0x41   :  { %3183 = vmatmul.msk.bf16.gmra.mxu0 %vm141_vm0, %v98_v29 }
  0x42   :  { %3207 = vmatmul.msk.bf16.gmra.mxu1 %vm141_vm0, %v98_v29  ;;  %v3354_v29 = vld [vmem:[#allocation2 + $0x270] sm:$0xf] }
  0x43   :  { %v3355_v31 = vor.u32 %v3583_v30, %v3354_v29  ;;  %v65_v30 = vld [vmem:[%s4917_s0 + $0xb0] sm:$0xff] }
  0x45   :  { %1408 = vmatpush.bf16.msrb.mxu1 %v3355_v31  ;;  %v66_v31 = vld [vmem:[%s4917_s0 + $0xb8] sm:$0xff] }
  0x49   :  { %1409 = vmatpush.bf16.msrb.mxu1 %v3351_v15 }
  0x51   :  { %3184 = vmatmul.msk.bf16.gmra.mxu0 %vm141_vm0, %v99_v32 }
  0x52   :  { %3208 = vmatmul.msk.bf16.gmra.mxu1 %vm141_vm0, %v99_v32  ;;  %v3310_v32 = vld [vmem:[#allocation2 + $0x140] sm:$0xf] }
  0x53   :  { %v3311_v34 = vor.u32 %v3572_v33, %v3310_v32 }
  0x55   :  { %1144 = vmatpush.bf16.msrb.mxu0 %v3311_v34  ;;  %v106_v34 = vpack.c.bf16 %v66_v31, %v65_v30 }
  0x59   :  { %1145 = vmatpush.bf16.msrb.mxu0 %v3307_v19 }
  0x61   :  { %3185 = vmatmul.msk.bf16.gmra.mxu0 %vm141_vm0, %v100_v44 }
  0x62   :  { %3209 = vmatmul.msk.bf16.gmra.mxu1 %vm141_vm0, %v100_v44 }
  0x71   :  { %3186 = vmatmul.msk.bf16.gmra.mxu0 %vm141_vm0, %v101_v4 }
  0x72   :  { %3210 = vmatmul.msk.bf16.gmra.mxu1 %vm141_vm0, %v101_v4 }
  0x81   :  { %3187 = vmatmul.msk.bf16.gmra.mxu0 %vm141_vm0, %v102_v28 }
  0x82   :  { %3211 = vmatmul.msk.bf16.gmra.mxu1 %vm141_vm0, %v102_v28 }
  0x8e   :  { %v223_v40 = vpop.f32.mrf.mxu0 }
  0x8f   :  { %v352_v41 = vpop.f32.mrf.mxu1  ;;  %v224_v45 = vadd.f32 %v223_v40, %v3870_v43 }
  0x90   :  { %v353_v44 = vadd.f32 %v352_v41, %v3867_v42 }
  0x91   :  { %3188 = vmatmul.msk.bf16.gmra.mxu0 %vm141_vm0, %v103_v38  ;;  %v472_v51 = vmax.f32 %v224_v45, 0.0 }
  0x92   :  { %3212 = vmatmul.msk.bf16.gmra.mxu1 %vm141_vm0, %v103_v38  ;;  %v473_v49 = vmax.f32 %v353_v44, 0.0 }
  0x96   :  { %v225_v46 = vpop.f32.mrf.mxu0 }
  0x97   :  { %v226_v47 = vadd.f32 %v225_v46, %v3870_v43  ;;  %v354_v48 = vpop.f32.mrf.mxu1 }
  0x98   :  { %v355_v50 = vadd.f32 %v354_v48, %v3867_v42 }
  0x99   :  { %v474_v52 = vmax.f32 %v226_v47, 0.0 }
  0x9a   :  { %v475_v53 = vmax.f32 %v355_v50, 0.0  ;;  %v67_v50 = vld [vmem:[%s4917_s0 + $0xc0] sm:$0xff] }
  0x9b   :  { %v600_v56 = vpack.c.bf16 %v474_v52, %v472_v51  ;;  %v68_v51 = vld [vmem:[%s4917_s0 + $0xc8] sm:$0xff] }
  0x9c   :  { %v601_v57 = vpack.c.bf16 %v475_v53, %v473_v49  ;;  %v107_v54 = vpack.c.bf16 %v68_v51, %v67_v50 }
  0x9d   :  { %753 = vmatmul.bf16.vlgmr.msra.gmra.mxu2 %v600_v56 }
  0x9e   :  { %v228_v59 = vpop.f32.mrf.mxu0  ;;  %882 = vmatmul.bf16.vlgmr.msra.gmra.mxu3 %v601_v57 }
  0x9f   :  { %v357_v60 = vpop.f32.mrf.mxu1  ;;  %v229_v62 = vadd.f32 %v228_v59, %v3870_v43 }
  0xa0   :  { %v358_v61 = vadd.f32 %v357_v60, %v3867_v42 }
  0xa1   :  { %3189 = vmatmul.msk.bf16.gmra.mxu0 %vm141_vm0, %v104_v58  ;;  %v476_v4 = vmax.f32 %v229_v62, 0.0 }
  0xa2   :  { %3213 = vmatmul.msk.bf16.gmra.mxu1 %vm141_vm0, %v104_v58  ;;  %v477_v2 = vmax.f32 %v358_v61, 0.0 }
  0xa6   :  { %v230_v63 = vpop.f32.mrf.mxu0 }
  0xa7   :  { %v231_v0 = vadd.f32 %v230_v63, %v3870_v43  ;;  %v359_v1 = vpop.f32.mrf.mxu1 }
  0xa8   :  { %v360_v3 = vadd.f32 %v359_v1, %v3867_v42 }
  0xa9   :  { %v478_v5 = vmax.f32 %v231_v0, 0.0 }
  0xaa   :  { %v479_v6 = vmax.f32 %v360_v3, 0.0  ;;  %v69_v3 = vld [vmem:[%s4917_s0 + $0xd0] sm:$0xff] }
  0xab   :  { %v602_v9 = vpack.c.bf16 %v478_v5, %v476_v4  ;;  %v70_v4 = vld [vmem:[%s4917_s0 + $0xd8] sm:$0xff] }
  0xac   :  { %v603_v10 = vpack.c.bf16 %v479_v6, %v477_v2  ;;  %v108_v7 = vpack.c.bf16 %v70_v4, %v69_v3 }
  0xad   :  { %758 = vmatmul.bf16.gmra.mxu2 %v602_v9  ;;  %v3581_v9 = vld [vmem:[#allocation2 + $0x254] sm:$0xf0] }
  0xae   :  { %v233_v14 = vpop.f32.mrf.mxu0  ;;  %887 = vmatmul.bf16.gmra.mxu3 %v603_v10 }
  0xaf   :  { %v362_v16 = vpop.f32.mrf.mxu1  ;;  %v234_v21 = vadd.f32 %v233_v14, %v3870_v43  ;;  %v3570_v14 = vld [vmem:[#allocation2 + $0x124] sm:$0xf0] }
  0xb0   :  { %v363_v20 = vadd.f32 %v362_v16, %v3867_v42  ;;  %v3303_v15 = vor.u32 %v3570_v14, %v3302_v13  ;;  %v3569_v13 = vld [vmem:[#allocation2 + $0x114] sm:$0xf0] }
  0xb1   :  { %3190 = vmatmul.msk.bf16.gmra.mxu0 %vm141_vm0, %v105_v11  ;;  %v480_v27 = vmax.f32 %v234_v21, 0.0 }
  0xb2   :  { %3214 = vmatmul.msk.bf16.gmra.mxu1 %vm141_vm0, %v105_v11  ;;  %v481_v25 = vmax.f32 %v363_v20, 0.0  ;;  %v3347_v11 = vor.u32 %v3581_v9, %v3346_v8  ;;  %1146 = vmatpush.bf16.msrb.mxu0 %v3303_v15  ;;  %v3342_v9 = vld [vmem:[#allocation2 + $0x240] sm:$0xf] }
  0xb4   :  { %1410 = vmatpush.bf16.msrb.mxu1 %v3347_v11 }
  0xb6   :  { %v235_v22 = vpop.f32.mrf.mxu0 }
  0xb7   :  { %v236_v23 = vadd.f32 %v235_v22, %v3870_v43  ;;  %v364_v24 = vpop.f32.mrf.mxu1 }
  0xb8   :  { %v365_v26 = vadd.f32 %v364_v24, %v3867_v42 }
  0xb9   :  { %v482_v28 = vmax.f32 %v236_v23, 0.0 }
  0xba   :  { %v483_v29 = vmax.f32 %v365_v26, 0.0  ;;  %v71_v26 = vld [vmem:[%s4917_s0 + $0xe0] sm:$0xff] }
  0xbb   :  { %v604_v32 = vpack.c.bf16 %v482_v28, %v480_v27  ;;  %v72_v27 = vld [vmem:[%s4917_s0 + $0xe8] sm:$0xff] }
  0xbc   :  { %v605_v33 = vpack.c.bf16 %v483_v29, %v481_v25  ;;  %v109_v30 = vpack.c.bf16 %v72_v27, %v71_v26  ;;  %v78_v26 = vld [vmem:[%s4917_s0 + $0x118] sm:$0xff] }
  0xbd   :  { %763 = vmatmul.bf16.gmra.mxu2 %v604_v32 }
  0xbe   :  { %v238_v35 = vpop.f32.mrf.mxu0  ;;  %892 = vmatmul.bf16.gmra.mxu3 %v605_v33 }
  0xbf   :  { %v367_v36 = vpop.f32.mrf.mxu1  ;;  %v239_v38 = vadd.f32 %v238_v35, %v3870_v43 }
  0xc0   :  { %v368_v37 = vadd.f32 %v367_v36, %v3867_v42 }
  0xc1   :  { %3191 = vmatmul.msk.bf16.gmra.mxu0 %vm141_vm0, %v106_v34  ;;  %v484_v47 = vmax.f32 %v239_v38, 0.0 }
  0xc2   :  { %3215 = vmatmul.msk.bf16.gmra.mxu1 %vm141_vm0, %v106_v34  ;;  %v485_v45 = vmax.f32 %v368_v37, 0.0 }
  0xc6   :  { %v240_v40 = vpop.f32.mrf.mxu0 }
  0xc7   :  { %v241_v41 = vadd.f32 %v240_v40, %v3870_v43  ;;  %v369_v44 = vpop.f32.mrf.mxu1 }
  0xc8   :  { %v370_v46 = vadd.f32 %v369_v44, %v3867_v42 }
  0xc9   :  { %v486_v48 = vmax.f32 %v241_v41, 0.0 }
  0xca   :  { %v487_v49 = vmax.f32 %v370_v46, 0.0  ;;  %v73_v46 = vld [vmem:[%s4917_s0 + $0xf0] sm:$0xff] }
  0xcb   :  { %v606_v52 = vpack.c.bf16 %v486_v48, %v484_v47  ;;  %v74_v47 = vld [vmem:[%s4917_s0 + $0xf8] sm:$0xff] }
  0xcc   :  { %v607_v53 = vpack.c.bf16 %v487_v49, %v485_v45  ;;  %v110_v50 = vpack.c.bf16 %v74_v47, %v73_v46 }
  0xcd   :  { %768 = vmatmul.bf16.gmra.mxu2 %v606_v52 }
  0xce   :  { %v243_v55 = vpop.f32.mrf.mxu0  ;;  %897 = vmatmul.bf16.gmra.mxu3 %v607_v53 }
  0xcf   :  { %v372_v56 = vpop.f32.mrf.mxu1  ;;  %v244_v58 = vadd.f32 %v243_v55, %v3870_v43 }
  0xd0   :  { %v373_v57 = vadd.f32 %v372_v56, %v3867_v42 }
  0xd1   :  { %3192 = vmatmul.msk.bf16.gmra.mxu0 %vm141_vm0, %v107_v54  ;;  %v488_v0 = vmax.f32 %v244_v58, 0.0 }
  0xd2   :  { %3216 = vmatmul.msk.bf16.gmra.mxu1 %vm141_vm0, %v107_v54  ;;  %v489_v62 = vmax.f32 %v373_v57, 0.0 }
  0xd6   :  { %v245_v59 = vpop.f32.mrf.mxu0 }
  0xd7   :  { %v246_v60 = vadd.f32 %v245_v59, %v3870_v43  ;;  %v374_v61 = vpop.f32.mrf.mxu1 }
  0xd8   :  { %v375_v63 = vadd.f32 %v374_v61, %v3867_v42 }
  0xd9   :  { %v490_v1 = vmax.f32 %v246_v60, 0.0 }
  0xda   :  { %v491_v2 = vmax.f32 %v375_v63, 0.0  ;;  %v3591_v63 = vld [vmem:[#allocation2 + $0x374] sm:$0xf0] }
  0xdb   :  { %v608_v5 = vpack.c.bf16 %v490_v1, %v488_v0  ;;  %v75_v1 = vld [vmem:[%s4917_s0 + $0x100] sm:$0xff] }
  0xdc   :  { %v609_v6 = vpack.c.bf16 %v491_v2, %v489_v62  ;;  %v3386_v62 = vld [vmem:[#allocation2 + $0x370] sm:$0xf]  ;;  %v76_v2 = vld [vmem:[%s4917_s0 + $0x108] sm:$0xff] }
  0xdd   :  { %773 = vmatmul.bf16.gmra.mxu2 %v608_v5  ;;  %v3387_v3 = vor.u32 %v3591_v63, %v3386_v62 }
  0xde   :  { %v248_v10 = vpop.f32.mrf.mxu0  ;;  %902 = vmatmul.bf16.gmra.mxu3 %v609_v6  ;;  %v111_v6 = vpack.c.bf16 %v76_v2, %v75_v1 }
  0xdf   :  { %v377_v12 = vpop.f32.mrf.mxu1  ;;  %v249_v17 = vadd.f32 %v248_v10, %v3870_v43  ;;  %1675 = vmatpush.bf16.msrb.mxu2 %v3387_v3  ;;  %v3580_v10 = vld [vmem:[#allocation2 + $0x244] sm:$0xf0] }
  0xe0   :  { %v378_v16 = vadd.f32 %v377_v12, %v3867_v42  ;;  %v3343_v11 = vor.u32 %v3580_v10, %v3342_v9  ;;  %v3298_v12 = vld [vmem:[#allocation2 + $0x110] sm:$0xf] }
  0xe1   :  { %3193 = vmatmul.msk.bf16.gmra.mxu0 %vm141_vm0, %v108_v7  ;;  %v492_v23 = vmax.f32 %v249_v17, 0.0  ;;  %v3299_v14 = vor.u32 %v3569_v13, %v3298_v12 }
  0xe2   :  { %3217 = vmatmul.msk.bf16.gmra.mxu1 %vm141_vm0, %v108_v7  ;;  %v493_v21 = vmax.f32 %v378_v16, 0.0 }
  0xe3   :  { %1411 = vmatpush.bf16.msrb.mxu1 %v3343_v11  ;;  %1147 = vmatpush.bf16.msrb.mxu0 %v3299_v14  ;;  %v3338_v14 = vld [vmem:[#allocation2 + $0x230] sm:$0xf] }
  0xe6   :  { %v250_v18 = vpop.f32.mrf.mxu0 }
  0xe7   :  { %v251_v19 = vadd.f32 %v250_v18, %v3870_v43  ;;  %v379_v20 = vpop.f32.mrf.mxu1 }
  0xe8   :  { %v380_v22 = vadd.f32 %v379_v20, %v3867_v42 }
  0xe9   :  { %v494_v24 = vmax.f32 %v251_v19, 0.0 }
  0xea   :  { %v495_v25 = vmax.f32 %v380_v22, 0.0 }
  0xeb   :  { %v610_v28 = vpack.c.bf16 %v494_v24, %v492_v23 }
  0xec   :  { %v611_v29 = vpack.c.bf16 %v495_v25, %v493_v21  ;;  %v77_v25 = vld [vmem:[%s4917_s0 + $0x110] sm:$0xff] }
  0xed   :  { %778 = vmatmul.bf16.gmra.mxu2 %v610_v28 }
  0xee   :  { %v253_v31 = vpop.f32.mrf.mxu0  ;;  %907 = vmatmul.bf16.gmra.mxu3 %v611_v29  ;;  %v112_v29 = vpack.c.bf16 %v78_v26, %v77_v25 }
  0xef   :  { %v382_v32 = vpop.f32.mrf.mxu1  ;;  %v254_v34 = vadd.f32 %v253_v31, %v3870_v43 }
  0xf0   :  { %v383_v33 = vadd.f32 %v382_v32, %v3867_v42 }
  0xf1   :  { %3194 = vmatmul.msk.bf16.gmra.mxu0 %vm141_vm0, %v109_v30  ;;  %v496_v41 = vmax.f32 %v254_v34, 0.0 }
  0xf2   :  { %3218 = vmatmul.msk.bf16.gmra.mxu1 %vm141_vm0, %v109_v30  ;;  %v497_v38 = vmax.f32 %v383_v33, 0.0 }
  0xf6   :  { %v255_v35 = vpop.f32.mrf.mxu0 }
  0xf7   :  { %v256_v36 = vadd.f32 %v255_v35, %v3870_v43  ;;  %v384_v37 = vpop.f32.mrf.mxu1 }
  0xf8   :  { %v385_v40 = vadd.f32 %v384_v37, %v3867_v42 }
  0xf9   :  { %v498_v44 = vmax.f32 %v256_v36, 0.0 }
  0xfa   :  { %v499_v45 = vmax.f32 %v385_v40, 0.0 }
  0xfb   :  { %v612_v48 = vpack.c.bf16 %v498_v44, %v496_v41 }
  0xfc   :  { %v613_v49 = vpack.c.bf16 %v499_v45, %v497_v38 }
  0xfd   :  { %783 = vmatmul.bf16.gmra.mxu2 %v612_v48 }
  0xfe   :  { %v258_v51 = vpop.f32.mrf.mxu0  ;;  %912 = vmatmul.bf16.gmra.mxu3 %v613_v49  ;;  %v79_v49 = vld [vmem:[%s4917_s0 + $0x120] sm:$0xff] }
  0xff   :  { %v387_v52 = vpop.f32.mrf.mxu1  ;;  %v259_v54 = vadd.f32 %v258_v51, %v3870_v43 }
 0x100   :  { %v388_v53 = vadd.f32 %v387_v52, %v3867_v42 }
 0x101   :  { %3195 = vmatmul.msk.bf16.gmra.mxu0 %vm141_vm0, %v110_v50  ;;  %v500_v60 = vmax.f32 %v259_v54, 0.0 }
 0x102   :  { %3219 = vmatmul.msk.bf16.gmra.mxu1 %vm141_vm0, %v110_v50  ;;  %v501_v58 = vmax.f32 %v388_v53, 0.0  ;;  %v80_v50 = vld [vmem:[%s4917_s0 + $0x128] sm:$0xff] }
 0x103   :  { %v113_v53 = vpack.c.bf16 %v80_v50, %v79_v49 }
 0x106   :  { %v260_v55 = vpop.f32.mrf.mxu0 }
 0x107   :  { %v261_v56 = vadd.f32 %v260_v55, %v3870_v43  ;;  %v389_v57 = vpop.f32.mrf.mxu1 }
 0x108   :  { %v390_v59 = vadd.f32 %v389_v57, %v3867_v42 }
 0x109   :  { %v502_v61 = vmax.f32 %v261_v56, 0.0 }
 0x10a   :  { %v503_v0 = vmax.f32 %v390_v59, 0.0 }
 0x10b   :  { %v614_v4 = vpack.c.bf16 %v502_v61, %v500_v60 }
 0x10c   :  { %v615_v5 = vpack.c.bf16 %v503_v0, %v501_v58 }
 0x10d   :  { %788 = vmatmul.bf16.gmra.mxu2 %v614_v4  ;;  %v3382_v4 = vld [vmem:[#allocation2 + $0x360] sm:$0xf] }
 0x10e   :  { %v263_v7 = vpop.f32.mrf.mxu0  ;;  %917 = vmatmul.bf16.gmra.mxu3 %v615_v5  ;;  %v3590_v5 = vld [vmem:[#allocation2 + $0x364] sm:$0xf0] }
 0x10f   :  { %v392_v8 = vpop.f32.mrf.mxu1  ;;  %v264_v16 = vadd.f32 %v263_v7, %v3870_v43  ;;  %v81_v7 = vld [vmem:[%s4917_s0 + $0x130] sm:$0xff]  ;;  %v3383_v9 = vor.u32 %v3590_v5, %v3382_v4 }
 0x110   :  { %v393_v15 = vadd.f32 %v392_v8, %v3867_v42  ;;  %v82_v8 = vld [vmem:[%s4917_s0 + $0x138] sm:$0xff] }
 0x111   :  { %3196 = vmatmul.msk.bf16.gmra.mxu0 %vm141_vm0, %v111_v6  ;;  %v504_v22 = vmax.f32 %v264_v16, 0.0  ;;  %1676 = vmatpush.bf16.msrb.mxu2 %v3383_v9  ;;  %v114_v13 = vpack.c.bf16 %v82_v8, %v81_v7 }
 0x112   :  { %3220 = vmatmul.msk.bf16.gmra.mxu1 %vm141_vm0, %v111_v6  ;;  %v505_v20 = vmax.f32 %v393_v15, 0.0  ;;  %v3579_v15 = vld [vmem:[#allocation2 + $0x234] sm:$0xf0] }
 0x116   :  { %v265_v17 = vpop.f32.mrf.mxu0 }
 0x117   :  { %v266_v18 = vadd.f32 %v265_v17, %v3870_v43  ;;  %v394_v19 = vpop.f32.mrf.mxu1  ;;  %v3339_v17 = vor.u32 %v3579_v15, %v3338_v14 }
 0x118   :  { %v395_v21 = vadd.f32 %v394_v19, %v3867_v42 }
 0x119   :  { %v506_v23 = vmax.f32 %v266_v18, 0.0  ;;  %1412 = vmatpush.bf16.msrb.mxu1 %v3339_v17 }
 0x11a   :  { %v507_v24 = vmax.f32 %v395_v21, 0.0  ;;  %v3568_v21 = vld [vmem:[#allocation2 + $0x104] sm:$0xf0] }
 0x11b   :  { %v616_v27 = vpack.c.bf16 %v506_v23, %v504_v22 }
 0x11c   :  { %v617_v28 = vpack.c.bf16 %v507_v24, %v505_v20  ;;  %v3294_v20 = vld [vmem:[#allocation2 + $0x100] sm:$0xf] }
 0x11d   :  { %793 = vmatmul.bf16.gmra.mxu2 %v616_v27  ;;  %v3295_v22 = vor.u32 %v3568_v21, %v3294_v20  ;;  %v3378_v21 = vld [vmem:[#allocation2 + $0x350] sm:$0xf] }
 0x11e   :  { %v268_v30 = vpop.f32.mrf.mxu0  ;;  %922 = vmatmul.bf16.gmra.mxu3 %v617_v28 }
 0x11f   :  { %v397_v31 = vpop.f32.mrf.mxu1  ;;  %v269_v35 = vadd.f32 %v268_v30, %v3870_v43  ;;  %1148 = vmatpush.bf16.msrb.mxu0 %v3295_v22  ;;  %v3589_v22 = vld [vmem:[#allocation2 + $0x354] sm:$0xf0] }
 0x120   :  { %v3980_v32 = vpop.f32.mrf.mxu2  ;;  %v398_v34 = vadd.f32 %v397_v31, %v3867_v42 }
 0x121   :  { %3197 = vmatmul.msk.bf16.gmra.mxu0 %vm141_vm0, %v112_v29  ;;  %v3983_v33 = vpop.f32.mrf.mxu3  ;;  %v508_v45 = vmax.f32 %v269_v35, 0.0 }
 0x122   :  { %3221 = vmatmul.msk.bf16.gmra.mxu1 %vm141_vm0, %v112_v29  ;;  %v509_v40 = vmax.f32 %v398_v34, 0.0 }
 0x126   :  { %v270_v36 = vpop.f32.mrf.mxu0 }
 0x127   :  { %v271_v37 = vadd.f32 %v270_v36, %v3870_v43  ;;  %v399_v38 = vpop.f32.mrf.mxu1  ;;  %v83_v36 = vld [vmem:[%s4917_s0 + $0x140] sm:$0xff] }
 0x128   :  { %v400_v41 = vadd.f32 %v399_v38, %v3867_v42  ;;  %v3990_v44 = vpop.f32.mrf.mxu2 }
 0x129   :  { %v510_v46 = vmax.f32 %v271_v37, 0.0  ;;  %v3992_v47 = vpop.f32.mrf.mxu3  ;;  %v84_v37 = vld [vmem:[%s4917_s0 + $0x148] sm:$0xff] }
 0x12a   :  { %v511_v48 = vmax.f32 %v400_v41, 0.0 }
 0x12b   :  { %v618_v51 = vpack.c.bf16 %v510_v46, %v508_v45  ;;  %v115_v45 = vpack.c.bf16 %v84_v37, %v83_v36 }
 0x12c   :  { %v619_v52 = vpack.c.bf16 %v511_v48, %v509_v40 }
 0x12d   :  { %798 = vmatmul.bf16.gmra.mxu2 %v618_v51 }
 0x12e   :  { %v273_v54 = vpop.f32.mrf.mxu0  ;;  %927 = vmatmul.bf16.gmra.mxu3 %v619_v52 }
 0x12f   :  { %v402_v55 = vpop.f32.mrf.mxu1  ;;  %v274_v59 = vadd.f32 %v273_v54, %v3870_v43 }
 0x130   :  { %v4000_v56 = vpop.f32.mrf.mxu2  ;;  %v403_v58 = vadd.f32 %v402_v55, %v3867_v42 }
 0x131   :  { %3198 = vmatmul.msk.bf16.gmra.mxu0 %vm141_vm0, %v113_v53  ;;  %v4003_v57 = vpop.f32.mrf.mxu3  ;;  %v512_v2 = vmax.f32 %v274_v59, 0.0 }
 0x132   :  { %3222 = vmatmul.msk.bf16.gmra.mxu1 %vm141_vm0, %v113_v53  ;;  %v513_v63 = vmax.f32 %v403_v58, 0.0 }
 0x136   :  { %v275_v60 = vpop.f32.mrf.mxu0 }
 0x137   :  { %v276_v61 = vadd.f32 %v275_v60, %v3870_v43  ;;  %v404_v62 = vpop.f32.mrf.mxu1 }
 0x138   :  { %v405_v0 = vadd.f32 %v404_v62, %v3867_v42  ;;  %v4010_v1 = vpop.f32.mrf.mxu2 }
 0x139   :  { %v514_v3 = vmax.f32 %v276_v61, 0.0  ;;  %v4018_v11 = vpop.f32.mrf.mxu3 }
 0x13a   :  { %v515_v6 = vmax.f32 %v405_v0, 0.0  ;;  %v85_v0 = vld [vmem:[%s4917_s0 + $0x150] sm:$0xff] }
 0x13b   :  { %v620_v10 = vpack.c.bf16 %v514_v3, %v512_v2  ;;  %v86_v2 = vld [vmem:[%s4917_s0 + $0x158] sm:$0xff] }
 0x13c   :  { %v621_v12 = vpack.c.bf16 %v515_v6, %v513_v63  ;;  %v116_v5 = vpack.c.bf16 %v86_v2, %v85_v0  ;;  %v90_v0 = vld [vmem:[%s4917_s0 + $0x178] sm:$0xff] }
 0x13d   :  { %803 = vmatmul.bf16.gmra.mxu2 %v620_v10 }
 0x13e   :  { %v278_v16 = vpop.f32.mrf.mxu0  ;;  %932 = vmatmul.bf16.gmra.mxu3 %v621_v12 }
 0x13f   :  { %v407_v18 = vpop.f32.mrf.mxu1  ;;  %v279_v24 = vadd.f32 %v278_v16, %v3870_v43 }
 0x140   :  { %v4021_v19 = vpop.f32.mrf.mxu2  ;;  %v408_v23 = vadd.f32 %v407_v18, %v3867_v42 }
 0x141   :  { %3199 = vmatmul.msk.bf16.gmra.mxu0 %vm141_vm0, %v114_v13  ;;  %v4026_v25 = vpop.f32.mrf.mxu3  ;;  %v516_v31 = vmax.f32 %v279_v24, 0.0 }
 0x142   :  { %3223 = vmatmul.msk.bf16.gmra.mxu1 %vm141_vm0, %v114_v13  ;;  %v517_v29 = vmax.f32 %v408_v23, 0.0 }
 0x146   :  { %v280_v26 = vpop.f32.mrf.mxu0 }
 0x147   :  { %v281_v27 = vadd.f32 %v280_v26, %v3870_v43  ;;  %v409_v28 = vpop.f32.mrf.mxu1  ;;  %v87_v26 = vld [vmem:[%s4917_s0 + $0x160] sm:$0xff] }
 0x148   :  { %v410_v30 = vadd.f32 %v409_v28, %v3867_v42  ;;  %v4036_v40 = vpop.f32.mrf.mxu2  ;;  %v3379_v28 = vor.u32 %v3589_v22, %v3378_v21 }
 0x149   :  { %v518_v34 = vmax.f32 %v281_v27, 0.0  ;;  %v4038_v49 = vpop.f32.mrf.mxu3  ;;  %v88_v27 = vld [vmem:[%s4917_s0 + $0x168] sm:$0xff] }
 0x14a   :  { %v519_v35 = vmax.f32 %v410_v30, 0.0  ;;  %1677 = vmatpush.bf16.msrb.mxu2 %v3379_v28 }
 0x14b   :  { %v622_v38 = vpack.c.bf16 %v518_v34, %v516_v31  ;;  %v117_v31 = vpack.c.bf16 %v88_v27, %v87_v26  ;;  %v3334_v34 = vld [vmem:[#allocation2 + $0x220] sm:$0xf] }
 0x14c   :  { %v623_v41 = vpack.c.bf16 %v519_v35, %v517_v29  ;;  %v3578_v35 = vld [vmem:[#allocation2 + $0x224] sm:$0xf0] }
 0x14d   :  { %808 = vmatmul.bf16.gmra.mxu2 %v622_v38  ;;  %v3335_v38 = vor.u32 %v3578_v35, %v3334_v34 }
 0x14e   :  { %v283_v46 = vpop.f32.mrf.mxu0  ;;  %937 = vmatmul.bf16.gmra.mxu3 %v623_v41 }
 0x14f   :  { %v412_v48 = vpop.f32.mrf.mxu1  ;;  %v284_v51 = vadd.f32 %v283_v46, %v3870_v43  ;;  %1413 = vmatpush.bf16.msrb.mxu1 %v3335_v38 }
 0x150   :  { %v413_v50 = vadd.f32 %v412_v48, %v3867_v42  ;;  %v4044_v52 = vpop.f32.mrf.mxu2 }
 0x151   :  { %3200 = vmatmul.msk.bf16.gmra.mxu0 %vm141_vm0, %v115_v45  ;;  %v520_v60 = vmax.f32 %v284_v51, 0.0  ;;  %v4048_v62 = vpop.f32.mrf.mxu3 }
 0x152   :  { %3224 = vmatmul.msk.bf16.gmra.mxu1 %vm141_vm0, %v115_v45  ;;  %v521_v58 = vmax.f32 %v413_v50, 0.0 }
 0x156   :  { %v285_v53 = vpop.f32.mrf.mxu0 }
 0x157   :  { %v286_v54 = vadd.f32 %v285_v53, %v3870_v43  ;;  %v414_v55 = vpop.f32.mrf.mxu1 }
 0x158   :  { %v415_v59 = vadd.f32 %v414_v55, %v3867_v42  ;;  %v4056_v8 = vpop.f32.mrf.mxu2 }
 0x159   :  { %v522_v61 = vmax.f32 %v286_v54, 0.0  ;;  %v4060_v9 = vpop.f32.mrf.mxu3 }
 0x15a   :  { %v523_v63 = vmax.f32 %v415_v59, 0.0 }
 0x15b   :  { %v624_v3 = vpack.c.bf16 %v522_v61, %v520_v60 }
 0x15c   :  { %v625_v4 = vpack.c.bf16 %v523_v63, %v521_v58  ;;  %v89_v63 = vld [vmem:[%s4917_s0 + $0x170] sm:$0xff] }
 0x15d   :  { %813 = vmatmul.bf16.gmra.mxu2 %v624_v3 }
 0x15e   :  { %v288_v6 = vpop.f32.mrf.mxu0  ;;  %942 = vmatmul.bf16.gmra.mxu3 %v625_v4  ;;  %v118_v4 = vpack.c.bf16 %v90_v0, %v89_v63  ;;  %v3374_v0 = vld [vmem:[#allocation2 + $0x340] sm:$0xf] }
 0x15f   :  { %v417_v7 = vpop.f32.mrf.mxu1  ;;  %v289_v12 = vadd.f32 %v288_v6, %v3870_v43 }
 0x160   :  { %v418_v10 = vadd.f32 %v417_v7, %v3867_v42  ;;  %v4066_v23 = vpop.f32.mrf.mxu2 }
 0x161   :  { %3201 = vmatmul.msk.bf16.gmra.mxu0 %vm141_vm0, %v116_v5  ;;  %v524_v18 = vmax.f32 %v289_v12, 0.0  ;;  %v4074_v36 = vpop.f32.mrf.mxu3 }
 0x162   :  { %3225 = vmatmul.msk.bf16.gmra.mxu1 %vm141_vm0, %v116_v5  ;;  %v525_v16 = vmax.f32 %v418_v10, 0.0  ;;  %v4095_v10 = vperm.slane %v3865_v39, 1 }
 0x166   :  { %v290_v13 = vpop.f32.mrf.mxu0 }
 0x167   :  { %v291_v14 = vadd.f32 %v290_v13, %v3870_v43  ;;  %v419_v15 = vpop.f32.mrf.mxu1  ;;  %v757_v13 = vadd.f32 %v3990_v44, %v4095_v10 }
 0x168   :  { %v420_v17 = vadd.f32 %v419_v15, %v3867_v42  ;;  %v4078_v45 = vpop.f32.mrf.mxu2  ;;  %v755_v15 = vadd.f32 %v3980_v32, %v4095_v10 }
 0x169   :  { %v526_v20 = vmax.f32 %v291_v14, 0.0  ;;  %v4083_v54 = vpop.f32.mrf.mxu3  ;;  %v886_v39 = vadd.f32 %v3992_v47, %v757_v13 }
 0x16a   :  { %v527_v24 = vmax.f32 %v420_v17, 0.0  ;;  %v884_v44 = vadd.f32 %v3983_v33, %v755_v15  ;;  %v762_v33 = vadd.f32 %v4010_v1, %v4095_v10 }
 0x16b   :  { %v626_v29 = vpack.c.bf16 %v526_v20, %v524_v18 }
 0x16c   :  { %v627_v30 = vpack.c.bf16 %v527_v24, %v525_v16  ;;  %v1003_v34 = vmax.f32 %v884_v44, 0.0  ;;  %v767_v44 = vadd.f32 %v4036_v40, %v4095_v10 }
 0x16d   :  { %818 = vmatmul.bf16.gmra.mxu2 %v626_v29  ;;  %v1004_v29 = vmax.f32 %v886_v39, 0.0 }
 0x16e   :  { %v293_v37 = vpop.f32.mrf.mxu0  ;;  %947 = vmatmul.bf16.gmra.mxu3 %v627_v30 }
 0x16f   :  { %v422_v41 = vpop.f32.mrf.mxu1  ;;  %v294_v48 = vadd.f32 %v293_v37, %v3870_v43  ;;  %v1068_v35 = vpack.c.bf16 %v1004_v29, %v1003_v34 }
 0x170   :  { %v423_v46 = vadd.f32 %v422_v41, %v3867_v42  ;;  %v4092_v5 = vpop.f32.mrf.mxu2 }
 0x171   :  { %3202 = vmatmul.msk.bf16.gmra.mxu0 %vm141_vm0, %v117_v31  ;;  %v528_v59 = vmax.f32 %v294_v48, 0.0  ;;  %v4098_v12 = vpop.f32.mrf.mxu3 }
 0x172   :  { %3226 = vmatmul.msk.bf16.gmra.mxu1 %vm141_vm0, %v117_v31  ;;  %v529_v55 = vmax.f32 %v423_v46, 0.0  ;;  %v760_v46 = vadd.f32 %v4000_v56, %v4095_v10 }
 0x174   :  { %v889_v1 = vadd.f32 %v4003_v57, %v760_v46  ;;  %v3577_v57 = vld [vmem:[#allocation2 + $0x214] sm:$0xf0] }
 0x176   :  { %v295_v50 = vpop.f32.mrf.mxu0 }
 0x177   :  { %v296_v51 = vadd.f32 %v295_v50, %v3870_v43  ;;  %v424_v53 = vpop.f32.mrf.mxu1 }
 0x178   :  { %v425_v58 = vadd.f32 %v424_v53, %v3867_v42  ;;  %v4109_v21 = vpop.f32.mrf.mxu2  ;;  %v891_v53 = vadd.f32 %v4018_v11, %v762_v33 }
 0x179   :  { %v530_v60 = vmax.f32 %v296_v51, 0.0  ;;  %v4113_v30 = vpop.f32.mrf.mxu3 }
 0x17a   :  { %v531_v61 = vmax.f32 %v425_v58, 0.0 }
 0x17b   :  { %v628_v2 = vpack.c.bf16 %v530_v60, %v528_v59 }
 0x17c   :  { %v629_v3 = vpack.c.bf16 %v531_v61, %v529_v55 }
 0x17d   :  { %823 = vmatmul.bf16.gmra.mxu2 %v628_v2  ;;  %v3588_v2 = vld [vmem:[#allocation2 + $0x344] sm:$0xf0] }
 0x17e   :  { %v298_v6 = vpop.f32.mrf.mxu0  ;;  %952 = vmatmul.bf16.gmra.mxu3 %v629_v3  ;;  %v3375_v3 = vor.u32 %v3588_v2, %v3374_v0 }
 0x17f   :  { %v427_v7 = vpop.f32.mrf.mxu1  ;;  %v299_v16 = vadd.f32 %v298_v6, %v3870_v43  ;;  %v3599_v6 = vld [vmem:[#allocation2 + $0x474] sm:$0xf0] }
 0x180   :  { %v428_v14 = vadd.f32 %v427_v7, %v3867_v42  ;;  %v4115_v38 = vpop.f32.mrf.mxu2  ;;  %v1006_v7 = vmax.f32 %v891_v53, 0.0  ;;  %1678 = vmatpush.bf16.msrb.mxu2 %v3375_v3 }
 0x181   :  { %3203 = vmatmul.msk.bf16.gmra.mxu0 %vm141_vm0, %v118_v4  ;;  %v532_v26 = vmax.f32 %v299_v16, 0.0  ;;  %v4123_v50 = vpop.f32.mrf.mxu3  ;;  %v1005_v16 = vmax.f32 %v889_v1, 0.0 }
 0x182   :  { %3227 = vmatmul.msk.bf16.gmra.mxu1 %vm141_vm0, %v118_v4  ;;  %v533_v22 = vmax.f32 %v428_v14, 0.0  ;;  %v3418_v4 = vld [vmem:[#allocation2 + $0x470] sm:$0xf] }
 0x183   :  { %v3419_v14 = vor.u32 %v3599_v6, %v3418_v4 }
 0x185   :  { %1942 = vmatpush.bf16.msrb.mxu3 %v3419_v14 }
 0x186   :  { %v300_v17 = vpop.f32.mrf.mxu0 }
 0x187   :  { %v301_v18 = vadd.f32 %v300_v17, %v3870_v43  ;;  %v429_v20 = vpop.f32.mrf.mxu1  ;;  %v3330_v17 = vld [vmem:[#allocation2 + $0x210] sm:$0xf] }
 0x188   :  { %v430_v24 = vadd.f32 %v429_v20, %v3867_v42  ;;  %v4129_v11 = vpop.f32.mrf.mxu2 }
 0x189   :  { %v534_v27 = vmax.f32 %v301_v18, 0.0  ;;  %v3331_v18 = vor.u32 %v3577_v57, %v3330_v17 }
 0x18a   :  { %v535_v28 = vmax.f32 %v430_v24, 0.0  ;;  %v4131_v24 = vpop.f32.mrf.mxu3 }
 0x18b   :  { %v630_v32 = vpack.c.bf16 %v534_v27, %v532_v26  ;;  %1414 = vmatpush.bf16.msrb.mxu1 %v3331_v18  ;;  %v765_v27 = vadd.f32 %v4021_v19, %v4095_v10 }
 0x18c   :  { %v631_v31 = vpack.c.bf16 %v535_v28, %v533_v22  ;;  %v1069_v22 = vpack.c.bf16 %v1006_v7, %v1005_v16 }
 0x18d   :  { %828 = vmatmul.bf16.gmra.mxu2 %v630_v32  ;;  %v894_v40 = vadd.f32 %v4026_v25, %v765_v27  ;;  %v772_v25 = vadd.f32 %v4056_v8, %v4095_v10  ;;  %v775_v27 = vadd.f32 %v4066_v23, %v4095_v10 }
 0x18e   :  { %v303_v47 = vpop.f32.mrf.mxu0  ;;  %957 = vmatmul.bf16.gmra.mxu3 %v631_v31  ;;  %v896_v31 = vadd.f32 %v4038_v49, %v767_v44 }
 0x18f   :  { %v432_v37 = vpop.f32.mrf.mxu1  ;;  %v304_v48 = vadd.f32 %v303_v47, %v3870_v43 }
 0x190   :  { %v433_v41 = vadd.f32 %v432_v37, %v3867_v42  ;;  %v4139_v29 = vpop.f32.mrf.mxu2 }
 0x191   :  { %1149 = vmatmul.bf16.vlgmr.msrb.gmra.mxu0 %v1068_v35  ;;  %v536_v61 = vmax.f32 %v304_v48, 0.0  ;;  %v1008_v48 = vmax.f32 %v896_v31, 0.0 }
 0x192   :  { %v537_v59 = vmax.f32 %v433_v41, 0.0  ;;  %v4145_v46 = vpop.f32.mrf.mxu3 }
 0x196   :  { %v305_v51 = vpop.f32.mrf.mxu0 }
 0x197   :  { %v306_v55 = vadd.f32 %v305_v51, %v3870_v43  ;;  %v434_v58 = vpop.f32.mrf.mxu1 }
 0x198   :  { %v435_v60 = vadd.f32 %v434_v58, %v3867_v42 }
 0x199   :  { %v538_v63 = vmax.f32 %v306_v55, 0.0  ;;  %v1007_v55 = vmax.f32 %v894_v40, 0.0  ;;  %v904_v40 = vadd.f32 %v4074_v36, %v775_v27 }
 0x19a   :  { %v539_v56 = vmax.f32 %v435_v60, 0.0  ;;  %v4147_v60 = vpop.f32.mrf.mxu2  ;;  %v4151_v1 = vpop.f32.mrf.mxu3 }
 0x19b   :  { %v632_v13 = vpack.c.bf16 %v538_v63, %v536_v61  ;;  %v770_v63 = vadd.f32 %v4044_v52, %v4095_v10 }
 0x19c   :  { %v633_v15 = vpack.c.bf16 %v539_v56, %v537_v59  ;;  %v1070_v59 = vpack.c.bf16 %v1008_v48, %v1007_v55  ;;  %v901_v56 = vadd.f32 %v4060_v9, %v772_v25  ;;  %v3587_v48 = vld [vmem:[#allocation2 + $0x334] sm:$0xf0]  ;;  %v3598_v55 = vld [vmem:[#allocation2 + $0x464] sm:$0xf0]  ;;  %v1011_v25 = vmax.f32 %v904_v40, 0.0 }
 0x19d   :  { %833 = vmatmul.bf16.gmra.mxu2 %v632_v13  ;;  %v899_v8 = vadd.f32 %v4048_v62, %v770_v63  ;;  %v777_v62 = vadd.f32 %v4078_v45, %v4095_v10  ;;  %v3576_v63 = vld [vmem:[#allocation2 + $0x204] sm:$0xf0] }
 0x19e   :  { %v308_v39 = vpop.f32.mrf.mxu0  ;;  %962 = vmatmul.bf16.gmra.mxu3 %v633_v15  ;;  %v1010_v17 = vmax.f32 %v901_v56, 0.0 }
 0x19f   :  { %v437_v20 = vpop.f32.mrf.mxu1  ;;  %v309_v28 = vadd.f32 %v308_v39, %v3870_v43  ;;  %v1009_v39 = vmax.f32 %v899_v8, 0.0  ;;  %v906_v31 = vadd.f32 %v4083_v54, %v777_v62  ;;  %v780_v8 = vadd.f32 %v4092_v5, %v4095_v10 }
 0x1a0   :  { %v438_v26 = vadd.f32 %v437_v20, %v3867_v42 }
 0x1a1   :  { %1154 = vmatmul.bf16.gmra.mxu0 %v1069_v22  ;;  %v540_v33 = vmax.f32 %v309_v28, 0.0  ;;  %v1071_v22 = vpack.c.bf16 %v1010_v17, %v1009_v39 }
 0x1a2   :  { %v541_v35 = vmax.f32 %v438_v26, 0.0  ;;  %v4161_v15 = vpop.f32.mrf.mxu2  ;;  %v4163_v18 = vpop.f32.mrf.mxu3 }
 0x1a6   :  { %v310_v32 = vpop.f32.mrf.mxu0 }
 0x1a7   :  { %v311_v34 = vadd.f32 %v310_v32, %v3870_v43  ;;  %v439_v47 = vpop.f32.mrf.mxu1 }
 0x1a8   :  { %v440_v37 = vadd.f32 %v439_v47, %v3867_v42 }
 0x1a9   :  { %v542_v41 = vmax.f32 %v311_v34, 0.0 }
 0x1aa   :  { %v543_v19 = vmax.f32 %v440_v37, 0.0  ;;  %v4167_v44 = vpop.f32.mrf.mxu2 }
 0x1ab   :  { %v634_v51 = vpack.c.bf16 %v542_v41, %v540_v33 }
 0x1ac   :  { %v635_v53 = vpack.c.bf16 %v543_v19, %v541_v35  ;;  %v4175_v35 = vpop.f32.mrf.mxu3  ;;  %v3370_v19 = vld [vmem:[#allocation2 + $0x330] sm:$0xf] }
 0x1ad   :  { %838 = vmatmul.bf16.gmra.mxu2 %v634_v51  ;;  %v3371_v51 = vor.u32 %v3587_v48, %v3370_v19 }
 0x1ae   :  { %v313_v58 = vpop.f32.mrf.mxu0  ;;  %967 = vmatmul.bf16.gmra.mxu3 %v635_v53  ;;  %v3414_v53 = vld [vmem:[#allocation2 + $0x460] sm:$0xf] }
 0x1af   :  { %v442_v49 = vpop.f32.mrf.mxu1  ;;  %v314_v0 = vadd.f32 %v313_v58, %v3870_v43  ;;  %v1012_v58 = vmax.f32 %v906_v31, 0.0  ;;  %1679 = vmatpush.bf16.msrb.mxu2 %v3371_v51 }
 0x1b0   :  { %v443_v61 = vadd.f32 %v442_v49, %v3867_v42  ;;  %v3415_v49 = vor.u32 %v3598_v55, %v3414_v53 }
 0x1b1   :  { %1159 = vmatmul.bf16.gmra.mxu0 %v1070_v59  ;;  %v544_v13 = vmax.f32 %v314_v0, 0.0 }
 0x1b2   :  { %v545_v6 = vmax.f32 %v443_v61, 0.0  ;;  %1943 = vmatpush.bf16.msrb.mxu3 %v3415_v49  ;;  %v3326_v61 = vld [vmem:[#allocation2 + $0x200] sm:$0xf]  ;;  %v4179_v0 = vpop.f32.mrf.mxu2 }
 0x1b6   :  { %v315_v2 = vpop.f32.mrf.mxu0 }
 0x1b7   :  { %v316_v3 = vadd.f32 %v315_v2, %v3870_v43  ;;  %v444_v4 = vpop.f32.mrf.mxu1  ;;  %v3327_v2 = vor.u32 %v3576_v63, %v3326_v61 }
 0x1b8   :  { %v445_v7 = vadd.f32 %v444_v4, %v3867_v42  ;;  %v4181_v4 = vpop.f32.mrf.mxu3 }
 0x1b9   :  { %v546_v14 = vmax.f32 %v316_v3, 0.0  ;;  %v1072_v3 = vpack.c.bf16 %v1012_v58, %v1011_v25  ;;  %1415 = vmatpush.bf16.msrb.mxu1 %v3327_v2 }
 0x1ba   :  { %v547_v16 = vmax.f32 %v445_v7, 0.0 }
 0x1bb   :  { %v636_v52 = vpack.c.bf16 %v546_v14, %v544_v13 }
 0x1bc   :  { %v637_v57 = vpack.c.bf16 %v547_v16, %v545_v6  ;;  %v782_v6 = vadd.f32 %v4109_v21, %v4095_v10  ;;  %v909_v21 = vadd.f32 %v4098_v12, %v780_v8  ;;  %v787_v12 = vadd.f32 %v4129_v11, %v4095_v10 }
 0x1bd   :  { %843 = vmatmul.bf16.gmra.mxu2 %v636_v52 }
 0x1be   :  { %v318_v9 = vpop.f32.mrf.mxu0  ;;  %972 = vmatmul.bf16.gmra.mxu3 %v637_v57  ;;  %v911_v16 = vadd.f32 %v4113_v30, %v782_v6  ;;  %v4191_v57 = vpop.f32.mrf.mxu2  ;;  %v916_v19 = vadd.f32 %v4131_v24, %v787_v12 }
 0x1bf   :  { %v447_v20 = vpop.f32.mrf.mxu1  ;;  %v319_v28 = vadd.f32 %v318_v9, %v3870_v43 }
 0x1c0   :  { %v448_v26 = vadd.f32 %v447_v20, %v3867_v42  ;;  %v4195_v27 = vpop.f32.mrf.mxu3  ;;  %v1016_v49 = vmax.f32 %v916_v19, 0.0  ;;  %v795_v19 = vadd.f32 %v4161_v15, %v4095_v10 }
 0x1c1   :  { %1164 = vmatmul.bf16.gmra.mxu0 %v1071_v22  ;;  %v548_v33 = vmax.f32 %v319_v28, 0.0 }
 0x1c2   :  { %v549_v37 = vmax.f32 %v448_v26, 0.0  ;;  %v1014_v26 = vmax.f32 %v911_v16, 0.0 }
 0x1c6   :  { %v320_v32 = vpop.f32.mrf.mxu0 }
 0x1c7   :  { %v321_v34 = vadd.f32 %v320_v32, %v3870_v43  ;;  %v449_v47 = vpop.f32.mrf.mxu1  ;;  %v1013_v32 = vmax.f32 %v909_v21, 0.0 }
 0x1c8   :  { %v450_v45 = vadd.f32 %v449_v47, %v3867_v42  ;;  %v4197_v47 = vpop.f32.mrf.mxu2 }
 0x1c9   :  { %v550_v41 = vmax.f32 %v321_v34, 0.0  ;;  %v1073_v34 = vpack.c.bf16 %v1014_v26, %v1013_v32  ;;  %v3410_v26 = vld [vmem:[#allocation2 + $0x450] sm:$0xf]  ;;  %v3597_v32 = vld [vmem:[#allocation2 + $0x454] sm:$0xf0] }
 0x1ca   :  { %v551_v23 = vmax.f32 %v450_v45, 0.0  ;;  %v785_v45 = vadd.f32 %v4115_v38, %v4095_v10 }
 0x1cb   :  { %v638_v54 = vpack.c.bf16 %v550_v41, %v548_v33  ;;  %v4205_v33 = vpop.f32.mrf.mxu3 }
 0x1cc   :  { %v639_v59 = vpack.c.bf16 %v551_v23, %v549_v37  ;;  %v914_v11 = vadd.f32 %v4123_v50, %v785_v45  ;;  %v792_v50 = vadd.f32 %v4147_v60, %v4095_v10  ;;  %v797_v45 = vadd.f32 %v4167_v44, %v4095_v10 }
 0x1cd   :  { %848 = vmatmul.bf16.gmra.mxu2 %v638_v54  ;;  %v924_v44 = vadd.f32 %v4163_v18, %v795_v19 }
 0x1ce   :  { %v323_v36 = vpop.f32.mrf.mxu0  ;;  %977 = vmatmul.bf16.gmra.mxu3 %v639_v59  ;;  %v1015_v61 = vmax.f32 %v914_v11, 0.0 }
 0x1cf   :  { %v452_v56 = vpop.f32.mrf.mxu1  ;;  %v324_v13 = vadd.f32 %v323_v36, %v3870_v43 }
 0x1d0   :  { %v453_v7 = vadd.f32 %v452_v56, %v3867_v42  ;;  %v4211_v59 = vpop.f32.mrf.mxu2  ;;  %v1074_v36 = vpack.c.bf16 %v1016_v49, %v1015_v61 }
 0x1d1   :  { %1169 = vmatmul.bf16.gmra.mxu0 %v1072_v3  ;;  %v552_v20 = vmax.f32 %v324_v13, 0.0  ;;  %v790_v3 = vadd.f32 %v4139_v29, %v4095_v10 }
 0x1d2   :  { %v553_v39 = vmax.f32 %v453_v7, 0.0  ;;  %v921_v7 = vadd.f32 %v4151_v1, %v792_v50  ;;  %v3586_v1 = vld [vmem:[#allocation2 + $0x324] sm:$0xf0]  ;;  %v802_v50 = vadd.f32 %v4191_v57, %v4095_v10 }
 0x1d3   :  { %v4213_v2 = vpop.f32.mrf.mxu3  ;;  %v919_v60 = vadd.f32 %v4145_v46, %v790_v3  ;;  %v800_v3 = vadd.f32 %v4179_v0, %v4095_v10 }
 0x1d4   :  { %v1018_v21 = vmax.f32 %v921_v7, 0.0 }
 0x1d6   :  { %v325_v14 = vpop.f32.mrf.mxu0 }
 0x1d7   :  { %v326_v17 = vadd.f32 %v325_v14, %v3870_v43  ;;  %v454_v52 = vpop.f32.mrf.mxu1 }
 0x1d8   :  { %v455_v9 = vadd.f32 %v454_v52, %v3867_v42  ;;  %v4222_v8 = vpop.f32.mrf.mxu2 }
 0x1d9   :  { %v554_v22 = vmax.f32 %v326_v17, 0.0 }
 0x1da   :  { %v555_v62 = vmax.f32 %v455_v9, 0.0 }
 0x1db   :  { %v640_v5 = vpack.c.bf16 %v554_v22, %v552_v20  ;;  %v4227_v20 = vpop.f32.mrf.mxu3 }
 0x1dc   :  { %v641_v28 = vpack.c.bf16 %v555_v62, %v553_v39  ;;  %v3366_v62 = vld [vmem:[#allocation2 + $0x320] sm:$0xf] }
 0x1dd   :  { %853 = vmatmul.bf16.gmra.mxu2 %v640_v5 }
 0x1de   :  { %v328_v30 = vpop.f32.mrf.mxu0  ;;  %982 = vmatmul.bf16.gmra.mxu3 %v641_v28  ;;  %v3367_v28 = vor.u32 %v3586_v1, %v3366_v62  ;;  %v805_v62 = vadd.f32 %v4197_v47, %v4095_v10 }
 0x1df   :  { %v457_v31 = vpop.f32.mrf.mxu1  ;;  %v329_v40 = vadd.f32 %v328_v30, %v3870_v43  ;;  %v1017_v30 = vmax.f32 %v919_v60, 0.0 }
 0x1e0   :  { %v458_v37 = vadd.f32 %v457_v31, %v3867_v42  ;;  %v3411_v31 = vor.u32 %v3597_v32, %v3410_v26  ;;  %1680 = vmatpush.bf16.msrb.mxu2 %v3367_v28  ;;  %v934_v32 = vadd.f32 %v4205_v33, %v805_v62 }
 0x1e1   :  { %1174 = vmatmul.bf16.gmra.mxu0 %v1073_v34  ;;  %v556_v55 = vmax.f32 %v329_v40, 0.0  ;;  %v1075_v12 = vpack.c.bf16 %v1018_v21, %v1017_v30 }
 0x1e2   :  { %v557_v51 = vmax.f32 %v458_v37, 0.0  ;;  %1944 = vmatpush.bf16.msrb.mxu3 %v3411_v31  ;;  %v4229_v37 = vpop.f32.mrf.mxu2 }
 0x1e3   :  { %v4233_v40 = vpop.f32.mrf.mxu3  ;;  %v812_v33 = vadd.f32 %v4229_v37, %v4095_v10 }
 0x1e6   :  { %v330_v41 = vpop.f32.mrf.mxu0 }
 0x1e7   :  { %v331_v48 = vadd.f32 %v330_v41, %v3870_v43  ;;  %v459_v23 = vpop.f32.mrf.mxu1 }
 0x1e8   :  { %v460_v53 = vadd.f32 %v459_v23, %v3867_v42 }
 0x1e9   :  { %v558_v58 = vmax.f32 %v331_v48, 0.0 }
 0x1ea   :  { %v559_v54 = vmax.f32 %v460_v53, 0.0 }
 0x1eb   :  { %v642_v38 = vpack.c.bf16 %v558_v58, %v556_v55 }
 0x1ec   :  { %v643_v25 = vpack.c.bf16 %v559_v54, %v557_v51  ;;  %v926_v51 = vadd.f32 %v4175_v35, %v797_v45  ;;  %v3406_v45 = vld [vmem:[#allocation2 + $0x440] sm:$0xf] }
 0x1ed   :  { %858 = vmatmul.bf16.gmra.mxu2 %v642_v38  ;;  %v4243_v38 = vpop.f32.mrf.mxu2 }
 0x1ee   :  { %v333_v63 = vpop.f32.mrf.mxu0  ;;  %987 = vmatmul.bf16.gmra.mxu3 %v643_v25  ;;  %v1020_v61 = vmax.f32 %v926_v51, 0.0 }
 0x1ef   :  { %v462_v24 = vpop.f32.mrf.mxu1  ;;  %v334_v6 = vadd.f32 %v333_v63, %v3870_v43 }
 0x1f0   :  { %v463_v56 = vadd.f32 %v462_v24, %v3867_v42  ;;  %v1019_v24 = vmax.f32 %v924_v44, 0.0 }
 0x1f1   :  { %1179 = vmatmul.bf16.gmra.mxu0 %v1074_v36  ;;  %v560_v39 = vmax.f32 %v334_v6, 0.0  ;;  %v4245_v36 = vpop.f32.mrf.mxu3 }
 0x1f2   :  { %v561_v17 = vmax.f32 %v463_v56, 0.0 }
 0x1f5   :  { %v4257_v56 = vpop.f32.mrf.mxu2 }
 0x1f6   :  { %v335_v13 = vpop.f32.mrf.mxu0 }
 0x1f7   :  { %v336_v14 = vadd.f32 %v335_v13, %v3870_v43  ;;  %v464_v16 = vpop.f32.mrf.mxu1  ;;  %v931_v13 = vadd.f32 %v4195_v27, %v802_v50  ;;  %v807_v27 = vadd.f32 %v4211_v59, %v4095_v10  ;;  %v3596_v59 = vld [vmem:[#allocation2 + $0x444] sm:$0xf0] }
 0x1f8   :  { %v465_v52 = vadd.f32 %v464_v16, %v3867_v42  ;;  %v3407_v47 = vor.u32 %v3596_v59, %v3406_v45  ;;  %v3402_v45 = vld [vmem:[#allocation2 + $0x430] sm:$0xf] }
 0x1f9   :  { %v562_v9 = vmax.f32 %v336_v14, 0.0  ;;  %v4264_v16 = vpop.f32.mrf.mxu3  ;;  %v936_v26 = vadd.f32 %v4213_v2, %v807_v27 }
 0x1fa   :  { %v563_v29 = vmax.f32 %v465_v52, 0.0  ;;  %1945 = vmatpush.bf16.msrb.mxu3 %v3407_v47 }
 0x1fb   :  { %v644_v22 = vpack.c.bf16 %v562_v9, %v560_v39  ;;  %v1022_v39 = vmax.f32 %v931_v13, 0.0 }
 0x1fc   :  { %v645_v5 = vpack.c.bf16 %v563_v29, %v561_v17  ;;  %v929_v17 = vadd.f32 %v4181_v4, %v800_v3  ;;  %v817_v3 = vadd.f32 %v4257_v56, %v4095_v10 }
 0x1fd   :  { %863 = vmatmul.bf16.gmra.mxu2 %v644_v22  ;;  %v4267_v21 = vpop.f32.mrf.mxu2 }
 0x1fe   :  { %v338_v34 = vpop.f32.mrf.mxu0  ;;  %992 = vmatmul.bf16.gmra.mxu3 %v645_v5  ;;  %v1021_v9 = vmax.f32 %v929_v17, 0.0  ;;  %v946_v13 = vadd.f32 %v4264_v16, %v817_v3  ;;  %v820_v16 = vadd.f32 %v4267_v21, %v4095_v10 }
 0x1ff   :  { %v467_v46 = vpop.f32.mrf.mxu1  ;;  %v339_v48 = vadd.f32 %v338_v34, %v3870_v43  ;;  %v3362_v34 = vld [vmem:[#allocation2 + $0x310] sm:$0xf] }
 0x200   :  { %v468_v41 = vadd.f32 %v467_v46, %v3867_v42  ;;  %v1077_v29 = vpack.c.bf16 %v1022_v39, %v1021_v9  ;;  %v3585_v46 = vld [vmem:[#allocation2 + $0x314] sm:$0xf0] }
 0x201   :  { %1184 = vmatmul.bf16.gmra.mxu0 %v1075_v12  ;;  %v564_v54 = vmax.f32 %v339_v48, 0.0  ;;  %v4269_v22 = vpop.f32.mrf.mxu3  ;;  %v3363_v12 = vor.u32 %v3585_v46, %v3362_v34  ;;  %v3584_v34 = vld [vmem:[#allocation2 + $0x304] sm:$0xf0] }
 0x202   :  { %v565_v55 = vmax.f32 %v468_v41, 0.0  ;;  %v1024_v41 = vmax.f32 %v936_v26, 0.0 }
 0x203   :  { %1681 = vmatpush.bf16.msrb.mxu2 %v3363_v12 }
 0x205   :  { %v821_v28 = vpop.f32.mrf.mxu2 }
 0x206   :  { %v340_v23 = vpop.f32.mrf.mxu0  ;;  %v822_v27 = vadd.f32 %v821_v28, %v4095_v10  ;;  %v3595_v28 = vld [vmem:[#allocation2 + $0x434] sm:$0xf0] }
 0x207   :  { %v341_v53 = vadd.f32 %v340_v23, %v3870_v43  ;;  %v469_v11 = vpop.f32.mrf.mxu1  ;;  %v1076_v43 = vpack.c.bf16 %v1020_v61, %v1019_v24  ;;  %v1023_v23 = vmax.f32 %v934_v32, 0.0 }
 0x208   :  { %v470_v58 = vadd.f32 %v469_v11, %v3867_v42  ;;  %v4250_v42 = vld [vmem:[%s4921_s4] sm:$0xff]  ;;  %v810_v11 = vadd.f32 %v4222_v8, %v4095_v10 }
 0x209   :  { %v566_v49 = vmax.f32 %v341_v53, 0.0  ;;  %v4253_v18 = vperm.slane %v4250_v42, 2  ;;  %v950_v48 = vpop.f32.mrf.mxu3  ;;  %v1078_v51 = vpack.c.bf16 %v1024_v41, %v1023_v23 }
 0x20a   :  { %v567_v25 = vmax.f32 %v470_v58, 0.0 }
 0x20b   :  { %v646_v15 = vpack.c.bf16 %v566_v49, %v564_v54  ;;  %v941_v54 = vadd.f32 %v4233_v40, %v812_v33  ;;  %v815_v40 = vadd.f32 %v4243_v38, %v4095_v10 }
 0x20c   :  { %v647_v63 = vpack.c.bf16 %v567_v25, %v565_v55  ;;  %v939_v25 = vadd.f32 %v4227_v20, %v810_v11 }
 0x20d   :  { %868 = vmatmul.bf16.gmra.mxu2 %v646_v15  ;;  %v4279_v53 = vpop.f32.mrf.mxu2  ;;  %v944_v17 = vadd.f32 %v4245_v36, %v815_v40 }
 0x20e   :  { %v1150_v35 = vpop.f32.mrf.mxu0  ;;  %997 = vmatmul.bf16.gmra.mxu3 %v647_v63  ;;  %v1026_v63 = vmax.f32 %v941_v54, 0.0  ;;  %v1025_v37 = vmax.f32 %v939_v25, 0.0 }
 0x20f   :  { %v1151_v6 = vadd.f32 %v1150_v35, %v4253_v18  ;;  %v1027_v9 = vmax.f32 %v944_v17, 0.0 }
 0x210   :  { %v1079_v8 = vpack.c.bf16 %v1026_v63, %v1025_v37 }
 0x211   :  { %1189 = vmatmul.bf16.gmra.mxu0 %v1076_v43  ;;  %v1270_v52 = vmax.f32 %v1151_v6, 0.0  ;;  %v4286_v58 = vpop.f32.mrf.mxu3 }
 0x215   :  { %v826_v35 = vpop.f32.mrf.mxu2 }
 0x216   :  { %v1152_v7 = vpop.f32.mrf.mxu0 }
 0x217   :  { %v1153_v14 = vadd.f32 %v1152_v7, %v4253_v18 }
 0x219   :  { %v1271_v60 = vmax.f32 %v1153_v14, 0.0  ;;  %v955_v50 = vpop.f32.mrf.mxu3 }
 0x21b   :  { %v1335_v57 = vpack.c.bf16 %v1271_v60, %v1270_v52 }
 0x21d   :  { %1416 = vmatmul.bf16.vlgmr.msrb.gmra.mxu1 %v1335_v57  ;;  %v4296_v20 = vpop.f32.mrf.mxu2  ;;  %v1028_v57 = vmax.f32 %v946_v13, 0.0 }
 0x21e   :  { %v1155_v0 = vpop.f32.mrf.mxu0 }
 0x21f   :  { %v1156_v4 = vadd.f32 %v1155_v0, %v4253_v18  ;;  %v1080_v0 = vpack.c.bf16 %v1028_v57, %v1027_v9 }
 0x221   :  { %1194 = vmatmul.bf16.gmra.mxu0 %v1077_v29  ;;  %v1272_v30 = vmax.f32 %v1156_v4, 0.0  ;;  %v4301_v39 = vpop.f32.mrf.mxu3 }
 0x225   :  { %v831_v29 = vpop.f32.mrf.mxu2 }
 0x226   :  { %v1157_v1 = vpop.f32.mrf.mxu0 }
 0x227   :  { %v1158_v5 = vadd.f32 %v1157_v1, %v4253_v18  ;;  %v951_v1 = vadd.f32 %v950_v48, %v822_v27 }
 0x229   :  { %v1273_v31 = vmax.f32 %v1158_v5, 0.0  ;;  %v960_v62 = vpop.f32.mrf.mxu3  ;;  %v949_v5 = vadd.f32 %v4269_v22, %v820_v16  ;;  %v1030_v59 = vmax.f32 %v951_v1, 0.0  ;;  %v827_v22 = vadd.f32 %v826_v35, %v4095_v10 }
 0x22b   :  { %v1336_v19 = vpack.c.bf16 %v1273_v31, %v1272_v30  ;;  %v3358_v31 = vld [vmem:[#allocation2 + $0x300] sm:$0xf]  ;;  %v1029_v21 = vmax.f32 %v949_v5, 0.0 }
 0x22c   :  { %v3359_v12 = vor.u32 %v3584_v34, %v3358_v31  ;;  %v3398_v5 = vld [vmem:[#allocation2 + $0x420] sm:$0xf] }
 0x22d   :  { %1421 = vmatmul.bf16.gmra.mxu1 %v1336_v19  ;;  %v834_v46 = vpop.f32.mrf.mxu2  ;;  %v3403_v19 = vor.u32 %v3595_v28, %v3402_v45  ;;  %v1081_v23 = vpack.c.bf16 %v1030_v59, %v1029_v21  ;;  %v3615_v28 = vld [vmem:[#allocation2 + $0x574] sm:$0xf0]  ;;  %v3480_v21 = vld [vmem:[#allocation2 + $0x578] sm:$0xf0] }
 0x22e   :  { %v1160_v2 = vpop.f32.mrf.mxu0  ;;  %1682 = vmatpush.bf16.msrb.mxu2 %v3359_v12 }
 0x22f   :  { %v1161_v55 = vadd.f32 %v1160_v2, %v4253_v18  ;;  %1946 = vmatpush.bf16.msrb.mxu3 %v3403_v19  ;;  %v3614_v19 = vld [vmem:[#allocation2 + $0x574] sm:$0xf] }
 0x231   :  { %1199 = vmatmul.bf16.gmra.mxu0 %v1078_v51  ;;  %v1274_v61 = vmax.f32 %v1161_v55, 0.0  ;;  %v963_v47 = vpop.f32.mrf.mxu3  ;;  %v825_v51 = vadd.f32 %v4279_v53, %v4095_v10  ;;  %v956_v55 = vadd.f32 %v955_v50, %v827_v22  ;;  %v830_v50 = vadd.f32 %v4296_v20, %v4095_v10 }
 0x233   :  { %v959_v13 = vadd.f32 %v4301_v39, %v830_v50 }
 0x235   :  { %v836_v2 = vpop.f32.mrf.mxu2 }
 0x236   :  { %v1162_v44 = vpop.f32.mrf.mxu0 }
 0x237   :  { %v1163_v49 = vadd.f32 %v1162_v44, %v4253_v18 }
 0x239   :  { %v1275_v15 = vmax.f32 %v1163_v49, 0.0  ;;  %v965_v54 = vpop.f32.mrf.mxu3  ;;  %v954_v49 = vadd.f32 %v4286_v58, %v825_v51 }
 0x23b   :  { %v1337_v24 = vpack.c.bf16 %v1275_v15, %v1274_v61  ;;  %v1032_v15 = vmax.f32 %v956_v55, 0.0 }
 0x23d   :  { %1426 = vmatmul.bf16.gmra.mxu1 %v1337_v24  ;;  %v1031_v24 = vmax.f32 %v954_v49, 0.0  ;;  %v839_v35 = vpop.f32.mrf.mxu2 }
 0x23e   :  { %v1165_v43 = vpop.f32.mrf.mxu0 }
 0x23f   :  { %v1166_v6 = vadd.f32 %v1165_v43, %v4253_v18  ;;  %v1082_v43 = vpack.c.bf16 %v1032_v15, %v1031_v24 }
 0x241   :  { %1204 = vmatmul.bf16.gmra.mxu0 %v1079_v8  ;;  %v1276_v52 = vmax.f32 %v1166_v6, 0.0  ;;  %v968_v53 = vpop.f32.mrf.mxu3  ;;  %v832_v8 = vadd.f32 %v831_v29, %v4095_v10  ;;  %v835_v29 = vadd.f32 %v834_v46, %v4095_v10  ;;  %v3478_v46 = vld [vmem:[#allocation2 + $0x570] sm:$0xf] }
 0x243   :  { %v961_v58 = vadd.f32 %v960_v62, %v832_v8 }
 0x246   :  { %v1167_v7 = vpop.f32.mrf.mxu0 }
 0x247   :  { %v1168_v14 = vadd.f32 %v1167_v7, %v4253_v18  ;;  %v841_v7 = vpop.f32.mrf.mxu2 }
 0x248   :  { %v842_v22 = vadd.f32 %v841_v7, %v4095_v10 }
 0x249   :  { %v1277_v60 = vmax.f32 %v1168_v14, 0.0  ;;  %v970_v57 = vpop.f32.mrf.mxu3 }
 0x24a   :  { %v971_v55 = vadd.f32 %v970_v57, %v842_v22 }
 0x24b   :  { %v1338_v56 = vpack.c.bf16 %v1277_v60, %v1276_v52  ;;  %v1034_v52 = vmax.f32 %v961_v58, 0.0 }
 0x24c   :  { %v1038_v24 = vmax.f32 %v971_v55, 0.0 }
 0x24d   :  { %1431 = vmatmul.bf16.gmra.mxu1 %v1338_v56  ;;  %v1033_v56 = vmax.f32 %v959_v13, 0.0 }
 0x24e   :  { %v1170_v38 = vpop.f32.mrf.mxu0 }
 0x24f   :  { %v1171_v36 = vadd.f32 %v1170_v38, %v4253_v18  ;;  %v1083_v38 = vpack.c.bf16 %v1034_v52, %v1033_v56  ;;  %v844_v20 = vpop.f32.mrf.mxu2 }
 0x250   :  { %v845_v7 = vadd.f32 %v844_v20, %v4095_v10 }
 0x251   :  { %1209 = vmatmul.bf16.gmra.mxu0 %v1080_v0  ;;  %v1278_v32 = vmax.f32 %v1171_v36, 0.0  ;;  %v837_v0 = vadd.f32 %v836_v2, %v4095_v10  ;;  %v4324_v62 = vpop.f32.mrf.mxu3  ;;  %v840_v2 = vadd.f32 %v839_v35, %v4095_v10 }
 0x252   :  { %v974_v57 = vadd.f32 %v4324_v62, %v845_v7 }
 0x253   :  { %v966_v16 = vadd.f32 %v965_v54, %v837_v0  ;;  %v4332_v54 = vperm.slane %v4250_v42, 3  ;;  %v969_v49 = vadd.f32 %v968_v53, %v840_v2 }
 0x254   :  { %v1039_v20 = vmax.f32 %v974_v57, 0.0 }
 0x255   :  { %v1036_v31 = vmax.f32 %v966_v16, 0.0  ;;  %v1037_v35 = vmax.f32 %v969_v49, 0.0 }
 0x256   :  { %v1172_v4 = vpop.f32.mrf.mxu0 }
 0x257   :  { %v1173_v26 = vadd.f32 %v1172_v4, %v4253_v18  ;;  %v964_v4 = vadd.f32 %v963_v47, %v835_v29  ;;  %v846_v12 = vpop.f32.mrf.mxu2  ;;  %v1085_v50 = vpack.c.bf16 %v1038_v24, %v1037_v35 }
 0x258   :  { %v847_v58 = vadd.f32 %v846_v12, %v4095_v10 }
 0x259   :  { %v1279_v30 = vmax.f32 %v1173_v26, 0.0  ;;  %v1035_v45 = vmax.f32 %v964_v4, 0.0  ;;  %v975_v47 = vpop.f32.mrf.mxu3 }
 0x25a   :  { %v976_v52 = vadd.f32 %v975_v47, %v847_v58 }
 0x25b   :  { %v1339_v41 = vpack.c.bf16 %v1279_v30, %v1278_v32  ;;  %v3594_v32 = vld [vmem:[#allocation2 + $0x424] sm:$0xf0] }
 0x25c   :  { %v3399_v30 = vor.u32 %v3594_v32, %v3398_v5  ;;  %v1040_v29 = vmax.f32 %v976_v52, 0.0 }
 0x25d   :  { %1436 = vmatmul.bf16.gmra.mxu1 %v1339_v41  ;;  %v3479_v41 = vor.u32 %v3615_v28, %v3478_v46 }
 0x25e   :  { %v1175_v48 = vpop.f32.mrf.mxu0  ;;  %1947 = vmatpush.bf16.msrb.mxu3 %v3399_v30  ;;  %v1086_v4 = vpack.c.bf16 %v1040_v29, %v1039_v20 }
 0x25f   :  { %v1176_v33 = vadd.f32 %v1175_v48, %v4253_v18  ;;  %v1084_v48 = vpack.c.bf16 %v1036_v31, %v1035_v45  ;;  %2242 = vmatpush.bf16.msra.mxu0 %v3479_v41 }
 0x261   :  { %1214 = vmatmul.bf16.gmra.mxu0 %v1081_v23  ;;  %v1280_v25 = vmax.f32 %v1176_v33, 0.0  ;;  %v3483_v23 = vor.u32 %v3614_v19, %v3480_v21  ;;  %v849_v33 = vpop.f32.mrf.mxu2  ;;  %v978_v15 = vpop.f32.mrf.mxu3  ;;  %v3394_v19 = vld [vmem:[#allocation2 + $0x410] sm:$0xf]  ;;  %v3593_v21 = vld [vmem:[#allocation2 + $0x414] sm:$0xf0] }
 0x262   :  { %v850_v32 = vadd.f32 %v849_v33, %v4095_v10  ;;  %v3470_v33 = vld [vmem:[#allocation2 + $0x560] sm:$0xf] }
 0x263   :  { %2371 = vmatpush.bf16.msra.mxu1 %v3483_v23  ;;  %v3395_v23 = vor.u32 %v3593_v21, %v3394_v19 }
 0x264   :  { %v979_v28 = vadd.f32 %v978_v15, %v850_v32 }
 0x265   :  { %1948 = vmatpush.bf16.msrb.mxu3 %v3395_v23 }
 0x266   :  { %v1177_v11 = vpop.f32.mrf.mxu0 }
 0x267   :  { %v1178_v44 = vadd.f32 %v1177_v11, %v4253_v18 }
 0x269   :  { %v1281_v61 = vmax.f32 %v1178_v44, 0.0 }
 0x26b   :  { %v1340_v63 = vpack.c.bf16 %v1281_v61, %v1280_v25 }
 0x26d   :  { %1441 = vmatmul.bf16.gmra.mxu1 %v1340_v63 }
 0x26e   :  { %v1180_v37 = vpop.f32.mrf.mxu0 }
 0x26f   :  { %v1181_v3 = vadd.f32 %v1180_v37, %v4253_v18 }
 0x271   :  { %1219 = vmatmul.bf16.gmra.mxu0 %v1082_v43  ;;  %v1282_v14 = vmax.f32 %v1181_v3, 0.0  ;;  %v851_v3 = vpop.f32.mrf.mxu2 }
 0x276   :  { %v1182_v40 = vpop.f32.mrf.mxu0 }
 0x277   :  { %v1183_v6 = vadd.f32 %v1182_v40, %v4253_v18 }
 0x279   :  { %v1283_v17 = vmax.f32 %v1183_v6, 0.0  ;;  %v980_v6 = vpop.f32.mrf.mxu3 }
 0x27b   :  { %v1341_v60 = vpack.c.bf16 %v1283_v17, %v1282_v14 }
 0x27d   :  { %1446 = vmatmul.bf16.gmra.mxu1 %v1341_v60 }
 0x27e   :  { %v1185_v9 = vpop.f32.mrf.mxu0 }
 0x27f   :  { %v1186_v27 = vadd.f32 %v1185_v9, %v4253_v18 }
 0x281   :  { %1224 = vmatmul.bf16.gmra.mxu0 %v1083_v38  ;;  %v1284_v1 = vmax.f32 %v1186_v27, 0.0  ;;  %v854_v38 = vpop.f32.mrf.mxu2  ;;  %v983_v16 = vpop.f32.mrf.mxu3 }
 0x286   :  { %v1187_v39 = vpop.f32.mrf.mxu0 }
 0x287   :  { %v1188_v36 = vadd.f32 %v1187_v39, %v4253_v18 }
 0x289   :  { %v1285_v26 = vmax.f32 %v1188_v36, 0.0  ;;  %v856_v5 = vpop.f32.mrf.mxu2  ;;  %v985_v46 = vpop.f32.mrf.mxu3 }
 0x28b   :  { %v1342_v34 = vpack.c.bf16 %v1285_v26, %v1284_v1  ;;  %v852_v26 = vadd.f32 %v851_v3, %v4095_v10 }
 0x28d   :  { %1451 = vmatmul.bf16.gmra.mxu1 %v1342_v34  ;;  %v981_v12 = vadd.f32 %v980_v6, %v852_v26 }
 0x28e   :  { %v1190_v59 = vpop.f32.mrf.mxu0 }
 0x28f   :  { %v1191_v51 = vadd.f32 %v1190_v59, %v4253_v18  ;;  %v1042_v47 = vmax.f32 %v981_v12, 0.0 }
 0x291   :  { %1229 = vmatmul.bf16.gmra.mxu0 %v1084_v48  ;;  %v1286_v25 = vmax.f32 %v1191_v51, 0.0  ;;  %v1041_v51 = vmax.f32 %v979_v28, 0.0  ;;  %v859_v55 = vpop.f32.mrf.mxu2  ;;  %v988_v24 = vpop.f32.mrf.mxu3 }
 0x293   :  { %v1087_v15 = vpack.c.bf16 %v1042_v47, %v1041_v51 }
 0x296   :  { %v1192_v11 = vpop.f32.mrf.mxu0 }
 0x297   :  { %v1193_v44 = vadd.f32 %v1192_v11, %v4253_v18  ;;  %v3613_v11 = vld [vmem:[#allocation2 + $0x564] sm:$0xf0] }
 0x298   :  { %v3471_v49 = vor.u32 %v3613_v11, %v3470_v33 }
 0x299   :  { %v1287_v61 = vmax.f32 %v1193_v44, 0.0  ;;  %v861_v6 = vpop.f32.mrf.mxu2 }
 0x29a   :  { %v1417_v63 = vpop.f32.mrf.mxu1  ;;  %2243 = vmatpush.bf16.msra.mxu0 %v3471_v49 }
 0x29b   :  { %v1418_v37 = vadd.f32 %v1417_v63, %v4332_v54  ;;  %v1343_v43 = vpack.c.bf16 %v1287_v61, %v1286_v25  ;;  %v3612_v25 = vld [vmem:[#allocation2 + $0x564] sm:$0xf]  ;;  %v3472_v61 = vld [vmem:[#allocation2 + $0x568] sm:$0xf0] }
 0x29c   :  { %v3475_v63 = vor.u32 %v3612_v25, %v3472_v61 }
 0x29d   :  { %1537 = vst [vmem:[#allocation5] sm:$0xff] %v1418_v37  ;;  %1456 = vmatmul.bf16.gmra.mxu1 %v1343_v43  ;;  %v857_v43 = vadd.f32 %v856_v5, %v4095_v10 }
 0x29e   :  { %v1195_v8 = vpop.f32.mrf.mxu0  ;;  %2372 = vmatpush.bf16.msra.mxu1 %v3475_v63  ;;  %v3592_v63 = vld [vmem:[#allocation2 + $0x404] sm:$0xf0] }
 0x29f   :  { %v1196_v13 = vadd.f32 %v1195_v8, %v4253_v18  ;;  %v855_v8 = vadd.f32 %v854_v38, %v4095_v10  ;;  %v986_v58 = vadd.f32 %v985_v46, %v857_v43 }
 0x2a1   :  { %1234 = vmatmul.bf16.gmra.mxu0 %v1085_v50  ;;  %v1288_v56 = vmax.f32 %v1196_v13, 0.0  ;;  %v984_v7 = vadd.f32 %v983_v16, %v855_v8  ;;  %v1044_v52 = vmax.f32 %v986_v58, 0.0  ;;  %v864_v29 = vpop.f32.mrf.mxu2  ;;  %v860_v16 = vadd.f32 %v859_v55, %v4095_v10  ;;  %v3611_v58 = vld [vmem:[#allocation2 + $0x554] sm:$0xf0] }
 0x2a2   :  { %v1419_v40 = vpop.f32.mrf.mxu1 }
 0x2a3   :  { %v1420_v53 = vadd.f32 %v1419_v40, %v4332_v54  ;;  %v989_v32 = vadd.f32 %v988_v24, %v860_v16 }
 0x2a5   :  { %1538 = vst [vmem:[#allocation5 + $0x8] sm:$0xff] %v1420_v53  ;;  %v1602_v14 = vpack.c.bf16 %v1420_v53, %v1418_v37 }
 0x2a6   :  { %v1197_v17 = vpop.f32.mrf.mxu0 }
 0x2a7   :  { %v1198_v60 = vadd.f32 %v1197_v17, %v4253_v18  ;;  %1683 = vmatmul.bf16.vlgmr.msrb.gmra.mxu2 %v1602_v14 }
 0x2a9   :  { %v1289_v9 = vmax.f32 %v1198_v60, 0.0  ;;  %v866_v28 = vpop.f32.mrf.mxu2 }
 0x2aa   :  { %v1422_v0 = vpop.f32.mrf.mxu1  ;;  %v867_v23 = vadd.f32 %v866_v28, %v4095_v10 }
 0x2ab   :  { %v1423_v27 = vadd.f32 %v1422_v0, %v4332_v54  ;;  %v1344_v39 = vpack.c.bf16 %v1289_v9, %v1288_v56  ;;  %v990_v56 = vpop.f32.mrf.mxu3  ;;  %v1043_v9 = vmax.f32 %v984_v7, 0.0  ;;  %v3610_v7 = vld [vmem:[#allocation2 + $0x554] sm:$0xf] }
 0x2ad   :  { %1539 = vst [vmem:[#allocation5 + $0x10] sm:$0xff] %v1423_v27  ;;  %1461 = vmatmul.bf16.gmra.mxu1 %v1344_v39  ;;  %v1088_v0 = vpack.c.bf16 %v1044_v52, %v1043_v9  ;;  %v862_v39 = vadd.f32 %v861_v6, %v4095_v10 }
 0x2ae   :  { %v1200_v36 = vpop.f32.mrf.mxu0 }
 0x2af   :  { %v1201_v30 = vadd.f32 %v1200_v36, %v4253_v18 }
 0x2b1   :  { %1239 = vmatmul.bf16.gmra.mxu0 %v1086_v4  ;;  %v1290_v59 = vmax.f32 %v1201_v30, 0.0  ;;  %v869_v33 = vpop.f32.mrf.mxu2 }
 0x2b2   :  { %v1424_v1 = vpop.f32.mrf.mxu1 }
 0x2b3   :  { %v1425_v62 = vadd.f32 %v1424_v1, %v4332_v54  ;;  %v993_v1 = vpop.f32.mrf.mxu3 }
 0x2b5   :  { %1540 = vst [vmem:[#allocation5 + $0x18] sm:$0xff] %v1425_v62  ;;  %v1603_v31 = vpack.c.bf16 %v1425_v62, %v1423_v27  ;;  %v991_v62 = vadd.f32 %v990_v56, %v862_v39 }
 0x2b6   :  { %v1202_v34 = vpop.f32.mrf.mxu0 }
 0x2b7   :  { %v1203_v45 = vadd.f32 %v1202_v34, %v4253_v18  ;;  %1688 = vmatmul.bf16.gmra.mxu2 %v1603_v31  ;;  %v1046_v12 = vmax.f32 %v991_v62, 0.0 }
 0x2b9   :  { %v1291_v41 = vmax.f32 %v1203_v45, 0.0  ;;  %v871_v52 = vpop.f32.mrf.mxu2 }
 0x2ba   :  { %v1427_v48 = vpop.f32.mrf.mxu1 }
 0x2bb   :  { %v1428_v22 = vadd.f32 %v1427_v48, %v4332_v54  ;;  %v1345_v2 = vpack.c.bf16 %v1291_v41, %v1290_v59  ;;  %v1045_v59 = vmax.f32 %v989_v32, 0.0  ;;  %v995_v21 = vpop.f32.mrf.mxu3 }
 0x2bc   :  { %v996_v55 = vadd.f32 %v995_v21, %v867_v23 }
 0x2bd   :  { %1541 = vst [vmem:[#allocation5 + $0x20] sm:$0xff] %v1428_v22  ;;  %1466 = vmatmul.bf16.gmra.mxu1 %v1345_v2  ;;  %v1089_v19 = vpack.c.bf16 %v1046_v12, %v1045_v59 }
 0x2be   :  { %v1205_v44 = vpop.f32.mrf.mxu0 }
 0x2bf   :  { %v1206_v50 = vadd.f32 %v1205_v44, %v4253_v18 }
 0x2c1   :  { %1244 = vmatmul.bf16.gmra.mxu0 %v1087_v15  ;;  %v1292_v13 = vmax.f32 %v1206_v50, 0.0  ;;  %v3390_v15 = vld [vmem:[#allocation2 + $0x400] sm:$0xf] }
 0x2c2   :  { %v1429_v37 = vpop.f32.mrf.mxu1  ;;  %v3391_v43 = vor.u32 %v3592_v63, %v3390_v15 }
 0x2c3   :  { %v1430_v35 = vadd.f32 %v1429_v37, %v4332_v54  ;;  %v998_v24 = vpop.f32.mrf.mxu3 }
 0x2c4   :  { %1949 = vmatpush.bf16.msrb.mxu3 %v3391_v43 }
 0x2c5   :  { %1542 = vst [vmem:[#allocation5 + $0x28] sm:$0xff] %v1430_v35  ;;  %v1604_v3 = vpack.c.bf16 %v1430_v35, %v1428_v22  ;;  %v865_v22 = vadd.f32 %v864_v29, %v4095_v10  ;;  %v1048_v35 = vmax.f32 %v996_v55, 0.0 }
 0x2c6   :  { %v1207_v40 = vpop.f32.mrf.mxu0 }
 0x2c7   :  { %v1208_v53 = vadd.f32 %v1207_v40, %v4253_v18  ;;  %1693 = vmatmul.bf16.gmra.mxu2 %v1604_v3  ;;  %v994_v49 = vadd.f32 %v993_v1, %v865_v22  ;;  %v3462_v40 = vld [vmem:[#allocation2 + $0x550] sm:$0xf] }
 0x2c8   :  { %v3463_v6 = vor.u32 %v3611_v58, %v3462_v40 }
 0x2c9   :  { %v1293_v14 = vmax.f32 %v1208_v53, 0.0  ;;  %v1047_v3 = vmax.f32 %v994_v49, 0.0  ;;  %v3623_v49 = vld [vmem:[%s4920_s3 + $0x38] sm:$0xff] }
 0x2ca   :  { %v1432_v17 = vpop.f32.mrf.mxu1  ;;  %2244 = vmatpush.bf16.msra.mxu0 %v3463_v6  ;;  %2773 = vmatpush.bf16.msra.mxu2 %v3623_v49 }
 0x2cb   :  { %v1433_v60 = vadd.f32 %v1432_v17, %v4332_v54  ;;  %v1346_v57 = vpack.c.bf16 %v1293_v14, %v1292_v13  ;;  %v3464_v13 = vld [vmem:[#allocation2 + $0x558] sm:$0xf0]  ;;  %v1090_v14 = vpack.c.bf16 %v1048_v35, %v1047_v3  ;;  %v1000_v9 = vpop.f32.mrf.mxu3 }
 0x2cc   :  { %v3467_v17 = vor.u32 %v3610_v7, %v3464_v13 }
 0x2cd   :  { %1543 = vst [vmem:[#allocation5 + $0x30] sm:$0xff] %v1433_v60  ;;  %1471 = vmatmul.bf16.gmra.mxu1 %v1346_v57  ;;  %v872_v57 = vadd.f32 %v871_v52, %v4095_v10 }
 0x2ce   :  { %v1210_v38 = vpop.f32.mrf.mxu0  ;;  %2373 = vmatpush.bf16.msra.mxu1 %v3467_v17 }
 0x2cf   :  { %v1211_v36 = vadd.f32 %v1210_v38, %v4253_v18  ;;  %v870_v38 = vadd.f32 %v869_v33, %v4095_v10  ;;  %v1001_v39 = vadd.f32 %v1000_v9, %v872_v57  ;;  %v4391_v9 = vperm.slane %v4250_v42, 4 }
 0x2d1   :  { %1249 = vmatmul.bf16.gmra.mxu0 %v1088_v0  ;;  %v1294_v30 = vmax.f32 %v1211_v36, 0.0  ;;  %v999_v16 = vadd.f32 %v998_v24, %v870_v38  ;;  %v3454_v24 = vld [vmem:[#allocation2 + $0x540] sm:$0xf] }
 0x2d2   :  { %v1434_v27 = vpop.f32.mrf.mxu1 }
 0x2d3   :  { %v1435_v20 = vadd.f32 %v1434_v27, %v4332_v54  ;;  %v1049_v32 = vmax.f32 %v999_v16, 0.0 }
 0x2d5   :  { %1544 = vst [vmem:[#allocation5 + $0x38] sm:$0xff] %v1435_v20  ;;  %v1605_v4 = vpack.c.bf16 %v1435_v20, %v1433_v60 }
 0x2d6   :  { %v1212_v26 = vpop.f32.mrf.mxu0 }
 0x2d7   :  { %v1213_v5 = vadd.f32 %v1212_v26, %v4253_v18  ;;  %1698 = vmatmul.bf16.gmra.mxu2 %v1605_v4  ;;  %v1050_v26 = vmax.f32 %v1001_v39, 0.0 }
 0x2d9   :  { %v1295_v31 = vmax.f32 %v1213_v5, 0.0 }
 0x2da   :  { %v1437_v34 = vpop.f32.mrf.mxu1 }
 0x2db   :  { %v1438_v45 = vadd.f32 %v1437_v34, %v4332_v54  ;;  %v1347_v46 = vpack.c.bf16 %v1295_v31, %v1294_v30  ;;  %v1091_v30 = vpack.c.bf16 %v1050_v26, %v1049_v32 }
 0x2dd   :  { %1545 = vst [vmem:[#allocation5 + $0x40] sm:$0xff] %v1438_v45  ;;  %1476 = vmatmul.bf16.gmra.mxu1 %v1347_v46 }
 0x2de   :  { %v1215_v41 = vpop.f32.mrf.mxu0 }
 0x2df   :  { %v1216_v2 = vadd.f32 %v1215_v41, %v4253_v18 }
 0x2e1   :  { %1254 = vmatmul.bf16.gmra.mxu0 %v1089_v19  ;;  %v1296_v25 = vmax.f32 %v1216_v2, 0.0 }
 0x2e2   :  { %v1439_v48 = vpop.f32.mrf.mxu1 }
 0x2e3   :  { %v1440_v47 = vadd.f32 %v1439_v48, %v4332_v54 }
 0x2e5   :  { %1546 = vst [vmem:[#allocation5 + $0x48] sm:$0xff] %v1440_v47  ;;  %v1606_v51 = vpack.c.bf16 %v1440_v47, %v1438_v45 }
 0x2e6   :  { %v1217_v11 = vpop.f32.mrf.mxu0 }
 0x2e7   :  { %v1218_v44 = vadd.f32 %v1217_v11, %v4253_v18  ;;  %1703 = vmatmul.bf16.gmra.mxu2 %v1606_v51 }
 0x2e9   :  { %v1297_v61 = vmax.f32 %v1218_v44, 0.0 }
 0x2ea   :  { %v1442_v37 = vpop.f32.mrf.mxu1 }
 0x2eb   :  { %v1443_v8 = vadd.f32 %v1442_v37, %v4332_v54  ;;  %v1348_v50 = vpack.c.bf16 %v1297_v61, %v1296_v25  ;;  %v3631_v25 = vld [vmem:[%s4920_s3 + $0x78] sm:$0xff]  ;;  %v3609_v37 = vld [vmem:[#allocation2 + $0x544] sm:$0xf0] }
 0x2ec   :  { %2902 = vmatpush.bf16.msra.mxu3 %v3631_v25  ;;  %v3455_v35 = vor.u32 %v3609_v37, %v3454_v24 }
 0x2ed   :  { %1547 = vst [vmem:[#allocation5 + $0x50] sm:$0xff] %v1443_v8  ;;  %1481 = vmatmul.bf16.gmra.mxu1 %v1348_v50  ;;  %v3456_v50 = vld [vmem:[#allocation2 + $0x548] sm:$0xf0] }
 0x2ee   :  { %v1220_v53 = vpop.f32.mrf.mxu0  ;;  %2245 = vmatpush.bf16.msra.mxu0 %v3455_v35  ;;  %v3448_v35 = vld [vmem:[#allocation2 + $0x538] sm:$0xf0] }
 0x2ef   :  { %v1221_v0 = vadd.f32 %v1220_v53, %v4253_v18 }
 0x2f1   :  { %1259 = vmatmul.bf16.gmra.mxu0 %v1090_v14  ;;  %v1298_v36 = vmax.f32 %v1221_v0, 0.0 }
 0x2f2   :  { %v1444_v60 = vpop.f32.mrf.mxu1 }
 0x2f3   :  { %v1445_v56 = vadd.f32 %v1444_v60, %v4332_v54 }
 0x2f5   :  { %1548 = vst [vmem:[#allocation5 + $0x58] sm:$0xff] %v1445_v56  ;;  %v1607_v29 = vpack.c.bf16 %v1445_v56, %v1443_v8  ;;  %v3608_v8 = vld [vmem:[#allocation2 + $0x544] sm:$0xf] }
 0x2f6   :  { %v1222_v27 = vpop.f32.mrf.mxu0  ;;  %v3459_v3 = vor.u32 %v3608_v8, %v3456_v50 }
 0x2f7   :  { %v1223_v20 = vadd.f32 %v1222_v27, %v4253_v18  ;;  %1708 = vmatmul.bf16.gmra.mxu2 %v1607_v29 }
 0x2f8   :  { %2374 = vmatpush.bf16.msra.mxu1 %v3459_v3 }
 0x2f9   :  { %v1299_v4 = vmax.f32 %v1223_v20, 0.0 }
 0x2fa   :  { %v1447_v1 = vpop.f32.mrf.mxu1 }
 0x2fb   :  { %v1448_v62 = vadd.f32 %v1447_v1, %v4332_v54  ;;  %v1349_v5 = vpack.c.bf16 %v1299_v4, %v1298_v36 }
 0x2fd   :  { %1549 = vst [vmem:[#allocation5 + $0x60] sm:$0xff] %v1448_v62  ;;  %1486 = vmatmul.bf16.gmra.mxu1 %v1349_v5 }
 0x2fe   :  { %v1225_v10 = vpop.f32.mrf.mxu0 }
 0x2ff   :  { %v1226_v12 = vadd.f32 %v1225_v10, %v4253_v18 }
 0x301   :  { %1264 = vmatmul.bf16.gmra.mxu0 %v1091_v30  ;;  %v1300_v59 = vmax.f32 %v1226_v12, 0.0 }
 0x302   :  { %v1449_v31 = vpop.f32.mrf.mxu1 }
 0x303   :  { %v1450_v34 = vadd.f32 %v1449_v31, %v4332_v54 }
 0x305   :  { %1550 = vst [vmem:[#allocation5 + $0x68] sm:$0xff] %v1450_v34  ;;  %v1608_v45 = vpack.c.bf16 %v1450_v34, %v1448_v62 }
 0x306   :  { %v1227_v46 = vpop.f32.mrf.mxu0 }
 0x307   :  { %v1228_v28 = vadd.f32 %v1227_v46, %v4253_v18  ;;  %1713 = vmatmul.bf16.gmra.mxu2 %v1608_v45 }
 0x309   :  { %v1301_v41 = vmax.f32 %v1228_v28, 0.0 }
 0x30a   :  { %v1452_v19 = vpop.f32.mrf.mxu1 }
 0x30b   :  { %v1453_v21 = vadd.f32 %v1452_v19, %v4332_v54  ;;  %v1350_v48 = vpack.c.bf16 %v1301_v41, %v1300_v59 }
 0x30d   :  { %1551 = vst [vmem:[#allocation5 + $0x70] sm:$0xff] %v1453_v21  ;;  %1491 = vmatmul.bf16.gmra.mxu1 %v1350_v48 }
 0x30e   :  { %v1230_v23 = vpop.f32.mrf.mxu0 }
 0x30f   :  { %v1231_v2 = vadd.f32 %v1230_v23, %v4253_v18 }
 0x311   :  { %v1302_v55 = vmax.f32 %v1231_v2, 0.0 }
 0x312   :  { %v1454_v47 = vpop.f32.mrf.mxu1 }
 0x313   :  { %v1455_v22 = vadd.f32 %v1454_v47, %v4332_v54 }
 0x315   :  { %1552 = vst [vmem:[#allocation5 + $0x78] sm:$0xff] %v1455_v22  ;;  %v1609_v51 = vpack.c.bf16 %v1455_v22, %v1453_v21 }
 0x316   :  { %v1232_v33 = vpop.f32.mrf.mxu0 }
 0x317   :  { %v1233_v11 = vadd.f32 %v1232_v33, %v4253_v18  ;;  %1718 = vmatmul.bf16.gmra.mxu2 %v1609_v51 }
 0x319   :  { %v1303_v44 = vmax.f32 %v1233_v11, 0.0  ;;  %v3622_v11 = vld [vmem:[%s4920_s3 + $0x30] sm:$0xff] }
 0x31a   :  { %v1457_v61 = vpop.f32.mrf.mxu1  ;;  %2774 = vmatpush.bf16.msra.mxu2 %v3622_v11 }
 0x31b   :  { %v1458_v15 = vadd.f32 %v1457_v61, %v4332_v54  ;;  %v1351_v63 = vpack.c.bf16 %v1303_v44, %v1302_v55  ;;  %v3630_v55 = vld [vmem:[%s4920_s3 + $0x70] sm:$0xff] }
 0x31c   :  { %2903 = vmatpush.bf16.msra.mxu3 %v3630_v55 }
 0x31d   :  { %1553 = vst [vmem:[#allocation5 + $0x80] sm:$0xff] %v1458_v15  ;;  %1496 = vmatmul.bf16.gmra.mxu1 %v1351_v63  ;;  %v3607_v63 = vld [vmem:[#allocation2 + $0x534] sm:$0xf0] }
 0x31e   :  { %v1235_v43 = vpop.f32.mrf.mxu0 }
 0x31f   :  { %v1236_v53 = vadd.f32 %v1235_v43, %v4253_v18  ;;  %v3606_v43 = vld [vmem:[#allocation2 + $0x534] sm:$0xf] }
 0x320   :  { %v3451_v8 = vor.u32 %v3606_v43, %v3448_v35  ;;  %v3438_v43 = vld [vmem:[#allocation2 + $0x520] sm:$0xf]  ;;  %v3605_v35 = vld [vmem:[#allocation2 + $0x524] sm:$0xf0] }
 0x321   :  { %v1304_v14 = vmax.f32 %v1236_v53, 0.0 }
 0x322   :  { %v1459_v40 = vpop.f32.mrf.mxu1  ;;  %2375 = vmatpush.bf16.msra.mxu1 %v3451_v8 }
 0x323   :  { %v1460_v58 = vadd.f32 %v1459_v40, %v4332_v54 }
 0x325   :  { %1554 = vst [vmem:[#allocation5 + $0x88] sm:$0xff] %v1460_v58  ;;  %v1610_v6 = vpack.c.bf16 %v1460_v58, %v1458_v15  ;;  %v3446_v15 = vld [vmem:[#allocation2 + $0x530] sm:$0xf] }
 0x326   :  { %v1237_v7 = vpop.f32.mrf.mxu0  ;;  %v3447_v37 = vor.u32 %v3607_v63, %v3446_v15 }
 0x327   :  { %v1238_v13 = vadd.f32 %v1237_v7, %v4253_v18  ;;  %1723 = vmatmul.bf16.gmra.mxu2 %v1610_v6 }
 0x328   :  { %2246 = vmatpush.bf16.msra.mxu0 %v3447_v37 }
 0x329   :  { %v1305_v17 = vmax.f32 %v1238_v13, 0.0 }
 0x32a   :  { %v1462_v52 = vpop.f32.mrf.mxu1  ;;  %v1684_v60 = vpop.f32.mrf.mxu2 }
 0x32b   :  { %v1463_v57 = vadd.f32 %v1462_v52, %v4332_v54  ;;  %v1352_v56 = vpack.c.bf16 %v1305_v17, %v1304_v14  ;;  %v1685_v0 = vadd.f32 %v1684_v60, %v4391_v9 }
 0x32d   :  { %1555 = vst [vmem:[#allocation5 + $0x90] sm:$0xff] %v1463_v57  ;;  %1501 = vmatmul.bf16.gmra.mxu1 %v1352_v56  ;;  %v1804_v16 = vmax.f32 %v1685_v0, 0.0 }
 0x32e   :  { %v1240_v38 = vpop.f32.mrf.mxu0 }
 0x32f   :  { %v1241_v36 = vadd.f32 %v1240_v38, %v4253_v18 }
 0x331   :  { %v1306_v5 = vmax.f32 %v1241_v36, 0.0 }
 0x332   :  { %v1464_v29 = vpop.f32.mrf.mxu1  ;;  %v1686_v27 = vpop.f32.mrf.mxu2 }
 0x333   :  { %v1465_v39 = vadd.f32 %v1464_v29, %v4332_v54  ;;  %v1687_v20 = vadd.f32 %v1686_v27, %v4391_v9 }
 0x335   :  { %1556 = vst [vmem:[#allocation5 + $0x98] sm:$0xff] %v1465_v39  ;;  %v1611_v4 = vpack.c.bf16 %v1465_v39, %v1463_v57  ;;  %v1805_v1 = vmax.f32 %v1687_v20, 0.0 }
 0x336   :  { %v1242_v26 = vpop.f32.mrf.mxu0 }
 0x337   :  { %v1869_v62 = vpack.c.bf16 %v1805_v1, %v1804_v16  ;;  %v1243_v42 = vadd.f32 %v1242_v26, %v4253_v18  ;;  %1728 = vmatmul.bf16.gmra.mxu2 %v1611_v4 }
 0x339   :  { %v1307_v32 = vmax.f32 %v1243_v42, 0.0  ;;  %1950 = vmatmul.bf16.vlgmr.msrb.gmra.mxu3 %v1869_v62 }
 0x33a   :  { %v1467_v10 = vpop.f32.mrf.mxu1  ;;  %v1689_v30 = vpop.f32.mrf.mxu2 }
 0x33b   :  { %v1468_v31 = vadd.f32 %v1467_v10, %v4332_v54  ;;  %v1353_v34 = vpack.c.bf16 %v1307_v32, %v1306_v5  ;;  %v1690_v45 = vadd.f32 %v1689_v30, %v4391_v9 }
 0x33d   :  { %1557 = vst [vmem:[#allocation5 + $0xa0] sm:$0xff] %v1468_v31  ;;  %1506 = vmatmul.bf16.gmra.mxu1 %v1353_v34  ;;  %v1806_v19 = vmax.f32 %v1690_v45, 0.0 }
 0x33e   :  { %v1245_v12 = vpop.f32.mrf.mxu0 }
 0x33f   :  { %v1246_v21 = vadd.f32 %v1245_v12, %v4253_v18 }
 0x341   :  { %v1308_v51 = vmax.f32 %v1246_v21, 0.0 }
 0x342   :  { %v1469_v46 = vpop.f32.mrf.mxu1  ;;  %v1691_v28 = vpop.f32.mrf.mxu2 }
 0x343   :  { %v1470_v59 = vadd.f32 %v1469_v46, %v4332_v54  ;;  %v1692_v41 = vadd.f32 %v1691_v28, %v4391_v9 }
 0x345   :  { %1558 = vst [vmem:[#allocation5 + $0xa8] sm:$0xff] %v1470_v59  ;;  %v1612_v48 = vpack.c.bf16 %v1470_v59, %v1468_v31  ;;  %v1807_v23 = vmax.f32 %v1692_v41, 0.0 }
 0x346   :  { %v1247_v47 = vpop.f32.mrf.mxu0 }
 0x347   :  { %v1248_v22 = vadd.f32 %v1247_v47, %v4253_v18  ;;  %1733 = vmatmul.bf16.gmra.mxu2 %v1612_v48  ;;  %v1870_v2 = vpack.c.bf16 %v1807_v23, %v1806_v19 }
 0x349   :  { %v1309_v33 = vmax.f32 %v1248_v22, 0.0  ;;  %1955 = vmatmul.bf16.gmra.mxu3 %v1870_v2 }
 0x34a   :  { %v1472_v44 = vpop.f32.mrf.mxu1  ;;  %v1694_v49 = vpop.f32.mrf.mxu2 }
 0x34b   :  { %v1473_v25 = vadd.f32 %v1472_v44, %v4332_v54  ;;  %v1354_v61 = vpack.c.bf16 %v1309_v33, %v1308_v51  ;;  %v1695_v50 = vadd.f32 %v1694_v49, %v4391_v9  ;;  %v3621_v44 = vld [vmem:[%s4920_s3 + $0x28] sm:$0xff] }
 0x34c   :  { %2775 = vmatpush.bf16.msra.mxu2 %v3621_v44  ;;  %v3600_v44 = vld [vmem:[#allocation2 + $0x504] sm:$0xf] }
 0x34d   :  { %1559 = vst [vmem:[#allocation5 + $0xb0] sm:$0xff] %v1473_v25  ;;  %1511 = vmatmul.bf16.gmra.mxu1 %v1354_v61  ;;  %v1808_v6 = vmax.f32 %v1695_v50, 0.0  ;;  %v3629_v61 = vld [vmem:[%s4920_s3 + $0x68] sm:$0xff]  ;;  %v3439_v50 = vor.u32 %v3605_v35, %v3438_v43 }
 0x34e   :  { %v1250_v24 = vpop.f32.mrf.mxu0  ;;  %2904 = vmatpush.bf16.msra.mxu3 %v3629_v61 }
 0x34f   :  { %v1251_v7 = vadd.f32 %v1250_v24, %v4253_v18  ;;  %2247 = vmatpush.bf16.msra.mxu0 %v3439_v50 }
 0x351   :  { %v1310_v57 = vmax.f32 %v1251_v7, 0.0 }
 0x352   :  { %v1474_v3 = vpop.f32.mrf.mxu1  ;;  %v1696_v40 = vpop.f32.mrf.mxu2 }
 0x353   :  { %v1475_v58 = vadd.f32 %v1474_v3, %v4332_v54  ;;  %v1697_v53 = vadd.f32 %v1696_v40, %v4391_v9  ;;  %v3604_v3 = vld [vmem:[#allocation2 + $0x524] sm:$0xf]  ;;  %v3440_v40 = vld [vmem:[#allocation2 + $0x528] sm:$0xf0] }
 0x355   :  { %1560 = vst [vmem:[#allocation5 + $0xb8] sm:$0xff] %v1475_v58  ;;  %v1613_v13 = vpack.c.bf16 %v1475_v58, %v1473_v25  ;;  %v1809_v14 = vmax.f32 %v1697_v53, 0.0  ;;  %v3443_v58 = vor.u32 %v3604_v3, %v3440_v40 }
 0x356   :  { %v1252_v17 = vpop.f32.mrf.mxu0 }
 0x357   :  { %v1253_v52 = vadd.f32 %v1252_v17, %v4253_v18  ;;  %1738 = vmatmul.bf16.gmra.mxu2 %v1613_v13  ;;  %v1871_v60 = vpack.c.bf16 %v1809_v14, %v1808_v6  ;;  %2376 = vmatpush.bf16.msra.mxu1 %v3443_v58 }
 0x359   :  { %v1311_v56 = vmax.f32 %v1253_v52, 0.0  ;;  %1960 = vmatmul.bf16.gmra.mxu3 %v1871_v60 }
 0x35a   :  { %v1477_v38 = vpop.f32.mrf.mxu1  ;;  %v1699_v0 = vpop.f32.mrf.mxu2 }
 0x35b   :  { %v1478_v29 = vadd.f32 %v1477_v38, %v4332_v54  ;;  %v1355_v27 = vpack.c.bf16 %v1311_v56, %v1310_v57  ;;  %v1700_v20 = vadd.f32 %v1699_v0, %v4391_v9 }
 0x35d   :  { %1561 = vst [vmem:[#allocation5 + $0xc0] sm:$0xff] %v1478_v29  ;;  %1516 = vmatmul.bf16.gmra.mxu1 %v1355_v27  ;;  %v1810_v26 = vmax.f32 %v1700_v20, 0.0 }
 0x35e   :  { %v1255_v39 = vpop.f32.mrf.mxu0 }
 0x35f   :  { %v1256_v62 = vadd.f32 %v1255_v39, %v4253_v18 }
 0x361   :  { %v1312_v31 = vmax.f32 %v1256_v62, 0.0 }
 0x362   :  { %v1479_v16 = vpop.f32.mrf.mxu1  ;;  %v1701_v36 = vpop.f32.mrf.mxu2 }
 0x363   :  { %v1480_v4 = vadd.f32 %v1479_v16, %v4332_v54  ;;  %v1702_v1 = vadd.f32 %v1701_v36, %v4391_v9 }
 0x365   :  { %1562 = vst [vmem:[#allocation5 + $0xc8] sm:$0xff] %v1480_v4  ;;  %v1614_v42 = vpack.c.bf16 %v1480_v4, %v1478_v29  ;;  %v1811_v5 = vmax.f32 %v1702_v1, 0.0 }
 0x366   :  { %v1257_v32 = vpop.f32.mrf.mxu0 }
 0x367   :  { %v1258_v10 = vadd.f32 %v1257_v32, %v4253_v18  ;;  %1743 = vmatmul.bf16.gmra.mxu2 %v1614_v42  ;;  %v1872_v30 = vpack.c.bf16 %v1811_v5, %v1810_v26 }
 0x369   :  { %v1313_v34 = vmax.f32 %v1258_v10, 0.0  ;;  %1965 = vmatmul.bf16.gmra.mxu3 %v1872_v30 }
 0x36a   :  { %v1482_v12 = vpop.f32.mrf.mxu1  ;;  %v1704_v45 = vpop.f32.mrf.mxu2 }
 0x36b   :  { %v1483_v46 = vadd.f32 %v1482_v12, %v4332_v54  ;;  %v1356_v28 = vpack.c.bf16 %v1313_v34, %v1312_v31  ;;  %v1705_v41 = vadd.f32 %v1704_v45, %v4391_v9  ;;  %v3430_v45 = vld [vmem:[#allocation2 + $0x510] sm:$0xf] }
 0x36d   :  { %1563 = vst [vmem:[#allocation5 + $0xd0] sm:$0xff] %v1483_v46  ;;  %1521 = vmatmul.bf16.gmra.mxu1 %v1356_v28  ;;  %v1812_v47 = vmax.f32 %v1705_v41, 0.0  ;;  %v3602_v28 = vld [vmem:[#allocation2 + $0x514] sm:$0xf] }
 0x36e   :  { %v1260_v59 = vpop.f32.mrf.mxu0 }
 0x36f   :  { %v1261_v22 = vadd.f32 %v1260_v59, %v4253_v18 }
 0x371   :  { %v1314_v49 = vmax.f32 %v1261_v22, 0.0 }
 0x372   :  { %v1484_v19 = vpop.f32.mrf.mxu1  ;;  %v1706_v21 = vpop.f32.mrf.mxu2 }
 0x373   :  { %v1485_v48 = vadd.f32 %v1484_v19, %v4332_v54  ;;  %v1707_v23 = vadd.f32 %v1706_v21, %v4391_v9  ;;  %v3432_v21 = vld [vmem:[#allocation2 + $0x518] sm:$0xf0] }
 0x375   :  { %1564 = vst [vmem:[#allocation5 + $0xd8] sm:$0xff] %v1485_v48  ;;  %v1615_v2 = vpack.c.bf16 %v1485_v48, %v1483_v46  ;;  %v1813_v51 = vmax.f32 %v1707_v23, 0.0  ;;  %v3603_v46 = vld [vmem:[#allocation2 + $0x514] sm:$0xf0] }
 0x376   :  { %v1262_v33 = vpop.f32.mrf.mxu0  ;;  %v3431_v19 = vor.u32 %v3603_v46, %v3430_v45 }
 0x377   :  { %v1263_v11 = vadd.f32 %v1262_v33, %v4253_v18  ;;  %1748 = vmatmul.bf16.gmra.mxu2 %v1615_v2  ;;  %v1873_v55 = vpack.c.bf16 %v1813_v51, %v1812_v47  ;;  %v3435_v47 = vor.u32 %v3602_v28, %v3432_v21  ;;  %v3422_v33 = vld [vmem:[#allocation2 + $0x500] sm:$0xf] }
 0x378   :  { %2248 = vmatpush.bf16.msra.mxu0 %v3431_v19 }
 0x379   :  { %v1315_v25 = vmax.f32 %v1263_v11, 0.0  ;;  %1970 = vmatmul.bf16.gmra.mxu3 %v1873_v55  ;;  %2377 = vmatpush.bf16.msra.mxu1 %v3435_v47  ;;  %v3601_v11 = vld [vmem:[#allocation2 + $0x504] sm:$0xf0] }
 0x37a   :  { %v1487_v15 = vpop.f32.mrf.mxu1  ;;  %v1709_v63 = vpop.f32.mrf.mxu2  ;;  %v3423_v55 = vor.u32 %v3601_v11, %v3422_v33  ;;  %v3627_v33 = vld [vmem:[%s4920_s3 + $0x58] sm:$0xff] }
 0x37b   :  { %v1488_v24 = vadd.f32 %v1487_v15, %v4332_v54  ;;  %v1357_v37 = vpack.c.bf16 %v1315_v25, %v1314_v49  ;;  %v1710_v53 = vadd.f32 %v1709_v63, %v4391_v9  ;;  %v3424_v49 = vld [vmem:[#allocation2 + $0x508] sm:$0xf0]  ;;  %v3620_v15 = vld [vmem:[%s4920_s3 + $0x20] sm:$0xff] }
 0x37c   :  { %v3427_v61 = vor.u32 %v3600_v44, %v3424_v49  ;;  %2249 = vmatpush.bf16.msra.mxu0 %v3423_v55  ;;  %v3628_v63 = vld [vmem:[%s4920_s3 + $0x60] sm:$0xff]  ;;  %2776 = vmatpush.bf16.msra.mxu2 %v3620_v15 }
 0x37d   :  { %1565 = vst [vmem:[#allocation5 + $0xe0] sm:$0xff] %v1488_v24  ;;  %1526 = vmatmul.bf16.gmra.mxu1 %v1357_v37  ;;  %v1814_v17 = vmax.f32 %v1710_v53, 0.0  ;;  %2905 = vmatpush.bf16.msra.mxu3 %v3628_v63 }
 0x37e   :  { %v1265_v8 = vpop.f32.mrf.mxu0  ;;  %2378 = vmatpush.bf16.msra.mxu1 %v3427_v61 }
 0x37f   :  { %v1266_v52 = vadd.f32 %v1265_v8, %v4253_v18 }
 0x381   :  { %v1316_v29 = vmax.f32 %v1266_v52, 0.0  ;;  %2906 = vmatpush.bf16.msra.mxu3 %v3627_v33 }
 0x382   :  { %v1489_v6 = vpop.f32.mrf.mxu1  ;;  %v1711_v7 = vpop.f32.mrf.mxu2 }
 0x383   :  { %v1490_v13 = vadd.f32 %v1489_v6, %v4332_v54  ;;  %v1712_v14 = vadd.f32 %v1711_v7, %v4391_v9 }
 0x385   :  { %1566 = vst [vmem:[#allocation5 + $0xe8] sm:$0xff] %v1490_v13  ;;  %v1616_v60 = vpack.c.bf16 %v1490_v13, %v1488_v24  ;;  %v1815_v57 = vmax.f32 %v1712_v14, 0.0 }
 0x386   :  { %v1267_v56 = vpop.f32.mrf.mxu0 }
 0x387   :  { %v1268_v38 = vadd.f32 %v1267_v56, %v4253_v18  ;;  %1753 = vmatmul.bf16.gmra.mxu2 %v1616_v60  ;;  %v1874_v0 = vpack.c.bf16 %v1815_v57, %v1814_v17  ;;  %v4462_v60 = vld [vmem:[%s4921_s4] sm:$0xff] }
 0x388   :  { %v4465_v57 = vperm.slane %v4462_v60, 5 }
 0x389   :  { %v1317_v27 = vmax.f32 %v1268_v38, 0.0  ;;  %1975 = vmatmul.bf16.gmra.mxu3 %v1874_v0 }
 0x38a   :  { %v1492_v39 = vpop.f32.mrf.mxu1  ;;  %v1714_v20 = vpop.f32.mrf.mxu2 }
 0x38b   :  { %v1493_v16 = vadd.f32 %v1492_v39, %v4332_v54  ;;  %v1358_v36 = vpack.c.bf16 %v1317_v27, %v1316_v29  ;;  %v1715_v4 = vadd.f32 %v1714_v20, %v4391_v9 }
 0x38d   :  { %1567 = vst [vmem:[#allocation5 + $0xf0] sm:$0xff] %v1493_v16  ;;  %1531 = vmatmul.bf16.gmra.mxu1 %v1358_v36  ;;  %v1816_v42 = vmax.f32 %v1715_v4, 0.0 }
 0x392   :  { %v1494_v1 = vpop.f32.mrf.mxu1  ;;  %v1716_v26 = vpop.f32.mrf.mxu2 }
 0x393   :  { %v1495_v62 = vadd.f32 %v1494_v1, %v4332_v54  ;;  %v1717_v18 = vadd.f32 %v1716_v26, %v4391_v9 }
 0x395   :  { %1568 = vst [vmem:[#allocation5 + $0xf8] sm:$0xff] %v1495_v62  ;;  %v1617_v5 = vpack.c.bf16 %v1495_v62, %v1493_v16  ;;  %v1817_v32 = vmax.f32 %v1717_v18, 0.0 }
 0x397   :  { %1758 = vmatmul.bf16.gmra.mxu2 %v1617_v5  ;;  %v1875_v10 = vpack.c.bf16 %v1817_v32, %v1816_v42 }
 0x399   :  { %1980 = vmatmul.bf16.gmra.mxu3 %v1875_v10 }
 0x39a   :  { %v1497_v30 = vpop.f32.mrf.mxu1  ;;  %v1719_v31 = vpop.f32.mrf.mxu2 }
 0x39b   :  { %v1498_v34 = vadd.f32 %v1497_v30, %v4332_v54  ;;  %v1720_v12 = vadd.f32 %v1719_v31, %v4391_v9 }
 0x39d   :  { %1569 = vst [vmem:[#allocation5 + $0x100] sm:$0xff] %v1498_v34  ;;  %v1818_v22 = vmax.f32 %v1720_v12, 0.0 }
 0x3a2   :  { %v1499_v59 = vpop.f32.mrf.mxu1  ;;  %v1721_v41 = vpop.f32.mrf.mxu2 }
 0x3a3   :  { %v1500_v48 = vadd.f32 %v1499_v59, %v4332_v54  ;;  %v1722_v23 = vadd.f32 %v1721_v41, %v4391_v9 }
 0x3a5   :  { %1570 = vst [vmem:[#allocation5 + $0x108] sm:$0xff] %v1500_v48  ;;  %v1618_v2 = vpack.c.bf16 %v1500_v48, %v1498_v34  ;;  %v1819_v51 = vmax.f32 %v1722_v23, 0.0 }
 0x3a7   :  { %1763 = vmatmul.bf16.gmra.mxu2 %v1618_v2  ;;  %v1876_v25 = vpack.c.bf16 %v1819_v51, %v1818_v22  ;;  %v3619_v2 = vld [vmem:[%s4920_s3 + $0x18] sm:$0xff] }
 0x3a8   :  { %2777 = vmatpush.bf16.msra.mxu2 %v3619_v2 }
 0x3a9   :  { %1985 = vmatmul.bf16.gmra.mxu3 %v1876_v25 }
 0x3aa   :  { %v1502_v24 = vpop.f32.mrf.mxu1  ;;  %v1724_v37 = vpop.f32.mrf.mxu2 }
 0x3ab   :  { %v1503_v43 = vadd.f32 %v1502_v24, %v4332_v54  ;;  %v1725_v35 = vadd.f32 %v1724_v37, %v4391_v9 }
 0x3ad   :  { %1571 = vst [vmem:[#allocation5 + $0x110] sm:$0xff] %v1503_v43  ;;  %v1820_v58 = vmax.f32 %v1725_v35, 0.0 }
 0x3b2   :  { %v1504_v8 = vpop.f32.mrf.mxu1  ;;  %v1726_v50 = vpop.f32.mrf.mxu2 }
 0x3b3   :  { %v1505_v3 = vadd.f32 %v1504_v8, %v4332_v54  ;;  %v1727_v40 = vadd.f32 %v1726_v50, %v4391_v9 }
 0x3b5   :  { %1572 = vst [vmem:[#allocation5 + $0x118] sm:$0xff] %v1505_v3  ;;  %v1619_v53 = vpack.c.bf16 %v1505_v3, %v1503_v43  ;;  %v1821_v6 = vmax.f32 %v1727_v40, 0.0 }
 0x3b7   :  { %1768 = vmatmul.bf16.gmra.mxu2 %v1619_v53  ;;  %v1877_v7 = vpack.c.bf16 %v1821_v6, %v1820_v58 }
 0x3b9   :  { %1990 = vmatmul.bf16.gmra.mxu3 %v1877_v7 }
 0x3ba   :  { %v1507_v13 = vpop.f32.mrf.mxu1  ;;  %v1729_v14 = vpop.f32.mrf.mxu2 }
 0x3bb   :  { %v1508_v17 = vadd.f32 %v1507_v13, %v4332_v54  ;;  %v1730_v56 = vadd.f32 %v1729_v14, %v4391_v9 }
 0x3bc   :  { %v1951_v52 = vpop.f32.mrf.mxu3 }
 0x3bd   :  { %1573 = vst [vmem:[#allocation5 + $0x120] sm:$0xff] %v1508_v17  ;;  %v1952_v29 = vadd.f32 %v1951_v52, %v4465_v57  ;;  %v1822_v16 = vmax.f32 %v1730_v56, 0.0 }
 0x3bf   :  { %v2071_v26 = vmax.f32 %v1952_v29, 0.0 }
 0x3c2   :  { %v1509_v38 = vpop.f32.mrf.mxu1  ;;  %v1731_v0 = vpop.f32.mrf.mxu2 }
 0x3c3   :  { %v1510_v27 = vadd.f32 %v1509_v38, %v4332_v54  ;;  %v1732_v39 = vadd.f32 %v1731_v0, %v4391_v9 }
 0x3c4   :  { %v1953_v20 = vpop.f32.mrf.mxu3 }
 0x3c5   :  { %1574 = vst [vmem:[#allocation5 + $0x128] sm:$0xff] %v1510_v27  ;;  %v1620_v36 = vpack.c.bf16 %v1510_v27, %v1508_v17  ;;  %v1823_v4 = vmax.f32 %v1732_v39, 0.0  ;;  %v1954_v1 = vadd.f32 %v1953_v20, %v4465_v57 }
 0x3c7   :  { %v2072_v62 = vmax.f32 %v1954_v1, 0.0  ;;  %1773 = vmatmul.bf16.gmra.mxu2 %v1620_v36  ;;  %v1878_v18 = vpack.c.bf16 %v1823_v4, %v1822_v16 }
 0x3c9   :  { %v2136_v42 = vpack.c.bf16 %v2072_v62, %v2071_v26  ;;  %1995 = vmatmul.bf16.gmra.mxu3 %v1878_v18 }
 0x3ca   :  { %v1512_v5 = vpop.f32.mrf.mxu1  ;;  %v1734_v32 = vpop.f32.mrf.mxu2 }
 0x3cb   :  { %v1513_v10 = vadd.f32 %v1512_v5, %v4332_v54  ;;  %2250 = vmatmul.bf16.vlgmr.msra.gmra.mxu0 %v2136_v42  ;;  %2379 = vmatmul.bf16.vlgmr.msra.gmra.mxu1 %v2136_v42  ;;  %v1735_v31 = vadd.f32 %v1734_v32, %v4391_v9 }
 0x3cc   :  { %v1956_v30 = vpop.f32.mrf.mxu3 }
 0x3cd   :  { %1575 = vst [vmem:[#allocation5 + $0x130] sm:$0xff] %v1513_v10  ;;  %v1957_v45 = vadd.f32 %v1956_v30, %v4465_v57  ;;  %v1824_v41 = vmax.f32 %v1735_v31, 0.0 }
 0x3cf   :  { %v2073_v23 = vmax.f32 %v1957_v45, 0.0 }
 0x3d2   :  { %v1514_v34 = vpop.f32.mrf.mxu1  ;;  %v1736_v12 = vpop.f32.mrf.mxu2 }
 0x3d3   :  { %v1515_v46 = vadd.f32 %v1514_v34, %v4332_v54  ;;  %v1737_v28 = vadd.f32 %v1736_v12, %v4391_v9 }
 0x3d4   :  { %v1958_v59 = vpop.f32.mrf.mxu3 }
 0x3d5   :  { %1576 = vst [vmem:[#allocation5 + $0x138] sm:$0xff] %v1515_v46  ;;  %v1621_v19 = vpack.c.bf16 %v1515_v46, %v1513_v10  ;;  %v1825_v21 = vmax.f32 %v1737_v28, 0.0  ;;  %v1959_v48 = vadd.f32 %v1958_v59, %v4465_v57 }
 0x3d7   :  { %v2074_v47 = vmax.f32 %v1959_v48, 0.0  ;;  %1778 = vmatmul.bf16.gmra.mxu2 %v1621_v19  ;;  %v1879_v22 = vpack.c.bf16 %v1825_v21, %v1824_v41 }
 0x3d9   :  { %2000 = vmatmul.bf16.gmra.mxu3 %v1879_v22  ;;  %v2137_v51 = vpack.c.bf16 %v2074_v47, %v2073_v23  ;;  %v3618_v22 = vld [vmem:[%s4920_s3 + $0x10] sm:$0xff] }
 0x3da   :  { %v1517_v11 = vpop.f32.mrf.mxu1  ;;  %v1739_v55 = vpop.f32.mrf.mxu2  ;;  %2778 = vmatpush.bf16.msra.mxu2 %v3618_v22 }
 0x3db   :  { %v1518_v44 = vadd.f32 %v1517_v11, %v4332_v54  ;;  %2255 = vmatmul.bf16.gmra.mxu0 %v2137_v51  ;;  %2384 = vmatmul.bf16.gmra.mxu1 %v2137_v51  ;;  %v1740_v25 = vadd.f32 %v1739_v55, %v4391_v9  ;;  %v3626_v51 = vld [vmem:[%s4920_s3 + $0x50] sm:$0xff] }
 0x3dc   :  { %v1961_v49 = vpop.f32.mrf.mxu3  ;;  %2907 = vmatpush.bf16.msra.mxu3 %v3626_v51 }
 0x3dd   :  { %1577 = vst [vmem:[#allocation5 + $0x140] sm:$0xff] %v1518_v44  ;;  %v1962_v63 = vadd.f32 %v1961_v49, %v4465_v57  ;;  %v1826_v35 = vmax.f32 %v1740_v25, 0.0 }
 0x3df   :  { %v2075_v40 = vmax.f32 %v1962_v63, 0.0 }
 0x3e2   :  { %v1519_v61 = vpop.f32.mrf.mxu1  ;;  %v1741_v15 = vpop.f32.mrf.mxu2 }
 0x3e3   :  { %v1520_v24 = vadd.f32 %v1519_v61, %v4332_v54  ;;  %v1742_v37 = vadd.f32 %v1741_v15, %v4391_v9 }
 0x3e4   :  { %v1963_v43 = vpop.f32.mrf.mxu3 }
 0x3e5   :  { %1578 = vst [vmem:[#allocation5 + $0x148] sm:$0xff] %v1520_v24  ;;  %v1622_v8 = vpack.c.bf16 %v1520_v24, %v1518_v44  ;;  %v1827_v50 = vmax.f32 %v1742_v37, 0.0  ;;  %v1964_v3 = vadd.f32 %v1963_v43, %v4465_v57 }
 0x3e7   :  { %v2076_v58 = vmax.f32 %v1964_v3, 0.0  ;;  %1783 = vmatmul.bf16.gmra.mxu2 %v1622_v8  ;;  %v1880_v53 = vpack.c.bf16 %v1827_v50, %v1826_v35 }
 0x3e9   :  { %2005 = vmatmul.bf16.gmra.mxu3 %v1880_v53  ;;  %v2138_v6 = vpack.c.bf16 %v2076_v58, %v2075_v40 }
 0x3ea   :  { %v1522_v7 = vpop.f32.mrf.mxu1  ;;  %v1744_v13 = vpop.f32.mrf.mxu2 }
 0x3eb   :  { %v1523_v14 = vadd.f32 %v1522_v7, %v4332_v54  ;;  %2260 = vmatmul.bf16.gmra.mxu0 %v2138_v6  ;;  %2389 = vmatmul.bf16.gmra.mxu1 %v2138_v6  ;;  %v1745_v52 = vadd.f32 %v1744_v13, %v4391_v9 }
 0x3ec   :  { %v1966_v17 = vpop.f32.mrf.mxu3 }
 0x3ed   :  { %1579 = vst [vmem:[#allocation5 + $0x150] sm:$0xff] %v1523_v14  ;;  %v1967_v0 = vadd.f32 %v1966_v17, %v4465_v57  ;;  %v1828_v20 = vmax.f32 %v1745_v52, 0.0 }
 0x3ef   :  { %v2077_v1 = vmax.f32 %v1967_v0, 0.0 }
 0x3f2   :  { %v1524_v56 = vpop.f32.mrf.mxu1  ;;  %v1746_v38 = vpop.f32.mrf.mxu2 }
 0x3f3   :  { %v1525_v29 = vadd.f32 %v1524_v56, %v4332_v54  ;;  %v1747_v27 = vadd.f32 %v1746_v38, %v4391_v9 }
 0x3f4   :  { %v1968_v39 = vpop.f32.mrf.mxu3 }
 0x3f5   :  { %1580 = vst [vmem:[#allocation5 + $0x158] sm:$0xff] %v1525_v29  ;;  %v1623_v16 = vpack.c.bf16 %v1525_v29, %v1523_v14  ;;  %v1829_v36 = vmax.f32 %v1747_v27, 0.0  ;;  %v1969_v4 = vadd.f32 %v1968_v39, %v4465_v57 }
 0x3f7   :  { %v2078_v26 = vmax.f32 %v1969_v4, 0.0  ;;  %1788 = vmatmul.bf16.gmra.mxu2 %v1623_v16  ;;  %v1881_v62 = vpack.c.bf16 %v1829_v36, %v1828_v20  ;;  %v3617_v4 = vld [vmem:[%s4920_s3 + $0x8] sm:$0xff] }
 0x3f8   :  { %2779 = vmatpush.bf16.msra.mxu2 %v3617_v4 }
 0x3f9   :  { %2010 = vmatmul.bf16.gmra.mxu3 %v1881_v62  ;;  %v2139_v18 = vpack.c.bf16 %v2078_v26, %v2077_v1  ;;  %v3616_v62 = vld [vmem:[%s4920_s3] sm:$0xff] }
 0x3fa   :  { %v1527_v42 = vpop.f32.mrf.mxu1  ;;  %v1749_v5 = vpop.f32.mrf.mxu2 }
 0x3fb   :  { %v1528_v32 = vadd.f32 %v1527_v42, %v4332_v54  ;;  %2265 = vmatmul.bf16.gmra.mxu0 %v2139_v18  ;;  %2394 = vmatmul.bf16.gmra.mxu1 %v2139_v18  ;;  %v1750_v30 = vadd.f32 %v1749_v5, %v4391_v9 }
 0x3fc   :  { %v1971_v10 = vpop.f32.mrf.mxu3  ;;  %2780 = vmatpush.bf16.msra.mxu2 %v3616_v62 }
 0x3fd   :  { %1581 = vst [vmem:[#allocation5 + $0x160] sm:$0xff] %v1528_v32  ;;  %v1972_v12 = vadd.f32 %v1971_v10, %v4465_v57  ;;  %v1830_v59 = vmax.f32 %v1750_v30, 0.0 }
 0x3ff   :  { %v2079_v48 = vmax.f32 %v1972_v12, 0.0 }
 0x402   :  { %v1529_v31 = vpop.f32.mrf.mxu1  ;;  %v1751_v34 = vpop.f32.mrf.mxu2 }
 0x403   :  { %v1530_v45 = vadd.f32 %v1529_v31, %v4332_v54  ;;  %v1752_v46 = vadd.f32 %v1751_v34, %v4391_v9 }
 0x404   :  { %v1973_v28 = vpop.f32.mrf.mxu3 }
 0x405   :  { %1582 = vst [vmem:[#allocation5 + $0x168] sm:$0xff] %v1530_v45  ;;  %v1624_v41 = vpack.c.bf16 %v1530_v45, %v1528_v32  ;;  %v1831_v19 = vmax.f32 %v1752_v46, 0.0  ;;  %v1974_v21 = vadd.f32 %v1973_v28, %v4465_v57  ;;  %v3625_v28 = vld [vmem:[%s4920_s3 + $0x48] sm:$0xff] }
 0x406   :  { %2908 = vmatpush.bf16.msra.mxu3 %v3625_v28 }
 0x407   :  { %v2080_v23 = vmax.f32 %v1974_v21, 0.0  ;;  %1793 = vmatmul.bf16.gmra.mxu2 %v1624_v41  ;;  %v1882_v47 = vpack.c.bf16 %v1831_v19, %v1830_v59 }
 0x409   :  { %2015 = vmatmul.bf16.gmra.mxu3 %v1882_v47  ;;  %v2140_v2 = vpack.c.bf16 %v2080_v23, %v2079_v48 }
 0x40a   :  { %v1532_v33 = vpop.f32.mrf.mxu1  ;;  %v1754_v11 = vpop.f32.mrf.mxu2 }
 0x40b   :  { %v1533_v55 = vadd.f32 %v1532_v33, %v4332_v54  ;;  %2270 = vmatmul.bf16.gmra.mxu0 %v2140_v2  ;;  %2399 = vmatmul.bf16.gmra.mxu1 %v2140_v2  ;;  %v1755_v49 = vadd.f32 %v1754_v11, %v4391_v9 }
 0x40c   :  { %v1976_v44 = vpop.f32.mrf.mxu3 }
 0x40d   :  { %1583 = vst [vmem:[#allocation5 + $0x170] sm:$0xff] %v1533_v55  ;;  %v1977_v15 = vadd.f32 %v1976_v44, %v4465_v57  ;;  %v1832_v43 = vmax.f32 %v1755_v49, 0.0 }
 0x40f   :  { %v2081_v3 = vmax.f32 %v1977_v15, 0.0 }
 0x412   :  { %v1534_v25 = vpop.f32.mrf.mxu1  ;;  %v1756_v61 = vpop.f32.mrf.mxu2 }
 0x413   :  { %v1535_v63 = vadd.f32 %v1534_v25, %v4332_v54  ;;  %v1757_v24 = vadd.f32 %v1756_v61, %v4391_v9  ;;  %v4538_v61 = vperm.slane %v4462_v60, 6 }
 0x414   :  { %v1978_v37 = vpop.f32.mrf.mxu3 }
 0x415   :  { %1584 = vst [vmem:[#allocation5 + $0x178] sm:$0xff] %v1535_v63  ;;  %v1625_v35 = vpack.c.bf16 %v1535_v63, %v1533_v55  ;;  %v1833_v8 = vmax.f32 %v1757_v24, 0.0  ;;  %v1979_v50 = vadd.f32 %v1978_v37, %v4465_v57 }
 0x417   :  { %v2082_v40 = vmax.f32 %v1979_v50, 0.0  ;;  %1798 = vmatmul.bf16.gmra.mxu2 %v1625_v35  ;;  %v1883_v58 = vpack.c.bf16 %v1833_v8, %v1832_v43 }
 0x419   :  { %2020 = vmatmul.bf16.gmra.mxu3 %v1883_v58  ;;  %v2141_v53 = vpack.c.bf16 %v2082_v40, %v2081_v3 }
 0x41a   :  { %v1759_v6 = vpop.f32.mrf.mxu2 }
 0x41b   :  { %2275 = vmatmul.bf16.gmra.mxu0 %v2141_v53  ;;  %2404 = vmatmul.bf16.gmra.mxu1 %v2141_v53  ;;  %v1760_v54 = vadd.f32 %v1759_v6, %v4391_v9 }
 0x41c   :  { %v1981_v7 = vpop.f32.mrf.mxu3 }
 0x41d   :  { %v1982_v14 = vadd.f32 %v1981_v7, %v4465_v57  ;;  %v1834_v56 = vmax.f32 %v1760_v54, 0.0 }
 0x41f   :  { %v2083_v29 = vmax.f32 %v1982_v14, 0.0 }
 0x422   :  { %v1761_v13 = vpop.f32.mrf.mxu2 }
 0x423   :  { %v1762_v17 = vadd.f32 %v1761_v13, %v4391_v9 }
 0x424   :  { %v1983_v52 = vpop.f32.mrf.mxu3 }
 0x425   :  { %v1835_v38 = vmax.f32 %v1762_v17, 0.0  ;;  %v1984_v0 = vadd.f32 %v1983_v52, %v4465_v57 }
 0x427   :  { %v2084_v27 = vmax.f32 %v1984_v0, 0.0  ;;  %v1884_v39 = vpack.c.bf16 %v1835_v38, %v1834_v56 }
 0x429   :  { %2025 = vmatmul.bf16.gmra.mxu3 %v1884_v39  ;;  %v2142_v20 = vpack.c.bf16 %v2084_v27, %v2083_v29 }
 0x42a   :  { %v1764_v16 = vpop.f32.mrf.mxu2 }
 0x42b   :  { %2280 = vmatmul.bf16.gmra.mxu0 %v2142_v20  ;;  %2409 = vmatmul.bf16.gmra.mxu1 %v2142_v20  ;;  %v1765_v1 = vadd.f32 %v1764_v16, %v4391_v9 }
 0x42c   :  { %v1986_v36 = vpop.f32.mrf.mxu3 }
 0x42d   :  { %v1987_v18 = vadd.f32 %v1986_v36, %v4465_v57  ;;  %v1836_v32 = vmax.f32 %v1765_v1, 0.0 }
 0x42f   :  { %v2085_v31 = vmax.f32 %v1987_v18, 0.0 }
 0x432   :  { %v1766_v26 = vpop.f32.mrf.mxu2 }
 0x433   :  { %v1767_v42 = vadd.f32 %v1766_v26, %v4391_v9 }
 0x434   :  { %v1988_v5 = vpop.f32.mrf.mxu3 }
 0x435   :  { %v1837_v10 = vmax.f32 %v1767_v42, 0.0  ;;  %v1989_v30 = vadd.f32 %v1988_v5, %v4465_v57 }
 0x437   :  { %v2086_v34 = vmax.f32 %v1989_v30, 0.0  ;;  %v1885_v12 = vpack.c.bf16 %v1837_v10, %v1836_v32 }
 0x439   :  { %2030 = vmatmul.bf16.gmra.mxu3 %v1885_v12  ;;  %v2143_v45 = vpack.c.bf16 %v2086_v34, %v2085_v31 }
 0x43a   :  { %v1769_v46 = vpop.f32.mrf.mxu2 }
 0x43b   :  { %2285 = vmatmul.bf16.gmra.mxu0 %v2143_v45  ;;  %2414 = vmatmul.bf16.gmra.mxu1 %v2143_v45  ;;  %v1770_v41 = vadd.f32 %v1769_v46, %v4391_v9 }
 0x43c   :  { %v1991_v59 = vpop.f32.mrf.mxu3 }
 0x43d   :  { %v1992_v21 = vadd.f32 %v1991_v59, %v4465_v57  ;;  %v1838_v47 = vmax.f32 %v1770_v41, 0.0  ;;  %v3624_v59 = vld [vmem:[%s4920_s3 + $0x40] sm:$0xff] }
 0x43e   :  { %2909 = vmatpush.bf16.msra.mxu3 %v3624_v59 }
 0x43f   :  { %v2087_v51 = vmax.f32 %v1992_v21, 0.0 }
 0x442   :  { %v1771_v19 = vpop.f32.mrf.mxu2 }
 0x443   :  { %v1772_v48 = vadd.f32 %v1771_v19, %v4391_v9 }
 0x444   :  { %v1993_v23 = vpop.f32.mrf.mxu3 }
 0x445   :  { %v1839_v22 = vmax.f32 %v1772_v48, 0.0  ;;  %v1994_v2 = vadd.f32 %v1993_v23, %v4465_v57 }
 0x447   :  { %v2088_v33 = vmax.f32 %v1994_v2, 0.0  ;;  %v1886_v11 = vpack.c.bf16 %v1839_v22, %v1838_v47 }
 0x448   :  { %v2251_v55 = vpop.f32.mrf.mxu0  ;;  %v4535_v44 = vpop.f32.mrf.mxu1 }
 0x449   :  { %2035 = vmatmul.bf16.gmra.mxu3 %v1886_v11  ;;  %v2144_v49 = vpack.c.bf16 %v2088_v33, %v2087_v51  ;;  %v2252_v63 = vadd.f32 %v2251_v55, %v4538_v61 }
 0x44a   :  { %v1774_v25 = vpop.f32.mrf.mxu2 }
 0x44b   :  { %2290 = vmatmul.bf16.gmra.mxu0 %v2144_v49  ;;  %2419 = vmatmul.bf16.gmra.mxu1 %v2144_v49  ;;  %v1775_v43 = vadd.f32 %v1774_v25, %v4391_v9  ;;  %v2500_v50 = vmax.f32 %v2252_v63, 0.0 }
 0x44c   :  { %v1996_v15 = vpop.f32.mrf.mxu3 }
 0x44d   :  { %v1997_v3 = vadd.f32 %v1996_v15, %v4465_v57  ;;  %v1840_v53 = vmax.f32 %v1775_v43, 0.0 }
 0x44f   :  { %v2089_v13 = vmax.f32 %v1997_v3, 0.0 }
 0x450   :  { %v2253_v24 = vpop.f32.mrf.mxu0  ;;  %v4541_v37 = vpop.f32.mrf.mxu1 }
 0x451   :  { %v2254_v35 = vadd.f32 %v2253_v24, %v4538_v61 }
 0x452   :  { %v1776_v8 = vpop.f32.mrf.mxu2 }
 0x453   :  { %v2502_v40 = vmax.f32 %v2254_v35, 0.0  ;;  %v1777_v60 = vadd.f32 %v1776_v8, %v4391_v9 }
 0x454   :  { %v1998_v58 = vpop.f32.mrf.mxu3 }
 0x455   :  { %v2628_v6 = vpack.c.bf16 %v2502_v40, %v2500_v50  ;;  %v1841_v7 = vmax.f32 %v1777_v60, 0.0  ;;  %v1999_v54 = vadd.f32 %v1998_v58, %v4465_v57 }
 0x457   :  { %v2090_v14 = vmax.f32 %v1999_v54, 0.0  ;;  %2781 = vmatmul.bf16.vlgmr.msra.gmra.mxu2 %v2628_v6  ;;  %v1887_v17 = vpack.c.bf16 %v1841_v7, %v1840_v53 }
 0x458   :  { %v2256_v52 = vpop.f32.mrf.mxu0  ;;  %v4548_v38 = vpop.f32.mrf.mxu1 }
 0x459   :  { %2040 = vmatmul.bf16.gmra.mxu3 %v1887_v17  ;;  %v2145_v56 = vpack.c.bf16 %v2090_v14, %v2089_v13  ;;  %v2257_v27 = vadd.f32 %v2256_v52, %v4538_v61 }
 0x45a   :  { %v1779_v0 = vpop.f32.mrf.mxu2 }
 0x45b   :  { %2295 = vmatmul.bf16.gmra.mxu0 %v2145_v56  ;;  %2424 = vmatmul.bf16.gmra.mxu1 %v2145_v56  ;;  %v1780_v20 = vadd.f32 %v1779_v0, %v4391_v9  ;;  %v2504_v4 = vmax.f32 %v2257_v27, 0.0 }
 0x45c   :  { %v2001_v29 = vpop.f32.mrf.mxu3 }
 0x45d   :  { %v2002_v1 = vadd.f32 %v2001_v29, %v4465_v57  ;;  %v1842_v5 = vmax.f32 %v1780_v20, 0.0 }
 0x45f   :  { %v2091_v31 = vmax.f32 %v2002_v1, 0.0 }
 0x460   :  { %v2258_v39 = vpop.f32.mrf.mxu0  ;;  %v4555_v18 = vpop.f32.mrf.mxu1 }
 0x461   :  { %v2259_v16 = vadd.f32 %v2258_v39, %v4538_v61 }
 0x462   :  { %v1781_v36 = vpop.f32.mrf.mxu2 }
 0x463   :  { %v2506_v26 = vmax.f32 %v2259_v16, 0.0  ;;  %v1782_v62 = vadd.f32 %v1781_v36, %v4391_v9 }
 0x464   :  { %v2003_v42 = vpop.f32.mrf.mxu3 }
 0x465   :  { %v1843_v32 = vmax.f32 %v1782_v62, 0.0  ;;  %v2004_v10 = vadd.f32 %v2003_v42, %v4465_v57  ;;  %v2630_v30 = vpack.c.bf16 %v2506_v26, %v2504_v4 }
 0x467   :  { %v2092_v34 = vmax.f32 %v2004_v10, 0.0  ;;  %2786 = vmatmul.bf16.gmra.mxu2 %v2630_v30  ;;  %v1888_v12 = vpack.c.bf16 %v1843_v32, %v1842_v5 }
 0x468   :  { %v2261_v45 = vpop.f32.mrf.mxu0  ;;  %v4561_v19 = vpop.f32.mrf.mxu1 }
 0x469   :  { %2045 = vmatmul.bf16.gmra.mxu3 %v1888_v12  ;;  %v2146_v46 = vpack.c.bf16 %v2092_v34, %v2091_v31  ;;  %v2262_v21 = vadd.f32 %v2261_v45, %v4538_v61 }
 0x46a   :  { %v1784_v28 = vpop.f32.mrf.mxu2 }
 0x46b   :  { %2300 = vmatmul.bf16.gmra.mxu0 %v2146_v46  ;;  %2429 = vmatmul.bf16.gmra.mxu1 %v2146_v46  ;;  %v1785_v23 = vadd.f32 %v1784_v28, %v4391_v9  ;;  %v2508_v2 = vmax.f32 %v2262_v21, 0.0 }
 0x46c   :  { %v2006_v41 = vpop.f32.mrf.mxu3 }
 0x46d   :  { %v2007_v51 = vadd.f32 %v2006_v41, %v4465_v57  ;;  %v1844_v49 = vmax.f32 %v1785_v23, 0.0 }
 0x46f   :  { %v2093_v24 = vmax.f32 %v2007_v51, 0.0 }
 0x470   :  { %v2263_v48 = vpop.f32.mrf.mxu0  ;;  %v4569_v8 = vpop.f32.mrf.mxu1 }
 0x471   :  { %v2264_v47 = vadd.f32 %v2263_v48, %v4538_v61 }
 0x472   :  { %v1786_v22 = vpop.f32.mrf.mxu2 }
 0x473   :  { %v2510_v33 = vmax.f32 %v2264_v47, 0.0  ;;  %v1787_v11 = vadd.f32 %v1786_v22, %v4391_v9 }
 0x474   :  { %v2008_v55 = vpop.f32.mrf.mxu3 }
 0x475   :  { %v1845_v25 = vmax.f32 %v1787_v11, 0.0  ;;  %v2009_v15 = vadd.f32 %v2008_v55, %v4465_v57  ;;  %v2632_v63 = vpack.c.bf16 %v2510_v33, %v2508_v2 }
 0x477   :  { %v2094_v43 = vmax.f32 %v2009_v15, 0.0  ;;  %2791 = vmatmul.bf16.gmra.mxu2 %v2632_v63  ;;  %v1889_v35 = vpack.c.bf16 %v1845_v25, %v1844_v49 }
 0x478   :  { %v2266_v50 = vpop.f32.mrf.mxu0  ;;  %v4574_v54 = vpop.f32.mrf.mxu1 }
 0x479   :  { %2050 = vmatmul.bf16.gmra.mxu3 %v1889_v35  ;;  %v2147_v3 = vpack.c.bf16 %v2094_v43, %v2093_v24  ;;  %v2267_v58 = vadd.f32 %v2266_v50, %v4538_v61 }
 0x47a   :  { %v1789_v40 = vpop.f32.mrf.mxu2 }
 0x47b   :  { %2305 = vmatmul.bf16.gmra.mxu0 %v2147_v3  ;;  %2434 = vmatmul.bf16.gmra.mxu1 %v2147_v3  ;;  %v1790_v6 = vadd.f32 %v1789_v40, %v4391_v9  ;;  %v2512_v14 = vmax.f32 %v2267_v58, 0.0 }
 0x47c   :  { %v2011_v60 = vpop.f32.mrf.mxu3 }
 0x47d   :  { %v2012_v17 = vadd.f32 %v2011_v60, %v4465_v57  ;;  %v1846_v29 = vmax.f32 %v1790_v6, 0.0 }
 0x47f   :  { %v2095_v16 = vmax.f32 %v2012_v17, 0.0 }
 0x480   :  { %v2268_v53 = vpop.f32.mrf.mxu0  ;;  %v4579_v42 = vpop.f32.mrf.mxu1 }
 0x481   :  { %v2269_v7 = vadd.f32 %v2268_v53, %v4538_v61 }
 0x482   :  { %v1791_v13 = vpop.f32.mrf.mxu2 }
 0x483   :  { %v2514_v52 = vmax.f32 %v2269_v7, 0.0  ;;  %v1792_v56 = vadd.f32 %v1791_v13, %v4391_v9 }
 0x484   :  { %v2013_v0 = vpop.f32.mrf.mxu3 }
 0x485   :  { %v1847_v27 = vmax.f32 %v1792_v56, 0.0  ;;  %v2014_v39 = vadd.f32 %v2013_v0, %v4465_v57  ;;  %v2634_v20 = vpack.c.bf16 %v2514_v52, %v2512_v14 }
 0x487   :  { %v2096_v36 = vmax.f32 %v2014_v39, 0.0  ;;  %2796 = vmatmul.bf16.gmra.mxu2 %v2634_v20  ;;  %v1890_v4 = vpack.c.bf16 %v1847_v27, %v1846_v29 }
 0x488   :  { %v2271_v1 = vpop.f32.mrf.mxu0  ;;  %v4587_v47 = vpop.f32.mrf.mxu1 }
 0x489   :  { %2055 = vmatmul.bf16.gmra.mxu3 %v1890_v4  ;;  %v2148_v26 = vpack.c.bf16 %v2096_v36, %v2095_v16  ;;  %v2272_v32 = vadd.f32 %v2271_v1, %v4538_v61 }
 0x48a   :  { %v1794_v62 = vpop.f32.mrf.mxu2 }
 0x48b   :  { %2310 = vmatmul.bf16.gmra.mxu0 %v2148_v26  ;;  %2439 = vmatmul.bf16.gmra.mxu1 %v2148_v26  ;;  %v1795_v30 = vadd.f32 %v1794_v62, %v4391_v9  ;;  %v2516_v12 = vmax.f32 %v2272_v32, 0.0 }
 0x48c   :  { %v2016_v5 = vpop.f32.mrf.mxu3 }
 0x48d   :  { %v2017_v45 = vadd.f32 %v2016_v5, %v4465_v57  ;;  %v1848_v41 = vmax.f32 %v1795_v30, 0.0 }
 0x48f   :  { %v2097_v22 = vmax.f32 %v2017_v45, 0.0 }
 0x490   :  { %v2273_v10 = vpop.f32.mrf.mxu0  ;;  %v4590_v15 = vpop.f32.mrf.mxu1 }
 0x491   :  { %v2274_v31 = vadd.f32 %v2273_v10, %v4538_v61 }
 0x492   :  { %v1796_v34 = vpop.f32.mrf.mxu2 }
 0x493   :  { %v2518_v46 = vmax.f32 %v2274_v31, 0.0  ;;  %v1797_v28 = vadd.f32 %v1796_v34, %v4391_v9 }
 0x494   :  { %v2018_v59 = vpop.f32.mrf.mxu3 }
 0x495   :  { %v1849_v21 = vmax.f32 %v1797_v28, 0.0  ;;  %v2019_v48 = vadd.f32 %v2018_v59, %v4465_v57  ;;  %v2636_v23 = vpack.c.bf16 %v2518_v46, %v2516_v12 }
 0x497   :  { %v2098_v2 = vmax.f32 %v2019_v48, 0.0  ;;  %2801 = vmatmul.bf16.gmra.mxu2 %v2636_v23  ;;  %v1891_v51 = vpack.c.bf16 %v1849_v21, %v1848_v41 }
 0x498   :  { %v2276_v33 = vpop.f32.mrf.mxu0  ;;  %v4597_v29 = vpop.f32.mrf.mxu1 }
 0x499   :  { %2060 = vmatmul.bf16.gmra.mxu3 %v1891_v51  ;;  %v2149_v11 = vpack.c.bf16 %v2098_v2, %v2097_v22  ;;  %v2277_v25 = vadd.f32 %v2276_v33, %v4538_v61 }
 0x49a   :  { %v1799_v55 = vpop.f32.mrf.mxu2 }
 0x49b   :  { %2315 = vmatmul.bf16.gmra.mxu0 %v2149_v11  ;;  %2444 = vmatmul.bf16.gmra.mxu1 %v2149_v11  ;;  %v1800_v24 = vadd.f32 %v1799_v55, %v4391_v9  ;;  %v2520_v50 = vmax.f32 %v2277_v25, 0.0 }
 0x49c   :  { %v2021_v49 = vpop.f32.mrf.mxu3 }
 0x49d   :  { %v2022_v3 = vadd.f32 %v2021_v49, %v4465_v57  ;;  %v1850_v53 = vmax.f32 %v1800_v24, 0.0 }
 0x49f   :  { %v2099_v14 = vmax.f32 %v2022_v3, 0.0 }
 0x4a0   :  { %v2278_v63 = vpop.f32.mrf.mxu0  ;;  %v4611_v10 = vpop.f32.mrf.mxu1 }
 0x4a1   :  { %v2279_v43 = vadd.f32 %v2278_v63, %v4538_v61 }
 0x4a2   :  { %v1801_v35 = vpop.f32.mrf.mxu2 }
 0x4a3   :  { %v2522_v40 = vmax.f32 %v2279_v43, 0.0  ;;  %v1802_v60 = vadd.f32 %v1801_v35, %v4391_v9  ;;  %v3639_v9 = vld [vmem:[%s4921_s4 + $0x8] sm:$0xff] }
 0x4a4   :  { %v2023_v58 = vpop.f32.mrf.mxu3  ;;  %v4602_v39 = vperm.slane %v3639_v9, 6 }
 0x4a5   :  { %v1851_v6 = vmax.f32 %v1802_v60, 0.0  ;;  %v2024_v7 = vadd.f32 %v2023_v58, %v4465_v57  ;;  %v2638_v13 = vpack.c.bf16 %v2522_v40, %v2520_v50 }
 0x4a6   :  { %v2383_v20 = vadd.f32 %v4541_v37, %v4602_v39  ;;  %v2381_v4 = vadd.f32 %v4535_v44, %v4602_v39  ;;  %v2388_v21 = vadd.f32 %v4555_v18, %v4602_v39  ;;  %v2386_v22 = vadd.f32 %v4548_v38, %v4602_v39 }
 0x4a7   :  { %v2100_v17 = vmax.f32 %v2024_v7, 0.0  ;;  %2806 = vmatmul.bf16.gmra.mxu2 %v2638_v13  ;;  %v1892_v52 = vpack.c.bf16 %v1851_v6, %v1850_v53  ;;  %v2393_v60 = vadd.f32 %v4569_v8, %v4602_v39  ;;  %v2391_v6 = vadd.f32 %v4561_v19, %v4602_v39 }
 0x4a8   :  { %v2281_v56 = vpop.f32.mrf.mxu0  ;;  %v2503_v26 = vmax.f32 %v2383_v20, 0.0  ;;  %v2501_v31 = vmax.f32 %v2381_v4, 0.0  ;;  %v4614_v41 = vpop.f32.mrf.mxu1  ;;  %v2507_v51 = vmax.f32 %v2388_v21, 0.0  ;;  %v2505_v25 = vmax.f32 %v2386_v22, 0.0 }
 0x4a9   :  { %2065 = vmatmul.bf16.gmra.mxu3 %v1892_v52  ;;  %v2150_v0 = vpack.c.bf16 %v2100_v17, %v2099_v14  ;;  %v2282_v16 = vadd.f32 %v2281_v56, %v4538_v61  ;;  %v2511_v14 = vmax.f32 %v2393_v60, 0.0 }
 0x4aa   :  { %v2629_v12 = vpack.c.bf16 %v2503_v26, %v2501_v31  ;;  %v2631_v35 = vpack.c.bf16 %v2507_v51, %v2505_v25  ;;  %v2396_v31 = vadd.f32 %v4574_v54, %v4602_v39 }
 0x4ab   :  { %2320 = vmatmul.bf16.gmra.mxu0 %v2150_v0  ;;  %2449 = vmatmul.bf16.gmra.mxu1 %v2150_v0  ;;  %v2524_v62 = vmax.f32 %v2282_v16, 0.0 }
 0x4ac   :  { %v2026_v27 = vpop.f32.mrf.mxu3 }
 0x4ad   :  { %v2027_v5 = vadd.f32 %v2026_v27, %v4465_v57  ;;  %v2509_v27 = vmax.f32 %v2391_v6, 0.0 }
 0x4af   :  { %v2101_v45 = vmax.f32 %v2027_v5, 0.0  ;;  %v2398_v5 = vadd.f32 %v4579_v42, %v4602_v39 }
 0x4b0   :  { %v2283_v36 = vpop.f32.mrf.mxu0  ;;  %v4624_v50 = vpop.f32.mrf.mxu1 }
 0x4b1   :  { %v2284_v1 = vadd.f32 %v2283_v36, %v4538_v61  ;;  %v2633_v36 = vpack.c.bf16 %v2511_v14, %v2509_v27 }
 0x4b3   :  { %v2526_v32 = vmax.f32 %v2284_v1, 0.0 }
 0x4b4   :  { %v2028_v30 = vpop.f32.mrf.mxu3 }
 0x4b5   :  { %v2029_v34 = vadd.f32 %v2028_v30, %v4465_v57  ;;  %v2640_v37 = vpack.c.bf16 %v2526_v32, %v2524_v62 }
 0x4b7   :  { %v2102_v46 = vmax.f32 %v2029_v34, 0.0  ;;  %2811 = vmatmul.bf16.gmra.mxu2 %v2640_v37  ;;  %v2515_v37 = vmax.f32 %v2398_v5, 0.0 }
 0x4b8   :  { %v2286_v28 = vpop.f32.mrf.mxu0  ;;  %v4632_v13 = vpop.f32.mrf.mxu1 }
 0x4b9   :  { %2910 = vmatmul.bf16.vlgmr.msra.gmra.mxu3 %v2629_v12  ;;  %v2151_v44 = vpack.c.bf16 %v2102_v46, %v2101_v45  ;;  %v2287_v48 = vadd.f32 %v2286_v28, %v4538_v61 }
 0x4bb   :  { %2325 = vmatmul.bf16.gmra.mxu0 %v2151_v44  ;;  %2454 = vmatmul.bf16.gmra.mxu1 %v2151_v44  ;;  %v2528_v33 = vmax.f32 %v2287_v48, 0.0 }
 0x4bc   :  { %v2031_v59 = vpop.f32.mrf.mxu3 }
 0x4bd   :  { %v2032_v11 = vadd.f32 %v2031_v59, %v4465_v57  ;;  %v2513_v59 = vmax.f32 %v2396_v31, 0.0 }
 0x4bf   :  { %v2103_v43 = vmax.f32 %v2032_v11, 0.0  ;;  %v2635_v54 = vpack.c.bf16 %v2515_v37, %v2513_v59 }
 0x4c0   :  { %v2288_v23 = vpop.f32.mrf.mxu0  ;;  %v4638_v26 = vpop.f32.mrf.mxu1 }
 0x4c1   :  { %v2289_v2 = vadd.f32 %v2288_v23, %v4538_v61 }
 0x4c3   :  { %v2530_v55 = vmax.f32 %v2289_v2, 0.0 }
 0x4c4   :  { %v2033_v49 = vpop.f32.mrf.mxu3 }
 0x4c5   :  { %v2034_v63 = vadd.f32 %v2033_v49, %v4465_v57  ;;  %v2642_v24 = vpack.c.bf16 %v2530_v55, %v2528_v33  ;;  %v2403_v55 = vadd.f32 %v4590_v15, %v4602_v39 }
 0x4c7   :  { %v2104_v18 = vmax.f32 %v2034_v63, 0.0  ;;  %2816 = vmatmul.bf16.gmra.mxu2 %v2642_v24  ;;  %v2401_v24 = vadd.f32 %v4587_v47, %v4602_v39 }
 0x4c8   :  { %v2291_v3 = vpop.f32.mrf.mxu0  ;;  %v4650_v48 = vpop.f32.mrf.mxu1 }
 0x4c9   :  { %2915 = vmatmul.bf16.gmra.mxu3 %v2631_v35  ;;  %v2152_v38 = vpack.c.bf16 %v2104_v18, %v2103_v43  ;;  %v2292_v58 = vadd.f32 %v2291_v3, %v4538_v61  ;;  %v2519_v18 = vmax.f32 %v2403_v55, 0.0  ;;  %v2517_v60 = vmax.f32 %v2401_v24, 0.0 }
 0x4cb   :  { %2330 = vmatmul.bf16.gmra.mxu0 %v2152_v38  ;;  %2459 = vmatmul.bf16.gmra.mxu1 %v2152_v38  ;;  %v2532_v17 = vmax.f32 %v2292_v58, 0.0 }
 0x4cc   :  { %v2036_v40 = vpop.f32.mrf.mxu3 }
 0x4cd   :  { %v2037_v52 = vadd.f32 %v2036_v40, %v4465_v57 }
 0x4cf   :  { %v2105_v20 = vmax.f32 %v2037_v52, 0.0 }
 0x4d0   :  { %v2293_v53 = vpop.f32.mrf.mxu0  ;;  %v4657_v25 = vpop.f32.mrf.mxu1 }
 0x4d1   :  { %v2294_v7 = vadd.f32 %v2293_v53, %v4538_v61 }
 0x4d3   :  { %v2534_v56 = vmax.f32 %v2294_v7, 0.0  ;;  %v2637_v7 = vpack.c.bf16 %v2519_v18, %v2517_v60 }
 0x4d4   :  { %v2038_v0 = vpop.f32.mrf.mxu3 }
 0x4d5   :  { %v2039_v9 = vadd.f32 %v2038_v0, %v4465_v57  ;;  %v2644_v8 = vpack.c.bf16 %v2534_v56, %v2532_v17  ;;  %v2408_v0 = vadd.f32 %v4611_v10, %v4602_v39 }
 0x4d7   :  { %v2106_v16 = vmax.f32 %v2039_v9, 0.0  ;;  %2821 = vmatmul.bf16.gmra.mxu2 %v2644_v8  ;;  %v2406_v8 = vadd.f32 %v4597_v29, %v4602_v39 }
 0x4d8   :  { %v2296_v4 = vpop.f32.mrf.mxu0  ;;  %v4666_v52 = vpop.f32.mrf.mxu1 }
 0x4d9   :  { %2920 = vmatmul.bf16.gmra.mxu3 %v2633_v36  ;;  %v2153_v19 = vpack.c.bf16 %v2106_v16, %v2105_v20  ;;  %v2297_v32 = vadd.f32 %v2296_v4, %v4538_v61  ;;  %v2523_v36 = vmax.f32 %v2408_v0, 0.0 }
 0x4da   :  { %v4636_v1 = vpop.f32.mrf.mxu2 }
 0x4db   :  { %2335 = vmatmul.bf16.gmra.mxu0 %v2153_v19  ;;  %2464 = vmatmul.bf16.gmra.mxu1 %v2153_v19  ;;  %v2536_v12 = vmax.f32 %v2297_v32, 0.0 }
 0x4dc   :  { %v2041_v62 = vpop.f32.mrf.mxu3 }
 0x4dd   :  { %v2042_v45 = vadd.f32 %v2041_v62, %v4465_v57 }
 0x4df   :  { %v2107_v23 = vmax.f32 %v2042_v45, 0.0 }
 0x4e0   :  { %v2298_v30 = vpop.f32.mrf.mxu0  ;;  %v4677_v5 = vpop.f32.mrf.mxu1 }
 0x4e1   :  { %v2299_v34 = vadd.f32 %v2298_v30, %v4538_v61  ;;  %v2521_v30 = vmax.f32 %v2406_v8, 0.0 }
 0x4e2   :  { %v4647_v28 = vpop.f32.mrf.mxu2 }
 0x4e3   :  { %v2538_v46 = vmax.f32 %v2299_v34, 0.0  ;;  %v2639_v29 = vpack.c.bf16 %v2523_v36, %v2521_v30 }
 0x4e4   :  { %v2043_v44 = vpop.f32.mrf.mxu3 }
 0x4e5   :  { %v2044_v21 = vadd.f32 %v2043_v44, %v4465_v57  ;;  %v2646_v42 = vpack.c.bf16 %v2538_v46, %v2536_v12 }
 0x4e7   :  { %v2108_v22 = vmax.f32 %v2044_v21, 0.0  ;;  %2826 = vmatmul.bf16.gmra.mxu2 %v2646_v42  ;;  %v2413_v21 = vadd.f32 %v4624_v50, %v4602_v39 }
 0x4e8   :  { %v2301_v2 = vpop.f32.mrf.mxu0  ;;  %v4682_v59 = vpop.f32.mrf.mxu1 }
 0x4e9   :  { %2925 = vmatmul.bf16.gmra.mxu3 %v2635_v54  ;;  %v2154_v51 = vpack.c.bf16 %v2108_v22, %v2107_v23  ;;  %v2302_v49 = vadd.f32 %v2301_v2, %v4538_v61  ;;  %v2411_v22 = vadd.f32 %v4614_v41, %v4602_v39  ;;  %v2527_v2 = vmax.f32 %v2413_v21, 0.0 }
 0x4ea   :  { %v4652_v11 = vpop.f32.mrf.mxu2 }
 0x4eb   :  { %2340 = vmatmul.bf16.gmra.mxu0 %v2154_v51  ;;  %2469 = vmatmul.bf16.gmra.mxu1 %v2154_v51  ;;  %v2540_v35 = vmax.f32 %v2302_v49, 0.0 }
 0x4ec   :  { %v2046_v33 = vpop.f32.mrf.mxu3 }
 0x4ed   :  { %v2047_v3 = vadd.f32 %v2046_v33, %v4465_v57 }
 0x4ef   :  { %v2109_v53 = vmax.f32 %v2047_v3, 0.0 }
 0x4f0   :  { %v2303_v63 = vpop.f32.mrf.mxu0 }
 0x4f1   :  { %v2304_v43 = vadd.f32 %v2303_v63, %v4538_v61  ;;  %v2525_v63 = vmax.f32 %v2411_v22, 0.0 }
 0x4f2   :  { %v4664_v14 = vpop.f32.mrf.mxu2 }
 0x4f3   :  { %v2542_v38 = vmax.f32 %v2304_v43, 0.0  ;;  %v2641_v3 = vpack.c.bf16 %v2527_v2, %v2525_v63 }
 0x4f4   :  { %v2048_v40 = vpop.f32.mrf.mxu3 }
 0x4f5   :  { %v2049_v58 = vadd.f32 %v2048_v40, %v4465_v57  ;;  %v2648_v15 = vpack.c.bf16 %v2542_v38, %v2540_v35  ;;  %v4694_v38 = vpop.f32.mrf.mxu1 }
 0x4f7   :  { %v2110_v6 = vmax.f32 %v2049_v58, 0.0  ;;  %2831 = vmatmul.bf16.gmra.mxu2 %v2648_v15  ;;  %v2418_v58 = vadd.f32 %v4638_v26, %v4602_v39 }
 0x4f8   :  { %v2306_v17 = vpop.f32.mrf.mxu0 }
 0x4f9   :  { %2930 = vmatmul.bf16.gmra.mxu3 %v2637_v7  ;;  %v2155_v47 = vpack.c.bf16 %v2110_v6, %v2109_v53  ;;  %v2307_v27 = vadd.f32 %v2306_v17, %v4538_v61  ;;  %v2416_v7 = vadd.f32 %v4632_v13, %v4602_v39 }
 0x4fa   :  { %v4674_v16 = vpop.f32.mrf.mxu2 }
 0x4fb   :  { %2345 = vmatmul.bf16.gmra.mxu0 %v2155_v47  ;;  %2474 = vmatmul.bf16.gmra.mxu1 %v2155_v47  ;;  %v2544_v4 = vmax.f32 %v2307_v27, 0.0 }
 0x4fc   :  { %v2051_v56 = vpop.f32.mrf.mxu3 }
 0x4fd   :  { %v2052_v19 = vadd.f32 %v2051_v56, %v4465_v57  ;;  %v4704_v47 = vpop.f32.mrf.mxu1  ;;  %v2531_v56 = vmax.f32 %v2418_v58, 0.0 }
 0x4ff   :  { %v2111_v34 = vmax.f32 %v2052_v19, 0.0 }
 0x500   :  { %v2308_v9 = vpop.f32.mrf.mxu0 }
 0x501   :  { %v2309_v20 = vadd.f32 %v2308_v9, %v4538_v61 }
 0x502   :  { %v4680_v46 = vpop.f32.mrf.mxu2 }
 0x503   :  { %v2546_v62 = vmax.f32 %v2309_v20, 0.0  ;;  %v2529_v20 = vmax.f32 %v2416_v7, 0.0  ;;  %v2426_v7 = vadd.f32 %v4666_v52, %v4602_v39 }
 0x504   :  { %v2053_v32 = vpop.f32.mrf.mxu3 }
 0x505   :  { %v2054_v10 = vadd.f32 %v2053_v32, %v4465_v57  ;;  %v2650_v31 = vpack.c.bf16 %v2546_v62, %v2544_v4  ;;  %v2643_v62 = vpack.c.bf16 %v2531_v56, %v2529_v20 }
 0x507   :  { %v2112_v37 = vmax.f32 %v2054_v10, 0.0  ;;  %2836 = vmatmul.bf16.gmra.mxu2 %v2650_v31  ;;  %v4710_v10 = vpop.f32.mrf.mxu1 }
 0x508   :  { %v2311_v12 = vpop.f32.mrf.mxu0 }
 0x509   :  { %2935 = vmatmul.bf16.gmra.mxu3 %v2639_v29  ;;  %v2156_v45 = vpack.c.bf16 %v2112_v37, %v2111_v34  ;;  %v2312_v42 = vadd.f32 %v2311_v12, %v4538_v61  ;;  %v2423_v34 = vadd.f32 %v4657_v25, %v4602_v39  ;;  %v2421_v12 = vadd.f32 %v4650_v48, %v4602_v39  ;;  %v3640_v48 = vld [vmem:[%s4921_s4] sm:$0xff] }
 0x50a   :  { %v4692_v18 = vpop.f32.mrf.mxu2 }
 0x50b   :  { %2350 = vmatmul.bf16.gmra.mxu0 %v2156_v45  ;;  %2479 = vmatmul.bf16.gmra.mxu1 %v2156_v45  ;;  %v2548_v51 = vmax.f32 %v2312_v42, 0.0  ;;  %v2533_v2 = vmax.f32 %v2421_v12, 0.0 }
 0x50c   :  { %v2056_v44 = vpop.f32.mrf.mxu3 }
 0x50d   :  { %v2057_v33 = vadd.f32 %v2056_v44, %v4465_v57  ;;  %v2535_v44 = vmax.f32 %v2423_v34, 0.0 }
 0x50f   :  { %v2113_v50 = vmax.f32 %v2057_v33, 0.0  ;;  %v4722_v33 = vpop.f32.mrf.mxu1 }
 0x510   :  { %v2313_v23 = vpop.f32.mrf.mxu0 }
 0x511   :  { %v2314_v54 = vadd.f32 %v2313_v23, %v4538_v61 }
 0x512   :  { %v4699_v53 = vpop.f32.mrf.mxu2 }
 0x513   :  { %v2550_v55 = vmax.f32 %v2314_v54, 0.0 }
 0x514   :  { %v2058_v49 = vpop.f32.mrf.mxu3 }
 0x515   :  { %v2652_v24 = vpack.c.bf16 %v2550_v55, %v2548_v51  ;;  %v2059_v43 = vadd.f32 %v2058_v49, %v4465_v57  ;;  %v4727_v55 = vperm.slane %v3640_v48, 7 }
 0x517   :  { %v2114_v35 = vmax.f32 %v2059_v43, 0.0  ;;  %2841 = vmatmul.bf16.gmra.mxu2 %v2652_v24  ;;  %v2645_v24 = vpack.c.bf16 %v2535_v44, %v2533_v2  ;;  %v2785_v56 = vadd.f32 %v4647_v28, %v4727_v55 }
 0x518   :  { %v2316_v41 = vpop.f32.mrf.mxu0 }
 0x519   :  { %2940 = vmatmul.bf16.gmra.mxu3 %v2641_v3  ;;  %v2157_v40 = vpack.c.bf16 %v2114_v35, %v2113_v50  ;;  %v2317_v15 = vadd.f32 %v2316_v41, %v4538_v61  ;;  %v2783_v35 = vadd.f32 %v4636_v1, %v4727_v55 }
 0x51a   :  { %v4708_v30 = vpop.f32.mrf.mxu2 }
 0x51b   :  { %2355 = vmatmul.bf16.gmra.mxu0 %v2157_v40  ;;  %2484 = vmatmul.bf16.gmra.mxu1 %v2157_v40  ;;  %v2552_v0 = vmax.f32 %v2317_v15, 0.0  ;;  %v2428_v40 = vadd.f32 %v4677_v5, %v4602_v39  ;;  %v4736_v15 = vpop.f32.mrf.mxu1  ;;  %v2537_v5 = vmax.f32 %v2426_v7, 0.0 }
 0x51c   :  { %v2061_v60 = vpop.f32.mrf.mxu3 }
 0x51d   :  { %v2062_v27 = vadd.f32 %v2061_v60, %v4465_v57 }
 0x51f   :  { %v2115_v4 = vmax.f32 %v2062_v27, 0.0 }
 0x520   :  { %v2318_v6 = vpop.f32.mrf.mxu0 }
 0x521   :  { %v2319_v17 = vadd.f32 %v2318_v6, %v4538_v61 }
 0x522   :  { %v4719_v22 = vpop.f32.mrf.mxu2 }
 0x523   :  { %v2554_v9 = vmax.f32 %v2319_v17, 0.0  ;;  %v2539_v17 = vmax.f32 %v2428_v40, 0.0  ;;  %v4745_v52 = vpop.f32.mrf.mxu1  ;;  %v2436_v40 = vadd.f32 %v4704_v47, %v4602_v39 }
 0x524   :  { %v2063_v8 = vpop.f32.mrf.mxu3 }
 0x525   :  { %v2654_v26 = vpack.c.bf16 %v2554_v9, %v2552_v0  ;;  %v2064_v36 = vadd.f32 %v2063_v8, %v4465_v57 }
 0x527   :  { %v2116_v19 = vmax.f32 %v2064_v36, 0.0  ;;  %2846 = vmatmul.bf16.gmra.mxu2 %v2654_v26  ;;  %v2647_v36 = vpack.c.bf16 %v2539_v17, %v2537_v5  ;;  %v2545_v17 = vmax.f32 %v2436_v40, 0.0 }
 0x528   :  { %v2321_v32 = vpop.f32.mrf.mxu0 }
 0x529   :  { %2945 = vmatmul.bf16.gmra.mxu3 %v2643_v62  ;;  %v2158_v13 = vpack.c.bf16 %v2116_v19, %v2115_v4  ;;  %v2322_v37 = vadd.f32 %v2321_v32, %v4538_v61  ;;  %v2788_v62 = vadd.f32 %v4652_v11, %v4727_v55  ;;  %v2790_v11 = vadd.f32 %v4664_v14, %v4727_v55 }
 0x52a   :  { %v4731_v41 = vpop.f32.mrf.mxu2 }
 0x52b   :  { %2360 = vmatmul.bf16.gmra.mxu0 %v2158_v13  ;;  %2489 = vmatmul.bf16.gmra.mxu1 %v2158_v13  ;;  %v2556_v21 = vmax.f32 %v2322_v37, 0.0  ;;  %v2433_v13 = vadd.f32 %v4694_v38, %v4602_v39 }
 0x52c   :  { %v2066_v31 = vpop.f32.mrf.mxu3 }
 0x52d   :  { %v2067_v42 = vadd.f32 %v2066_v31, %v4465_v57  ;;  %v2543_v44 = vmax.f32 %v2433_v13, 0.0 }
 0x52f   :  { %v2117_v49 = vmax.f32 %v2067_v42, 0.0 }
 0x530   :  { %v2323_v29 = vpop.f32.mrf.mxu0 }
 0x531   :  { %v2324_v45 = vadd.f32 %v2323_v29, %v4538_v61  ;;  %v2431_v29 = vadd.f32 %v4682_v59, %v4602_v39 }
 0x532   :  { %v4743_v4 = vpop.f32.mrf.mxu2 }
 0x533   :  { %v2558_v23 = vmax.f32 %v2324_v45, 0.0 }
 0x534   :  { %v2068_v54 = vpop.f32.mrf.mxu3 }
 0x535   :  { %v2656_v51 = vpack.c.bf16 %v2558_v23, %v2556_v21  ;;  %v2069_v25 = vadd.f32 %v2068_v54, %v4465_v57  ;;  %v4759_v23 = vpop.f32.mrf.mxu1  ;;  %v2541_v54 = vmax.f32 %v2431_v29, 0.0 }
 0x537   :  { %v2118_v63 = vmax.f32 %v2069_v25, 0.0  ;;  %2851 = vmatmul.bf16.gmra.mxu2 %v2656_v51  ;;  %v2649_v59 = vpack.c.bf16 %v2543_v44, %v2541_v54  ;;  %v2803_v54 = vadd.f32 %v4708_v30, %v4727_v55  ;;  %v2805_v30 = vadd.f32 %v4719_v22, %v4727_v55 }
 0x538   :  { %v2326_v43 = vpop.f32.mrf.mxu0 }
 0x539   :  { %2950 = vmatmul.bf16.gmra.mxu3 %v2645_v24  ;;  %v2159_v50 = vpack.c.bf16 %v2118_v63, %v2117_v49  ;;  %v2327_v60 = vadd.f32 %v2326_v43, %v4538_v61  ;;  %v2793_v49 = vadd.f32 %v4674_v16, %v4727_v55 }
 0x53a   :  { %v4755_v45 = vpop.f32.mrf.mxu2 }
 0x53b   :  { %2365 = vmatmul.bf16.gmra.mxu0 %v2159_v50  ;;  %2494 = vmatmul.bf16.gmra.mxu1 %v2159_v50  ;;  %v2560_v0 = vmax.f32 %v2327_v60, 0.0  ;;  %v2438_v50 = vadd.f32 %v4710_v10, %v4602_v39 }
 0x53c   :  { %v2911_v57 = vpop.f32.mrf.mxu3 }
 0x53d   :  { %v2912_v3 = vadd.f32 %v2911_v57, %v2783_v35  ;;  %v4765_v43 = vpop.f32.mrf.mxu1  ;;  %v2547_v16 = vmax.f32 %v2438_v50, 0.0 }
 0x53f   :  { %v3031_v58 = vmax.f32 %v2912_v3, 0.0 }
 0x540   :  { %v2328_v6 = vpop.f32.mrf.mxu0 }
 0x541   :  { %3079 = vst [vmem:[#allocation6] sm:$0xff] %v3031_v58  ;;  %v2329_v1 = vadd.f32 %v2328_v6, %v4538_v61  ;;  %v2795_v58 = vadd.f32 %v4680_v46, %v4727_v55 }
 0x542   :  { %v4763_v63 = vpop.f32.mrf.mxu2 }
 0x543   :  { %v2562_v27 = vmax.f32 %v2329_v1, 0.0 }
 0x544   :  { %v2913_v9 = vpop.f32.mrf.mxu3 }
 0x545   :  { %v2658_v8 = vpack.c.bf16 %v2562_v27, %v2560_v0  ;;  %v2914_v20 = vadd.f32 %v2913_v9, %v2785_v56  ;;  %v2651_v9 = vpack.c.bf16 %v2547_v16, %v2545_v17  ;;  %v2452_v5 = vpop.f32.mrf.mxu1 }
 0x547   :  { %v3032_v26 = vmax.f32 %v2914_v20, 0.0  ;;  %2856 = vmatmul.bf16.gmra.mxu2 %v2658_v8  ;;  %v2798_v8 = vadd.f32 %v4692_v18, %v4727_v55 }
 0x548   :  { %v2331_v19 = vpop.f32.mrf.mxu0 }
 0x549   :  { %3080 = vst [vmem:[#allocation6 + $0x8] sm:$0xff] %v3032_v26  ;;  %2955 = vmatmul.bf16.gmra.mxu3 %v2647_v36  ;;  %v2332_v31 = vadd.f32 %v2331_v19, %v4538_v61  ;;  %v2443_v26 = vadd.f32 %v4736_v15, %v4602_v39 }
 0x54a   :  { %v4775_v0 = vpop.f32.mrf.mxu2 }
 0x54b   :  { %v2564_v21 = vmax.f32 %v2332_v31, 0.0  ;;  %v2551_v18 = vmax.f32 %v2443_v26, 0.0 }
 0x54c   :  { %v2916_v28 = vpop.f32.mrf.mxu3 }
 0x54d   :  { %v2917_v32 = vadd.f32 %v2916_v28, %v2788_v62  ;;  %v4787_v31 = vpop.f32.mrf.mxu1 }
 0x54f   :  { %v3033_v34 = vmax.f32 %v2917_v32, 0.0  ;;  %v2441_v32 = vadd.f32 %v4722_v33, %v4602_v39 }
 0x550   :  { %v2333_v37 = vpop.f32.mrf.mxu0 }
 0x551   :  { %3081 = vst [vmem:[#allocation6 + $0x10] sm:$0xff] %v3033_v34  ;;  %v2334_v12 = vadd.f32 %v2333_v37, %v4538_v61  ;;  %v2800_v34 = vadd.f32 %v4699_v53, %v4727_v55 }
 0x552   :  { %v4782_v62 = vpop.f32.mrf.mxu2 }
 0x553   :  { %v2566_v42 = vmax.f32 %v2334_v12, 0.0  ;;  %v2549_v12 = vmax.f32 %v2441_v32, 0.0 }
 0x554   :  { %v2918_v38 = vpop.f32.mrf.mxu3 }
 0x555   :  { %v2660_v2 = vpack.c.bf16 %v2566_v42, %v2564_v21  ;;  %v2919_v51 = vadd.f32 %v2918_v38, %v2790_v11  ;;  %v2653_v21 = vpack.c.bf16 %v2551_v18, %v2549_v12 }
 0x557   :  { %v3034_v25 = vmax.f32 %v2919_v51, 0.0  ;;  %2861 = vmatmul.bf16.gmra.mxu2 %v2660_v2  ;;  %v2457_v2 = vpop.f32.mrf.mxu1 }
 0x558   :  { %v2336_v48 = vpop.f32.mrf.mxu0 }
 0x559   :  { %3082 = vst [vmem:[#allocation6 + $0x18] sm:$0xff] %v3034_v25  ;;  %2960 = vmatmul.bf16.gmra.mxu3 %v2649_v59  ;;  %v2337_v35 = vadd.f32 %v2336_v48, %v4538_v61  ;;  %v2448_v25 = vadd.f32 %v4759_v23, %v4602_v39 }
 0x55a   :  { %v4791_v33 = vpop.f32.mrf.mxu2 }
 0x55b   :  { %v2568_v6 = vmax.f32 %v2337_v35, 0.0  ;;  %v2555_v50 = vmax.f32 %v2448_v25, 0.0 }
 0x55c   :  { %v2921_v14 = vpop.f32.mrf.mxu3 }
 0x55d   :  { %v2922_v24 = vadd.f32 %v2921_v14, %v2793_v49  ;;  %v2446_v14 = vadd.f32 %v4745_v52, %v4602_v39 }
 0x55f   :  { %v3035_v57 = vmax.f32 %v2922_v24, 0.0  ;;  %v2553_v23 = vmax.f32 %v2446_v14, 0.0 }
 0x560   :  { %v2338_v3 = vpop.f32.mrf.mxu0 }
 0x561   :  { %3083 = vst [vmem:[#allocation6 + $0x20] sm:$0xff] %v3035_v57  ;;  %v2339_v60 = vadd.f32 %v2338_v3, %v4538_v61 }
 0x562   :  { %v4803_v3 = vpop.f32.mrf.mxu2 }
 0x563   :  { %v2570_v7 = vmax.f32 %v2339_v60, 0.0 }
 0x564   :  { %v2923_v1 = vpop.f32.mrf.mxu3 }
 0x565   :  { %v2662_v56 = vpack.c.bf16 %v2570_v7, %v2568_v6  ;;  %v2924_v10 = vadd.f32 %v2923_v1, %v2795_v58  ;;  %v4805_v58 = vpop.f32.mrf.mxu1  ;;  %v2655_v6 = vpack.c.bf16 %v2555_v50, %v2553_v23  ;;  %v2808_v1 = vadd.f32 %v4731_v41, %v4727_v55 }
 0x566   :  { %v2810_v41 = vadd.f32 %v4743_v4, %v4727_v55 }
 0x567   :  { %v3036_v27 = vmax.f32 %v2924_v10, 0.0  ;;  %2866 = vmatmul.bf16.gmra.mxu2 %v2662_v56  ;;  %v2453_v10 = vadd.f32 %v2452_v5, %v4602_v39 }
 0x568   :  { %v2341_v47 = vpop.f32.mrf.mxu0 }
 0x569   :  { %3084 = vst [vmem:[#allocation6 + $0x28] sm:$0xff] %v3036_v27  ;;  %2965 = vmatmul.bf16.gmra.mxu3 %v2651_v9  ;;  %v2342_v36 = vadd.f32 %v2341_v47, %v4538_v61  ;;  %v2559_v26 = vmax.f32 %v2453_v10, 0.0 }
 0x56a   :  { %v4809_v56 = vpop.f32.mrf.mxu2 }
 0x56b   :  { %v2572_v37 = vmax.f32 %v2342_v36, 0.0 }
 0x56c   :  { %v2926_v20 = vpop.f32.mrf.mxu3 }
 0x56d   :  { %v2927_v46 = vadd.f32 %v2926_v20, %v2798_v8  ;;  %v2462_v47 = vpop.f32.mrf.mxu1  ;;  %v2451_v20 = vadd.f32 %v4765_v43, %v4602_v39 }
 0x56f   :  { %v3037_v19 = vmax.f32 %v2927_v46, 0.0  ;;  %v2557_v32 = vmax.f32 %v2451_v20, 0.0 }
 0x570   :  { %v2343_v28 = vpop.f32.mrf.mxu0 }
 0x571   :  { %3085 = vst [vmem:[#allocation6 + $0x30] sm:$0xff] %v3037_v19  ;;  %v2344_v13 = vadd.f32 %v2343_v28, %v4538_v61  ;;  %v2657_v18 = vpack.c.bf16 %v2559_v26, %v2557_v32 }
 0x573   :  { %v2574_v15 = vmax.f32 %v2344_v13, 0.0 }
 0x574   :  { %v2928_v29 = vpop.f32.mrf.mxu3 }
 0x575   :  { %v2664_v44 = vpack.c.bf16 %v2574_v15, %v2572_v37  ;;  %v2929_v11 = vadd.f32 %v2928_v29, %v2800_v34  ;;  %v4818_v37 = vpop.f32.mrf.mxu2  ;;  %v4820_v43 = vpop.f32.mrf.mxu1  ;;  %v2813_v29 = vadd.f32 %v4755_v45, %v4727_v55  ;;  %v2815_v45 = vadd.f32 %v4763_v63, %v4727_v55 }
 0x577   :  { %v3038_v42 = vmax.f32 %v2929_v11, 0.0  ;;  %2871 = vmatmul.bf16.gmra.mxu2 %v2664_v44  ;;  %v2458_v44 = vadd.f32 %v2457_v2, %v4602_v39 }
 0x578   :  { %v2346_v38 = vpop.f32.mrf.mxu0 }
 0x579   :  { %3086 = vst [vmem:[#allocation6 + $0x38] sm:$0xff] %v3038_v42  ;;  %2970 = vmatmul.bf16.gmra.mxu3 %v2653_v21  ;;  %v2347_v59 = vadd.f32 %v2346_v38, %v4538_v61  ;;  %v2456_v38 = vadd.f32 %v4787_v31, %v4602_v39 }
 0x57b   :  { %v2576_v35 = vmax.f32 %v2347_v59, 0.0 }
 0x57c   :  { %v2931_v51 = vpop.f32.mrf.mxu3 }
 0x57d   :  { %v2932_v53 = vadd.f32 %v2931_v51, %v2803_v54  ;;  %v4829_v51 = vpop.f32.mrf.mxu2 }
 0x57f   :  { %v3039_v48 = vmax.f32 %v2932_v53, 0.0  ;;  %v2563_v53 = vmax.f32 %v2458_v44, 0.0 }
 0x580   :  { %v2348_v49 = vpop.f32.mrf.mxu0 }
 0x581   :  { %3087 = vst [vmem:[#allocation6 + $0x40] sm:$0xff] %v3039_v48  ;;  %v2349_v24 = vadd.f32 %v2348_v49, %v4538_v61  ;;  %v2467_v48 = vpop.f32.mrf.mxu1  ;;  %v2561_v49 = vmax.f32 %v2456_v38, 0.0 }
 0x583   :  { %v2578_v57 = vmax.f32 %v2349_v24, 0.0  ;;  %v2659_v50 = vpack.c.bf16 %v2563_v53, %v2561_v49 }
 0x584   :  { %v2933_v40 = vpop.f32.mrf.mxu3 }
 0x585   :  { %v2666_v60 = vpack.c.bf16 %v2578_v57, %v2576_v35  ;;  %v2934_v16 = vadd.f32 %v2933_v40, %v2805_v30  ;;  %v2818_v35 = vadd.f32 %v4775_v0, %v4727_v55  ;;  %v4835_v57 = vpop.f32.mrf.mxu2  ;;  %v2820_v0 = vadd.f32 %v4782_v62, %v4727_v55 }
 0x587   :  { %v3040_v7 = vmax.f32 %v2934_v16, 0.0  ;;  %2876 = vmatmul.bf16.gmra.mxu2 %v2666_v60  ;;  %v2463_v60 = vadd.f32 %v2462_v47, %v4602_v39 }
 0x588   :  { %v2351_v52 = vpop.f32.mrf.mxu0 }
 0x589   :  { %3088 = vst [vmem:[#allocation6 + $0x48] sm:$0xff] %v3040_v7  ;;  %2975 = vmatmul.bf16.gmra.mxu3 %v2655_v6  ;;  %v2352_v27 = vadd.f32 %v2351_v52, %v4538_v61  ;;  %v2470_v23 = vpop.f32.mrf.mxu1  ;;  %v2461_v52 = vadd.f32 %v4805_v58, %v4602_v39 }
 0x58b   :  { %v2580_v36 = vmax.f32 %v2352_v27, 0.0 }
 0x58c   :  { %v2936_v22 = vpop.f32.mrf.mxu3 }
 0x58d   :  { %v2937_v17 = vadd.f32 %v2936_v22, %v2808_v1  ;;  %v2567_v22 = vmax.f32 %v2463_v60, 0.0  ;;  %v4844_v20 = vpop.f32.mrf.mxu2 }
 0x58f   :  { %v3041_v9 = vmax.f32 %v2937_v17, 0.0 }
 0x590   :  { %v2353_v8 = vpop.f32.mrf.mxu0 }
 0x591   :  { %3089 = vst [vmem:[#allocation6 + $0x50] sm:$0xff] %v3041_v9  ;;  %v2354_v46 = vadd.f32 %v2353_v8, %v4538_v61  ;;  %v2565_v9 = vmax.f32 %v2461_v52, 0.0 }
 0x593   :  { %v2582_v19 = vmax.f32 %v2354_v46, 0.0  ;;  %v2661_v46 = vpack.c.bf16 %v2567_v22, %v2565_v9  ;;  %v2835_v22 = vadd.f32 %v4835_v57, %v4727_v55 }
 0x594   :  { %v2938_v28 = vpop.f32.mrf.mxu3 }
 0x595   :  { %v2668_v5 = vpack.c.bf16 %v2582_v19, %v2580_v36  ;;  %v2939_v13 = vadd.f32 %v2938_v28, %v2810_v41  ;;  %v2472_v41 = vpop.f32.mrf.mxu1  ;;  %v2823_v36 = vadd.f32 %v4791_v33, %v4727_v55  ;;  %v2468_v28 = vadd.f32 %v2467_v48, %v4602_v39 }
 0x596   :  { %v2825_v33 = vadd.f32 %v4803_v3, %v4727_v55  ;;  %v2473_v3 = vadd.f32 %v2472_v41, %v4602_v39 }
 0x597   :  { %v3042_v34 = vmax.f32 %v2939_v13, 0.0  ;;  %2881 = vmatmul.bf16.gmra.mxu2 %v2668_v5  ;;  %v4850_v13 = vpop.f32.mrf.mxu2 }
 0x598   :  { %v2356_v15 = vpop.f32.mrf.mxu0  ;;  %v2575_v49 = vmax.f32 %v2473_v3, 0.0 }
 0x599   :  { %3090 = vst [vmem:[#allocation6 + $0x58] sm:$0xff] %v3042_v34  ;;  %2980 = vmatmul.bf16.gmra.mxu3 %v2657_v18  ;;  %v2357_v11 = vadd.f32 %v2356_v15, %v4538_v61  ;;  %v2466_v34 = vadd.f32 %v4820_v43, %v4602_v39 }
 0x59b   :  { %v2584_v25 = vmax.f32 %v2357_v11, 0.0 }
 0x59c   :  { %v2941_v4 = vpop.f32.mrf.mxu3 }
 0x59d   :  { %v2942_v12 = vadd.f32 %v2941_v4, %v2813_v29  ;;  %v2475_v29 = vpop.f32.mrf.mxu1  ;;  %v2571_v4 = vmax.f32 %v2468_v28, 0.0 }
 0x59f   :  { %v3043_v21 = vmax.f32 %v2942_v12, 0.0  ;;  %v2842_v43 = vpop.f32.mrf.mxu2 }
 0x5a0   :  { %v2358_v42 = vpop.f32.mrf.mxu0 }
 0x5a1   :  { %3091 = vst [vmem:[#allocation6 + $0x60] sm:$0xff] %v3043_v21  ;;  %v2359_v54 = vadd.f32 %v2358_v42, %v4538_v61  ;;  %v2569_v21 = vmax.f32 %v2466_v34, 0.0 }
 0x5a3   :  { %v2586_v59 = vmax.f32 %v2359_v54, 0.0  ;;  %v2663_v54 = vpack.c.bf16 %v2571_v4, %v2569_v21 }
 0x5a4   :  { %v2943_v2 = vpop.f32.mrf.mxu3 }
 0x5a5   :  { %v2670_v14 = vpack.c.bf16 %v2586_v59, %v2584_v25  ;;  %v2944_v24 = vadd.f32 %v2943_v2, %v2815_v45  ;;  %v2477_v45 = vpop.f32.mrf.mxu1  ;;  %v2471_v2 = vadd.f32 %v2470_v23, %v4602_v39 }
 0x5a7   :  { %v3044_v30 = vmax.f32 %v2944_v24, 0.0  ;;  %2886 = vmatmul.bf16.gmra.mxu2 %v2670_v14  ;;  %v2830_v14 = vadd.f32 %v4818_v37, %v4727_v55  ;;  %v2844_v24 = vpop.f32.mrf.mxu2  ;;  %v2476_v37 = vadd.f32 %v2475_v29, %v4602_v39 }
 0x5a8   :  { %v2361_v31 = vpop.f32.mrf.mxu0 }
 0x5a9   :  { %3092 = vst [vmem:[#allocation6 + $0x68] sm:$0xff] %v3044_v30  ;;  %2985 = vmatmul.bf16.gmra.mxu3 %v2659_v50  ;;  %v2362_v16 = vadd.f32 %v2361_v31, %v4538_v61  ;;  %v2573_v30 = vmax.f32 %v2471_v2, 0.0 }
 0x5ab   :  { %v2588_v17 = vmax.f32 %v2362_v16, 0.0 }
 0x5ac   :  { %v2946_v40 = vpop.f32.mrf.mxu3 }
 0x5ad   :  { %v2947_v63 = vadd.f32 %v2946_v40, %v2818_v35  ;;  %v2480_v35 = vpop.f32.mrf.mxu1  ;;  %v2665_v40 = vpack.c.bf16 %v2575_v49, %v2573_v30 }
 0x5af   :  { %v3045_v6 = vmax.f32 %v2947_v63, 0.0  ;;  %v2833_v63 = vadd.f32 %v4829_v51, %v4727_v55  ;;  %v2847_v23 = vpop.f32.mrf.mxu2 }
 0x5b0   :  { %v2363_v7 = vpop.f32.mrf.mxu0 }
 0x5b1   :  { %3093 = vst [vmem:[#allocation6 + $0x70] sm:$0xff] %v3045_v6  ;;  %v2364_v1 = vadd.f32 %v2363_v7, %v4538_v61  ;;  %v2478_v6 = vadd.f32 %v2477_v45, %v4602_v39 }
 0x5b3   :  { %v2590_v10 = vmax.f32 %v2364_v1, 0.0  ;;  %v2579_v1 = vmax.f32 %v2478_v6, 0.0 }
 0x5b4   :  { %v2948_v27 = vpop.f32.mrf.mxu3 }
 0x5b5   :  { %v2672_v8 = vpack.c.bf16 %v2590_v10, %v2588_v17  ;;  %v2949_v47 = vadd.f32 %v2948_v27, %v2820_v0  ;;  %v2482_v52 = vpop.f32.mrf.mxu1  ;;  %v2577_v17 = vmax.f32 %v2476_v37, 0.0 }
 0x5b6   :  { %v2483_v41 = vadd.f32 %v2482_v52, %v4602_v39 }
 0x5b7   :  { %v3046_v26 = vmax.f32 %v2949_v47, 0.0  ;;  %2891 = vmatmul.bf16.gmra.mxu2 %v2672_v8  ;;  %v2667_v27 = vpack.c.bf16 %v2579_v1, %v2577_v17  ;;  %v2849_v51 = vpop.f32.mrf.mxu2  ;;  %v2838_v47 = vadd.f32 %v4844_v20, %v4727_v55  ;;  %v2843_v20 = vadd.f32 %v2842_v43, %v4727_v55 }
 0x5b8   :  { %v2366_v58 = vpop.f32.mrf.mxu0 }
 0x5b9   :  { %3094 = vst [vmem:[#allocation6 + $0x78] sm:$0xff] %v3046_v26  ;;  %2990 = vmatmul.bf16.gmra.mxu3 %v2661_v46  ;;  %v2367_v32 = vadd.f32 %v2366_v58, %v4538_v61 }
 0x5bb   :  { %v2592_v12 = vmax.f32 %v2367_v32, 0.0 }
 0x5bc   :  { %v2951_v19 = vpop.f32.mrf.mxu3 }
 0x5bd   :  { %v2952_v62 = vadd.f32 %v2951_v19, %v2823_v36  ;;  %v2485_v8 = vpop.f32.mrf.mxu1  ;;  %v2481_v36 = vadd.f32 %v2480_v35, %v4602_v39  ;;  %v2583_v19 = vmax.f32 %v2483_v41, 0.0 }
 0x5be   :  { %v2486_v21 = vadd.f32 %v2485_v8, %v4602_v39 }
 0x5bf   :  { %v3047_v5 = vmax.f32 %v2952_v62, 0.0  ;;  %v2852_v57 = vpop.f32.mrf.mxu2  ;;  %v2840_v62 = vadd.f32 %v4850_v13, %v4727_v55 }
 0x5c0   :  { %v2368_v18 = vpop.f32.mrf.mxu0 }
 0x5c1   :  { %3095 = vst [vmem:[#allocation6 + $0x80] sm:$0xff] %v3047_v5  ;;  %v2369_v15 = vadd.f32 %v2368_v18, %v4538_v61  ;;  %v2828_v61 = vadd.f32 %v4809_v56, %v4727_v55  ;;  %v2581_v5 = vmax.f32 %v2481_v36, 0.0 }
 0x5c3   :  { %v2594_v44 = vmax.f32 %v2369_v15, 0.0  ;;  %v2669_v34 = vpack.c.bf16 %v2583_v19, %v2581_v5 }
 0x5c4   :  { %v2953_v11 = vpop.f32.mrf.mxu3 }
 0x5c5   :  { %v2674_v42 = vpack.c.bf16 %v2594_v44, %v2592_v12  ;;  %v2954_v38 = vadd.f32 %v2953_v11, %v2825_v33  ;;  %v2487_v28 = vpop.f32.mrf.mxu1 }
 0x5c6   :  { %v2488_v44 = vadd.f32 %v2487_v28, %v4602_v39 }
 0x5c7   :  { %v3048_v53 = vmax.f32 %v2954_v38, 0.0  ;;  %2896 = vmatmul.bf16.gmra.mxu2 %v2674_v42  ;;  %v2854_v29 = vpop.f32.mrf.mxu2  ;;  %v2845_v42 = vadd.f32 %v2844_v24, %v4727_v55 }
 0x5c8   :  { %v2587_v13 = vmax.f32 %v2488_v44, 0.0  ;;  %v2855_v17 = vadd.f32 %v2854_v29, %v4727_v55 }
 0x5c9   :  { %3096 = vst [vmem:[#allocation6 + $0x88] sm:$0xff] %v3048_v53  ;;  %2995 = vmatmul.bf16.gmra.mxu3 %v2663_v54  ;;  %v2585_v54 = vmax.f32 %v2486_v21, 0.0 }
 0x5cb   :  { %v2671_v45 = vpack.c.bf16 %v2587_v13, %v2585_v54 }
 0x5cc   :  { %v2956_v25 = vpop.f32.mrf.mxu3 }
 0x5cd   :  { %v2957_v59 = vadd.f32 %v2956_v25, %v2828_v61  ;;  %v2490_v12 = vpop.f32.mrf.mxu1 }
 0x5cf   :  { %v3049_v48 = vmax.f32 %v2957_v59, 0.0  ;;  %v2857_v61 = vpop.f32.mrf.mxu2  ;;  %v2848_v59 = vadd.f32 %v2847_v23, %v4727_v55  ;;  %v2853_v23 = vadd.f32 %v2852_v57, %v4727_v55 }
 0x5d1   :  { %3097 = vst [vmem:[#allocation6 + $0x90] sm:$0xff] %v3049_v48 }
 0x5d4   :  { %v2958_v50 = vpop.f32.mrf.mxu3 }
 0x5d5   :  { %v2959_v31 = vadd.f32 %v2958_v50, %v2830_v14  ;;  %v2492_v43 = vpop.f32.mrf.mxu1  ;;  %v2491_v50 = vadd.f32 %v2490_v12, %v4602_v39 }
 0x5d6   :  { %v2493_v2 = vadd.f32 %v2492_v43, %v4602_v39 }
 0x5d7   :  { %v3050_v56 = vmax.f32 %v2959_v31, 0.0  ;;  %v2859_v14 = vpop.f32.mrf.mxu2  ;;  %v2850_v31 = vadd.f32 %v2849_v51, %v4727_v55 }
 0x5d8   :  { %v2591_v30 = vmax.f32 %v2493_v2, 0.0 }
 0x5d9   :  { %3098 = vst [vmem:[#allocation6 + $0x98] sm:$0xff] %v3050_v56  ;;  %3000 = vmatmul.bf16.gmra.mxu3 %v2665_v40  ;;  %v2589_v40 = vmax.f32 %v2491_v50, 0.0 }
 0x5dc   :  { %v2961_v60 = vpop.f32.mrf.mxu3 }
 0x5dd   :  { %v2962_v16 = vadd.f32 %v2961_v60, %v2833_v63  ;;  %v2495_v24 = vpop.f32.mrf.mxu1  ;;  %v2673_v63 = vpack.c.bf16 %v2591_v30, %v2589_v40 }
 0x5df   :  { %v3051_v7 = vmax.f32 %v2962_v16, 0.0  ;;  %v2862_v16 = vpop.f32.mrf.mxu2 }
 0x5e1   :  { %3099 = vst [vmem:[#allocation6 + $0xa0] sm:$0xff] %v3051_v7 }
 0x5e4   :  { %v2963_v0 = vpop.f32.mrf.mxu3 }
 0x5e5   :  { %v2964_v10 = vadd.f32 %v2963_v0, %v2835_v22  ;;  %v2497_v6 = vpop.f32.mrf.mxu1  ;;  %v2496_v22 = vadd.f32 %v2495_v24, %v4602_v39 }
 0x5e6   :  { %v2498_v37 = vadd.f32 %v2497_v6, %v4602_v39  ;;  %v2860_v39 = vadd.f32 %v2859_v14, %v4727_v55 }
 0x5e7   :  { %v3052_v9 = vmax.f32 %v2964_v10, 0.0  ;;  %v2864_v10 = vpop.f32.mrf.mxu2 }
 0x5e8   :  { %v2595_v0 = vmax.f32 %v2498_v37, 0.0 }
 0x5e9   :  { %3100 = vst [vmem:[#allocation6 + $0xa8] sm:$0xff] %v3052_v9  ;;  %3005 = vmatmul.bf16.gmra.mxu3 %v2667_v27  ;;  %v2593_v9 = vmax.f32 %v2496_v22, 0.0 }
 0x5eb   :  { %v2675_v8 = vpack.c.bf16 %v2595_v0, %v2593_v9 }
 0x5ec   :  { %v2966_v46 = vpop.f32.mrf.mxu3 }
 0x5ed   :  { %v2967_v26 = vadd.f32 %v2966_v46, %v2838_v47  ;;  %v2858_v46 = vadd.f32 %v2857_v61, %v4727_v55 }
 0x5ef   :  { %v3053_v58 = vmax.f32 %v2967_v26, 0.0 }
 0x5f1   :  { %3101 = vst [vmem:[#allocation6 + $0xb0] sm:$0xff] %v3053_v58  ;;  %v2867_v58 = vpop.f32.mrf.mxu2 }
 0x5f2   :  { %v2868_v12 = vadd.f32 %v2867_v58, %v4727_v55 }
 0x5f4   :  { %v2968_v32 = vpop.f32.mrf.mxu3 }
 0x5f5   :  { %v2969_v18 = vadd.f32 %v2968_v32, %v2840_v62  ;;  %v2863_v32 = vadd.f32 %v2862_v16, %v4727_v55 }
 0x5f7   :  { %v3054_v15 = vmax.f32 %v2969_v18, 0.0 }
 0x5f9   :  { %3102 = vst [vmem:[#allocation6 + $0xb8] sm:$0xff] %v3054_v15  ;;  %3010 = vmatmul.bf16.gmra.mxu3 %v2669_v34  ;;  %v2869_v28 = vpop.f32.mrf.mxu2 }
 0x5fc   :  { %v2971_v4 = vpop.f32.mrf.mxu3 }
 0x5fd   :  { %v2972_v33 = vadd.f32 %v2971_v4, %v2843_v20  ;;  %v2865_v20 = vadd.f32 %v2864_v10, %v4727_v55 }
 0x5ff   :  { %v3055_v11 = vmax.f32 %v2972_v33, 0.0 }
 0x601   :  { %3103 = vst [vmem:[#allocation6 + $0xc0] sm:$0xff] %v3055_v11  ;;  %v2872_v15 = vpop.f32.mrf.mxu2 }
 0x604   :  { %v2973_v38 = vpop.f32.mrf.mxu3 }
 0x605   :  { %v2974_v53 = vadd.f32 %v2973_v38, %v2845_v42  ;;  %v2870_v42 = vadd.f32 %v2869_v28, %v4727_v55 }
 0x607   :  { %v3056_v25 = vmax.f32 %v2974_v53, 0.0 }
 0x609   :  { %3104 = vst [vmem:[#allocation6 + $0xc8] sm:$0xff] %v3056_v25  ;;  %3015 = vmatmul.bf16.gmra.mxu3 %v2671_v45  ;;  %v2874_v44 = vpop.f32.mrf.mxu2  ;;  %v2873_v45 = vadd.f32 %v2872_v15, %v4727_v55 }
 0x60c   :  { %v2976_v3 = vpop.f32.mrf.mxu3 }
 0x60d   :  { %v2977_v48 = vadd.f32 %v2976_v3, %v2848_v59 }
 0x60f   :  { %v3057_v49 = vmax.f32 %v2977_v48, 0.0  ;;  %v2875_v48 = vadd.f32 %v2874_v44, %v4727_v55 }
 0x611   :  { %3105 = vst [vmem:[#allocation6 + $0xd0] sm:$0xff] %v3057_v49  ;;  %v2877_v53 = vpop.f32.mrf.mxu2 }
 0x612   :  { %v2878_v24 = vadd.f32 %v2877_v53, %v4727_v55 }
 0x614   :  { %v2978_v35 = vpop.f32.mrf.mxu3 }
 0x615   :  { %v2979_v56 = vadd.f32 %v2978_v35, %v2850_v31 }
 0x617   :  { %v3058_v60 = vmax.f32 %v2979_v56, 0.0 }
 0x619   :  { %3106 = vst [vmem:[#allocation6 + $0xd8] sm:$0xff] %v3058_v60  ;;  %3020 = vmatmul.bf16.gmra.mxu3 %v2673_v63  ;;  %v2879_v3 = vpop.f32.mrf.mxu2 }
 0x61a   :  { %v2880_v40 = vadd.f32 %v2879_v3, %v4727_v55 }
 0x61c   :  { %v2981_v7 = vpop.f32.mrf.mxu3 }
 0x61d   :  { %v2982_v52 = vadd.f32 %v2981_v7, %v2853_v23 }
 0x61f   :  { %v3059_v1 = vmax.f32 %v2982_v52, 0.0 }
 0x621   :  { %3107 = vst [vmem:[#allocation6 + $0xe0] sm:$0xff] %v3059_v1  ;;  %v2882_v50 = vpop.f32.mrf.mxu2 }
 0x622   :  { %v2883_v23 = vadd.f32 %v2882_v50, %v4727_v55 }
 0x624   :  { %v2983_v27 = vpop.f32.mrf.mxu3 }
 0x625   :  { %v2984_v51 = vadd.f32 %v2983_v27, %v2855_v17 }
 0x627   :  { %v3060_v47 = vmax.f32 %v2984_v51, 0.0 }
 0x629   :  { %3108 = vst [vmem:[#allocation6 + $0xe8] sm:$0xff] %v3060_v47  ;;  %3025 = vmatmul.bf16.gmra.mxu3 %v2675_v8  ;;  %v2884_v56 = vpop.f32.mrf.mxu2 }
 0x62a   :  { %v2885_v1 = vadd.f32 %v2884_v56, %v4727_v55 }
 0x62c   :  { %v2986_v26 = vpop.f32.mrf.mxu3 }
 0x62d   :  { %v2987_v41 = vadd.f32 %v2986_v26, %v2858_v46 }
 0x62f   :  { %v3061_v36 = vmax.f32 %v2987_v41, 0.0 }
 0x631   :  { %3109 = vst [vmem:[#allocation6 + $0xf0] sm:$0xff] %v3061_v36  ;;  %v2887_v52 = vpop.f32.mrf.mxu2 }
 0x632   :  { %v2888_v27 = vadd.f32 %v2887_v52, %v4727_v55 }
 0x634   :  { %v2988_v57 = vpop.f32.mrf.mxu3 }
 0x635   :  { %v2989_v19 = vadd.f32 %v2988_v57, %v2860_v39 }
 0x637   :  { %v3062_v62 = vmax.f32 %v2989_v19, 0.0 }
 0x639   :  { %3110 = vst [vmem:[#allocation6 + $0xf8] sm:$0xff] %v3062_v62  ;;  %v2889_v10 = vpop.f32.mrf.mxu2 }
 0x63a   :  { %v2890_v46 = vadd.f32 %v2889_v10, %v4727_v55 }
 0x63c   :  { %v2991_v5 = vpop.f32.mrf.mxu3 }
 0x63d   :  { %v2992_v18 = vadd.f32 %v2991_v5, %v2863_v32 }
 0x63f   :  { %v3063_v34 = vmax.f32 %v2992_v18, 0.0 }
 0x641   :  { %3111 = vst [vmem:[#allocation6 + $0x100] sm:$0xff] %v3063_v34  ;;  %v2892_v47 = vpop.f32.mrf.mxu2 }
 0x642   :  { %v2893_v36 = vadd.f32 %v2892_v47, %v4727_v55 }
 0x644   :  { %v2993_v29 = vpop.f32.mrf.mxu3 }
 0x645   :  { %v2994_v4 = vadd.f32 %v2993_v29, %v2865_v20 }
 0x647   :  { %v3064_v33 = vmax.f32 %v2994_v4, 0.0 }
 0x649   :  { %3112 = vst [vmem:[#allocation6 + $0x108] sm:$0xff] %v3064_v33  ;;  %v2894_v39 = vpop.f32.mrf.mxu2 }
 0x64a   :  { %v2895_v28 = vadd.f32 %v2894_v39, %v4727_v55 }
 0x64c   :  { %v2996_v11 = vpop.f32.mrf.mxu3 }
 0x64d   :  { %v2997_v21 = vadd.f32 %v2996_v11, %v2868_v12 }
 0x64f   :  { %v3065_v13 = vmax.f32 %v2997_v21, 0.0 }
 0x651   :  { %3113 = vst [vmem:[#allocation6 + $0x110] sm:$0xff] %v3065_v13  ;;  %v2897_v18 = vpop.f32.mrf.mxu2 }
 0x652   :  { %v2898_v15 = vadd.f32 %v2897_v18, %v4727_v55 }
 0x654   :  { %v2998_v38 = vpop.f32.mrf.mxu3 }
 0x655   :  { %v2999_v54 = vadd.f32 %v2998_v38, %v2870_v42 }
 0x657   :  { %v3066_v61 = vmax.f32 %v2999_v54, 0.0 }
 0x659   :  { %3114 = vst [vmem:[#allocation6 + $0x118] sm:$0xff] %v3066_v61  ;;  %v2899_v33 = vpop.f32.mrf.mxu2 }
 0x65a   :  { %v2900_v12 = vadd.f32 %v2899_v33, %v4727_v55 }
 0x65c   :  { %v3001_v25 = vpop.f32.mrf.mxu3 }
 0x65d   :  { %v3002_v43 = vadd.f32 %v3001_v25, %v2873_v45 }
 0x65f   :  { %v3067_v59 = vmax.f32 %v3002_v43, 0.0 }
 0x661   :  { %3115 = vst [vmem:[#allocation6 + $0x120] sm:$0xff] %v3067_v59 }
 0x664   :  { %v3003_v2 = vpop.f32.mrf.mxu3 }
 0x665   :  { %v3004_v49 = vadd.f32 %v3003_v2, %v2875_v48 }
 0x667   :  { %v3068_v14 = vmax.f32 %v3004_v49, 0.0 }
 0x669   :  { %3116 = vst [vmem:[#allocation6 + $0x128] sm:$0xff] %v3068_v14 }
 0x66c   :  { %v3006_v30 = vpop.f32.mrf.mxu3 }
 0x66d   :  { %v3007_v31 = vadd.f32 %v3006_v30, %v2878_v24 }
 0x66f   :  { %v3069_v35 = vmax.f32 %v3007_v31, 0.0 }
 0x671   :  { %3117 = vst [vmem:[#allocation6 + $0x130] sm:$0xff] %v3069_v35 }
 0x674   :  { %v3008_v63 = vpop.f32.mrf.mxu3 }
 0x675   :  { %v3009_v60 = vadd.f32 %v3008_v63, %v2880_v40 }
 0x677   :  { %v3070_v16 = vmax.f32 %v3009_v60, 0.0 }
 0x679   :  { %3118 = vst [vmem:[#allocation6 + $0x138] sm:$0xff] %v3070_v16 }
 0x67c   :  { %v3011_v6 = vpop.f32.mrf.mxu3 }
 0x67d   :  { %v3012_v7 = vadd.f32 %v3011_v6, %v2883_v23 }
 0x67f   :  { %v3071_v37 = vmax.f32 %v3012_v7, 0.0 }
 0x681   :  { %3119 = vst [vmem:[#allocation6 + $0x140] sm:$0xff] %v3071_v37 }
 0x684   :  { %v3013_v22 = vpop.f32.mrf.mxu3 }
 0x685   :  { %v3014_v0 = vadd.f32 %v3013_v22, %v2885_v1 }
 0x687   :  { %v3072_v17 = vmax.f32 %v3014_v0, 0.0 }
 0x689   :  { %3120 = vst [vmem:[#allocation6 + $0x148] sm:$0xff] %v3072_v17 }
 0x68c   :  { %v3016_v9 = vpop.f32.mrf.mxu3 }
 0x68d   :  { %v3017_v51 = vadd.f32 %v3016_v9, %v2888_v27 }
 0x68f   :  { %v3073_v8 = vmax.f32 %v3017_v51, 0.0 }
 0x691   :  { %3121 = vst [vmem:[#allocation6 + $0x150] sm:$0xff] %v3073_v8 }
 0x694   :  { %v3018_v26 = vpop.f32.mrf.mxu3 }
 0x695   :  { %v3019_v41 = vadd.f32 %v3018_v26, %v2890_v46 }
 0x697   :  { %v3074_v58 = vmax.f32 %v3019_v41, 0.0 }
 0x699   :  { %3122 = vst [vmem:[#allocation6 + $0x158] sm:$0xff] %v3074_v58 }
 0x69c   :  { %v3021_v57 = vpop.f32.mrf.mxu3 }
 0x69d   :  { %v3022_v19 = vadd.f32 %v3021_v57, %v2893_v36 }
 0x69f   :  { %v3075_v62 = vmax.f32 %v3022_v19, 0.0 }
 0x6a1   :  { %3123 = vst [vmem:[#allocation6 + $0x160] sm:$0xff] %v3075_v62 }
 0x6a4   :  { %v3023_v32 = vpop.f32.mrf.mxu3 }
 0x6a5   :  { %v3024_v5 = vadd.f32 %v3023_v32, %v2895_v28 }
 0x6a7   :  { %v3076_v34 = vmax.f32 %v3024_v5, 0.0 }
 0x6a9   :  { %3124 = vst [vmem:[#allocation6 + $0x168] sm:$0xff] %v3076_v34 }
 0x6ac   :  { %v3026_v20 = vpop.f32.mrf.mxu3 }
 0x6ad   :  { %v3027_v29 = vadd.f32 %v3026_v20, %v2898_v15 }
 0x6af   :  { %v3077_v4 = vmax.f32 %v3027_v29, 0.0 }
 0x6b1   :  { %3125 = vst [vmem:[#allocation6 + $0x170] sm:$0xff] %v3077_v4 }
 0x6b4   :  { %v3028_v44 = vpop.f32.mrf.mxu3 }
 0x6b5   :  { %v3029_v11 = vadd.f32 %v3028_v44, %v2900_v12 }
 0x6b7   :  { %v3078_v21 = vmax.f32 %v3029_v11, 0.0 }
 0x6b9   :  { %3126 = vst [vmem:[#allocation6 + $0x178] sm:$0xff] %v3078_v21 }
 0x6ba   :  { %3130 = vsyncadd [#allocation4], 1280  ;;  %s3133_s13 = sshll.u32 %s4922_s5, 4  ;;  %s3722_s14 = smov [#allocation5]   ;;  %s3134_s13 = int_to_ptr.hbm [resolvable:$true] %s3133_s13 }
 0x6bb   :  { %s3131_s15 = sshll.u32 %s3722_s14, 4  ;;  %s3132_s15 = int_to_ptr.vmem [resolvable:$true] %s3131_s15 }
 0x6bc   :  { %3139 = dma.vmem_to_hbm [thread:$0]  %s3132_s15, 4864, %s3134_s13, [#allocation4], %s3720_s26, %s3720_s26, %s3721_s27  }
 0x6bd   :  { %3143 = vsyncadd [#allocation7], 1280  ;;  %s3146_s18 = sshll.u32 %s4923_s6, 4  ;;  %s3723_s19 = smov [#allocation6]   ;;  %s3147_s18 = int_to_ptr.hbm [resolvable:$true] %s3146_s18 }
 0x6be   :  { %s3144_s20 = sshll.u32 %s3723_s19, 4  ;;  %s3145_s20 = int_to_ptr.vmem [resolvable:$true] %s3144_s20 }
 0x6bf   :  { %3152 = dma.vmem_to_hbm [thread:$0]  %s3145_s20, 4864, %s3147_s18, [#allocation7], %s3720_s26, %s3720_s26, %s3721_s27  }
 0x6c0   :  { %3715 = dma.done.wait [#allocation4], 6144  }
 0x6c1   :  { %3716 = vsyncadd [#allocation4], 4294961152 }
 0x6c2   :  { %3717 = dma.done.wait [#allocation7], 6144  }
 0x6c3   :  { %3718 = vsyncadd [#allocation7], 4294961152 }
 0x6c4   :  { %3161 = vsyncpa [#allocation3], 1 }
 0x6c5   :  { %3162 = vsyncpa [#allocation4], 1 }
 0x6c6   :  { %3163 = vsyncpa [#allocation7], 1 }

</bundles_post_ra>
